<compile_context>
chip_gen: v5e
topology: v5e:2x2
jax: 0.10.0
libtpu: 0.0.40
codegen_flags: <defaults>
</compile_context>

<pallas_src>
import jax
import jax.numpy as jnp
from jax.experimental import pallas as pl
from jax.experimental.pallas import tpu as pltpu

# Small shapes consistent with the module's hard-coded 256*2*3 view:
#   resnet18 downsamples /32 -> feat (bs, 512, 4, 6) -> head conv -> (bs, 256, 2, 3)
STATE_SHAPE = (2, 3, 128, 192)
TASK_DIM = 1024
ACTION_DIM = 49 * 7 + 7          # 350
ACT_PAD = 384                    # action padded to a lane-friendly K for the MXU
BN_EPS = 1e-5
# Explicit scoped-VMEM override: v5e default is 16 MiB (v6e/v7x: 32 MiB);
# total single-buffered operand footprint of this kernel is ~6 MB.
VMEM_LIMIT = 32 * 1024 * 1024

# ---- slab row offsets (all multiples of 16 -> bf16-tile aligned) -------------
# bf16 slab, 256 lanes
OFF_CONV = 0                     # (4608, 256) im2col conv head weight
OFF_IMG2 = 4608                  # 6 x (256, 256) img_feat_block2, pos-major
OFF_T2 = 6144                    # (512, 256)
OFF_A1 = 6656                    # (384, 256)  rows 350.. are zero
OFF_A2 = 7040                    # (256, 256)
ROWS_256 = 7296
# bf16 slab, 512 lanes
OFF_T1 = 0                       # (1024, 512)
OFF_C1I = 1024                   # (256, 512)  critic_feat_block1 img split
OFF_C1T = 1280                   # (128, 512)  critic_feat_block1 task split
OFF_C1A = 1408                   # (128, 512)  critic_feat_block1 action split
ROWS_512 = 1536
# bf16 slab, 128 lanes
OFF_T3 = 0                       # (256, 128)
OFF_A3 = 256                     # (256, 128)
OFF_C2 = 512                     # (512, 128)
OFF_C3 = 1024                    # (128, 128)  cols 64.. are zero
OFF_C4 = 1152                    # (128, 128)  rows 64.. / cols 16.. are zero
ROWS_128 = 1280
# f32 bias/scale slab: one vector per row, padded to 512 lanes
BIAS_COLS = 512
(B_CONV, B_SCALE, B_SHIFT, B_IMG2,
 B_T1, B_T2, B_T3,
 B_A1, B_A2, B_A3,
 B_C1, B_C2, B_C3, B_C4,
 B_W5, B_B5) = range(16)
N_BIAS_ROWS = 16


# ----------------------------------------------------------------------------
# Deterministic parameter construction
# ----------------------------------------------------------------------------
class KeyGen:
    def __init__(self, key):
        self._key = key

    def __call__(self):
        self._key, sub = jax.random.split(self._key)
        return sub


def _he_conv(kg, out_c, in_c, kh, kw):
    std = (2.0 / (in_c * kh * kw)) ** 0.5
    return jax.random.normal(kg(), (out_c, in_c, kh, kw), jnp.float32) * std


def _init_bn(c):
    return {
        "gamma": jnp.ones((c,), jnp.float32),
        "beta": jnp.zeros((c,), jnp.float32),
        "mean": jnp.zeros((c,), jnp.float32),
        "var": jnp.ones((c,), jnp.float32),
    }


# TODO(synk): pretrained torchvision resnet18 weights cannot be loaded in-script;
# the backbone uses deterministic He-normal init and eval-mode BatchNorm instead.
def init_backbone(kg):
    p = {"conv1": _he_conv(kg, 64, 3, 7, 7), "bn1": _init_bn(64)}

    def make_layer(in_c, out_c, stride):
        blocks = []
        for i in range(2):
            s = stride if i == 0 else 1
            ic = in_c if i == 0 else out_c
            b = {
                "conv1": _he_conv(kg, out_c, ic, 3, 3),
                "bn1": _init_bn(out_c),
                "conv2": _he_conv(kg, out_c, out_c, 3, 3),
                "bn2": _init_bn(out_c),
            }
            if i == 0 and (s != 1 or ic != out_c):
                b["down_conv"] = _he_conv(kg, out_c, ic, 1, 1)
                b["down_bn"] = _init_bn(out_c)
            blocks.append(b)
        return blocks

    p["layer1"] = make_layer(64, 64, 1)
    p["layer2"] = make_layer(64, 128, 2)
    p["layer3"] = make_layer(128, 256, 2)
    p["layer4"] = make_layer(256, 512, 2)
    return p


def init_head_params(kg):
    hp = {}
    # img_feat_block1: Conv2d(512, 256, 3, stride 2, pad 1, bias) + ReLU + BatchNorm2d(256)
    hp["conv_w"] = _he_conv(kg, 256, 512, 3, 3)
    hp["conv_b"] = jnp.zeros((256,), jnp.float32)
    bn = _init_bn(256)  # fresh BN, eval-mode stats
    scale = bn["gamma"] / jnp.sqrt(bn["var"] + BN_EPS)
    hp["bn_scale"] = scale
    hp["bn_shift"] = bn["beta"] - bn["mean"] * scale

    def lin(in_d, out_d):  # set_init: weight ~ N(0, 0.05), bias = 0; stored (in, out)
        w = jax.random.normal(kg(), (in_d, out_d), jnp.float32) * 0.05
        b = jnp.zeros((1, out_d), jnp.float32)
        return w, b

    hp["img2"] = lin(256 * 2 * 3, 256)
    hp["t1"] = lin(TASK_DIM, 512)
    hp["t2"] = lin(512, 256)
    hp["t3"] = lin(256, 128)
    hp["a1"] = lin(ACTION_DIM, 256)
    hp["a2"] = lin(256, 256)
    hp["a3"] = lin(256, 128)
    hp["c1"] = lin(256 + 128 + 128, 512)
    hp["c2"] = lin(512, 128)
    hp["c3"] = lin(128, 64)
    hp["c4"] = lin(64, 16)
    hp["c5"] = lin(16, 1)
    return hp


def prepare_head_params(hp):
    """Pack head params into 3 bf16 weight slabs + 1 f32 bias slab for the kernel."""
    bf16 = jnp.bfloat16

    # im2col matrix form of the head conv: (512*9, 256), rows in [c, kh, kw] order.
    conv_w = hp["conv_w"].reshape(256, 512 * 9).T                     # (4608, 256)

    # img_feat_block2 weight (1536, 256); row index = c*6 + pos under PyTorch's
    # NCHW view(-1, 256*2*3).  Repack pos-major: block `pos` rows = W[c*6+pos, :].
    w_img2, b_img2 = hp["img2"]
    w_img2 = jnp.transpose(w_img2.reshape(256, 6, 256), (1, 0, 2)).reshape(6 * 256, 256)

    wt1, bt1 = hp["t1"]; wt2, bt2 = hp["t2"]; wt3, bt3 = hp["t3"]
    wa1, ba1 = hp["a1"]; wa2, ba2 = hp["a2"]; wa3, ba3 = hp["a3"]
    wc1, bc1 = hp["c1"]; wc2, bc2 = hp["c2"]; wc3, bc3 = hp["c3"]
    wc4, bc4 = hp["c4"]; wc5, bc5 = hp["c5"]

    wa1_p = jnp.pad(wa1, ((0, ACT_PAD - ACTION_DIM), (0, 0)))          # (384, 256)
    wc3_p = jnp.pad(wc3, ((0, 0), (0, 128 - 64)))                      # (128, 128)
    wc4_p = jnp.pad(wc4, ((0, 128 - 64), (0, 128 - 16)))               # (128, 128)

    slab256 = jnp.concatenate([conv_w, w_img2, wt2, wa1_p, wa2], axis=0).astype(bf16)
    # critic_feat_block1: concat([img,t,a]) @ Wc1 == img@Wc1[:256] + t@Wc1[256:384] + a@Wc1[384:]
    slab512 = jnp.concatenate([wt1, wc1[:256], wc1[256:384], wc1[384:]], axis=0).astype(bf16)
    slab128 = jnp.concatenate([wt3, wa3, wc2, wc3_p, wc4_p], axis=0).astype(bf16)
    assert slab256.shape == (ROWS_256, 256)
    assert slab512.shape == (ROWS_512, 512)
    assert slab128.shape == (ROWS_128, 128)

    def row(v):
        v = jnp.reshape(v, (-1,)).astype(jnp.float32)
        return jnp.pad(v, (0, BIAS_COLS - v.shape[0]))

    bias_slab = jnp.stack([
        row(hp["conv_b"]), row(hp["bn_scale"]), row(hp["bn_shift"]), row(b_img2),
        row(bt1), row(bt2), row(bt3),
        row(ba1), row(ba2), row(ba3),
        row(bc1), row(bc2), row(bc3), row(bc4),
        row(wc5),            # final 16->1 weight, used as a lane reduction
        row(bc5),
    ])
    assert bias_slab.shape == (N_BIAS_ROWS, BIAS_COLS)

    return {"slab512": slab512, "slab256": slab256, "slab128": slab128,
            "bias_slab": bias_slab}


# ----------------------------------------------------------------------------
# resnet18 feature extractor (plain-JAX glue, eval-mode BN)
# ----------------------------------------------------------------------------
def _conv2d(x, w, stride, pad):
    return jax.lax.conv_general_dilated(
        x, w, window_strides=(stride, stride),
        padding=[(pad, pad), (pad, pad)],
        dimension_numbers=("NCHW", "OIHW", "NCHW"))


def _apply_bn(x, p):
    scale = p["gamma"] / jnp.sqrt(p["var"] + BN_EPS)
    shift = p["beta"] - p["mean"] * scale
    return x * scale.reshape(1, -1, 1, 1) + shift.reshape(1, -1, 1, 1)


def _maxpool3x3s2(x):
    return jax.lax.reduce_window(
        x, -jnp.inf, jax.lax.max,
        window_dimensions=(1, 1, 3, 3), window_strides=(1, 1, 2, 2),
        padding=((0, 0), (0, 0), (1, 1), (1, 1)))


def _basic_block(x, b):
    stride = 2 if "down_conv" in b else 1
    identity = x
    out = jax.nn.relu(_apply_bn(_conv2d(x, b["conv1"], stride, 1), b["bn1"]))
    out = _apply_bn(_conv2d(out, b["conv2"], 1, 1), b["bn2"])
    if "down_conv" in b:
        identity = _apply_bn(_conv2d(x, b["down_conv"], stride, 0), b["down_bn"])
    return jax.nn.relu(out + identity)


def backbone_apply(p, x):
    x = jax.nn.relu(_apply_bn(_conv2d(x, p["conv1"], 2, 3), p["bn1"]))
    x = _maxpool3x3s2(x)
    for name in ("layer1", "layer2", "layer3", "layer4"):
        for b in p[name]:
            x = _basic_block(x, b)
    return x  # (bs, 512, 4, 6)


# ----------------------------------------------------------------------------
# Fused Pallas kernel: conv head + BN + full MLP tower in one call
# ----------------------------------------------------------------------------
def _fused_critic_kernel(patch_ref, task_ref, act_ref,
                         w512_ref, w256_ref, w128_ref, bias_ref, q_ref):
    bf16 = jnp.bfloat16
    bs = task_ref.shape[0]

    def dot(x, w):
        # bf16 x bf16 on the MXU, f32 accumulation
        return jnp.dot(x, w, preferred_element_type=jnp.float32)

    def brow(r, n):
        return bias_ref[r:r + 1, :n]          # (1, n) f32, broadcast over batch

    # ---- img_feat_block1: Conv2d(512,256,3,s2,p1) via im2col matmul + bias + ReLU + eval-BN
    y = dot(patch_ref[...], w256_ref[OFF_CONV:OFF_CONV + 4608, :]) + brow(B_CONV, 256)
    y = jnp.maximum(y, 0.0) * brow(B_SCALE, 256) + brow(B_SHIFT, 256)     # (6*bs, 256)

    # ---- img_feat_block2: PyTorch view(-1, 256*2*3) on NCHW folded into 6 per-position
    #      256x256 sub-matmuls (patch rows are pos-major: row = pos*bs + b).
    #      NOTE: no ReLU after this layer in the reference module.
    img = brow(B_IMG2, 256)
    for pos in range(6):
        r0 = OFF_IMG2 + 256 * pos
        img = img + dot(y[pos * bs:(pos + 1) * bs, :].astype(bf16),
                        w256_ref[r0:r0 + 256, :])

    # ---- task tower
    t = jnp.maximum(dot(task_ref[...], w512_ref[OFF_T1:OFF_T1 + 1024, :]) + brow(B_T1, 512), 0.0)
    t = jnp.maximum(dot(t.astype(bf16), w256_ref[OFF_T2:OFF_T2 + 512, :]) + brow(B_T2, 256), 0.0)
    t = jnp.maximum(dot(t.astype(bf16), w128_ref[OFF_T3:OFF_T3 + 256, :]) + brow(B_T3, 128), 0.0)

    # ---- action tower (action pre-padded to ACT_PAD lanes; extra weight rows are zero)
    a = jnp.maximum(dot(act_ref[...], w256_ref[OFF_A1:OFF_A1 + ACT_PAD, :]) + brow(B_A1, 256), 0.0)
    a = jnp.maximum(dot(a.astype(bf16), w256_ref[OFF_A2:OFF_A2 + 256, :]) + brow(B_A2, 256), 0.0)
    a = jnp.maximum(dot(a.astype(bf16), w128_ref[OFF_A3:OFF_A3 + 256, :]) + brow(B_A3, 128), 0.0)

    # ---- critic tower: concat([img, t, a], -1) @ Wc1 folded into split weights
    c = (dot(img.astype(bf16), w512_ref[OFF_C1I:OFF_C1I + 256, :])
         + dot(t.astype(bf16), w512_ref[OFF_C1T:OFF_C1T + 128, :])
         + dot(a.astype(bf16), w512_ref[OFF_C1A:OFF_C1A + 128, :])
         + brow(B_C1, 512))
    c = jnp.maximum(c, 0.0)
    c = jnp.maximum(dot(c.astype(bf16), w128_ref[OFF_C2:OFF_C2 + 512, :]) + brow(B_C2, 128), 0.0)
    # c3/c4 are zero-padded to 128 lanes; padded lanes stay exactly 0 through bias=0 + ReLU.
    c = jnp.maximum(dot(c.astype(bf16), w128_ref[OFF_C3:OFF_C3 + 128, :]) + brow(B_C3, 128), 0.0)
    c = jnp.maximum(dot(c.astype(bf16), w128_ref[OFF_C4:OFF_C4 + 128, :]) + brow(B_C4, 128), 0.0)
    # final 16 -> 1 linear as a lane reduction (avoids an N=1 MXU matmul)
    q_ref[...] = (jnp.sum(c * brow(B_W5, 128), axis=-1, keepdims=True)
                  + bias_ref[B_B5:B_B5 + 1, 0:1])


def fused_critic_head(patches, task_vec, action, ph):
    bs = task_vec.shape[0]
    act = jnp.pad(action, ((0, 0), (0, ACT_PAD - action.shape[1]))).astype(jnp.bfloat16)
    # No grid: single invocation, every operand brought to VMEM exactly once
    # (no double-buffering), ~6 MB resident.
    return pl.pallas_call(
        _fused_critic_kernel,
        out_shape=jax.ShapeDtypeStruct((bs, 1), jnp.float32),
        compiler_params=pltpu.CompilerParams(vmem_limit_bytes=VMEM_LIMIT),
    )(patches, task_vec.astype(jnp.bfloat16), act,
      ph["slab512"], ph["slab256"], ph["slab128"], ph["bias_slab"])


# ----------------------------------------------------------------------------
# Full Critic forward
# ----------------------------------------------------------------------------
def _im2col_head(feat):
    # feat: (bs, 512, 4, 6); conv k=3, s=2, p=1 -> output positions 2x3.
    # Rows stacked POS-MAJOR (row = pos*bs + b) so each output position's batch
    # rows form a contiguous static slice inside the fused kernel.
    # Cast to bf16 here: halves this (largest) activation DMA into the kernel.
    bs = feat.shape[0]
    feat = feat.astype(jnp.bfloat16)
    pad = jnp.pad(feat, ((0, 0), (0, 0), (1, 1), (1, 1)))
    rows = []
    for oh in range(2):
        for ow in range(3):
            win = pad[:, :, oh * 2:oh * 2 + 3, ow * 2:ow * 2 + 3]  # (bs, 512, 3, 3)
            rows.append(win.reshape(bs, 512 * 9))                  # [c, kh, kw] order
    return jnp.concatenate(rows, axis=0)                           # (6*bs, 4608) bf16


@jax.jit
def critic_forward(params, state, task_vec, action):
    feat = backbone_apply(params["backbone"], state)               # (bs, 512, 4, 6)
    patches = _im2col_head(feat)                                   # (6*bs, 4608) bf16
    return fused_critic_head(patches, task_vec, action, params["head"])  # (bs, 1)


# ----------------------------------------------------------------------------
if __name__ == "__main__":
    kg = KeyGen(jax.random.PRNGKey(0))
    backbone = init_backbone(kg)
    head = prepare_head_params(init_head_params(kg))
    params = {"backbone": backbone, "head": head}

    state = jax.random.normal(kg(), STATE_SHAPE, jnp.float32)
    task_vec = jax.random.normal(kg(), (STATE_SHAPE[0], TASK_DIM), jnp.float32)
    action = jax.random.normal(kg(), (STATE_SHAPE[0], ACTION_DIM), jnp.float32)

    q = jax.block_until_ready(critic_forward(params, state, task_vec, action))

    assert q.shape == (STATE_SHAPE[0], 1), q.shape
    assert bool(jnp.all(jnp.isfinite(q)))
    print("KERNEL_OK")
</pallas_src>

<mosaic_0001>
module attributes {stable_mosaic.version = 11 : i64} {
  func.func @_fused_critic_kernel(%arg0: memref<12x4608xbf16, #tpu.memory_space<vmem>>, %arg1: memref<2x1024xbf16, #tpu.memory_space<vmem>>, %arg2: memref<2x384xbf16, #tpu.memory_space<vmem>>, %arg3: memref<1536x512xbf16, #tpu.memory_space<vmem>>, %arg4: memref<7296x256xbf16, #tpu.memory_space<vmem>>, %arg5: memref<1280x128xbf16, #tpu.memory_space<vmem>>, %arg6: memref<16x512xf32, #tpu.memory_space<vmem>>, %arg7: memref<2x1xf32, #tpu.memory_space<vmem>>) attributes {dimension_semantics = [], scalar_prefetch = 0 : i64, scratch_operands = 0 : i64, tpu.core_type = #tpu.core_type<tc>} {
    %c0 = arith.constant 0 : index
    %c0_0 = arith.constant 0 : index
    %0 = vector.load %arg0[%c0, %c0_0] : memref<12x4608xbf16, #tpu.memory_space<vmem>>, vector<12x4608xbf16>
    %c0_1 = arith.constant 0 : index
    %c0_2 = arith.constant 0 : index
    %1 = vector.load %arg4[%c0_1, %c0_2] : memref<7296x256xbf16, #tpu.memory_space<vmem>>, vector<4608x256xbf16>
    %cst = arith.constant dense<0.000000e+00> : vector<12x256xf32>
    %2 = tpu.matmul %0, %1, %cst {dimension_numbers = #tpu.dot_dimension_numbers<[1], [0], [0], [1], [0, 0, 1, 1], [], []>} : vector<12x4608xbf16>, vector<4608x256xbf16>, vector<12x256xf32> -> vector<12x256xf32>
    %c0_3 = arith.constant 0 : index
    %c0_4 = arith.constant 0 : index
    %3 = vector.load %arg6[%c0_3, %c0_4] : memref<16x512xf32, #tpu.memory_space<vmem>>, vector<1x256xf32>
    %4 = vector.broadcast %3 : vector<1x256xf32> to vector<12x256xf32>
    %5 = arith.addf %2, %4 : vector<12x256xf32>
    %cst_5 = arith.constant 0.000000e+00 : f32
    %6 = vector.broadcast %cst_5 : f32 to vector<12x256xf32>
    %7 = arith.maximumf %5, %6 : vector<12x256xf32>
    %c1 = arith.constant 1 : index
    %c0_6 = arith.constant 0 : index
    %8 = vector.load %arg6[%c1, %c0_6] : memref<16x512xf32, #tpu.memory_space<vmem>>, vector<1x256xf32>
    %9 = vector.broadcast %8 : vector<1x256xf32> to vector<12x256xf32>
    %10 = arith.mulf %7, %9 : vector<12x256xf32>
    %c2 = arith.constant 2 : index
    %c0_7 = arith.constant 0 : index
    %11 = vector.load %arg6[%c2, %c0_7] : memref<16x512xf32, #tpu.memory_space<vmem>>, vector<1x256xf32>
    %12 = vector.broadcast %11 : vector<1x256xf32> to vector<12x256xf32>
    %13 = arith.addf %10, %12 : vector<12x256xf32>
    %c3 = arith.constant 3 : index
    %c0_8 = arith.constant 0 : index
    %14 = vector.load %arg6[%c3, %c0_8] : memref<16x512xf32, #tpu.memory_space<vmem>>, vector<1x256xf32>
    %15 = vector.extract_strided_slice %13 {offsets = [0, 0], sizes = [2, 256], strides = [1, 1]} : vector<12x256xf32> to vector<2x256xf32>
    %16 = arith.truncf %15 : vector<2x256xf32> to vector<2x256xbf16>
    %c4608 = arith.constant 4608 : index
    %c0_9 = arith.constant 0 : index
    %17 = vector.load %arg4[%c4608, %c0_9] : memref<7296x256xbf16, #tpu.memory_space<vmem>>, vector<256x256xbf16>
    %cst_10 = arith.constant dense<0.000000e+00> : vector<2x256xf32>
    %18 = tpu.matmul %16, %17, %cst_10 {dimension_numbers = #tpu.dot_dimension_numbers<[1], [0], [0], [1], [0, 0, 1, 1], [], []>} : vector<2x256xbf16>, vector<256x256xbf16>, vector<2x256xf32> -> vector<2x256xf32>
    %19 = vector.broadcast %14 : vector<1x256xf32> to vector<2x256xf32>
    %20 = arith.addf %19, %18 : vector<2x256xf32>
    %21 = vector.extract_strided_slice %13 {offsets = [2, 0], sizes = [2, 256], strides = [1, 1]} : vector<12x256xf32> to vector<2x256xf32>
    %22 = arith.truncf %21 : vector<2x256xf32> to vector<2x256xbf16>
    %c4864 = arith.constant 4864 : index
    %c0_11 = arith.constant 0 : index
    %23 = vector.load %arg4[%c4864, %c0_11] : memref<7296x256xbf16, #tpu.memory_space<vmem>>, vector<256x256xbf16>
    %cst_12 = arith.constant dense<0.000000e+00> : vector<2x256xf32>
    %24 = tpu.matmul %22, %23, %cst_12 {dimension_numbers = #tpu.dot_dimension_numbers<[1], [0], [0], [1], [0, 0, 1, 1], [], []>} : vector<2x256xbf16>, vector<256x256xbf16>, vector<2x256xf32> -> vector<2x256xf32>
    %25 = arith.addf %20, %24 : vector<2x256xf32>
    %26 = vector.extract_strided_slice %13 {offsets = [4, 0], sizes = [2, 256], strides = [1, 1]} : vector<12x256xf32> to vector<2x256xf32>
    %27 = arith.truncf %26 : vector<2x256xf32> to vector<2x256xbf16>
    %c5120 = arith.constant 5120 : index
    %c0_13 = arith.constant 0 : index
    %28 = vector.load %arg4[%c5120, %c0_13] : memref<7296x256xbf16, #tpu.memory_space<vmem>>, vector<256x256xbf16>
    %cst_14 = arith.constant dense<0.000000e+00> : vector<2x256xf32>
    %29 = tpu.matmul %27, %28, %cst_14 {dimension_numbers = #tpu.dot_dimension_numbers<[1], [0], [0], [1], [0, 0, 1, 1], [], []>} : vector<2x256xbf16>, vector<256x256xbf16>, vector<2x256xf32> -> vector<2x256xf32>
    %30 = arith.addf %25, %29 : vector<2x256xf32>
    %31 = vector.extract_strided_slice %13 {offsets = [6, 0], sizes = [2, 256], strides = [1, 1]} : vector<12x256xf32> to vector<2x256xf32>
    %32 = arith.truncf %31 : vector<2x256xf32> to vector<2x256xbf16>
    %c5376 = arith.constant 5376 : index
    %c0_15 = arith.constant 0 : index
    %33 = vector.load %arg4[%c5376, %c0_15] : memref<7296x256xbf16, #tpu.memory_space<vmem>>, vector<256x256xbf16>
    %cst_16 = arith.constant dense<0.000000e+00> : vector<2x256xf32>
    %34 = tpu.matmul %32, %33, %cst_16 {dimension_numbers = #tpu.dot_dimension_numbers<[1], [0], [0], [1], [0, 0, 1, 1], [], []>} : vector<2x256xbf16>, vector<256x256xbf16>, vector<2x256xf32> -> vector<2x256xf32>
    %35 = arith.addf %30, %34 : vector<2x256xf32>
    %36 = vector.extract_strided_slice %13 {offsets = [8, 0], sizes = [2, 256], strides = [1, 1]} : vector<12x256xf32> to vector<2x256xf32>
    %37 = arith.truncf %36 : vector<2x256xf32> to vector<2x256xbf16>
    %c5632 = arith.constant 5632 : index
    %c0_17 = arith.constant 0 : index
    %38 = vector.load %arg4[%c5632, %c0_17] : memref<7296x256xbf16, #tpu.memory_space<vmem>>, vector<256x256xbf16>
    %cst_18 = arith.constant dense<0.000000e+00> : vector<2x256xf32>
    %39 = tpu.matmul %37, %38, %cst_18 {dimension_numbers = #tpu.dot_dimension_numbers<[1], [0], [0], [1], [0, 0, 1, 1], [], []>} : vector<2x256xbf16>, vector<256x256xbf16>, vector<2x256xf32> -> vector<2x256xf32>
    %40 = arith.addf %35, %39 : vector<2x256xf32>
    %41 = vector.extract_strided_slice %13 {offsets = [10, 0], sizes = [2, 256], strides = [1, 1]} : vector<12x256xf32> to vector<2x256xf32>
    %42 = arith.truncf %41 : vector<2x256xf32> to vector<2x256xbf16>
    %c5888 = arith.constant 5888 : index
    %c0_19 = arith.constant 0 : index
    %43 = vector.load %arg4[%c5888, %c0_19] : memref<7296x256xbf16, #tpu.memory_space<vmem>>, vector<256x256xbf16>
    %cst_20 = arith.constant dense<0.000000e+00> : vector<2x256xf32>
    %44 = tpu.matmul %42, %43, %cst_20 {dimension_numbers = #tpu.dot_dimension_numbers<[1], [0], [0], [1], [0, 0, 1, 1], [], []>} : vector<2x256xbf16>, vector<256x256xbf16>, vector<2x256xf32> -> vector<2x256xf32>
    %45 = arith.addf %40, %44 : vector<2x256xf32>
    %c0_21 = arith.constant 0 : index
    %c0_22 = arith.constant 0 : index
    %46 = vector.load %arg1[%c0_21, %c0_22] : memref<2x1024xbf16, #tpu.memory_space<vmem>>, vector<2x1024xbf16>
    %c0_23 = arith.constant 0 : index
    %c0_24 = arith.constant 0 : index
    %47 = vector.load %arg3[%c0_23, %c0_24] : memref<1536x512xbf16, #tpu.memory_space<vmem>>, vector<1024x512xbf16>
    %cst_25 = arith.constant dense<0.000000e+00> : vector<2x512xf32>
    %48 = tpu.matmul %46, %47, %cst_25 {dimension_numbers = #tpu.dot_dimension_numbers<[1], [0], [0], [1], [0, 0, 1, 1], [], []>} : vector<2x1024xbf16>, vector<1024x512xbf16>, vector<2x512xf32> -> vector<2x512xf32>
    %c4 = arith.constant 4 : index
    %c0_26 = arith.constant 0 : index
    %49 = vector.load %arg6[%c4, %c0_26] : memref<16x512xf32, #tpu.memory_space<vmem>>, vector<1x512xf32>
    %50 = vector.broadcast %49 : vector<1x512xf32> to vector<2x512xf32>
    %51 = arith.addf %48, %50 : vector<2x512xf32>
    %cst_27 = arith.constant 0.000000e+00 : f32
    %52 = vector.broadcast %cst_27 : f32 to vector<2x512xf32>
    %53 = arith.maximumf %51, %52 : vector<2x512xf32>
    %54 = arith.truncf %53 : vector<2x512xf32> to vector<2x512xbf16>
    %c6144 = arith.constant 6144 : index
    %c0_28 = arith.constant 0 : index
    %55 = vector.load %arg4[%c6144, %c0_28] : memref<7296x256xbf16, #tpu.memory_space<vmem>>, vector<512x256xbf16>
    %cst_29 = arith.constant dense<0.000000e+00> : vector<2x256xf32>
    %56 = tpu.matmul %54, %55, %cst_29 {dimension_numbers = #tpu.dot_dimension_numbers<[1], [0], [0], [1], [0, 0, 1, 1], [], []>} : vector<2x512xbf16>, vector<512x256xbf16>, vector<2x256xf32> -> vector<2x256xf32>
    %c5 = arith.constant 5 : index
    %c0_30 = arith.constant 0 : index
    %57 = vector.load %arg6[%c5, %c0_30] : memref<16x512xf32, #tpu.memory_space<vmem>>, vector<1x256xf32>
    %58 = vector.broadcast %57 : vector<1x256xf32> to vector<2x256xf32>
    %59 = arith.addf %56, %58 : vector<2x256xf32>
    %cst_31 = arith.constant 0.000000e+00 : f32
    %60 = vector.broadcast %cst_31 : f32 to vector<2x256xf32>
    %61 = arith.maximumf %59, %60 : vector<2x256xf32>
    %62 = arith.truncf %61 : vector<2x256xf32> to vector<2x256xbf16>
    %c0_32 = arith.constant 0 : index
    %c0_33 = arith.constant 0 : index
    %63 = vector.load %arg5[%c0_32, %c0_33] : memref<1280x128xbf16, #tpu.memory_space<vmem>>, vector<256x128xbf16>
    %cst_34 = arith.constant dense<0.000000e+00> : vector<2x128xf32>
    %64 = tpu.matmul %62, %63, %cst_34 {dimension_numbers = #tpu.dot_dimension_numbers<[1], [0], [0], [1], [0, 0, 1, 1], [], []>} : vector<2x256xbf16>, vector<256x128xbf16>, vector<2x128xf32> -> vector<2x128xf32>
    %c6 = arith.constant 6 : index
    %c0_35 = arith.constant 0 : index
    %65 = vector.load %arg6[%c6, %c0_35] : memref<16x512xf32, #tpu.memory_space<vmem>>, vector<1x128xf32>
    %66 = vector.broadcast %65 : vector<1x128xf32> to vector<2x128xf32>
    %67 = arith.addf %64, %66 : vector<2x128xf32>
    %cst_36 = arith.constant 0.000000e+00 : f32
    %68 = vector.broadcast %cst_36 : f32 to vector<2x128xf32>
    %69 = arith.maximumf %67, %68 : vector<2x128xf32>
    %c0_37 = arith.constant 0 : index
    %c0_38 = arith.constant 0 : index
    %70 = vector.load %arg2[%c0_37, %c0_38] : memref<2x384xbf16, #tpu.memory_space<vmem>>, vector<2x384xbf16>
    %c6656 = arith.constant 6656 : index
    %c0_39 = arith.constant 0 : index
    %71 = vector.load %arg4[%c6656, %c0_39] : memref<7296x256xbf16, #tpu.memory_space<vmem>>, vector<384x256xbf16>
    %cst_40 = arith.constant dense<0.000000e+00> : vector<2x256xf32>
    %72 = tpu.matmul %70, %71, %cst_40 {dimension_numbers = #tpu.dot_dimension_numbers<[1], [0], [0], [1], [0, 0, 1, 1], [], []>} : vector<2x384xbf16>, vector<384x256xbf16>, vector<2x256xf32> -> vector<2x256xf32>
    %c7 = arith.constant 7 : index
    %c0_41 = arith.constant 0 : index
    %73 = vector.load %arg6[%c7, %c0_41] : memref<16x512xf32, #tpu.memory_space<vmem>>, vector<1x256xf32>
    %74 = vector.broadcast %73 : vector<1x256xf32> to vector<2x256xf32>
    %75 = arith.addf %72, %74 : vector<2x256xf32>
    %cst_42 = arith.constant 0.000000e+00 : f32
    %76 = vector.broadcast %cst_42 : f32 to vector<2x256xf32>
    %77 = arith.maximumf %75, %76 : vector<2x256xf32>
    %78 = arith.truncf %77 : vector<2x256xf32> to vector<2x256xbf16>
    %c7040 = arith.constant 7040 : index
    %c0_43 = arith.constant 0 : index
    %79 = vector.load %arg4[%c7040, %c0_43] : memref<7296x256xbf16, #tpu.memory_space<vmem>>, vector<256x256xbf16>
    %cst_44 = arith.constant dense<0.000000e+00> : vector<2x256xf32>
    %80 = tpu.matmul %78, %79, %cst_44 {dimension_numbers = #tpu.dot_dimension_numbers<[1], [0], [0], [1], [0, 0, 1, 1], [], []>} : vector<2x256xbf16>, vector<256x256xbf16>, vector<2x256xf32> -> vector<2x256xf32>
    %c8 = arith.constant 8 : index
    %c0_45 = arith.constant 0 : index
    %81 = vector.load %arg6[%c8, %c0_45] : memref<16x512xf32, #tpu.memory_space<vmem>>, vector<1x256xf32>
    %82 = vector.broadcast %81 : vector<1x256xf32> to vector<2x256xf32>
    %83 = arith.addf %80, %82 : vector<2x256xf32>
    %cst_46 = arith.constant 0.000000e+00 : f32
    %84 = vector.broadcast %cst_46 : f32 to vector<2x256xf32>
    %85 = arith.maximumf %83, %84 : vector<2x256xf32>
    %86 = arith.truncf %85 : vector<2x256xf32> to vector<2x256xbf16>
    %c256 = arith.constant 256 : index
    %c0_47 = arith.constant 0 : index
    %87 = vector.load %arg5[%c256, %c0_47] : memref<1280x128xbf16, #tpu.memory_space<vmem>>, vector<256x128xbf16>
    %cst_48 = arith.constant dense<0.000000e+00> : vector<2x128xf32>
    %88 = tpu.matmul %86, %87, %cst_48 {dimension_numbers = #tpu.dot_dimension_numbers<[1], [0], [0], [1], [0, 0, 1, 1], [], []>} : vector<2x256xbf16>, vector<256x128xbf16>, vector<2x128xf32> -> vector<2x128xf32>
    %c9 = arith.constant 9 : index
    %c0_49 = arith.constant 0 : index
    %89 = vector.load %arg6[%c9, %c0_49] : memref<16x512xf32, #tpu.memory_space<vmem>>, vector<1x128xf32>
    %90 = vector.broadcast %89 : vector<1x128xf32> to vector<2x128xf32>
    %91 = arith.addf %88, %90 : vector<2x128xf32>
    %cst_50 = arith.constant 0.000000e+00 : f32
    %92 = vector.broadcast %cst_50 : f32 to vector<2x128xf32>
    %93 = arith.maximumf %91, %92 : vector<2x128xf32>
    %94 = arith.truncf %45 : vector<2x256xf32> to vector<2x256xbf16>
    %c1024 = arith.constant 1024 : index
    %c0_51 = arith.constant 0 : index
    %95 = vector.load %arg3[%c1024, %c0_51] : memref<1536x512xbf16, #tpu.memory_space<vmem>>, vector<256x512xbf16>
    %cst_52 = arith.constant dense<0.000000e+00> : vector<2x512xf32>
    %96 = tpu.matmul %94, %95, %cst_52 {dimension_numbers = #tpu.dot_dimension_numbers<[1], [0], [0], [1], [0, 0, 1, 1], [], []>} : vector<2x256xbf16>, vector<256x512xbf16>, vector<2x512xf32> -> vector<2x512xf32>
    %97 = arith.truncf %69 : vector<2x128xf32> to vector<2x128xbf16>
    %c1280 = arith.constant 1280 : index
    %c0_53 = arith.constant 0 : index
    %98 = vector.load %arg3[%c1280, %c0_53] : memref<1536x512xbf16, #tpu.memory_space<vmem>>, vector<128x512xbf16>
    %cst_54 = arith.constant dense<0.000000e+00> : vector<2x512xf32>
    %99 = tpu.matmul %97, %98, %cst_54 {dimension_numbers = #tpu.dot_dimension_numbers<[1], [0], [0], [1], [0, 0, 1, 1], [], []>} : vector<2x128xbf16>, vector<128x512xbf16>, vector<2x512xf32> -> vector<2x512xf32>
    %100 = arith.addf %96, %99 : vector<2x512xf32>
    %101 = arith.truncf %93 : vector<2x128xf32> to vector<2x128xbf16>
    %c1408 = arith.constant 1408 : index
    %c0_55 = arith.constant 0 : index
    %102 = vector.load %arg3[%c1408, %c0_55] : memref<1536x512xbf16, #tpu.memory_space<vmem>>, vector<128x512xbf16>
    %cst_56 = arith.constant dense<0.000000e+00> : vector<2x512xf32>
    %103 = tpu.matmul %101, %102, %cst_56 {dimension_numbers = #tpu.dot_dimension_numbers<[1], [0], [0], [1], [0, 0, 1, 1], [], []>} : vector<2x128xbf16>, vector<128x512xbf16>, vector<2x512xf32> -> vector<2x512xf32>
    %104 = arith.addf %100, %103 : vector<2x512xf32>
    %c10 = arith.constant 10 : index
    %c0_57 = arith.constant 0 : index
    %105 = vector.load %arg6[%c10, %c0_57] : memref<16x512xf32, #tpu.memory_space<vmem>>, vector<1x512xf32>
    %106 = vector.broadcast %105 : vector<1x512xf32> to vector<2x512xf32>
    %107 = arith.addf %104, %106 : vector<2x512xf32>
    %cst_58 = arith.constant 0.000000e+00 : f32
    %108 = vector.broadcast %cst_58 : f32 to vector<2x512xf32>
    %109 = arith.maximumf %107, %108 : vector<2x512xf32>
    %110 = arith.truncf %109 : vector<2x512xf32> to vector<2x512xbf16>
    %c512 = arith.constant 512 : index
    %c0_59 = arith.constant 0 : index
    %111 = vector.load %arg5[%c512, %c0_59] : memref<1280x128xbf16, #tpu.memory_space<vmem>>, vector<512x128xbf16>
    %cst_60 = arith.constant dense<0.000000e+00> : vector<2x128xf32>
    %112 = tpu.matmul %110, %111, %cst_60 {dimension_numbers = #tpu.dot_dimension_numbers<[1], [0], [0], [1], [0, 0, 1, 1], [], []>} : vector<2x512xbf16>, vector<512x128xbf16>, vector<2x128xf32> -> vector<2x128xf32>
    %c11 = arith.constant 11 : index
    %c0_61 = arith.constant 0 : index
    %113 = vector.load %arg6[%c11, %c0_61] : memref<16x512xf32, #tpu.memory_space<vmem>>, vector<1x128xf32>
    %114 = vector.broadcast %113 : vector<1x128xf32> to vector<2x128xf32>
    %115 = arith.addf %112, %114 : vector<2x128xf32>
    %cst_62 = arith.constant 0.000000e+00 : f32
    %116 = vector.broadcast %cst_62 : f32 to vector<2x128xf32>
    %117 = arith.maximumf %115, %116 : vector<2x128xf32>
    %118 = arith.truncf %117 : vector<2x128xf32> to vector<2x128xbf16>
    %c1024_63 = arith.constant 1024 : index
    %c0_64 = arith.constant 0 : index
    %119 = vector.load %arg5[%c1024_63, %c0_64] : memref<1280x128xbf16, #tpu.memory_space<vmem>>, vector<128x128xbf16>
    %cst_65 = arith.constant dense<0.000000e+00> : vector<2x128xf32>
    %120 = tpu.matmul %118, %119, %cst_65 {dimension_numbers = #tpu.dot_dimension_numbers<[1], [0], [0], [1], [0, 0, 1, 1], [], []>} : vector<2x128xbf16>, vector<128x128xbf16>, vector<2x128xf32> -> vector<2x128xf32>
    %c12 = arith.constant 12 : index
    %c0_66 = arith.constant 0 : index
    %121 = vector.load %arg6[%c12, %c0_66] : memref<16x512xf32, #tpu.memory_space<vmem>>, vector<1x128xf32>
    %122 = vector.broadcast %121 : vector<1x128xf32> to vector<2x128xf32>
    %123 = arith.addf %120, %122 : vector<2x128xf32>
    %cst_67 = arith.constant 0.000000e+00 : f32
    %124 = vector.broadcast %cst_67 : f32 to vector<2x128xf32>
    %125 = arith.maximumf %123, %124 : vector<2x128xf32>
    %126 = arith.truncf %125 : vector<2x128xf32> to vector<2x128xbf16>
    %c1152 = arith.constant 1152 : index
    %c0_68 = arith.constant 0 : index
    %127 = vector.load %arg5[%c1152, %c0_68] : memref<1280x128xbf16, #tpu.memory_space<vmem>>, vector<128x128xbf16>
    %cst_69 = arith.constant dense<0.000000e+00> : vector<2x128xf32>
    %128 = tpu.matmul %126, %127, %cst_69 {dimension_numbers = #tpu.dot_dimension_numbers<[1], [0], [0], [1], [0, 0, 1, 1], [], []>} : vector<2x128xbf16>, vector<128x128xbf16>, vector<2x128xf32> -> vector<2x128xf32>
    %c13 = arith.constant 13 : index
    %c0_70 = arith.constant 0 : index
    %129 = vector.load %arg6[%c13, %c0_70] : memref<16x512xf32, #tpu.memory_space<vmem>>, vector<1x128xf32>
    %130 = vector.broadcast %129 : vector<1x128xf32> to vector<2x128xf32>
    %131 = arith.addf %128, %130 : vector<2x128xf32>
    %cst_71 = arith.constant 0.000000e+00 : f32
    %132 = vector.broadcast %cst_71 : f32 to vector<2x128xf32>
    %133 = arith.maximumf %131, %132 : vector<2x128xf32>
    %c14 = arith.constant 14 : index
    %c0_72 = arith.constant 0 : index
    %134 = vector.load %arg6[%c14, %c0_72] : memref<16x512xf32, #tpu.memory_space<vmem>>, vector<1x128xf32>
    %135 = vector.broadcast %134 : vector<1x128xf32> to vector<2x128xf32>
    %136 = arith.mulf %133, %135 : vector<2x128xf32>
    %cst_73 = arith.constant dense<0.000000e+00> : vector<2xf32>
    %137 = vector.multi_reduction <add>, %136, %cst_73 [1] : vector<2x128xf32> to vector<2xf32>
    %138 = vector.shape_cast %137 : vector<2xf32> to vector<2x1xf32>
    %c15 = arith.constant 15 : index
    %c0_74 = arith.constant 0 : index
    %139 = vector.load %arg6[%c15, %c0_74] : memref<16x512xf32, #tpu.memory_space<vmem>>, vector<1x1xf32>
    %140 = vector.broadcast %139 : vector<1x1xf32> to vector<2x1xf32>
    %141 = arith.addf %138, %140 : vector<2x1xf32>
    %c0_75 = arith.constant 0 : index
    %c0_76 = arith.constant 0 : index
    %142 = vector.load %arg7[%c0_75, %c0_76] : memref<2x1xf32, #tpu.memory_space<vmem>>, vector<2x1xf32>
    tpu.vector_store %arg7[%c0_75, %c0_76], %141 {strides = array<i32>} : memref<2x1xf32, #tpu.memory_space<vmem>>, vector<2x1xf32>,
    return
  }
}

</mosaic_0001>

<bundles_post_ra>
// kernel: critic_forward.1
= control target key start
LH: loop header
LB: loop body
LE: loop exit
PB: predicated region body
PF: predicated region fallthrough
CT: control target
= control target key end

     0   :  { %vm11166_vm0 = vcmask 1041408   ;;  %vm11172_vm1 = vcmask 1024   ;;  %s27355_s4 = inlined_call_operand.vmem [shape: bf16[7296,256], index: 4, kind: input, shape index: {}]   ;;  %s27356_s0 = inlined_call_operand.vmem [shape: bf16[12,4608], index: 0, kind: input, shape index: {}]   ;;  %s27357_s6 = inlined_call_operand.vmem [shape: f32[16,512], index: 6, kind: input, shape index: {}]   ;;  %s27358_s3 = inlined_call_operand.vmem [shape: bf16[1536,512], index: 3, kind: input, shape index: {}]   ;;  %s27359_s1 = inlined_call_operand.vmem [shape: bf16[2,1024], index: 1, kind: input, shape index: {}]   ;;  %s27360_s2 = inlined_call_operand.vmem [shape: bf16[2,384], index: 2, kind: input, shape index: {}]   ;;  %s27361_s5 = inlined_call_operand.vmem [shape: bf16[1280,128], index: 5, kind: input, shape index: {}]   ;;  %s27362_s7 = inlined_call_operand.vmem [shape: f32[2,1], index: 7, kind: output, shape index: {}]  }
   0x1   :  { %v11380_v0 = vld [vmem:[%s27355_s4 + $0x70] sm:$0xf]  ;;  %v16885_v1 = vld [vmem:[%s27355_s4 + $0x74] sm:$0xf0]  ;;  %v11372_v11 = vld [vmem:[%s27355_s4 + $0x60] sm:$0xf] }
   0x2   :  { %v11444_v2 = vld [vmem:[%s27355_s4 + $0xf0] sm:$0xf]  ;;  %v11381_v3 = vor.u32 %v16885_v1, %v11380_v0  ;;  %v16901_v4 = vld [vmem:[%s27355_s4 + $0xf4] sm:$0xf0]  ;;  %v16883_v13 = vld [vmem:[%s27355_s4 + $0x64] sm:$0xf0] }
   0x3   :  { %v11508_v5 = vld [vmem:[%s27355_s4 + $0x170] sm:$0xf]  ;;  %v16917_v6 = vld [vmem:[%s27355_s4 + $0x174] sm:$0xf0]  ;;  %v11445_v7 = vor.u32 %v16901_v4, %v11444_v2  ;;  %v11436_v14 = vld [vmem:[%s27355_s4 + $0xe0] sm:$0xf]  ;;  %v11373_v16 = vor.u32 %v16883_v13, %v11372_v11 }
   0x4   :  { %v11509_v8 = vor.u32 %v16917_v6, %v11508_v5  ;;  %v11572_v9 = vld [vmem:[%s27355_s4 + $0x1f0] sm:$0xf]  ;;  %v16933_v10 = vld [vmem:[%s27355_s4 + $0x1f4] sm:$0xf0]  ;;  %3704 = vmatpush.bf16.msra.mxu0 %v11381_v3  ;;  %v16899_v15 = vld [vmem:[%s27355_s4 + $0xe4] sm:$0xf0] }
   0x5   :  { %v11573_v12 = vor.u32 %v16933_v10, %v11572_v9  ;;  %3718 = vmatpush.bf16.msra.mxu1 %v11445_v7  ;;  %v11437_v17 = vor.u32 %v16899_v15, %v11436_v14  ;;  %v11500_v18 = vld [vmem:[%s27355_s4 + $0x160] sm:$0xf]  ;;  %v16915_v19 = vld [vmem:[%s27355_s4 + $0x164] sm:$0xf0]  ;;  %v11364_v23 = vld [vmem:[%s27355_s4 + $0x50] sm:$0xf] }
   0x6   :  { %3732 = vmatpush.bf16.msra.mxu2 %v11509_v8  ;;  %v11564_v20 = vld [vmem:[%s27355_s4 + $0x1e0] sm:$0xf]  ;;  %v11501_v21 = vor.u32 %v16915_v19, %v11500_v18  ;;  %v16931_v22 = vld [vmem:[%s27355_s4 + $0x1e4] sm:$0xf0]  ;;  %v16881_v24 = vld [vmem:[%s27355_s4 + $0x54] sm:$0xf0] }
   0x7   :  { %3746 = vmatpush.bf16.msra.mxu3 %v11573_v12  ;;  %v11565_v25 = vor.u32 %v16931_v22, %v11564_v20  ;;  %v11428_v26 = vld [vmem:[%s27355_s4 + $0xd0] sm:$0xf]  ;;  %v16897_v27 = vld [vmem:[%s27355_s4 + $0xd4] sm:$0xf0]  ;;  %v11365_v29 = vor.u32 %v16881_v24, %v11364_v23  ;;  %v11356_v35 = vld [vmem:[%s27355_s4 + $0x40] sm:$0xf] }
   0x8   :  { %v11492_v28 = vld [vmem:[%s27355_s4 + $0x150] sm:$0xf]  ;;  %3705 = vmatpush.bf16.msra.mxu0 %v11373_v16  ;;  %v16913_v30 = vld [vmem:[%s27355_s4 + $0x154] sm:$0xf0]  ;;  %v11429_v33 = vor.u32 %v16897_v27, %v11428_v26  ;;  %v16879_v36 = vld [vmem:[%s27355_s4 + $0x44] sm:$0xf0] }
   0x9   :  { %v11556_v31 = vld [vmem:[%s27355_s4 + $0x1d0] sm:$0xf]  ;;  %v16929_v32 = vld [vmem:[%s27355_s4 + $0x1d4] sm:$0xf0]  ;;  %3719 = vmatpush.bf16.msra.mxu1 %v11437_v17  ;;  %v11493_v34 = vor.u32 %v16913_v30, %v11492_v28  ;;  %v11420_v37 = vld [vmem:[%s27355_s4 + $0xc0] sm:$0xf]  ;;  %v11357_v44 = vor.u32 %v16879_v36, %v11356_v35 }
   0xa   :  { %3733 = vmatpush.bf16.msra.mxu2 %v11501_v21  ;;  %v11557_v38 = vor.u32 %v16929_v32, %v11556_v31  ;;  %v16895_v39 = vld [vmem:[%s27355_s4 + $0xc4] sm:$0xf0]  ;;  %v11484_v40 = vld [vmem:[%s27355_s4 + $0x140] sm:$0xf]  ;;  %v11348_v47 = vld [vmem:[%s27355_s4 + $0x30] sm:$0xf] }
   0xb   :  { %3747 = vmatpush.bf16.msra.mxu3 %v11565_v25  ;;  %v16911_v41 = vld [vmem:[%s27355_s4 + $0x144] sm:$0xf0]  ;;  %v11548_v42 = vld [vmem:[%s27355_s4 + $0x1c0] sm:$0xf]  ;;  %v11421_v45 = vor.u32 %v16895_v39, %v11420_v37  ;;  %v16877_v48 = vld [vmem:[%s27355_s4 + $0x34] sm:$0xf0] }
   0xc   :  { %v16927_v43 = vld [vmem:[%s27355_s4 + $0x1c4] sm:$0xf0]  ;;  %3706 = vmatpush.bf16.msra.mxu0 %v11365_v29  ;;  %v11485_v46 = vor.u32 %v16911_v41, %v11484_v40  ;;  %v11412_v49 = vld [vmem:[%s27355_s4 + $0xb0] sm:$0xf]  ;;  %v16893_v51 = vld [vmem:[%s27355_s4 + $0xb4] sm:$0xf0]  ;;  %v11349_v56 = vor.u32 %v16877_v48, %v11348_v47 }
   0xd   :  { %3720 = vmatpush.bf16.msra.mxu1 %v11429_v33  ;;  %v11549_v50 = vor.u32 %v16927_v43, %v11548_v42  ;;  %v11476_v52 = vld [vmem:[%s27355_s4 + $0x130] sm:$0xf]  ;;  %v16909_v53 = vld [vmem:[%s27355_s4 + $0x134] sm:$0xf0]  ;;  %v11413_v57 = vor.u32 %v16893_v51, %v11412_v49  ;;  %v11340_v59 = vld [vmem:[%s27355_s4 + $0x20] sm:$0xf] }
   0xe   :  { %3734 = vmatpush.bf16.msra.mxu2 %v11493_v34  ;;  %v11540_v54 = vld [vmem:[%s27355_s4 + $0x1b0] sm:$0xf]  ;;  %v16925_v55 = vld [vmem:[%s27355_s4 + $0x1b4] sm:$0xf0]  ;;  %v11477_v58 = vor.u32 %v16909_v53, %v11476_v52  ;;  %v16875_v60 = vld [vmem:[%s27355_s4 + $0x24] sm:$0xf0] }
   0xf   :  { %3748 = vmatpush.bf16.msra.mxu3 %v11557_v38  ;;  %v11404_v61 = vld [vmem:[%s27355_s4 + $0xa0] sm:$0xf]  ;;  %v11541_v62 = vor.u32 %v16925_v55, %v11540_v54  ;;  %v16891_v63 = vld [vmem:[%s27355_s4 + $0xa4] sm:$0xf0]  ;;  %v11341_v4 = vor.u32 %v16875_v60, %v11340_v59  ;;  %v11332_v7 = vld [vmem:[%s27355_s4 + $0x10] sm:$0xf] }
  0x10   :  { %3707 = vmatpush.bf16.msra.mxu0 %v11357_v44  ;;  %v11468_v0 = vld [vmem:[%s27355_s4 + $0x120] sm:$0xf]  ;;  %v16907_v1 = vld [vmem:[%s27355_s4 + $0x124] sm:$0xf0]  ;;  %v11405_v5 = vor.u32 %v16891_v63, %v11404_v61  ;;  %v16873_v8 = vld [vmem:[%s27355_s4 + $0x14] sm:$0xf0] }
  0x11   :  { %3721 = vmatpush.bf16.msra.mxu1 %v11421_v45  ;;  %v11532_v2 = vld [vmem:[%s27355_s4 + $0x1a0] sm:$0xf]  ;;  %v16923_v3 = vld [vmem:[%s27355_s4 + $0x1a4] sm:$0xf0]  ;;  %v11469_v6 = vor.u32 %v16907_v1, %v11468_v0  ;;  %v11396_v9 = vld [vmem:[%s27355_s4 + $0x90] sm:$0xf]  ;;  %v11333_v16 = vor.u32 %v16873_v8, %v11332_v7 }
  0x12   :  { %3735 = vmatpush.bf16.msra.mxu2 %v11485_v46  ;;  %v11533_v10 = vor.u32 %v16923_v3, %v11532_v2  ;;  %v16889_v11 = vld [vmem:[%s27355_s4 + $0x94] sm:$0xf0]  ;;  %v11460_v12 = vld [vmem:[%s27355_s4 + $0x110] sm:$0xf]  ;;  %v11324_v17 = vld [vmem:[%s27355_s4] sm:$0xf] }
  0x13   :  { %3749 = vmatpush.bf16.msra.mxu3 %v11549_v50  ;;  %v16905_v13 = vld [vmem:[%s27355_s4 + $0x114] sm:$0xf0]  ;;  %v11524_v14 = vld [vmem:[%s27355_s4 + $0x190] sm:$0xf]  ;;  %v16871_v18 = vld [vmem:[%s27355_s4 + $0x4] sm:$0xf0]  ;;  %v11397_v19 = vor.u32 %v16889_v11, %v11396_v9 }
  0x14   :  { %3708 = vmatpush.bf16.msra.mxu0 %v11349_v56  ;;  %v16921_v15 = vld [vmem:[%s27355_s4 + $0x194] sm:$0xf0]  ;;  %v11461_v20 = vor.u32 %v16905_v13, %v11460_v12  ;;  %v11388_v21 = vld [vmem:[%s27355_s4 + $0x80] sm:$0xf]  ;;  %v16887_v22 = vld [vmem:[%s27355_s4 + $0x84] sm:$0xf0]  ;;  %v11325_v31 = vor.u32 %v16871_v18, %v11324_v17 }
  0x15   :  { %3722 = vmatpush.bf16.msra.mxu1 %v11413_v57  ;;  %v11452_v23 = vld [vmem:[%s27355_s4 + $0x100] sm:$0xf]  ;;  %v11525_v24 = vor.u32 %v16921_v15, %v11524_v14  ;;  %v16903_v25 = vld [vmem:[%s27355_s4 + $0x104] sm:$0xf0]  ;;  %v11636_v28 = vld [vmem:[%s27355_s4 + $0x270] sm:$0xf]  ;;  %v11389_v35 = vor.u32 %v16887_v22, %v11388_v21 }
  0x16   :  { %3736 = vmatpush.bf16.msra.mxu2 %v11477_v58  ;;  %v11516_v26 = vld [vmem:[%s27355_s4 + $0x180] sm:$0xf]  ;;  %v16919_v27 = vld [vmem:[%s27355_s4 + $0x184] sm:$0xf0]  ;;  %v16949_v29 = vld [vmem:[%s27355_s4 + $0x274] sm:$0xf0]  ;;  %v11453_v36 = vor.u32 %v16903_v25, %v11452_v23 }
  0x17   :  { %3750 = vmatpush.bf16.msra.mxu3 %v11541_v62  ;;  %v11700_v30 = vld [vmem:[%s27355_s4 + $0x2f0] sm:$0xf]  ;;  %v16965_v32 = vld [vmem:[%s27355_s4 + $0x2f4] sm:$0xf0]  ;;  %v11517_v39 = vor.u32 %v16919_v27, %v11516_v26  ;;  %v11637_v40 = vor.u32 %v16949_v29, %v11636_v28  ;;  %v11628_v41 = vld [vmem:[%s27355_s4 + $0x260] sm:$0xf] }
  0x18   :  { %3709 = vmatpush.bf16.msra.mxu0 %v11341_v4  ;;  %v11764_v33 = vld [vmem:[%s27355_s4 + $0x370] sm:$0xf]  ;;  %v16981_v34 = vld [vmem:[%s27355_s4 + $0x374] sm:$0xf0]  ;;  %v16947_v42 = vld [vmem:[%s27355_s4 + $0x264] sm:$0xf0]  ;;  %v11701_v43 = vor.u32 %v16965_v32, %v11700_v30 }
  0x19   :  { %3723 = vmatpush.bf16.msra.mxu1 %v11405_v5  ;;  %v11828_v37 = vld [vmem:[%s27355_s4 + $0x3f0] sm:$0xf]  ;;  %v16997_v38 = vld [vmem:[%s27355_s4 + $0x3f4] sm:$0xf0]  ;;  %v11765_v44 = vor.u32 %v16981_v34, %v11764_v33  ;;  %v11692_v45 = vld [vmem:[%s27355_s4 + $0x2e0] sm:$0xf]  ;;  %v11629_v55 = vor.u32 %v16947_v42, %v11628_v41 }
  0x1a   :  { %3737 = vmatpush.bf16.msra.mxu2 %v11469_v6  ;;  %v16963_v46 = vld [vmem:[%s27355_s4 + $0x2e4] sm:$0xf0]  ;;  %v11756_v47 = vld [vmem:[%s27355_s4 + $0x360] sm:$0xf]  ;;  %v11829_v48 = vor.u32 %v16997_v38, %v11828_v37  ;;  %v16852_v53 = vld [vmem:[%s27356_s0 + $0x8c] sm:$0x30] }
  0x1b   :  { %3751 = vmatpush.bf16.msra.mxu3 %v11533_v10  ;;  %v16979_v49 = vld [vmem:[%s27355_s4 + $0x364] sm:$0xf0]  ;;  %v11820_v50 = vld [vmem:[%s27355_s4 + $0x3e0] sm:$0xf]  ;;  %v11620_v56 = vld [vmem:[%s27355_s4 + $0x250] sm:$0xf]  ;;  %v11693_v60 = vor.u32 %v16963_v46, %v11692_v45 }
  0x1c   :  { %3710 = vmatpush.bf16.msra.mxu0 %v11333_v16  ;;  %v16995_v51 = vld [vmem:[%s27355_s4 + $0x3e4] sm:$0xf0]  ;;  %v11180_v52 = vld [vmem:[%s27356_s0] sm:$0xf]  ;;  %v16945_v57 = vld [vmem:[%s27355_s4 + $0x254] sm:$0xf0]  ;;  %v11757_v61 = vor.u32 %v16979_v49, %v11756_v47 }
  0x1d   :  { %3724 = vmatpush.bf16.msra.mxu1 %v11397_v19  ;;  %v11188_v54 = vld [vmem:[%s27356_s0 + $0x8] sm:$0xf]  ;;  %v18544_v58 = vor.u32 %v16852_v53, %v11180_v52  ;;  %v16853_v59 = vld [vmem:[%s27356_s0 + $0x94] sm:$0x30]  ;;  %v11684_v62 = vld [vmem:[%s27355_s4 + $0x2d0] sm:$0xf]  ;;  %v11821_v2 = vor.u32 %v16995_v51, %v11820_v50  ;;  %v11621_v9 = vor.u32 %v16945_v57, %v11620_v56 }
  0x1e   :  { %3738 = vmatpush.bf16.msra.mxu2 %v11461_v20  ;;  %v16961_v63 = vld [vmem:[%s27355_s4 + $0x2d4] sm:$0xf0]  ;;  %v11748_v0 = vld [vmem:[%s27355_s4 + $0x350] sm:$0xf]  ;;  %v18558_v1 = vor.u32 %v16853_v59, %v11188_v54  ;;  %v16834_v6 = vld [vmem:[%s27356_s0 + $0x4] sm:$0xf] }
  0x1f   :  { %3752 = vmatpush.bf16.msra.mxu3 %v11525_v24  ;;  %v16977_v3 = vld [vmem:[%s27355_s4 + $0x354] sm:$0xf0]  ;;  %v11812_v4 = vld [vmem:[%s27355_s4 + $0x3d0] sm:$0xf]  ;;  %v11182_v7 = vld [vmem:[%s27356_s0 + $0x90] sm:$0x30]  ;;  %v11685_v12 = vor.u32 %v16961_v63, %v11684_v62 }
  0x20   :  { %3711 = vmatpush.bf16.msra.mxu0 %v11325_v31  ;;  %v16993_v5 = vld [vmem:[%s27355_s4 + $0x3d4] sm:$0xf0]  ;;  %v16835_v8 = vld [vmem:[%s27356_s0 + $0xc] sm:$0xf]  ;;  %v18580_v10 = vor.u32 %v16834_v6, %v11182_v7  ;;  %v11190_v11 = vld [vmem:[%s27356_s0 + $0x98] sm:$0x30]  ;;  %v11749_v13 = vor.u32 %v16977_v3, %v11748_v0 }
  0x21   :  { %3725 = vmatpush.bf16.msra.mxu1 %v11389_v35  ;;  %v11612_v14 = vld [vmem:[%s27355_s4 + $0x240] sm:$0xf]  ;;  %v16943_v15 = vld [vmem:[%s27355_s4 + $0x244] sm:$0xf0]  ;;  %v18594_v17 = vor.u32 %v16835_v8, %v11190_v11  ;;  %v11813_v18 = vor.u32 %v16993_v5, %v11812_v4  ;;  %v11604_v27 = vld [vmem:[%s27355_s4 + $0x230] sm:$0xf] }
  0x22   :  { %3739 = vmatpush.bf16.msra.mxu2 %v11453_v36  ;;  %v11676_v16 = vld [vmem:[%s27355_s4 + $0x2c0] sm:$0xf]  ;;  %v16959_v19 = vld [vmem:[%s27355_s4 + $0x2c4] sm:$0xf0]  ;;  %v11613_v24 = vor.u32 %v16943_v15, %v11612_v14  ;;  %v16941_v28 = vld [vmem:[%s27355_s4 + $0x234] sm:$0xf0] }
  0x23   :  { %3753 = vmatpush.bf16.msra.mxu3 %v11517_v39  ;;  %3712 = vmatmul.bf16.vlgmr.msra.gmra.mxu0 %v18544_v58  ;;  %v11740_v20 = vld [vmem:[%s27355_s4 + $0x340] sm:$0xf]  ;;  %v16975_v21 = vld [vmem:[%s27355_s4 + $0x344] sm:$0xf0]  ;;  %v11677_v25 = vor.u32 %v16959_v19, %v11676_v16  ;;  %v11668_v29 = vld [vmem:[%s27355_s4 + $0x2b0] sm:$0xf]  ;;  %v11605_v36 = vor.u32 %v16941_v28, %v11604_v27 }
  0x24   :  { %3760 = vmatpush.bf16.msrb.mxu0 %v11637_v40  ;;  %3726 = vmatmul.bf16.vlgmr.msra.gmra.mxu1 %v18580_v10  ;;  %v11804_v22 = vld [vmem:[%s27355_s4 + $0x3c0] sm:$0xf]  ;;  %v16991_v23 = vld [vmem:[%s27355_s4 + $0x3c4] sm:$0xf0]  ;;  %v11741_v26 = vor.u32 %v16975_v21, %v11740_v20  ;;  %v16957_v31 = vld [vmem:[%s27355_s4 + $0x2b4] sm:$0xf0] }
  0x25   :  { %3774 = vmatpush.bf16.msrb.mxu1 %v11701_v43  ;;  %3740 = vmatmul.bf16.vlgmr.msra.gmra.mxu2 %v18558_v1  ;;  %v11805_v30 = vor.u32 %v16991_v23, %v11804_v22  ;;  %v11732_v32 = vld [vmem:[%s27355_s4 + $0x330] sm:$0xf]  ;;  %v16973_v33 = vld [vmem:[%s27355_s4 + $0x334] sm:$0xf0]  ;;  %v11669_v37 = vor.u32 %v16957_v31, %v11668_v29  ;;  %v11596_v39 = vld [vmem:[%s27355_s4 + $0x220] sm:$0xf] }
  0x26   :  { %3788 = vmatpush.bf16.msrb.mxu2 %v11765_v44  ;;  %3754 = vmatmul.bf16.vlgmr.msra.gmra.mxu3 %v18594_v17  ;;  %v11796_v34 = vld [vmem:[%s27355_s4 + $0x3b0] sm:$0xf]  ;;  %v16989_v35 = vld [vmem:[%s27355_s4 + $0x3b4] sm:$0xf0]  ;;  %v11733_v38 = vor.u32 %v16973_v33, %v11732_v32  ;;  %v16939_v40 = vld [vmem:[%s27355_s4 + $0x224] sm:$0xf0] }
  0x27   :  { %3802 = vmatpush.bf16.msrb.mxu3 %v11829_v48  ;;  %v11660_v41 = vld [vmem:[%s27355_s4 + $0x2a0] sm:$0xf]  ;;  %v11797_v42 = vor.u32 %v16989_v35, %v11796_v34  ;;  %v16955_v43 = vld [vmem:[%s27355_s4 + $0x2a4] sm:$0xf0]  ;;  %v11597_v48 = vor.u32 %v16939_v40, %v11596_v39  ;;  %v11588_v49 = vld [vmem:[%s27355_s4 + $0x210] sm:$0xf] }
  0x28   :  { %3761 = vmatpush.bf16.msrb.mxu0 %v11629_v55  ;;  %v11724_v44 = vld [vmem:[%s27355_s4 + $0x320] sm:$0xf]  ;;  %v16971_v45 = vld [vmem:[%s27355_s4 + $0x324] sm:$0xf0]  ;;  %v11661_v50 = vor.u32 %v16955_v43, %v11660_v41  ;;  %v16937_v52 = vld [vmem:[%s27355_s4 + $0x214] sm:$0xf0] }
  0x29   :  { %3775 = vmatpush.bf16.msrb.mxu1 %v11693_v60  ;;  %v11788_v46 = vld [vmem:[%s27355_s4 + $0x3a0] sm:$0xf]  ;;  %v16987_v47 = vld [vmem:[%s27355_s4 + $0x3a4] sm:$0xf0]  ;;  %v11725_v51 = vor.u32 %v16971_v45, %v11724_v44  ;;  %v11652_v53 = vld [vmem:[%s27355_s4 + $0x290] sm:$0xf]  ;;  %v11589_v63 = vor.u32 %v16937_v52, %v11588_v49 }
  0x2a   :  { %3789 = vmatpush.bf16.msrb.mxu2 %v11757_v61  ;;  %v16953_v54 = vld [vmem:[%s27355_s4 + $0x294] sm:$0xf0]  ;;  %v11789_v55 = vor.u32 %v16987_v47, %v11788_v46  ;;  %v11716_v56 = vld [vmem:[%s27355_s4 + $0x310] sm:$0xf]  ;;  %v11580_v61 = vld [vmem:[%s27355_s4 + $0x200] sm:$0xf] }
  0x2b   :  { %3803 = vmatpush.bf16.msrb.mxu3 %v11821_v2  ;;  %v16969_v57 = vld [vmem:[%s27355_s4 + $0x314] sm:$0xf0]  ;;  %v11780_v59 = vld [vmem:[%s27355_s4 + $0x390] sm:$0xf]  ;;  %v16935_v62 = vld [vmem:[%s27355_s4 + $0x204] sm:$0xf0]  ;;  %v11653_v5 = vor.u32 %v16953_v54, %v11652_v53 }
  0x2c   :  { %3762 = vmatpush.bf16.msrb.mxu0 %v11621_v9  ;;  %v16985_v60 = vld [vmem:[%s27355_s4 + $0x394] sm:$0xf0]  ;;  %v11644_v0 = vld [vmem:[%s27355_s4 + $0x280] sm:$0xf]  ;;  %v16951_v2 = vld [vmem:[%s27355_s4 + $0x284] sm:$0xf0]  ;;  %v11717_v6 = vor.u32 %v16969_v57, %v11716_v56  ;;  %v11581_v19 = vor.u32 %v16935_v62, %v11580_v61 }
  0x2d   :  { %3776 = vmatpush.bf16.msrb.mxu1 %v11685_v12  ;;  %v11708_v3 = vld [vmem:[%s27355_s4 + $0x300] sm:$0xf]  ;;  %v16967_v4 = vld [vmem:[%s27355_s4 + $0x304] sm:$0xf0]  ;;  %v11892_v9 = vld [vmem:[%s27355_s4 + $0x470] sm:$0xf]  ;;  %v11781_v11 = vor.u32 %v16985_v60, %v11780_v59  ;;  %v11645_v23 = vor.u32 %v16951_v2, %v11644_v0 }
  0x2e   :  { %3790 = vmatpush.bf16.msrb.mxu2 %v11749_v13  ;;  %v11772_v7 = vld [vmem:[%s27355_s4 + $0x380] sm:$0xf]  ;;  %v16983_v8 = vld [vmem:[%s27355_s4 + $0x384] sm:$0xf0]  ;;  %v17013_v12 = vld [vmem:[%s27355_s4 + $0x474] sm:$0xf0] }
  0x2f   :  { %3804 = vmatpush.bf16.msrb.mxu3 %v11813_v18  ;;  %v11956_v13 = vld [vmem:[%s27355_s4 + $0x4f0] sm:$0xf]  ;;  %v17029_v14 = vld [vmem:[%s27355_s4 + $0x4f4] sm:$0xf0]  ;;  %v16854_v22 = vld [vmem:[%s27356_s0 + $0x9c] sm:$0x30]  ;;  %v11773_v28 = vor.u32 %v16983_v8, %v11772_v7  ;;  %v11893_v29 = vor.u32 %v17013_v12, %v11892_v9 }
  0x30   :  { %3763 = vmatpush.bf16.msrb.mxu0 %v11613_v24  ;;  %v12020_v15 = vld [vmem:[%s27355_s4 + $0x570] sm:$0xf]  ;;  %v17045_v16 = vld [vmem:[%s27355_s4 + $0x574] sm:$0xf0]  ;;  %v11709_v24 = vor.u32 %v16967_v4, %v11708_v3  ;;  %v16836_v27 = vld [vmem:[%s27356_s0 + $0x14] sm:$0xf]  ;;  %v11957_v33 = vor.u32 %v17029_v14, %v11956_v13 }
  0x31   :  { %3777 = vmatpush.bf16.msrb.mxu1 %v11677_v25  ;;  %v12084_v18 = vld [vmem:[%s27355_s4 + $0x5f0] sm:$0xf]  ;;  %v17061_v20 = vld [vmem:[%s27355_s4 + $0x5f4] sm:$0xf0]  ;;  %v16837_v31 = vld [vmem:[%s27356_s0 + $0x1c] sm:$0xf]  ;;  %v12021_v34 = vor.u32 %v17045_v16, %v12020_v15 }
  0x32   :  { %3791 = vmatpush.bf16.msrb.mxu2 %v11741_v26  ;;  %v11196_v21 = vld [vmem:[%s27356_s0 + $0x10] sm:$0xf]  ;;  %v11204_v25 = vld [vmem:[%s27356_s0 + $0x18] sm:$0xf]  ;;  %v16855_v26 = vld [vmem:[%s27356_s0 + $0xa4] sm:$0x30] }
  0x33   :  { %3805 = vmatpush.bf16.msrb.mxu3 %v11805_v30  ;;  %v11198_v30 = vld [vmem:[%s27356_s0 + $0xa0] sm:$0x30]  ;;  %v11206_v32 = vld [vmem:[%s27356_s0 + $0xa8] sm:$0x30]  ;;  %v11884_v35 = vld [vmem:[%s27355_s4 + $0x460] sm:$0xf]  ;;  %v18766_v39 = vor.u32 %v16854_v22, %v11196_v21  ;;  %v18777_v43 = vor.u32 %v16855_v26, %v11204_v25 }
  0x34   :  { %3764 = vmatpush.bf16.msrb.mxu0 %v11605_v36  ;;  %v17011_v36 = vld [vmem:[%s27355_s4 + $0x464] sm:$0xf0]  ;;  %v12012_v41 = vld [vmem:[%s27355_s4 + $0x560] sm:$0xf]  ;;  %v18779_v44 = vor.u32 %v16836_v27, %v11198_v30  ;;  %v18787_v47 = vor.u32 %v16837_v31, %v11206_v32  ;;  %v17009_v52 = vld [vmem:[%s27355_s4 + $0x454] sm:$0xf0] }
  0x35   :  { %3778 = vmatpush.bf16.msrb.mxu1 %v11669_v37  ;;  %v11948_v37 = vld [vmem:[%s27355_s4 + $0x4e0] sm:$0xf]  ;;  %v17027_v40 = vld [vmem:[%s27355_s4 + $0x4e4] sm:$0xf0]  ;;  %v11940_v53 = vld [vmem:[%s27355_s4 + $0x4d0] sm:$0xf] }
  0x36   :  { %3792 = vmatpush.bf16.msrb.mxu2 %v11733_v38  ;;  %v12085_v38 = vor.u32 %v17061_v20, %v12084_v18  ;;  %v12076_v45 = vld [vmem:[%s27355_s4 + $0x5e0] sm:$0xf]  ;;  %v17059_v46 = vld [vmem:[%s27355_s4 + $0x5e4] sm:$0xf0]  ;;  %v11949_v49 = vor.u32 %v17027_v40, %v11948_v37  ;;  %v12004_v56 = vld [vmem:[%s27355_s4 + $0x550] sm:$0xf] }
  0x37   :  { %3806 = vmatpush.bf16.msrb.mxu3 %v11797_v42  ;;  %v17043_v42 = vld [vmem:[%s27355_s4 + $0x564] sm:$0xf0]  ;;  %v12077_v54 = vor.u32 %v17059_v46, %v12076_v45  ;;  %v17041_v57 = vld [vmem:[%s27355_s4 + $0x554] sm:$0xf0]  ;;  %v12068_v59 = vld [vmem:[%s27355_s4 + $0x5d0] sm:$0xf] }
  0x38   :  { %3765 = vmatpush.bf16.msrb.mxu0 %v11597_v48  ;;  %v11885_v48 = vor.u32 %v17011_v36, %v11884_v35  ;;  %v17057_v60 = vld [vmem:[%s27355_s4 + $0x5d4] sm:$0xf0]  ;;  %v11868_v0 = vld [vmem:[%s27355_s4 + $0x440] sm:$0xf]  ;;  %v17007_v2 = vld [vmem:[%s27355_s4 + $0x444] sm:$0xf0] }
  0x39   :  { %3779 = vmatpush.bf16.msrb.mxu1 %v11661_v50  ;;  %v12013_v50 = vor.u32 %v17043_v42, %v12012_v41  ;;  %v11932_v3 = vld [vmem:[%s27355_s4 + $0x4c0] sm:$0xf]  ;;  %v12069_v4 = vor.u32 %v17057_v60, %v12068_v59  ;;  %v17039_v7 = vld [vmem:[%s27355_s4 + $0x544] sm:$0xf0]  ;;  %v11860_v14 = vld [vmem:[%s27355_s4 + $0x430] sm:$0xf] }
  0x3a   :  { %3793 = vmatpush.bf16.msrb.mxu2 %v11725_v51  ;;  %v11876_v51 = vld [vmem:[%s27355_s4 + $0x450] sm:$0xf]  ;;  %v12060_v8 = vld [vmem:[%s27355_s4 + $0x5c0] sm:$0xf]  ;;  %v17055_v9 = vld [vmem:[%s27355_s4 + $0x5c4] sm:$0xf0] }
  0x3b   :  { %3807 = vmatpush.bf16.msrb.mxu3 %v11789_v55  ;;  %v17025_v55 = vld [vmem:[%s27355_s4 + $0x4d4] sm:$0xf0]  ;;  %v11877_v61 = vor.u32 %v17009_v52, %v11876_v51  ;;  %v11924_v16 = vld [vmem:[%s27355_s4 + $0x4b0] sm:$0xf]  ;;  %v12061_v18 = vor.u32 %v17055_v9, %v12060_v8  ;;  %v11852_v27 = vld [vmem:[%s27355_s4 + $0x420] sm:$0xf] }
  0x3c   :  { %3766 = vmatpush.bf16.msrb.mxu0 %v11589_v63  ;;  %v11941_v62 = vor.u32 %v17025_v55, %v11940_v53  ;;  %v12005_v63 = vor.u32 %v17041_v57, %v12004_v56  ;;  %v17005_v15 = vld [vmem:[%s27355_s4 + $0x434] sm:$0xf0]  ;;  %v11988_v20 = vld [vmem:[%s27355_s4 + $0x530] sm:$0xf]  ;;  %v17019_v31 = vld [vmem:[%s27355_s4 + $0x4a4] sm:$0xf0] }
  0x3d   :  { %3780 = vmatpush.bf16.msrb.mxu1 %v11653_v5  ;;  %v17023_v5 = vld [vmem:[%s27355_s4 + $0x4c4] sm:$0xf0]  ;;  %v17037_v21 = vld [vmem:[%s27355_s4 + $0x534] sm:$0xf0]  ;;  %v12052_v22 = vld [vmem:[%s27355_s4 + $0x5b0] sm:$0xf] }
  0x3e   :  { %3794 = vmatpush.bf16.msrb.mxu2 %v11717_v6  ;;  %v11996_v6 = vld [vmem:[%s27355_s4 + $0x540] sm:$0xf]  ;;  %v11933_v12 = vor.u32 %v17023_v5, %v11932_v3  ;;  %v11989_v26 = vor.u32 %v17037_v21, %v11988_v20  ;;  %v17051_v35 = vld [vmem:[%s27355_s4 + $0x5a4] sm:$0xf0]  ;;  %v11844_v37 = vld [vmem:[%s27355_s4 + $0x410] sm:$0xf] }
  0x3f   :  { %3808 = vmatpush.bf16.msrb.mxu3 %v11781_v11  ;;  %v11869_v11 = vor.u32 %v17007_v2, %v11868_v0  ;;  %v11997_v13 = vor.u32 %v17039_v7, %v11996_v6  ;;  %v11980_v32 = vld [vmem:[%s27355_s4 + $0x520] sm:$0xf]  ;;  %v17001_v41 = vld [vmem:[%s27355_s4 + $0x414] sm:$0xf0]  ;;  %v11908_v42 = vld [vmem:[%s27355_s4 + $0x490] sm:$0xf] }
  0x40   :  { %3767 = vmatpush.bf16.msrb.mxu0 %v11581_v19  ;;  %v17021_v19 = vld [vmem:[%s27355_s4 + $0x4b4] sm:$0xf0]  ;;  %v11836_v52 = vld [vmem:[%s27355_s4 + $0x400] sm:$0xf]  ;;  %v16999_v53 = vld [vmem:[%s27355_s4 + $0x404] sm:$0xf0] }
  0x41   :  { %3781 = vmatpush.bf16.msrb.mxu1 %v11645_v23  ;;  %v17053_v23 = vld [vmem:[%s27355_s4 + $0x5b4] sm:$0xf0]  ;;  %v11925_v25 = vor.u32 %v17021_v19, %v11924_v16  ;;  %v11900_v55 = vld [vmem:[%s27355_s4 + $0x480] sm:$0xf]  ;;  %v17015_v56 = vld [vmem:[%s27355_s4 + $0x484] sm:$0xf0]  ;;  %v11837_v9 = vor.u32 %v16999_v53, %v11836_v52 }
  0x42   :  { %3795 = vmatpush.bf16.msrb.mxu2 %v11709_v24  ;;  %v11861_v24 = vor.u32 %v17005_v15, %v11860_v14  ;;  %v12053_v30 = vor.u32 %v17053_v23, %v12052_v22  ;;  %v17017_v45 = vld [vmem:[%s27355_s4 + $0x494] sm:$0xf0]  ;;  %v11964_v57 = vld [vmem:[%s27355_s4 + $0x500] sm:$0xf]  ;;  %v17031_v59 = vld [vmem:[%s27355_s4 + $0x504] sm:$0xf0]  ;;  %v11901_v14 = vor.u32 %v17015_v56, %v11900_v55 }
  0x43   :  { %3809 = vmatpush.bf16.msrb.mxu3 %v11773_v28  ;;  %3768 = vmatmul.bf16.vlgmr.msrb.gmra.mxu0 %v18766_v39  ;;  %v17003_v28 = vld [vmem:[%s27355_s4 + $0x424] sm:$0xf0]  ;;  %v17049_v51 = vld [vmem:[%s27355_s4 + $0x594] sm:$0xf0]  ;;  %v11909_v60 = vor.u32 %v17017_v45, %v11908_v42  ;;  %v12148_v0 = vld [vmem:[%s27355_s4 + $0x670] sm:$0xf]  ;;  %v11965_v15 = vor.u32 %v17031_v59, %v11964_v57 }
  0x44   :  { %3816 = vmatpush.bf16.msra.mxu0 %v11893_v29  ;;  %3782 = vmatmul.bf16.vlgmr.msrb.gmra.mxu1 %v18779_v44  ;;  %v11916_v29 = vld [vmem:[%s27355_s4 + $0x4a0] sm:$0xf]  ;;  %v11853_v36 = vor.u32 %v17003_v28, %v11852_v27  ;;  %v17077_v3 = vld [vmem:[%s27355_s4 + $0x674] sm:$0xf0]  ;;  %v12276_v6 = vld [vmem:[%s27355_s4 + $0x770] sm:$0xf] }
  0x45   :  { %3830 = vmatpush.bf16.msra.mxu1 %v11957_v33  ;;  %3796 = vmatmul.bf16.vlgmr.msrb.gmra.mxu2 %v18777_v43  ;;  %v17035_v33 = vld [vmem:[%s27355_s4 + $0x524] sm:$0xf0]  ;;  %v17093_v5 = vld [vmem:[%s27355_s4 + $0x6f4] sm:$0xf0]  ;;  %v12340_v8 = vld [vmem:[%s27355_s4 + $0x7f0] sm:$0xf]  ;;  %v12149_v21 = vor.u32 %v17077_v3, %v12148_v0 }
  0x46   :  { %3844 = vmatpush.bf16.msra.mxu2 %v12021_v34  ;;  %3810 = vmatmul.bf16.vlgmr.msrb.gmra.mxu3 %v18787_v47  ;;  %v12044_v34 = vld [vmem:[%s27355_s4 + $0x5a0] sm:$0xf]  ;;  %v11981_v40 = vor.u32 %v17035_v33, %v11980_v32  ;;  %v17109_v7 = vld [vmem:[%s27355_s4 + $0x774] sm:$0xf0]  ;;  %v11220_v16 = vld [vmem:[%s27356_s0 + $0x28] sm:$0xf] }
  0x47   :  { %3858 = vmatpush.bf16.msra.mxu3 %v12085_v38  ;;  %v11917_v38 = vor.u32 %v17019_v31, %v11916_v29  ;;  %v12045_v46 = vor.u32 %v17051_v35, %v12044_v34  ;;  %v16838_v19 = vld [vmem:[%s27356_s0 + $0x24] sm:$0xf]  ;;  %v11214_v22 = vld [vmem:[%s27356_s0 + $0xb0] sm:$0x30]  ;;  %v16839_v23 = vld [vmem:[%s27356_s0 + $0x2c] sm:$0xf] }
  0x48   :  { %3817 = vmatpush.bf16.msra.mxu0 %v11885_v48  ;;  %v11972_v48 = vld [vmem:[%s27355_s4 + $0x510] sm:$0xf]  ;;  %v12140_v27 = vld [vmem:[%s27355_s4 + $0x660] sm:$0xf]  ;;  %v17075_v28 = vld [vmem:[%s27355_s4 + $0x664] sm:$0xf0] }
  0x49   :  { %3831 = vmatpush.bf16.msra.mxu1 %v11949_v49  ;;  %v17033_v49 = vld [vmem:[%s27355_s4 + $0x514] sm:$0xf0]  ;;  %v12204_v29 = vld [vmem:[%s27355_s4 + $0x6e0] sm:$0xf]  ;;  %v17091_v32 = vld [vmem:[%s27355_s4 + $0x6e4] sm:$0xf0] }
  0x4a   :  { %3845 = vmatpush.bf16.msra.mxu2 %v12013_v50  ;;  %v12036_v50 = vld [vmem:[%s27355_s4 + $0x590] sm:$0xf]  ;;  %v12268_v33 = vld [vmem:[%s27355_s4 + $0x760] sm:$0xf]  ;;  %v17107_v34 = vld [vmem:[%s27355_s4 + $0x764] sm:$0xf0]  ;;  %v12205_v42 = vor.u32 %v17091_v32, %v12204_v29 }
  0x4b   :  { %3859 = vmatpush.bf16.msra.mxu3 %v12077_v54  ;;  %v11845_v54 = vor.u32 %v17001_v41, %v11844_v37  ;;  %v12037_v2 = vor.u32 %v17049_v51, %v12036_v50  ;;  %v12332_v37 = vld [vmem:[%s27355_s4 + $0x7e0] sm:$0xf]  ;;  %v12141_v41 = vor.u32 %v17075_v28, %v12140_v27  ;;  %v12269_v45 = vor.u32 %v17107_v34, %v12268_v33  ;;  %v17089_v51 = vld [vmem:[%s27355_s4 + $0x6d4] sm:$0xf0]  ;;  %v12260_v52 = vld [vmem:[%s27355_s4 + $0x750] sm:$0xf] }
  0x4c   :  { %3818 = vmatpush.bf16.msra.mxu0 %v11877_v61  ;;  %v11973_v61 = vor.u32 %v17033_v49, %v11972_v48  ;;  %v17073_v48 = vld [vmem:[%s27355_s4 + $0x654] sm:$0xf0]  ;;  %v12196_v49 = vld [vmem:[%s27355_s4 + $0x6d0] sm:$0xf]  ;;  %v17087_v0 = vld [vmem:[%s27355_s4 + $0x6c4] sm:$0xf0] }
  0x4d   :  { %3832 = vmatpush.bf16.msra.mxu1 %v11941_v62  ;;  %v12028_v62 = vld [vmem:[%s27355_s4 + $0x580] sm:$0xf]  ;;  %v17105_v53 = vld [vmem:[%s27355_s4 + $0x754] sm:$0xf0]  ;;  %v12197_v57 = vor.u32 %v17089_v51, %v12196_v49  ;;  %v17103_v3 = vld [vmem:[%s27355_s4 + $0x744] sm:$0xf0] }
  0x4e   :  { %3846 = vmatpush.bf16.msra.mxu2 %v12005_v63  ;;  %v17047_v63 = vld [vmem:[%s27355_s4 + $0x584] sm:$0xf0]  ;;  %v17121_v55 = vld [vmem:[%s27355_s4 + $0x7d4] sm:$0xf0]  ;;  %v12261_v59 = vor.u32 %v17105_v53, %v12260_v52  ;;  %v12236_v28 = vld [vmem:[%s27355_s4 + $0x720] sm:$0xf] }
  0x4f   :  { %3860 = vmatpush.bf16.msra.mxu3 %v12069_v4  ;;  %v12212_v4 = vld [vmem:[%s27355_s4 + $0x6f0] sm:$0xf]  ;;  %v12029_v20 = vor.u32 %v17047_v63, %v12028_v62  ;;  %v12188_v62 = vld [vmem:[%s27355_s4 + $0x6c0] sm:$0xf]  ;;  %v17083_v27 = vld [vmem:[%s27355_s4 + $0x6a4] sm:$0xf0] }
  0x50   :  { %3819 = vmatpush.bf16.msra.mxu0 %v11869_v11  ;;  %v17125_v11 = vld [vmem:[%s27355_s4 + $0x7f4] sm:$0xf0]  ;;  %v17099_v29 = vld [vmem:[%s27355_s4 + $0x724] sm:$0xf0]  ;;  %v12100_v34 = vld [vmem:[%s27355_s4 + $0x610] sm:$0xf] }
  0x51   :  { %3833 = vmatpush.bf16.msra.mxu1 %v11933_v12  ;;  %v11212_v12 = vld [vmem:[%s27356_s0 + $0x20] sm:$0xf]  ;;  %v17115_v32 = vld [vmem:[%s27355_s4 + $0x7a4] sm:$0xf0]  ;;  %v17097_v49 = vld [vmem:[%s27355_s4 + $0x714] sm:$0xf0] }
  0x52   :  { %3847 = vmatpush.bf16.msra.mxu2 %v11997_v13  ;;  %v16856_v13 = vld [vmem:[%s27356_s0 + $0xac] sm:$0x30]  ;;  %v17113_v51 = vld [vmem:[%s27355_s4 + $0x794] sm:$0xf0]  ;;  %v12092_v52 = vld [vmem:[%s27355_s4 + $0x600] sm:$0xf] }
  0x53   :  { %3861 = vmatpush.bf16.msra.mxu3 %v12061_v18  ;;  %v16857_v18 = vld [vmem:[%s27356_s0 + $0xb4] sm:$0x30]  ;;  %v18994_v31 = vor.u32 %v16856_v13, %v11212_v12  ;;  %v12180_v12 = vld [vmem:[%s27355_s4 + $0x6b0] sm:$0xf]  ;;  %v17063_v53 = vld [vmem:[%s27355_s4 + $0x604] sm:$0xf0] }
  0x54   :  { %3820 = vmatpush.bf16.msra.mxu0 %v11861_v24  ;;  %v11222_v24 = vld [vmem:[%s27356_s0 + $0xb8] sm:$0x30]  ;;  %v19005_v35 = vor.u32 %v16857_v18, %v11220_v16  ;;  %v17101_v16 = vld [vmem:[%s27355_s4 + $0x734] sm:$0xf0]  ;;  %v12308_v18 = vld [vmem:[%s27355_s4 + $0x7b0] sm:$0xf] }
  0x55   :  { %3834 = vmatpush.bf16.msra.mxu1 %v11925_v25  ;;  %v12213_v25 = vor.u32 %v17093_v5, %v12212_v4  ;;  %v12316_v4 = vld [vmem:[%s27355_s4 + $0x7c0] sm:$0xf]  ;;  %v17119_v5 = vld [vmem:[%s27355_s4 + $0x7c4] sm:$0xf0] }
  0x56   :  { %3848 = vmatpush.bf16.msra.mxu2 %v11989_v26  ;;  %v12277_v26 = vor.u32 %v17109_v7, %v12276_v6  ;;  %v12189_v7 = vor.u32 %v17087_v0, %v12188_v62  ;;  %v12317_v13 = vor.u32 %v17119_v5, %v12316_v4  ;;  %v12284_v62 = vld [vmem:[%s27355_s4 + $0x780] sm:$0xf]  ;;  %v12404_v0 = vld [vmem:[%s27355_s4 + $0x870] sm:$0xf]  ;;  %v17157_v5 = vld [vmem:[%s27355_s4 + $0x8f4] sm:$0xf0] }
  0x57   :  { %3862 = vmatpush.bf16.msra.mxu3 %v12053_v30  ;;  %v12341_v30 = vor.u32 %v17125_v11, %v12340_v8  ;;  %v17069_v11 = vld [vmem:[%s27355_s4 + $0x634] sm:$0xf0]  ;;  %v12468_v4 = vld [vmem:[%s27355_s4 + $0x8f0] sm:$0xf] }
  0x58   :  { %3821 = vmatpush.bf16.msra.mxu0 %v11853_v36  ;;  %v19007_v36 = vor.u32 %v16838_v19, %v11214_v22  ;;  %v17117_v19 = vld [vmem:[%s27355_s4 + $0x7b4] sm:$0xf0] }
  0x59   :  { %3835 = vmatpush.bf16.msra.mxu1 %v11917_v38  ;;  %v17123_v38 = vld [vmem:[%s27355_s4 + $0x7e4] sm:$0xf0] }
  0x5a   :  { %3849 = vmatpush.bf16.msra.mxu2 %v11981_v40  ;;  %v19015_v40 = vor.u32 %v16839_v23, %v11222_v24  ;;  %v12333_v50 = vor.u32 %v17123_v38, %v12332_v37  ;;  %v12108_v23 = vld [vmem:[%s27355_s4 + $0x620] sm:$0xf]  ;;  %v17067_v24 = vld [vmem:[%s27355_s4 + $0x624] sm:$0xf0]  ;;  %v12237_v38 = vor.u32 %v17099_v29, %v12236_v28 }
  0x5b   :  { %3863 = vmatpush.bf16.msra.mxu3 %v12045_v46  ;;  %v12132_v46 = vld [vmem:[%s27355_s4 + $0x650] sm:$0xf]  ;;  %v12109_v33 = vor.u32 %v17067_v24, %v12108_v23  ;;  %v16841_v23 = vld [vmem:[%s27356_s0 + $0x3c] sm:$0xf]  ;;  %v11238_v24 = vld [vmem:[%s27356_s0 + $0xc8] sm:$0x30] }
  0x5c   :  { %3822 = vmatpush.bf16.msra.mxu0 %v11845_v54  ;;  %v12324_v54 = vld [vmem:[%s27355_s4 + $0x7d0] sm:$0xf]  ;;  %v12133_v56 = vor.u32 %v17073_v48, %v12132_v46  ;;  %v17139_v28 = vld [vmem:[%s27355_s4 + $0x864] sm:$0xf0]  ;;  %v12460_v29 = vld [vmem:[%s27355_s4 + $0x8e0] sm:$0xf] }
  0x5d   :  { %3836 = vmatpush.bf16.msra.mxu1 %v11909_v60  ;;  %v12124_v60 = vld [vmem:[%s27355_s4 + $0x640] sm:$0xf]  ;;  %v12325_v63 = vor.u32 %v17121_v55, %v12324_v54  ;;  %v12228_v48 = vld [vmem:[%s27355_s4 + $0x710] sm:$0xf] }
  0x5e   :  { %3850 = vmatpush.bf16.msra.mxu2 %v11973_v61  ;;  %v17071_v61 = vld [vmem:[%s27355_s4 + $0x644] sm:$0xf0]  ;;  %v12156_v55 = vld [vmem:[%s27355_s4 + $0x680] sm:$0xf] }
  0x5f   :  { %3864 = vmatpush.bf16.msra.mxu3 %v12037_v2  ;;  %v12252_v2 = vld [vmem:[%s27355_s4 + $0x740] sm:$0xf]  ;;  %v12125_v6 = vor.u32 %v17071_v61, %v12124_v60  ;;  %v12229_v61 = vor.u32 %v17097_v49, %v12228_v48 }
  0x60   :  { %3823 = vmatpush.bf16.msra.mxu0 %v11837_v9  ;;  %v12253_v8 = vor.u32 %v17103_v3, %v12252_v2  ;;  %v12116_v9 = vld [vmem:[%s27355_s4 + $0x630] sm:$0xf]  ;;  %v17141_v3 = vld [vmem:[%s27355_s4 + $0x874] sm:$0xf0] }
  0x61   :  { %3837 = vmatpush.bf16.msra.mxu1 %v11901_v14  ;;  %v17085_v14 = vld [vmem:[%s27355_s4 + $0x6b4] sm:$0xf0] }
  0x62   :  { %3851 = vmatpush.bf16.msra.mxu2 %v11965_v15  ;;  %v12244_v15 = vld [vmem:[%s27355_s4 + $0x730] sm:$0xf] }
  0x63   :  { %3865 = vmatpush.bf16.msra.mxu3 %v12029_v20  ;;  %3824 = vmatmul.bf16.vlgmr.msra.gmra.mxu0 %v18994_v31  ;;  %v12117_v20 = vor.u32 %v17069_v11, %v12116_v9  ;;  %v12245_v22 = vor.u32 %v17101_v16, %v12244_v15  ;;  %v12093_v9 = vor.u32 %v17063_v53, %v12092_v52  ;;  %v17189_v11 = vld [vmem:[%s27355_s4 + $0x9f4] sm:$0xf0]  ;;  %v12452_v53 = vld [vmem:[%s27355_s4 + $0x8d0] sm:$0xf] }
  0x64   :  { %3872 = vmatpush.bf16.msrb.mxu0 %v12149_v21  ;;  %3838 = vmatmul.bf16.vlgmr.msra.gmra.mxu1 %v19007_v36  ;;  %v12181_v21 = vor.u32 %v17085_v14, %v12180_v12  ;;  %v11228_v12 = vld [vmem:[%s27356_s0 + $0x30] sm:$0xf]  ;;  %v11236_v16 = vld [vmem:[%s27356_s0 + $0x38] sm:$0xf] }
  0x65   :  { %3886 = vmatpush.bf16.msrb.mxu1 %v12213_v25  ;;  %3852 = vmatmul.bf16.vlgmr.msra.gmra.mxu2 %v19005_v35  ;;  %v12172_v25 = vld [vmem:[%s27355_s4 + $0x6a0] sm:$0xf]  ;;  %v17137_v52 = vld [vmem:[%s27355_s4 + $0x854] sm:$0xf0] }
  0x66   :  { %3900 = vmatpush.bf16.msrb.mxu2 %v12277_v26  ;;  %3866 = vmatmul.bf16.vlgmr.msra.gmra.mxu3 %v19015_v40  ;;  %v12309_v26 = vor.u32 %v17117_v19, %v12308_v18  ;;  %v12173_v37 = vor.u32 %v17083_v27, %v12172_v25  ;;  %v16859_v18 = vld [vmem:[%s27356_s0 + $0xc4] sm:$0x30]  ;;  %v16840_v19 = vld [vmem:[%s27356_s0 + $0x34] sm:$0xf]  ;;  %v12469_v25 = vor.u32 %v17157_v5, %v12468_v4  ;;  %v12396_v27 = vld [vmem:[%s27355_s4 + $0x860] sm:$0xf] }
  0x67   :  { %3914 = vmatpush.bf16.msrb.mxu3 %v12341_v30  ;;  %v12300_v30 = vld [vmem:[%s27355_s4 + $0x7a0] sm:$0xf]  ;;  %v12397_v48 = vor.u32 %v17139_v28, %v12396_v27  ;;  %v17151_v5 = vld [vmem:[%s27355_s4 + $0x8c4] sm:$0xf0] }
  0x68   :  { %3873 = vmatpush.bf16.msrb.mxu0 %v12141_v41  ;;  %v17065_v41 = vld [vmem:[%s27355_s4 + $0x614] sm:$0xf0]  ;;  %v12301_v46 = vor.u32 %v17115_v32, %v12300_v30  ;;  %v12364_v27 = vld [vmem:[%s27355_s4 + $0x820] sm:$0xf]  ;;  %v17131_v28 = vld [vmem:[%s27355_s4 + $0x824] sm:$0xf0] }
  0x69   :  { %3887 = vmatpush.bf16.msrb.mxu1 %v12205_v42  ;;  %v12164_v42 = vld [vmem:[%s27355_s4 + $0x690] sm:$0xf]  ;;  %v12101_v54 = vor.u32 %v17065_v41, %v12100_v34  ;;  %v12524_v34 = vld [vmem:[%s27355_s4 + $0x960] sm:$0xf] }
  0x6a   :  { %3901 = vmatpush.bf16.msrb.mxu2 %v12269_v45  ;;  %v17081_v45 = vld [vmem:[%s27355_s4 + $0x694] sm:$0xf0] }
  0x6b   :  { %3915 = vmatpush.bf16.msrb.mxu3 %v12333_v50  ;;  %v12292_v50 = vld [vmem:[%s27355_s4 + $0x790] sm:$0xf]  ;;  %v12165_v60 = vor.u32 %v17081_v45, %v12164_v42  ;;  %v12588_v42 = vld [vmem:[%s27355_s4 + $0x9e0] sm:$0xf]  ;;  %v17187_v45 = vld [vmem:[%s27355_s4 + $0x9e4] sm:$0xf0] }
  0x6c   :  { %3874 = vmatpush.bf16.msrb.mxu0 %v12133_v56  ;;  %v17079_v56 = vld [vmem:[%s27355_s4 + $0x684] sm:$0xf0]  ;;  %v12293_v2 = vor.u32 %v17113_v51, %v12292_v50  ;;  %v12388_v51 = vld [vmem:[%s27355_s4 + $0x850] sm:$0xf] }
  0x6d   :  { %3888 = vmatpush.bf16.msrb.mxu1 %v12197_v57  ;;  %v12220_v57 = vld [vmem:[%s27355_s4 + $0x700] sm:$0xf]  ;;  %v12157_v14 = vor.u32 %v17079_v56, %v12156_v55  ;;  %v17153_v55 = vld [vmem:[%s27355_s4 + $0x8d4] sm:$0xf0]  ;;  %v12516_v56 = vld [vmem:[%s27355_s4 + $0x950] sm:$0xf] }
  0x6e   :  { %3902 = vmatpush.bf16.msrb.mxu2 %v12261_v59  ;;  %v17095_v59 = vld [vmem:[%s27355_s4 + $0x704] sm:$0xf0] }
  0x6f   :  { %3916 = vmatpush.bf16.msrb.mxu3 %v12325_v63  ;;  %v17111_v63 = vld [vmem:[%s27355_s4 + $0x784] sm:$0xf0]  ;;  %v12221_v15 = vor.u32 %v17095_v59, %v12220_v57  ;;  %v17169_v57 = vld [vmem:[%s27355_s4 + $0x954] sm:$0xf0]  ;;  %v12580_v59 = vld [vmem:[%s27355_s4 + $0x9d0] sm:$0xf] }
  0x70   :  { %3875 = vmatpush.bf16.msrb.mxu0 %v12125_v6  ;;  %v12532_v6 = vld [vmem:[%s27355_s4 + $0x970] sm:$0xf] }
  0x71   :  { %3889 = vmatpush.bf16.msrb.mxu1 %v12189_v7  ;;  %v17173_v7 = vld [vmem:[%s27355_s4 + $0x974] sm:$0xf0] }
  0x72   :  { %3903 = vmatpush.bf16.msrb.mxu2 %v12253_v8  ;;  %v12596_v8 = vld [vmem:[%s27355_s4 + $0x9f0] sm:$0xf] }
  0x73   :  { %3917 = vmatpush.bf16.msrb.mxu3 %v12317_v13  ;;  %v16858_v13 = vld [vmem:[%s27356_s0 + $0xbc] sm:$0x30]  ;;  %v12597_v30 = vor.u32 %v17189_v11, %v12596_v8 }
  0x74   :  { %3876 = vmatpush.bf16.msrb.mxu0 %v12117_v20  ;;  %v12285_v20 = vor.u32 %v17111_v63, %v12284_v62  ;;  %v19222_v32 = vor.u32 %v16858_v13, %v11228_v12  ;;  %v12453_v62 = vor.u32 %v17153_v55, %v12452_v53  ;;  %v12517_v63 = vor.u32 %v17169_v57, %v12516_v56  ;;  %v12572_v8 = vld [vmem:[%s27355_s4 + $0x9c0] sm:$0xf]  ;;  %v12420_v53 = vld [vmem:[%s27355_s4 + $0x890] sm:$0xf]  ;;  %v17161_v57 = vld [vmem:[%s27355_s4 + $0x914] sm:$0xf0] }
  0x75   :  { %3890 = vmatpush.bf16.msrb.mxu1 %v12181_v21  ;;  %v12405_v21 = vor.u32 %v17141_v3, %v12404_v0  ;;  %v12380_v0 = vld [vmem:[%s27355_s4 + $0x840] sm:$0xf]  ;;  %v12484_v56 = vld [vmem:[%s27355_s4 + $0x910] sm:$0xf] }
  0x76   :  { %3904 = vmatpush.bf16.msrb.mxu2 %v12245_v22  ;;  %v11230_v22 = vld [vmem:[%s27356_s0 + $0xc0] sm:$0x30]  ;;  %v12444_v3 = vld [vmem:[%s27355_s4 + $0x8c0] sm:$0xf] }
  0x77   :  { %3918 = vmatpush.bf16.msrb.mxu3 %v12309_v26  ;;  %v12533_v26 = vor.u32 %v17173_v7, %v12532_v6  ;;  %v19235_v41 = vor.u32 %v16840_v19, %v11230_v22  ;;  %v12508_v6 = vld [vmem:[%s27355_s4 + $0x940] sm:$0xf]  ;;  %v17167_v7 = vld [vmem:[%s27355_s4 + $0x944] sm:$0xf0]  ;;  %v12445_v12 = vor.u32 %v17151_v5, %v12444_v3  ;;  %v17149_v19 = vld [vmem:[%s27355_s4 + $0x8b4] sm:$0xf0] }
  0x78   :  { %3877 = vmatpush.bf16.msrb.mxu0 %v12109_v33  ;;  %v17155_v33 = vld [vmem:[%s27355_s4 + $0x8e4] sm:$0xf0]  ;;  %v12509_v13 = vor.u32 %v17167_v7, %v12508_v6  ;;  %v12564_v22 = vld [vmem:[%s27355_s4 + $0x9b0] sm:$0xf]  ;;  %v12476_v3 = vld [vmem:[%s27355_s4 + $0x900] sm:$0xf]  ;;  %v12485_v6 = vor.u32 %v17161_v57, %v12484_v56 }
  0x79   :  { %3891 = vmatpush.bf16.msrb.mxu1 %v12173_v37  ;;  %v17171_v37 = vld [vmem:[%s27355_s4 + $0x964] sm:$0xf0]  ;;  %v12461_v49 = vor.u32 %v17155_v33, %v12460_v29  ;;  %v12428_v29 = vld [vmem:[%s27355_s4 + $0x8a0] sm:$0xf] }
  0x7a   :  { %3905 = vmatpush.bf16.msrb.mxu2 %v12237_v38  ;;  %v19233_v38 = vor.u32 %v16859_v18, %v11236_v16  ;;  %v12525_v50 = vor.u32 %v17171_v37, %v12524_v34  ;;  %v12436_v16 = vld [vmem:[%s27355_s4 + $0x8b0] sm:$0xf]  ;;  %v17147_v33 = vld [vmem:[%s27355_s4 + $0x8a4] sm:$0xf0]  ;;  %v12492_v34 = vld [vmem:[%s27355_s4 + $0x920] sm:$0xf] }
  0x7b   :  { %3919 = vmatpush.bf16.msrb.mxu3 %v12301_v46  ;;  %v19243_v46 = vor.u32 %v16841_v23, %v11238_v24  ;;  %v17181_v23 = vld [vmem:[%s27355_s4 + $0x9b4] sm:$0xf0]  ;;  %v17163_v37 = vld [vmem:[%s27355_s4 + $0x924] sm:$0xf0]  ;;  %v12540_v7 = vld [vmem:[%s27355_s4 + $0x980] sm:$0xf] }
  0x7c   :  { %3878 = vmatpush.bf16.msrb.mxu0 %v12101_v54  ;;  %v12589_v54 = vor.u32 %v17187_v45, %v12588_v42  ;;  %v12556_v42 = vld [vmem:[%s27355_s4 + $0x9a0] sm:$0xf]  ;;  %v17179_v45 = vld [vmem:[%s27355_s4 + $0x9a4] sm:$0xf0] }
  0x7d   :  { %3892 = vmatpush.bf16.msrb.mxu1 %v12165_v60  ;;  %v17185_v60 = vld [vmem:[%s27355_s4 + $0x9d4] sm:$0xf0]  ;;  %v12557_v55 = vor.u32 %v17179_v45, %v12556_v42  ;;  %v12652_v45 = vld [vmem:[%s27355_s4 + $0xa60] sm:$0xf] }
  0x7e   :  { %3906 = vmatpush.bf16.msrb.mxu2 %v12229_v61  ;;  %v12389_v61 = vor.u32 %v17137_v52, %v12388_v51  ;;  %v12581_v4 = vor.u32 %v17185_v60, %v12580_v59  ;;  %v12493_v51 = vor.u32 %v17163_v37, %v12492_v34  ;;  %v17129_v52 = vld [vmem:[%s27355_s4 + $0x814] sm:$0xf0]  ;;  %v12548_v59 = vld [vmem:[%s27355_s4 + $0x990] sm:$0xf]  ;;  %v11254_v34 = vld [vmem:[%s27356_s0 + $0xd8] sm:$0x30] }
  0x7f   :  { %3920 = vmatpush.bf16.msrb.mxu3 %v12293_v2  ;;  %v17135_v2 = vld [vmem:[%s27355_s4 + $0x844] sm:$0xf0]  ;;  %v17177_v60 = vld [vmem:[%s27355_s4 + $0x994] sm:$0xf0]  ;;  %v12844_v57 = vld [vmem:[%s27355_s4 + $0xbe0] sm:$0xf] }
  0x80   :  { %3879 = vmatpush.bf16.msrb.mxu0 %v12093_v9  ;;  %v17183_v9 = vld [vmem:[%s27355_s4 + $0x9c4] sm:$0xf0]  ;;  %v12381_v11 = vor.u32 %v17135_v2, %v12380_v0  ;;  %v12412_v0 = vld [vmem:[%s27355_s4 + $0x880] sm:$0xf] }
  0x81   :  { %3893 = vmatpush.bf16.msrb.mxu1 %v12157_v14  ;;  %v12372_v14 = vld [vmem:[%s27355_s4 + $0x830] sm:$0xf]  ;;  %v12573_v18 = vor.u32 %v17183_v9, %v12572_v8  ;;  %v17143_v2 = vld [vmem:[%s27355_s4 + $0x884] sm:$0xf0] }
  0x82   :  { %3907 = vmatpush.bf16.msrb.mxu2 %v12221_v15  ;;  %v17133_v15 = vld [vmem:[%s27355_s4 + $0x834] sm:$0xf0]  ;;  %v17175_v8 = vld [vmem:[%s27355_s4 + $0x984] sm:$0xf0]  ;;  %v12660_v9 = vld [vmem:[%s27355_s4 + $0xa70] sm:$0xf] }
  0x83   :  { %3921 = vmatpush.bf16.msrb.mxu3 %v12285_v20  ;;  %3880 = vmatmul.bf16.vlgmr.msrb.gmra.mxu0 %v19222_v32  ;;  %v12500_v20 = vld [vmem:[%s27355_s4 + $0x930] sm:$0xf]  ;;  %v12373_v24 = vor.u32 %v17133_v15, %v12372_v14  ;;  %v17221_v14 = vld [vmem:[%s27355_s4 + $0xaf4] sm:$0xf0] }
  0x84   :  { %3928 = vmatpush.bf16.msra.mxu0 %v12405_v21  ;;  %3894 = vmatmul.bf16.vlgmr.msrb.gmra.mxu1 %v19235_v41  ;;  %v17165_v21 = vld [vmem:[%s27355_s4 + $0x934] sm:$0xf0]  ;;  %v12788_v15 = vld [vmem:[%s27355_s4 + $0xb70] sm:$0xf] }
  0x85   :  { %3942 = vmatpush.bf16.msra.mxu1 %v12469_v25  ;;  %3908 = vmatmul.bf16.vlgmr.msrb.gmra.mxu2 %v19233_v38  ;;  %v12437_v25 = vor.u32 %v17149_v19, %v12436_v16  ;;  %v17237_v16 = vld [vmem:[%s27355_s4 + $0xb74] sm:$0xf0] }
  0x86   :  { %3956 = vmatpush.bf16.msra.mxu2 %v12533_v26  ;;  %3922 = vmatmul.bf16.vlgmr.msrb.gmra.mxu3 %v19243_v46  ;;  %v12501_v26 = vor.u32 %v17165_v21, %v12500_v20  ;;  %v17253_v20 = vld [vmem:[%s27355_s4 + $0xbf4] sm:$0xf0]  ;;  %v11244_v21 = vld [vmem:[%s27356_s0 + $0x40] sm:$0xf]  ;;  %v12789_v42 = vor.u32 %v17237_v16, %v12788_v15 }
  0x87   :  { %3970 = vmatpush.bf16.msra.mxu3 %v12597_v30  ;;  %v12565_v30 = vor.u32 %v17181_v23, %v12564_v22  ;;  %v16860_v22 = vld [vmem:[%s27356_s0 + $0xcc] sm:$0x30]  ;;  %v12413_v23 = vor.u32 %v17143_v2, %v12412_v0  ;;  %v12636_v16 = vld [vmem:[%s27355_s4 + $0xa40] sm:$0xf] }
  0x88   :  { %3929 = vmatpush.bf16.msra.mxu0 %v12397_v48  ;;  %v12365_v48 = vor.u32 %v17131_v28, %v12364_v27  ;;  %v16842_v27 = vld [vmem:[%s27356_s0 + $0x44] sm:$0xf]  ;;  %v12541_v28 = vor.u32 %v17175_v8, %v12540_v7  ;;  %v12772_v7 = vld [vmem:[%s27355_s4 + $0xb50] sm:$0xf]  ;;  %v17233_v8 = vld [vmem:[%s27355_s4 + $0xb54] sm:$0xf0] }
  0x89   :  { %3943 = vmatpush.bf16.msra.mxu1 %v12461_v49  ;;  %v12356_v49 = vld [vmem:[%s27355_s4 + $0x810] sm:$0xf]  ;;  %v12773_v15 = vor.u32 %v17233_v8, %v12772_v7  ;;  %v12812_v8 = vld [vmem:[%s27355_s4 + $0xba0] sm:$0xf] }
  0x8a   :  { %3957 = vmatpush.bf16.msra.mxu2 %v12525_v50  ;;  %v12429_v50 = vor.u32 %v17147_v33, %v12428_v29  ;;  %v16843_v33 = vld [vmem:[%s27356_s0 + $0x4c] sm:$0xf] }
  0x8b   :  { %3971 = vmatpush.bf16.msra.mxu3 %v12589_v54  ;;  %v17145_v54 = vld [vmem:[%s27355_s4 + $0x894] sm:$0xf0] }
  0x8c   :  { %3930 = vmatpush.bf16.msra.mxu0 %v12389_v61  ;;  %v12348_v61 = vld [vmem:[%s27355_s4 + $0x800] sm:$0xf]  ;;  %v12421_v5 = vor.u32 %v17145_v54, %v12420_v53  ;;  %v17235_v54 = vld [vmem:[%s27355_s4 + $0xb64] sm:$0xf0] }
  0x8d   :  { %3944 = vmatpush.bf16.msra.mxu1 %v12453_v62  ;;  %v17127_v62 = vld [vmem:[%s27355_s4 + $0x804] sm:$0xf0]  ;;  %v12780_v53 = vld [vmem:[%s27355_s4 + $0xb60] sm:$0xf] }
  0x8e   :  { %3958 = vmatpush.bf16.msra.mxu2 %v12517_v63  ;;  %v12357_v63 = vor.u32 %v17129_v52, %v12356_v49  ;;  %v12349_v19 = vor.u32 %v17127_v62, %v12348_v61  ;;  %v12716_v49 = vld [vmem:[%s27355_s4 + $0xae0] sm:$0xf]  ;;  %v17219_v52 = vld [vmem:[%s27355_s4 + $0xae4] sm:$0xf0]  ;;  %v12644_v62 = vld [vmem:[%s27355_s4 + $0xa50] sm:$0xf]  ;;  %v12781_v2 = vor.u32 %v17235_v54, %v12780_v53 }
  0x8f   :  { %3972 = vmatpush.bf16.msra.mxu3 %v12581_v4  ;;  %v17159_v4 = vld [vmem:[%s27355_s4 + $0x904] sm:$0xf0]  ;;  %v12717_v0 = vor.u32 %v17219_v52, %v12716_v49  ;;  %v17229_v49 = vld [vmem:[%s27355_s4 + $0xb34] sm:$0xf0] }
  0x90   :  { %3931 = vmatpush.bf16.msra.mxu0 %v12381_v11  ;;  %v12549_v11 = vor.u32 %v17177_v60, %v12548_v59  ;;  %v17251_v59 = vld [vmem:[%s27355_s4 + $0xbe4] sm:$0xf0]  ;;  %v19471_v60 = vor.u32 %v16843_v33, %v11254_v34  ;;  %v12628_v33 = vld [vmem:[%s27355_s4 + $0xa30] sm:$0xf]  ;;  %v17197_v34 = vld [vmem:[%s27355_s4 + $0xa34] sm:$0xf0] }
  0x91   :  { %3945 = vmatpush.bf16.msra.mxu1 %v12445_v12  ;;  %v17205_v12 = vld [vmem:[%s27355_s4 + $0xa74] sm:$0xf0]  ;;  %v12629_v54 = vor.u32 %v17197_v34, %v12628_v33  ;;  %v12668_v33 = vld [vmem:[%s27355_s4 + $0xa80] sm:$0xf]  ;;  %v17207_v34 = vld [vmem:[%s27355_s4 + $0xa84] sm:$0xf0] }
  0x92   :  { %3959 = vmatpush.bf16.msra.mxu2 %v12509_v13  ;;  %v12724_v13 = vld [vmem:[%s27355_s4 + $0xaf0] sm:$0xf]  ;;  %v12661_v29 = vor.u32 %v17205_v12, %v12660_v9  ;;  %v17245_v52 = vld [vmem:[%s27355_s4 + $0xbb4] sm:$0xf0] }
  0x93   :  { %3973 = vmatpush.bf16.msra.mxu3 %v12573_v18  ;;  %v12852_v18 = vld [vmem:[%s27355_s4 + $0xbf0] sm:$0xf]  ;;  %v12725_v37 = vor.u32 %v17221_v14, %v12724_v13 }
  0x94   :  { %3932 = vmatpush.bf16.msra.mxu0 %v12373_v24  ;;  %v12477_v24 = vor.u32 %v17159_v4, %v12476_v3  ;;  %v12708_v3 = vld [vmem:[%s27355_s4 + $0xad0] sm:$0xf]  ;;  %v19485_v4 = vld [vmem:[%s27357_s6] ss:$8 sm:$0x3] }
  0x95   :  { %3946 = vmatpush.bf16.msra.mxu1 %v12437_v25  ;;  %v11252_v25 = vld [vmem:[%s27356_s0 + $0x48] sm:$0xf]  ;;  %v12836_v9 = vld [vmem:[%s27355_s4 + $0xbd0] sm:$0xf]  ;;  %v27363_v13 = vperm.slane %v19485_v4, 0 }
  0x96   :  { %3960 = vmatpush.bf16.msra.mxu2 %v12501_v26  ;;  %v16861_v26 = vld [vmem:[%s27356_s0 + $0xd4] sm:$0x30] }
  0x97   :  { %3974 = vmatpush.bf16.msra.mxu3 %v12565_v30  ;;  %v11246_v30 = vld [vmem:[%s27356_s0 + $0xd0] sm:$0x30] }
  0x98   :  { %3933 = vmatpush.bf16.msra.mxu0 %v12365_v48  ;;  %v17203_v48 = vld [vmem:[%s27355_s4 + $0xa64] sm:$0xf0]  ;;  %v19463_v56 = vor.u32 %v16842_v27, %v11246_v30 }
  0x99   :  { %3947 = vmatpush.bf16.msra.mxu1 %v12429_v50  ;;  %v12853_v50 = vor.u32 %v17253_v20, %v12852_v18  ;;  %v12653_v61 = vor.u32 %v17203_v48, %v12652_v45  ;;  %v17199_v18 = vld [vmem:[%s27355_s4 + $0xa44] sm:$0xf0]  ;;  %v17213_v45 = vld [vmem:[%s27355_s4 + $0xab4] sm:$0xf0]  ;;  %v12756_v48 = vld [vmem:[%s27355_s4 + $0xb30] sm:$0xf] }
  0x9a   :  { %3961 = vmatpush.bf16.msra.mxu2 %v12493_v51  ;;  %v19450_v51 = vor.u32 %v16860_v22, %v11244_v21  ;;  %v17215_v21 = vld [vmem:[%s27355_s4 + $0xac4] sm:$0xf0]  ;;  %v12764_v22 = vld [vmem:[%s27355_s4 + $0xb40] sm:$0xf]  ;;  %v12637_v27 = vor.u32 %v17199_v18, %v12636_v16  ;;  %v17193_v18 = vld [vmem:[%s27355_s4 + $0xa14] sm:$0xf0] }
  0x9b   :  { %3975 = vmatpush.bf16.msra.mxu3 %v12557_v55  ;;  %v19461_v55 = vor.u32 %v16861_v26, %v11252_v25  ;;  %v17247_v25 = vld [vmem:[%s27355_s4 + $0xbc4] sm:$0xf0] }
  0x9c   :  { %3934 = vmatpush.bf16.msra.mxu0 %v12357_v63  ;;  %v17201_v63 = vld [vmem:[%s27355_s4 + $0xa54] sm:$0xf0] }
  0x9d   :  { %3948 = vmatpush.bf16.msra.mxu1 %v12421_v5  ;;  %v12845_v5 = vor.u32 %v17251_v59, %v12844_v57  ;;  %v12645_v12 = vor.u32 %v17201_v63, %v12644_v62  ;;  %v12620_v62 = vld [vmem:[%s27355_s4 + $0xa20] sm:$0xf]  ;;  %v17195_v63 = vld [vmem:[%s27355_s4 + $0xa24] sm:$0xf0] }
  0x9e   :  { %3962 = vmatpush.bf16.msra.mxu2 %v12485_v6  ;;  %v17217_v6 = vld [vmem:[%s27355_s4 + $0xad4] sm:$0xf0] }
  0x9f   :  { %3976 = vmatpush.bf16.msra.mxu3 %v12549_v11  ;;  %v17249_v11 = vld [vmem:[%s27355_s4 + $0xbd4] sm:$0xf0]  ;;  %v12709_v14 = vor.u32 %v17217_v6, %v12708_v3  ;;  %v17211_v3 = vld [vmem:[%s27355_s4 + $0xaa4] sm:$0xf0] }
  0xa0   :  { %3935 = vmatpush.bf16.msra.mxu0 %v12349_v19  ;;  %v12700_v19 = vld [vmem:[%s27355_s4 + $0xac0] sm:$0xf]  ;;  %v12837_v20 = vor.u32 %v17249_v11, %v12836_v9  ;;  %v3713_v26 = vpop.f32.mrf.mxu0  ;;  %v17227_v6 = vld [vmem:[%s27355_s4 + $0xb24] sm:$0xf0] }
  0xa1   :  { %3949 = vmatpush.bf16.msra.mxu1 %v12413_v23  ;;  %v17231_v23 = vld [vmem:[%s27355_s4 + $0xb44] sm:$0xf0]  ;;  %v3727_v53 = vpop.f32.mrf.mxu1 }
  0xa2   :  { %3963 = vmatpush.bf16.msra.mxu2 %v12477_v24  ;;  %v12828_v24 = vld [vmem:[%s27355_s4 + $0xbc0] sm:$0xf]  ;;  %v12765_v30 = vor.u32 %v17231_v23, %v12764_v22  ;;  %v17243_v9 = vld [vmem:[%s27355_s4 + $0xba4] sm:$0xf0]  ;;  %v12740_v22 = vld [vmem:[%s27355_s4 + $0xb10] sm:$0xf] }
  0xa3   :  { %3977 = vmatpush.bf16.msra.mxu3 %v12541_v28  ;;  %3936 = vmatmul.bf16.vlgmr.msra.gmra.mxu0 %v19450_v51  ;;  %v3714_v28 = vadd.f32 %v3713_v26, %v27363_v13  ;;  %v17225_v23 = vld [vmem:[%s27355_s4 + $0xb14] sm:$0xf0] }
  0xa4   :  { %3984 = vmatpush.bf16.msrb.mxu0 %v12661_v29  ;;  %3950 = vmatmul.bf16.vlgmr.msra.gmra.mxu1 %v19463_v56  ;;  %v12701_v29 = vor.u32 %v17215_v21, %v12700_v19  ;;  %v12676_v19 = vld [vmem:[%s27355_s4 + $0xa90] sm:$0xf]  ;;  %v12813_v21 = vor.u32 %v17243_v9, %v12812_v8  ;;  %v17241_v26 = vld [vmem:[%s27355_s4 + $0xb94] sm:$0xf0]  ;;  %v16863_v9 = vld [vmem:[%s27356_s0 + $0xe4] sm:$0x30] }
  0xa5   :  { %3998 = vmatpush.bf16.msrb.mxu1 %v12725_v37  ;;  %3964 = vmatmul.bf16.vlgmr.msra.gmra.mxu2 %v19461_v55  ;;  %v12692_v37 = vld [vmem:[%s27355_s4 + $0xab0] sm:$0xf]  ;;  %v3728_v57 = vadd.f32 %v3727_v53, %v3714_v28  ;;  %v17191_v28 = vld [vmem:[%s27355_s4 + $0xa04] sm:$0xf0]  ;;  %v11268_v8 = vld [vmem:[%s27356_s0 + $0x58] sm:$0xf] }
  0xa6   :  { %4012 = vmatpush.bf16.msrb.mxu2 %v12789_v42  ;;  %3978 = vmatmul.bf16.vlgmr.msra.gmra.mxu3 %v19471_v60  ;;  %v12829_v42 = vor.u32 %v17247_v25, %v12828_v24  ;;  %v12693_v59 = vor.u32 %v17213_v45, %v12692_v37  ;;  %v12804_v24 = vld [vmem:[%s27355_s4 + $0xb90] sm:$0xf]  ;;  %v12732_v37 = vld [vmem:[%s27355_s4 + $0xb00] sm:$0xf] }
  0xa7   :  { %4026 = vmatpush.bf16.msrb.mxu3 %v12853_v50  ;;  %v12820_v50 = vld [vmem:[%s27355_s4 + $0xbb0] sm:$0xf]  ;;  %v12805_v53 = vor.u32 %v17241_v26, %v12804_v24  ;;  %v12972_v24 = vld [vmem:[%s27355_s4 + $0xce0] sm:$0xf] }
  0xa8   :  { %3985 = vmatpush.bf16.msrb.mxu0 %v12653_v61  ;;  %v12757_v61 = vor.u32 %v17229_v49, %v12756_v48  ;;  %v3741_v7 = vpop.f32.mrf.mxu2  ;;  %v12741_v48 = vor.u32 %v17225_v23, %v12740_v22  ;;  %v12796_v49 = vld [vmem:[%s27355_s4 + $0xb80] sm:$0xf]  ;;  %v17267_v23 = vld [vmem:[%s27355_s4 + $0xc64] sm:$0xf0] }
  0xa9   :  { %3999 = vmatpush.bf16.msrb.mxu1 %v12717_v0  ;;  %v12684_v0 = vld [vmem:[%s27355_s4 + $0xaa0] sm:$0xf]  ;;  %v3742_v11 = vadd.f32 %v3741_v7, %v3728_v57  ;;  %v3755_v25 = vpop.f32.mrf.mxu3  ;;  %v12980_v57 = vld [vmem:[%s27355_s4 + $0xcf0] sm:$0xf] }
  0xaa   :  { %4013 = vmatpush.bf16.msrb.mxu2 %v12781_v2  ;;  %v12821_v2 = vor.u32 %v17245_v52, %v12820_v50  ;;  %v17239_v50 = vld [vmem:[%s27355_s4 + $0xb84] sm:$0xf0]  ;;  %v12916_v52 = vld [vmem:[%s27355_s4 + $0xc70] sm:$0xf]  ;;  %v12908_v22 = vld [vmem:[%s27355_s4 + $0xc60] sm:$0xf] }
  0xab   :  { %4027 = vmatpush.bf16.msrb.mxu3 %v12845_v5  ;;  %v12748_v5 = vld [vmem:[%s27355_s4 + $0xb20] sm:$0xf] }
  0xac   :  { %3986 = vmatpush.bf16.msrb.mxu0 %v12645_v12  ;;  %v12621_v12 = vor.u32 %v17195_v63, %v12620_v62  ;;  %v12749_v16 = vor.u32 %v17227_v6, %v12748_v5  ;;  %v17301_v62 = vld [vmem:[%s27355_s4 + $0xd74] sm:$0xf0]  ;;  %v13108_v63 = vld [vmem:[%s27355_s4 + $0xdf0] sm:$0xf]  ;;  %v16862_v5 = vld [vmem:[%s27356_s0 + $0xdc] sm:$0x30]  ;;  %v12669_v6 = vor.u32 %v17207_v34, %v12668_v33  ;;  %v19701_v33 = vor.u32 %v16863_v9, %v11268_v8 }
  0xad   :  { %4000 = vmatpush.bf16.msrb.mxu1 %v12709_v14  ;;  %v12612_v14 = vld [vmem:[%s27355_s4 + $0xa10] sm:$0xf]  ;;  %v12892_v8 = vld [vmem:[%s27355_s4 + $0xc40] sm:$0xf]  ;;  %v17263_v9 = vld [vmem:[%s27355_s4 + $0xc44] sm:$0xf0] }
  0xae   :  { %4014 = vmatpush.bf16.msrb.mxu2 %v12773_v15  ;;  %v12685_v15 = vor.u32 %v17211_v3, %v12684_v0  ;;  %v11260_v3 = vld [vmem:[%s27356_s0 + $0x50] sm:$0xf] }
  0xaf   :  { %4028 = vmatpush.bf16.msrb.mxu3 %v12837_v20  ;;  %v17209_v20 = vld [vmem:[%s27355_s4 + $0xa94] sm:$0xf0]  ;;  %v19690_v26 = vor.u32 %v16862_v5, %v11260_v3 }
  0xb0   :  { %3987 = vmatpush.bf16.msrb.mxu0 %v12637_v27  ;;  %v12604_v27 = vld [vmem:[%s27355_s4 + $0xa00] sm:$0xf]  ;;  %v12677_v45 = vor.u32 %v17209_v20, %v12676_v19  ;;  %v19743_v5 = vpop.f32.mrf.mxu2 }
  0xb1   :  { %4001 = vmatpush.bf16.msrb.mxu1 %v12701_v29  ;;  %v19611_v29 = vadd.f32 %v3755_v25, %v3742_v11  ;;  %v12605_v0 = vor.u32 %v17191_v28, %v12604_v27  ;;  %v16844_v11 = vld [vmem:[%s27356_s0 + $0x54] sm:$0xf]  ;;  %v17283_v27 = vld [vmem:[%s27355_s4 + $0xce4] sm:$0xf0]  ;;  %v13036_v28 = vld [vmem:[%s27355_s4 + $0xd60] sm:$0xf] }
  0xb2   :  { %4015 = vmatpush.bf16.msrb.mxu2 %v12765_v30  ;;  %v12613_v30 = vor.u32 %v17193_v18, %v12612_v14  ;;  %v11270_v18 = vld [vmem:[%s27356_s0 + $0xe8] sm:$0x30] }
  0xb3   :  { %4029 = vmatpush.bf16.msrb.mxu3 %v12829_v42  ;;  %v17223_v42 = vld [vmem:[%s27355_s4 + $0xb04] sm:$0xf0] }
  0xb4   :  { %3988 = vmatpush.bf16.msrb.mxu0 %v12629_v54  ;;  %v17269_v54 = vld [vmem:[%s27355_s4 + $0xc74] sm:$0xf0]  ;;  %v12733_v7 = vor.u32 %v17223_v42, %v12732_v37  ;;  %v13100_v37 = vld [vmem:[%s27355_s4 + $0xde0] sm:$0xf]  ;;  %v17315_v42 = vld [vmem:[%s27355_s4 + $0xde4] sm:$0xf0] }
  0xb5   :  { %4002 = vmatpush.bf16.msrb.mxu1 %v12693_v59  ;;  %v17285_v59 = vld [vmem:[%s27355_s4 + $0xcf4] sm:$0xf0]  ;;  %v12917_v14 = vor.u32 %v17269_v54, %v12916_v52 }
  0xb6   :  { %4016 = vmatpush.bf16.msrb.mxu2 %v12757_v61  ;;  %v13044_v61 = vld [vmem:[%s27355_s4 + $0xd70] sm:$0xf]  ;;  %v12981_v19 = vor.u32 %v17285_v59, %v12980_v57  ;;  %v17265_v54 = vld [vmem:[%s27355_s4 + $0xc54] sm:$0xf0]  ;;  %v13101_v59 = vor.u32 %v17315_v42, %v13100_v37 }
  0xb7   :  { %4030 = vmatpush.bf16.msrb.mxu3 %v12821_v2  ;;  %v17317_v2 = vld [vmem:[%s27355_s4 + $0xdf4] sm:$0xf0]  ;;  %v13045_v20 = vor.u32 %v17301_v62, %v13044_v61  ;;  %v12964_v57 = vld [vmem:[%s27355_s4 + $0xcd0] sm:$0xf] }
  0xb8   :  { %3989 = vmatpush.bf16.msrb.mxu0 %v12621_v12  ;;  %v12797_v12 = vor.u32 %v17239_v50, %v12796_v49  ;;  %v13109_v25 = vor.u32 %v17317_v2, %v13108_v63  ;;  %v12909_v49 = vor.u32 %v17267_v23, %v12908_v22  ;;  %v12973_v50 = vor.u32 %v17283_v27, %v12972_v24  ;;  %v17281_v61 = vld [vmem:[%s27355_s4 + $0xcd4] sm:$0xf0]  ;;  %v13028_v62 = vld [vmem:[%s27355_s4 + $0xd50] sm:$0xf]  ;;  %v17311_v22 = vld [vmem:[%s27355_s4 + $0xdc4] sm:$0xf0] }
  0xb9   :  { %4003 = vmatpush.bf16.msrb.mxu1 %v12685_v15  ;;  %v11262_v15 = vld [vmem:[%s27356_s0 + $0xe0] sm:$0x30]  ;;  %v17297_v63 = vld [vmem:[%s27355_s4 + $0xd54] sm:$0xf0]  ;;  %v12893_v24 = vor.u32 %v17263_v9, %v12892_v8  ;;  %v12948_v42 = vld [vmem:[%s27355_s4 + $0xcb0] sm:$0xf] }
  0xba   :  { %4017 = vmatpush.bf16.msrb.mxu2 %v12749_v16  ;;  %v16845_v16 = vld [vmem:[%s27356_s0 + $0x5c] sm:$0xf]  ;;  %v19703_v34 = vor.u32 %v16844_v11, %v11262_v15  ;;  %v17313_v2 = vld [vmem:[%s27355_s4 + $0xdd4] sm:$0xf0]  ;;  %v12956_v11 = vld [vmem:[%s27355_s4 + $0xcc0] sm:$0xf] }
  0xbb   :  { %4031 = vmatpush.bf16.msrb.mxu3 %v12813_v21  ;;  %v19679_v21 = vpop.f32.mrf.mxu0  ;;  %v17279_v15 = vld [vmem:[%s27355_s4 + $0xcc4] sm:$0xf0]  ;;  %v17261_v37 = vld [vmem:[%s27355_s4 + $0xc34] sm:$0xf0]  ;;  %v13004_v8 = vld [vmem:[%s27355_s4 + $0xd20] sm:$0xf] }
  0xbc   :  { %3990 = vmatpush.bf16.msrb.mxu0 %v12613_v30  ;;  %v17299_v30 = vld [vmem:[%s27355_s4 + $0xd64] sm:$0xf0] }
  0xbd   :  { %4004 = vmatpush.bf16.msrb.mxu1 %v12677_v45  ;;  %v19711_v45 = vpop.f32.mrf.mxu1  ;;  %v13037_v52 = vor.u32 %v17299_v30, %v13036_v28  ;;  %v12884_v30 = vld [vmem:[%s27355_s4 + $0xc30] sm:$0xf]  ;;  %v17291_v9 = vld [vmem:[%s27355_s4 + $0xd24] sm:$0xf0] }
  0xbe   :  { %4018 = vmatpush.bf16.msrb.mxu2 %v12741_v48  ;;  %v19713_v48 = vor.u32 %v16845_v16, %v11270_v18  ;;  %v13020_v16 = vld [vmem:[%s27355_s4 + $0xd40] sm:$0xf]  ;;  %v17295_v18 = vld [vmem:[%s27355_s4 + $0xd44] sm:$0xf0] }
  0xbf   :  { %4032 = vmatpush.bf16.msrb.mxu3 %v12805_v53  ;;  %v12900_v53 = vld [vmem:[%s27355_s4 + $0xc50] sm:$0xf]  ;;  %v13021_v27 = vor.u32 %v17295_v18, %v13020_v16 }
  0xc0   :  { %3991 = vmatpush.bf16.msrb.mxu0 %v12605_v0  ;;  %v13092_v0 = vld [vmem:[%s27355_s4 + $0xdd0] sm:$0xf]  ;;  %v12901_v3 = vor.u32 %v17265_v54, %v12900_v53  ;;  %v17293_v53 = vld [vmem:[%s27355_s4 + $0xd34] sm:$0xf0] }
  0xc1   :  { %4005 = vmatpush.bf16.msrb.mxu1 %v12669_v6  ;;  %v12965_v6 = vor.u32 %v17281_v61, %v12964_v57  ;;  %v13076_v54 = vld [vmem:[%s27355_s4 + $0xdb0] sm:$0xf]  ;;  %v17309_v57 = vld [vmem:[%s27355_s4 + $0xdb4] sm:$0xf0] }
  0xc2   :  { %4019 = vmatpush.bf16.msrb.mxu2 %v12733_v7  ;;  %v13029_v7 = vor.u32 %v17297_v63, %v13028_v62  ;;  %v12876_v63 = vld [vmem:[%s27355_s4 + $0xc20] sm:$0xf] }
  0xc3   :  { %4033 = vmatpush.bf16.msrb.mxu3 %v12797_v12  ;;  %3992 = vmatmul.bf16.vlgmr.msrb.gmra.mxu0 %v19690_v26  ;;  %v13093_v12 = vor.u32 %v17313_v2, %v13092_v0  ;;  %v17259_v0 = vld [vmem:[%s27355_s4 + $0xc24] sm:$0xf0]  ;;  %v12940_v2 = vld [vmem:[%s27355_s4 + $0xca0] sm:$0xf] }
  0xc4   :  { %4040 = vmatpush.bf16.msra.mxu0 %v12917_v14  ;;  %4006 = vmatmul.bf16.vlgmr.msrb.gmra.mxu1 %v19703_v34  ;;  %v19754_v14 = vpop.f32.mrf.mxu3  ;;  %v12877_v18 = vor.u32 %v17259_v0, %v12876_v63  ;;  %v13052_v63 = vld [vmem:[%s27355_s4 + $0xd80] sm:$0xf]  ;;  %v17303_v0 = vld [vmem:[%s27355_s4 + $0xd84] sm:$0xf0] }
  0xc5   :  { %4054 = vmatpush.bf16.msra.mxu1 %v12981_v19  ;;  %4020 = vmatmul.bf16.vlgmr.msrb.gmra.mxu2 %v19701_v33  ;;  %v3769_v19 = vpop.f32.mrf.mxu0  ;;  %v3783_v28 = vpop.f32.mrf.mxu1 }
  0xc6   :  { %4068 = vmatpush.bf16.msra.mxu2 %v13045_v20  ;;  %4034 = vmatmul.bf16.vlgmr.msrb.gmra.mxu3 %v19713_v48  ;;  %v13084_v20 = vld [vmem:[%s27355_s4 + $0xdc0] sm:$0xf]  ;;  %v3770_v23 = vadd.f32 %v3769_v19, %v19611_v29  ;;  %v12868_v19 = vld [vmem:[%s27355_s4 + $0xc10] sm:$0xf] }
  0xc7   :  { %4082 = vmatpush.bf16.msra.mxu3 %v13109_v25  ;;  %v12957_v25 = vor.u32 %v17279_v15, %v12956_v11  ;;  %v13085_v29 = vor.u32 %v17311_v22, %v13084_v20  ;;  %v17307_v15 = vld [vmem:[%s27355_s4 + $0xda4] sm:$0xf0] }
  0xc8   :  { %4041 = vmatpush.bf16.msra.mxu0 %v12909_v49  ;;  %v3784_v49 = vadd.f32 %v3783_v28, %v3770_v23  ;;  %v13005_v23 = vor.u32 %v17291_v9, %v13004_v8  ;;  %v17349_v8 = vld [vmem:[%s27355_s4 + $0xef4] sm:$0xf0]  ;;  %v13300_v9 = vld [vmem:[%s27355_s4 + $0xf70] sm:$0xf] }
  0xc9   :  { %4055 = vmatpush.bf16.msra.mxu1 %v12973_v50  ;;  %v17277_v50 = vld [vmem:[%s27355_s4 + $0xcb4] sm:$0xf0] }
  0xca   :  { %4069 = vmatpush.bf16.msra.mxu2 %v13037_v52  ;;  %v13012_v52 = vld [vmem:[%s27355_s4 + $0xd30] sm:$0xf]  ;;  %v12949_v61 = vor.u32 %v17277_v50, %v12948_v42  ;;  %v17255_v50 = vld [vmem:[%s27355_s4 + $0xc04] sm:$0xf0] }
  0xcb   :  { %4083 = vmatpush.bf16.msra.mxu3 %v13101_v59  ;;  %v12885_v59 = vor.u32 %v17261_v37, %v12884_v30  ;;  %v13013_v62 = vor.u32 %v17293_v53, %v13012_v52  ;;  %v12996_v30 = vld [vmem:[%s27355_s4 + $0xd10] sm:$0xf]  ;;  %v17289_v37 = vld [vmem:[%s27355_s4 + $0xd14] sm:$0xf0]  ;;  %v12924_v53 = vld [vmem:[%s27355_s4 + $0xc80] sm:$0xf] }
  0xcc   :  { %4042 = vmatpush.bf16.msra.mxu0 %v12901_v3  ;;  %v13077_v3 = vor.u32 %v17309_v57, %v13076_v54  ;;  %v3811_v16 = vpop.f32.mrf.mxu3  ;;  %v13060_v42 = vld [vmem:[%s27355_s4 + $0xd90] sm:$0xf]  ;;  %v17271_v54 = vld [vmem:[%s27355_s4 + $0xc84] sm:$0xf0]  ;;  %v12988_v57 = vld [vmem:[%s27355_s4 + $0xd00] sm:$0xf] }
  0xcd   :  { %4056 = vmatpush.bf16.msra.mxu1 %v12965_v6  ;;  %v3797_v6 = vpop.f32.mrf.mxu2 }
  0xce   :  { %4070 = vmatpush.bf16.msra.mxu2 %v13029_v7  ;;  %v17275_v7 = vld [vmem:[%s27355_s4 + $0xca4] sm:$0xf0]  ;;  %v3798_v11 = vadd.f32 %v3797_v6, %v3784_v49  ;;  %v12860_v49 = vld [vmem:[%s27355_s4 + $0xc00] sm:$0xf]  ;;  %v17333_v6 = vld [vmem:[%s27355_s4 + $0xe74] sm:$0xf0] }
  0xcf   :  { %4084 = vmatpush.bf16.msra.mxu3 %v13093_v12  ;;  %v13068_v12 = vld [vmem:[%s27355_s4 + $0xda0] sm:$0xf]  ;;  %v12941_v22 = vor.u32 %v17275_v7, %v12940_v2  ;;  %v13172_v2 = vld [vmem:[%s27355_s4 + $0xe70] sm:$0xf] }
  0xd0   :  { %4043 = vmatpush.bf16.msra.mxu0 %v12893_v24  ;;  %v19823_v20 = vadd.f32 %v3811_v16, %v3798_v11  ;;  %v17257_v24 = vld [vmem:[%s27355_s4 + $0xc14] sm:$0xf0]  ;;  %v13069_v28 = vor.u32 %v17307_v15, %v13068_v12  ;;  %v13236_v7 = vld [vmem:[%s27355_s4 + $0xef0] sm:$0xf]  ;;  %v12861_v15 = vor.u32 %v17255_v50, %v12860_v49 }
  0xd1   :  { %4057 = vmatpush.bf16.msra.mxu1 %v12957_v25  ;;  %v12932_v25 = vld [vmem:[%s27355_s4 + $0xc90] sm:$0xf]  ;;  %v12869_v52 = vor.u32 %v17257_v24, %v12868_v19  ;;  %v17365_v11 = vld [vmem:[%s27355_s4 + $0xf74] sm:$0xf0]  ;;  %v11284_v24 = vld [vmem:[%s27356_s0 + $0x68] sm:$0xf]  ;;  %v13237_v49 = vor.u32 %v17349_v8, %v13236_v7  ;;  %v19950_v8 = vpop.f32.mrf.mxu1 }
  0xd2   :  { %4071 = vmatpush.bf16.msra.mxu2 %v13021_v27  ;;  %v17273_v27 = vld [vmem:[%s27355_s4 + $0xc94] sm:$0xf0]  ;;  %v13364_v12 = vld [vmem:[%s27355_s4 + $0xff0] sm:$0xf]  ;;  %v13301_v50 = vor.u32 %v17365_v11, %v13300_v9  ;;  %v17379_v7 = vld [vmem:[%s27355_s4 + $0xfe4] sm:$0xf0] }
  0xd3   :  { %4085 = vmatpush.bf16.msra.mxu3 %v13085_v29  ;;  %v17305_v29 = vld [vmem:[%s27355_s4 + $0xd94] sm:$0xf0]  ;;  %v16864_v19 = vld [vmem:[%s27356_s0 + $0xec] sm:$0x30] }
  0xd4   :  { %4044 = vmatpush.bf16.msra.mxu0 %v12885_v59  ;;  %v17287_v59 = vld [vmem:[%s27355_s4 + $0xd04] sm:$0xf0]  ;;  %v17381_v16 = vld [vmem:[%s27355_s4 + $0xff4] sm:$0xf0] }
  0xd5   :  { %4058 = vmatpush.bf16.msra.mxu1 %v12949_v61  ;;  %v12933_v61 = vor.u32 %v17273_v27, %v12932_v25  ;;  %v16865_v25 = vld [vmem:[%s27356_s0 + $0xf4] sm:$0x30]  ;;  %v16846_v27 = vld [vmem:[%s27356_s0 + $0x64] sm:$0xf] }
  0xd6   :  { %4072 = vmatpush.bf16.msra.mxu2 %v13013_v62  ;;  %v12997_v62 = vor.u32 %v17289_v37, %v12996_v30  ;;  %v13173_v30 = vor.u32 %v17333_v6, %v13172_v2  ;;  %v11278_v37 = vld [vmem:[%s27356_s0 + $0xf0] sm:$0x30]  ;;  %v19940_v2 = vor.u32 %v16865_v25, %v11284_v24  ;;  %v13356_v6 = vld [vmem:[%s27355_s4 + $0xfe0] sm:$0xf]  ;;  %v13284_v24 = vld [vmem:[%s27355_s4 + $0xf50] sm:$0xf] }
  0xd7   :  { %4086 = vmatpush.bf16.msra.mxu3 %v13077_v3  ;;  %v13061_v3 = vor.u32 %v17305_v29, %v13060_v42  ;;  %v16847_v42 = vld [vmem:[%s27356_s0 + $0x6c] sm:$0xf]  ;;  %v11286_v29 = vld [vmem:[%s27356_s0 + $0xf8] sm:$0x30]  ;;  %v17361_v25 = vld [vmem:[%s27355_s4 + $0xf54] sm:$0xf0] }
  0xd8   :  { %4045 = vmatpush.bf16.msra.mxu0 %v12877_v18  ;;  %v11276_v18 = vld [vmem:[%s27356_s0 + $0x60] sm:$0xf]  ;;  %27374 = vst [vmem:[#allocation3_spill] sm:$0xff] %v19940_v2  ;;  %v19952_v9 = vor.u32 %v16847_v42, %v11286_v29  ;;  %v13285_v42 = vor.u32 %v17361_v25, %v13284_v24  ;;  %v17341_v25 = vld [vmem:[%s27355_s4 + $0xeb4] sm:$0xf0] }
  0xd9   :  { %4059 = vmatpush.bf16.msra.mxu1 %v12941_v22  ;;  %v12925_v22 = vor.u32 %v17271_v54, %v12924_v53  ;;  %v17331_v53 = vld [vmem:[%s27355_s4 + $0xe64] sm:$0xf0]  ;;  %v13228_v54 = vld [vmem:[%s27355_s4 + $0xee0] sm:$0xf] }
  0xda   :  { %4073 = vmatpush.bf16.msra.mxu2 %v13005_v23  ;;  %v12989_v23 = vor.u32 %v17287_v59, %v12988_v57  ;;  %v13365_v57 = vor.u32 %v17381_v16, %v13364_v12  ;;  %v19927_v59 = vor.u32 %v16864_v19, %v11276_v18  ;;  %27376 = vst [vmem:[#allocation5_spill] sm:$0xff] %v19952_v9  ;;  %v13156_v16 = vld [vmem:[%s27355_s4 + $0xe50] sm:$0xf]  ;;  %v17329_v18 = vld [vmem:[%s27355_s4 + $0xe54] sm:$0xf0] }
  0xdb   :  { %4087 = vmatpush.bf16.msra.mxu3 %v13069_v28  ;;  %v13053_v28 = vor.u32 %v17303_v0, %v13052_v63  ;;  %v17363_v63 = vld [vmem:[%s27355_s4 + $0xf64] sm:$0xf0]  ;;  %v19938_v0 = vpop.f32.mrf.mxu0  ;;  %v13220_v19 = vld [vmem:[%s27355_s4 + $0xed0] sm:$0xf]  ;;  %v13148_v29 = vld [vmem:[%s27355_s4 + $0xe40] sm:$0xf] }
  0xdc   :  { %4046 = vmatpush.bf16.msra.mxu0 %v12869_v52  ;;  %v13164_v52 = vld [vmem:[%s27355_s4 + $0xe60] sm:$0xf]  ;;  %27373 = vst [vmem:[#allocation2_spill] sm:$0xff] %v19927_v59 }
  0xdd   :  { %4060 = vmatpush.bf16.msra.mxu1 %v12933_v61  ;;  %v17347_v61 = vld [vmem:[%s27355_s4 + $0xee4] sm:$0xf0]  ;;  %v13165_v11 = vor.u32 %v17331_v53, %v13164_v52  ;;  %v19991_v52 = vpop.f32.mrf.mxu2 }
  0xde   :  { %4074 = vmatpush.bf16.msra.mxu2 %v12997_v62  ;;  %v13292_v62 = vld [vmem:[%s27355_s4 + $0xf60] sm:$0xf]  ;;  %v13229_v12 = vor.u32 %v17347_v61, %v13228_v54  ;;  %v17343_v54 = vld [vmem:[%s27355_s4 + $0xec4] sm:$0xf0] }
  0xdf   :  { %4088 = vmatpush.bf16.msra.mxu3 %v13061_v3  ;;  %v19942_v3 = vor.u32 %v16846_v27, %v11278_v37  ;;  %v13348_v27 = vld [vmem:[%s27355_s4 + $0xfd0] sm:$0xf]  ;;  %v17359_v61 = vld [vmem:[%s27355_s4 + $0xf44] sm:$0xf0] }
  0xe0   :  { %4047 = vmatpush.bf16.msra.mxu0 %v12861_v15  ;;  %v13293_v15 = vor.u32 %v17363_v63, %v13292_v62  ;;  %v20002_v62 = vpop.f32.mrf.mxu3 }
  0xe1   :  { %4061 = vmatpush.bf16.msra.mxu1 %v12925_v22  ;;  %27375 = vst [vmem:[#allocation4_spill] sm:$0xff] %v19942_v3  ;;  %v13357_v22 = vor.u32 %v17379_v7, %v13356_v6  ;;  %v13340_v6 = vld [vmem:[%s27355_s4 + $0xfc0] sm:$0xf]  ;;  %v17375_v7 = vld [vmem:[%s27355_s4 + $0xfc4] sm:$0xf0] }
  0xe2   :  { %4075 = vmatpush.bf16.msra.mxu2 %v12989_v23  ;;  %v17345_v23 = vld [vmem:[%s27355_s4 + $0xed4] sm:$0xf0] }
  0xe3   :  { %4089 = vmatpush.bf16.msra.mxu3 %v13053_v28  ;;  %4048 = vmatmul.bf16.vlgmr.msra.gmra.mxu0 %v19927_v59  ;;  %v17377_v28 = vld [vmem:[%s27355_s4 + $0xfd4] sm:$0xf0]  ;;  %v13221_v37 = vor.u32 %v17345_v23, %v13220_v19  ;;  %v3825_v63 = vpop.f32.mrf.mxu0  ;;  %v13140_v19 = vld [vmem:[%s27355_s4 + $0xe30] sm:$0xf] }
  0xe4   :  { %4096 = vmatpush.bf16.msrb.mxu0 %v13173_v30  ;;  %4062 = vmatmul.bf16.vlgmr.msra.gmra.mxu1 %v19942_v3  ;;  %v13157_v30 = vor.u32 %v17329_v18, %v13156_v16  ;;  %v13349_v53 = vor.u32 %v17377_v28, %v13348_v27  ;;  %v13204_v23 = vld [vmem:[%s27355_s4 + $0xeb0] sm:$0xf]  ;;  %v17357_v28 = vld [vmem:[%s27355_s4 + $0xf34] sm:$0xf0] }
  0xe5   :  { %4110 = vmatpush.bf16.msrb.mxu1 %v13237_v49  ;;  %4076 = vmatmul.bf16.vlgmr.msra.gmra.mxu2 %v19940_v2  ;;  %v17327_v49 = vld [vmem:[%s27355_s4 + $0xe44] sm:$0xf0]  ;;  %v13268_v27 = vld [vmem:[%s27355_s4 + $0xf30] sm:$0xf] }
  0xe6   :  { %4124 = vmatpush.bf16.msrb.mxu2 %v13301_v50  ;;  %4090 = vmatmul.bf16.vlgmr.msra.gmra.mxu3 %v19952_v9  ;;  %v13212_v50 = vld [vmem:[%s27355_s4 + $0xec0] sm:$0xf] }
  0xe7   :  { %4138 = vmatpush.bf16.msrb.mxu3 %v13365_v57  ;;  %v13276_v57 = vld [vmem:[%s27355_s4 + $0xf40] sm:$0xf]  ;;  %v13213_v16 = vor.u32 %v17343_v54, %v13212_v50 }
  0xe8   :  { %4097 = vmatpush.bf16.msrb.mxu0 %v13165_v11  ;;  %v3826_v11 = vadd.f32 %v3825_v63, %v19823_v20  ;;  %v13277_v18 = vor.u32 %v17359_v61, %v13276_v57  ;;  %v13341_v20 = vor.u32 %v17375_v7, %v13340_v6  ;;  %v13132_v50 = vld [vmem:[%s27355_s4 + $0xe20] sm:$0xf]  ;;  %v3853_v61 = vpop.f32.mrf.mxu2  ;;  %v17339_v63 = vld [vmem:[%s27355_s4 + $0xea4] sm:$0xf0] }
  0xe9   :  { %4111 = vmatpush.bf16.msrb.mxu1 %v13229_v12  ;;  %v13149_v12 = vor.u32 %v17327_v49, %v13148_v29  ;;  %v13205_v29 = vor.u32 %v17341_v25, %v13204_v23  ;;  %v13269_v49 = vor.u32 %v17357_v28, %v13268_v27  ;;  %v13196_v54 = vld [vmem:[%s27355_s4 + $0xea0] sm:$0xf]  ;;  %v17355_v7 = vld [vmem:[%s27355_s4 + $0xf24] sm:$0xf0]  ;;  %v13188_v25 = vld [vmem:[%s27355_s4 + $0xe90] sm:$0xf] }
  0xea   :  { %4125 = vmatpush.bf16.msrb.mxu2 %v13293_v15  ;;  %v3839_v15 = vpop.f32.mrf.mxu1  ;;  %v13260_v6 = vld [vmem:[%s27355_s4 + $0xf20] sm:$0xf]  ;;  %v13197_v23 = vor.u32 %v17339_v63, %v13196_v54  ;;  %v17337_v27 = vld [vmem:[%s27355_s4 + $0xe94] sm:$0xf0]  ;;  %v17351_v63 = vld [vmem:[%s27355_s4 + $0xf04] sm:$0xf0] }
  0xeb   :  { %4139 = vmatpush.bf16.msrb.mxu3 %v13357_v22  ;;  %v17325_v22 = vld [vmem:[%s27355_s4 + $0xe34] sm:$0xf0]  ;;  %v3840_v24 = vadd.f32 %v3839_v15, %v3826_v11  ;;  %v13324_v15 = vld [vmem:[%s27355_s4 + $0xfa0] sm:$0xf] }
  0xec   :  { %4098 = vmatpush.bf16.msrb.mxu0 %v13157_v30  ;;  %v13332_v30 = vld [vmem:[%s27355_s4 + $0xfb0] sm:$0xf]  ;;  %v13180_v54 = vld [vmem:[%s27355_s4 + $0xe80] sm:$0xf] }
  0xed   :  { %4112 = vmatpush.bf16.msrb.mxu1 %v13221_v37  ;;  %v17373_v37 = vld [vmem:[%s27355_s4 + $0xfb4] sm:$0xf0]  ;;  %v3854_v11 = vadd.f32 %v3853_v61, %v3840_v24  ;;  %v13244_v61 = vld [vmem:[%s27355_s4 + $0xf00] sm:$0xf] }
  0xee   :  { %4126 = vmatpush.bf16.msrb.mxu2 %v13285_v42  ;;  %v13141_v42 = vor.u32 %v17325_v22, %v13140_v19  ;;  %v13333_v57 = vor.u32 %v17373_v37, %v13332_v30  ;;  %v13124_v19 = vld [vmem:[%s27355_s4 + $0xe10] sm:$0xf]  ;;  %v17321_v24 = vld [vmem:[%s27355_s4 + $0xe14] sm:$0xf0] }
  0xef   :  { %4140 = vmatpush.bf16.msrb.mxu3 %v13349_v53  ;;  %v17323_v53 = vld [vmem:[%s27355_s4 + $0xe24] sm:$0xf0]  ;;  %v13252_v30 = vld [vmem:[%s27355_s4 + $0xf10] sm:$0xf]  ;;  %v17353_v37 = vld [vmem:[%s27355_s4 + $0xf14] sm:$0xf0] }
  0xf0   :  { %4099 = vmatpush.bf16.msrb.mxu0 %v13149_v12  ;;  %v3867_v12 = vpop.f32.mrf.mxu3 }
  0xf1   :  { %4113 = vmatpush.bf16.msrb.mxu1 %v13213_v16  ;;  %v17371_v16 = vld [vmem:[%s27355_s4 + $0xfa4] sm:$0xf0]  ;;  %v20062_v22 = vadd.f32 %v3867_v12, %v3854_v11  ;;  %v13308_v11 = vld [vmem:[%s27355_s4 + $0xf80] sm:$0xf] }
  0xf2   :  { %4127 = vmatpush.bf16.msrb.mxu2 %v13277_v18  ;;  %v13133_v18 = vor.u32 %v17323_v53, %v13132_v50  ;;  %v13325_v28 = vor.u32 %v17371_v16, %v13324_v15  ;;  %v17319_v50 = vld [vmem:[%s27355_s4 + $0xe04] sm:$0xf0]  ;;  %v13125_v53 = vor.u32 %v17321_v24, %v13124_v19  ;;  %v13428_v15 = vld [vmem:[%s27355_s4 + $0x1070] sm:$0xf]  ;;  %v17429_v24 = vld [vmem:[%s27355_s4 + $0x1174] sm:$0xf0] }
  0xf3   :  { %4141 = vmatpush.bf16.msrb.mxu3 %v13341_v20  ;;  %v13261_v20 = vor.u32 %v17355_v7, %v13260_v6  ;;  %v13189_v6 = vor.u32 %v17337_v27, %v13188_v25  ;;  %v13253_v7 = vor.u32 %v17353_v37, %v13252_v30  ;;  %v17367_v12 = vld [vmem:[%s27355_s4 + $0xf84] sm:$0xf0]  ;;  %v13492_v19 = vld [vmem:[%s27355_s4 + $0x10f0] sm:$0xf]  ;;  %v16866_v37 = vld [vmem:[%s27356_s0 + $0xfc] sm:$0x30] }
  0xf4   :  { %4100 = vmatpush.bf16.msrb.mxu0 %v13141_v42  ;;  %v13316_v42 = vld [vmem:[%s27355_s4 + $0xf90] sm:$0xf]  ;;  %v13309_v13 = vor.u32 %v17367_v12, %v13308_v11  ;;  %v17395_v11 = vld [vmem:[%s27355_s4 + $0x1064] sm:$0xf0]  ;;  %v13484_v12 = vld [vmem:[%s27355_s4 + $0x10e0] sm:$0xf] }
  0xf5   :  { %4114 = vmatpush.bf16.msrb.mxu1 %v13205_v29  ;;  %v17369_v29 = vld [vmem:[%s27355_s4 + $0xf94] sm:$0xf0]  ;;  %v13620_v25 = vld [vmem:[%s27355_s4 + $0x11f0] sm:$0xf] }
  0xf6   :  { %4128 = vmatpush.bf16.msrb.mxu2 %v13269_v49  ;;  %v13116_v49 = vld [vmem:[%s27355_s4 + $0xe00] sm:$0xf]  ;;  %v13317_v16 = vor.u32 %v17369_v29, %v13316_v42  ;;  %v11292_v30 = vld [vmem:[%s27356_s0 + $0x70] sm:$0xf]  ;;  %v13245_v29 = vor.u32 %v17351_v63, %v13244_v61  ;;  %v11302_v61 = vld [vmem:[%s27356_s0 + $0x108] sm:$0x30] }
  0xf7   :  { %4142 = vmatpush.bf16.msrb.mxu3 %v13333_v57  ;;  %v17335_v57 = vld [vmem:[%s27355_s4 + $0xe84] sm:$0xf0]  ;;  %v13117_v27 = vor.u32 %v17319_v50, %v13116_v49  ;;  %v11300_v49 = vld [vmem:[%s27356_s0 + $0x78] sm:$0xf] }
  0xf8   :  { %4101 = vmatpush.bf16.msrb.mxu0 %v13133_v18  ;;  %v17397_v18 = vld [vmem:[%s27355_s4 + $0x1074] sm:$0xf0]  ;;  %v13181_v42 = vor.u32 %v17335_v57, %v13180_v54  ;;  %v16867_v50 = vld [vmem:[%s27356_s0 + $0x104] sm:$0x30]  ;;  %v11294_v54 = vld [vmem:[%s27356_s0 + $0x100] sm:$0x30] }
  0xf9   :  { %4115 = vmatpush.bf16.msrb.mxu1 %v13197_v23  ;;  %v17413_v23 = vld [vmem:[%s27355_s4 + $0x10f4] sm:$0xf0]  ;;  %v13429_v9 = vor.u32 %v17397_v18, %v13428_v15  ;;  %v16849_v57 = vld [vmem:[%s27356_s0 + $0x7c] sm:$0xf]  ;;  %v17411_v18 = vld [vmem:[%s27355_s4 + $0x10e4] sm:$0xf0] }
  0xfa   :  { %4129 = vmatpush.bf16.msrb.mxu2 %v13261_v20  ;;  %v13556_v20 = vld [vmem:[%s27355_s4 + $0x1170] sm:$0xf]  ;;  %v13493_v63 = vor.u32 %v17413_v23, %v13492_v19  ;;  %v13548_v19 = vld [vmem:[%s27355_s4 + $0x1160] sm:$0xf]  ;;  %v17427_v23 = vld [vmem:[%s27355_s4 + $0x1164] sm:$0xf0] }
  0xfb   :  { %4143 = vmatpush.bf16.msrb.mxu3 %v13325_v28  ;;  %v17445_v28 = vld [vmem:[%s27355_s4 + $0x11f4] sm:$0xf0] }
  0xfc   :  { %4102 = vmatpush.bf16.msrb.mxu0 %v13125_v53  ;;  %v16848_v53 = vld [vmem:[%s27356_s0 + $0x74] sm:$0xf]  ;;  %v13621_v15 = vor.u32 %v17445_v28, %v13620_v25  ;;  %v17443_v28 = vld [vmem:[%s27355_s4 + $0x11e4] sm:$0xf0] }
  0xfd   :  { %4116 = vmatpush.bf16.msrb.mxu1 %v13189_v6  ;;  %v13557_v6 = vor.u32 %v17429_v24, %v13556_v20  ;;  %v20177_v20 = vpop.f32.mrf.mxu0  ;;  %v20179_v24 = vor.u32 %v16867_v50, %v11300_v49  ;;  %v20181_v25 = vor.u32 %v16848_v53, %v11294_v54  ;;  %v13549_v49 = vor.u32 %v17427_v23, %v13548_v19  ;;  %v13412_v50 = vld [vmem:[%s27355_s4 + $0x1050] sm:$0xf]  ;;  %v17393_v53 = vld [vmem:[%s27355_s4 + $0x1054] sm:$0xf0]  ;;  %v13468_v19 = vld [vmem:[%s27355_s4 + $0x10c0] sm:$0xf]  ;;  %v20230_v23 = vpop.f32.mrf.mxu2 }
  0xfe   :  { %4130 = vmatpush.bf16.msrb.mxu2 %v13253_v7  ;;  %v13420_v7 = vld [vmem:[%s27355_s4 + $0x1060] sm:$0xf]  ;;  %v17409_v54 = vld [vmem:[%s27355_s4 + $0x10d4] sm:$0xf0] }
  0xff   :  { %4144 = vmatpush.bf16.msrb.mxu3 %v13317_v16  ;;  %v20166_v16 = vor.u32 %v16866_v37, %v11292_v30  ;;  %27378 = vst [vmem:[#allocation7_spill] sm:$0xff] %v20179_v24  ;;  %v20189_v30 = vpop.f32.mrf.mxu1  ;;  %v20191_v37 = vor.u32 %v16849_v57, %v11302_v61  ;;  %v13540_v57 = vld [vmem:[%s27355_s4 + $0x1150] sm:$0xf]  ;;  %v17425_v61 = vld [vmem:[%s27355_s4 + $0x1154] sm:$0xf0] }
 0x100   :  { %4103 = vmatpush.bf16.msrb.mxu0 %v13117_v27  ;;  %27379 = vst [vmem:[#allocation8_spill] sm:$0xff] %v20181_v25  ;;  %v13612_v27 = vld [vmem:[%s27355_s4 + $0x11e0] sm:$0xf] }
 0x101   :  { %27377 = vst [vmem:[#allocation6_spill] sm:$0xff] %v20166_v16  ;;  %4117 = vmatpush.bf16.msrb.mxu1 %v13181_v42  ;;  %v13421_v42 = vor.u32 %v17395_v11, %v13420_v7  ;;  %v13413_v7 = vor.u32 %v17393_v53, %v13412_v50  ;;  %v13596_v53 = vld [vmem:[%s27355_s4 + $0x11c0] sm:$0xf] }
 0x102   :  { %4131 = vmatpush.bf16.msrb.mxu2 %v13245_v29  ;;  %27380 = vst [vmem:[#allocation9_spill] sm:$0xff] %v20191_v37  ;;  %v13485_v29 = vor.u32 %v17411_v18, %v13484_v12  ;;  %v13541_v12 = vor.u32 %v17425_v61, %v13540_v57  ;;  %v17391_v18 = vld [vmem:[%s27355_s4 + $0x1044] sm:$0xf0] }
 0x103   :  { %4145 = vmatpush.bf16.msrb.mxu3 %v13309_v13  ;;  %v13476_v13 = vld [vmem:[%s27355_s4 + $0x10d0] sm:$0xf]  ;;  %4104 = vmatmul.bf16.vlgmr.msrb.gmra.mxu0 %v20166_v16 }
 0x104   :  { %4152 = vmatpush.bf16.msra.mxu0 %v13429_v9  ;;  %v13613_v9 = vor.u32 %v17443_v28, %v13612_v27  ;;  %4118 = vmatmul.bf16.vlgmr.msrb.gmra.mxu1 %v20181_v25  ;;  %v13477_v11 = vor.u32 %v17409_v54, %v13476_v13  ;;  %v17407_v28 = vld [vmem:[%s27355_s4 + $0x10c4] sm:$0xf0]  ;;  %v16884_v25 = vld [vmem:[%s27355_s4 + $0x74] sm:$0xf]  ;;  %v16868_v16 = vld [vmem:[%s27356_s0 + $0x10c] sm:$0x30] }
 0x105   :  { %4166 = vmatpush.bf16.msra.mxu1 %v13493_v63  ;;  %4132 = vmatmul.bf16.vlgmr.msrb.gmra.mxu2 %v20179_v24  ;;  %v13604_v63 = vld [vmem:[%s27355_s4 + $0x11d0] sm:$0xf]  ;;  %v3881_v50 = vpop.f32.mrf.mxu0  ;;  %v17439_v13 = vld [vmem:[%s27355_s4 + $0x11c4] sm:$0xf0]  ;;  %v13469_v61 = vor.u32 %v17407_v28, %v13468_v19 }
 0x106   :  { %4180 = vmatpush.bf16.msra.mxu2 %v13557_v6  ;;  %v17441_v6 = vld [vmem:[%s27355_s4 + $0x11d4] sm:$0xf0]  ;;  %4146 = vmatmul.bf16.vlgmr.msrb.gmra.mxu3 %v20191_v37  ;;  %v13588_v19 = vld [vmem:[%s27355_s4 + $0x11b0] sm:$0xf] }
 0x107   :  { %4194 = vmatpush.bf16.msra.mxu3 %v13621_v15  ;;  %v13404_v15 = vld [vmem:[%s27355_s4 + $0x1040] sm:$0xf]  ;;  %v13605_v27 = vor.u32 %v17441_v6, %v13604_v63  ;;  %v3895_v57 = vpop.f32.mrf.mxu1  ;;  %v13396_v6 = vld [vmem:[%s27355_s4 + $0x1030] sm:$0xf]  ;;  %v17389_v37 = vld [vmem:[%s27355_s4 + $0x1034] sm:$0xf0] }
 0x108   :  { %4153 = vmatpush.bf16.msra.mxu0 %v13421_v42  ;;  %v13532_v42 = vld [vmem:[%s27355_s4 + $0x1140] sm:$0xf]  ;;  %v13405_v54 = vor.u32 %v17391_v18, %v13404_v15  ;;  %v17421_v18 = vld [vmem:[%s27355_s4 + $0x1134] sm:$0xf0]  ;;  %v13397_v28 = vor.u32 %v17389_v37, %v13396_v6  ;;  %v17403_v37 = vld [vmem:[%s27355_s4 + $0x10a4] sm:$0xf0] }
 0x109   :  { %4167 = vmatpush.bf16.msra.mxu1 %v13485_v29  ;;  %v17423_v29 = vld [vmem:[%s27355_s4 + $0x1144] sm:$0xf0] }
 0x10a   :  { %4181 = vmatpush.bf16.msra.mxu2 %v13549_v49  ;;  %v20241_v49 = vpop.f32.mrf.mxu3  ;;  %v13533_v63 = vor.u32 %v17423_v29, %v13532_v42 }
 0x10b   :  { %4195 = vmatpush.bf16.msra.mxu3 %v13613_v9  ;;  %v3882_v9 = vadd.f32 %v3881_v50, %v20062_v22  ;;  %v13597_v22 = vor.u32 %v17439_v13, %v13596_v53  ;;  %v13388_v50 = vld [vmem:[%s27355_s4 + $0x1020] sm:$0xf]  ;;  %v17387_v53 = vld [vmem:[%s27355_s4 + $0x1024] sm:$0xf0] }
 0x10c   :  { %4154 = vmatpush.bf16.msra.mxu0 %v13413_v7  ;;  %v13460_v7 = vld [vmem:[%s27355_s4 + $0x10b0] sm:$0xf]  ;;  %v13452_v13 = vld [vmem:[%s27355_s4 + $0x10a0] sm:$0xf] }
 0x10d   :  { %4168 = vmatpush.bf16.msra.mxu1 %v13477_v11  ;;  %v3896_v15 = vadd.f32 %v3895_v57, %v3882_v9  ;;  %v17405_v11 = vld [vmem:[%s27355_s4 + $0x10b4] sm:$0xf0]  ;;  %v13516_v57 = vld [vmem:[%s27355_s4 + $0x1120] sm:$0xf] }
 0x10e   :  { %4182 = vmatpush.bf16.msra.mxu2 %v13541_v12  ;;  %v13524_v12 = vld [vmem:[%s27355_s4 + $0x1130] sm:$0xf]  ;;  %v13461_v42 = vor.u32 %v17405_v11, %v13460_v7  ;;  %v13580_v7 = vld [vmem:[%s27355_s4 + $0x11a0] sm:$0xf]  ;;  %v13389_v11 = vor.u32 %v17387_v53, %v13388_v50 }
 0x10f   :  { %4196 = vmatpush.bf16.msra.mxu3 %v13605_v27  ;;  %v17437_v27 = vld [vmem:[%s27355_s4 + $0x11b4] sm:$0xf0]  ;;  %v13525_v29 = vor.u32 %v17421_v18, %v13524_v12  ;;  %v13380_v12 = vld [vmem:[%s27355_s4 + $0x1010] sm:$0xf] }
 0x110   :  { %4155 = vmatpush.bf16.msra.mxu0 %v13405_v54  ;;  %v13589_v9 = vor.u32 %v17437_v27, %v13588_v19  ;;  %v3909_v54 = vpop.f32.mrf.mxu2  ;;  %v17385_v27 = vld [vmem:[%s27355_s4 + $0x1014] sm:$0xf0]  ;;  %v13572_v53 = vld [vmem:[%s27355_s4 + $0x1190] sm:$0xf] }
 0x111   :  { %4169 = vmatpush.bf16.msra.mxu1 %v13469_v61  ;;  %v17419_v61 = vld [vmem:[%s27355_s4 + $0x1124] sm:$0xf0] }
 0x112   :  { %4183 = vmatpush.bf16.msra.mxu2 %v13533_v63  ;;  %v3910_v63 = vadd.f32 %v3909_v54, %v3896_v15  ;;  %v3923_v6 = vpop.f32.mrf.mxu3  ;;  %v13453_v15 = vor.u32 %v17403_v37, %v13452_v13  ;;  %v13517_v19 = vor.u32 %v17419_v61, %v13516_v57  ;;  %v13444_v54 = vld [vmem:[%s27355_s4 + $0x1090] sm:$0xf]  ;;  %v17433_v13 = vld [vmem:[%s27355_s4 + $0x1194] sm:$0xf0]  ;;  %v17383_v37 = vld [vmem:[%s27355_s4 + $0x1004] sm:$0xf0]  ;;  %v13381_v57 = vor.u32 %v17385_v27, %v13380_v12 }
 0x113   :  { %4197 = vmatpush.bf16.msra.mxu3 %v13597_v22  ;;  %v17435_v22 = vld [vmem:[%s27355_s4 + $0x11a4] sm:$0xf0]  ;;  %v13436_v61 = vld [vmem:[%s27355_s4 + $0x1080] sm:$0xf]  ;;  %v13573_v24 = vor.u32 %v17433_v13, %v13572_v53  ;;  %v11574_v53 = vld [vmem:[%s27355_s4 + $0x1f8] sm:$0xf0] }
 0x114   :  { %4156 = vmatpush.bf16.msra.mxu0 %v13397_v28  ;;  %v20301_v18 = vadd.f32 %v3923_v6, %v3910_v63  ;;  %v17401_v28 = vld [vmem:[%s27355_s4 + $0x1094] sm:$0xf0]  ;;  %v13581_v50 = vor.u32 %v17435_v22, %v13580_v7  ;;  %v17399_v63 = vld [vmem:[%s27355_s4 + $0x1084] sm:$0xf0]  ;;  %v13500_v6 = vld [vmem:[%s27355_s4 + $0x1100] sm:$0xf] }
 0x115   :  { %4170 = vmatpush.bf16.msra.mxu1 %v13461_v42  ;;  %v13508_v42 = vld [vmem:[%s27355_s4 + $0x1110] sm:$0xf]  ;;  %v17415_v7 = vld [vmem:[%s27355_s4 + $0x1104] sm:$0xf0]  ;;  %v13445_v22 = vor.u32 %v17401_v28, %v13444_v54  ;;  %v13564_v12 = vld [vmem:[%s27355_s4 + $0x1180] sm:$0xf] }
 0x116   :  { %4184 = vmatpush.bf16.msra.mxu2 %v13525_v29  ;;  %27381 = vst [vmem:[#allocation10_spill] sm:$0xff] %v20301_v18  ;;  %v17417_v29 = vld [vmem:[%s27355_s4 + $0x1114] sm:$0xf0]  ;;  %v17431_v27 = vld [vmem:[%s27355_s4 + $0x1184] sm:$0xf0]  ;;  %v13437_v18 = vor.u32 %v17399_v63, %v13436_v61  ;;  %v13501_v3 = vor.u32 %v17415_v7, %v13500_v6 }
 0x117   :  { %4198 = vmatpush.bf16.msra.mxu3 %v13589_v9  ;;  %v13372_v9 = vld [vmem:[%s27355_s4 + $0x1000] sm:$0xf]  ;;  %v11446_v54 = vld [vmem:[%s27355_s4 + $0xf8] sm:$0xf0]  ;;  %v16916_v28 = vld [vmem:[%s27355_s4 + $0x174] sm:$0xf]  ;;  %v13565_v2 = vor.u32 %v17431_v27, %v13564_v12 }
 0x118   :  { %4157 = vmatpush.bf16.msra.mxu0 %v13389_v11  ;;  %v13509_v11 = vor.u32 %v17417_v29, %v13508_v42  ;;  %v16932_v42 = vld [vmem:[%s27355_s4 + $0x1f4] sm:$0xf]  ;;  %v13373_v29 = vor.u32 %v17383_v37, %v13372_v9  ;;  %v11308_v13 = vld [vmem:[%s27356_s0 + $0x80] sm:$0xf]  ;;  %v11316_v9 = vld [vmem:[%s27356_s0 + $0x88] sm:$0xf] }
 0x119   :  { %4171 = vmatpush.bf16.msra.mxu1 %v13453_v15  ;;  %v11382_v15 = vld [vmem:[%s27355_s4 + $0x78] sm:$0xf0]  ;;  %v16869_v37 = vld [vmem:[%s27356_s0 + $0x114] sm:$0x30]  ;;  %v11310_v61 = vld [vmem:[%s27356_s0 + $0x110] sm:$0x30]  ;;  %v11577_v12 = vor.u32 %v16932_v42, %v11574_v53  ;;  %v20405_v27 = vor.u32 %v16868_v16, %v11308_v13 }
 0x11a   :  { %4185 = vmatpush.bf16.msra.mxu2 %v13517_v19  ;;  %v16900_v19 = vld [vmem:[%s27355_s4 + $0xf4] sm:$0xf]  ;;  %v11385_v59 = vor.u32 %v16884_v25, %v11382_v15  ;;  %v16851_v63 = vld [vmem:[%s27356_s0 + $0x8c] sm:$0xf]  ;;  %v11318_v6 = vld [vmem:[%s27356_s0 + $0x118] sm:$0x30] }
 0x11b   :  { %4199 = vmatpush.bf16.msra.mxu3 %v13581_v50  ;;  %v11510_v50 = vld [vmem:[%s27355_s4 + $0x178] sm:$0xf0]  ;;  %v11449_v7 = vor.u32 %v16900_v19, %v11446_v54  ;;  %v11374_v25 = vld [vmem:[%s27355_s4 + $0x68] sm:$0xf0]  ;;  %v16914_v19 = vld [vmem:[%s27355_s4 + $0x164] sm:$0xf] }
 0x11c   :  { %4158 = vmatpush.bf16.msra.mxu0 %v13381_v57  ;;  %v16850_v57 = vld [vmem:[%s27356_s0 + $0x84] sm:$0xf]  ;;  %v11438_v15 = vld [vmem:[%s27355_s4 + $0xe8] sm:$0xf0]  ;;  %v16880_v13 = vld [vmem:[%s27355_s4 + $0x54] sm:$0xf] }
 0x11d   :  { %4172 = vmatpush.bf16.msra.mxu1 %v13445_v22  ;;  %v11513_v22 = vor.u32 %v16916_v28, %v11510_v50  ;;  %v11502_v54 = vld [vmem:[%s27355_s4 + $0x168] sm:$0xf0]  ;;  %v20416_v28 = vor.u32 %v16869_v37, %v11316_v9  ;;  %v20418_v50 = vor.u32 %v16850_v57, %v11310_v61  ;;  %v16930_v16 = vld [vmem:[%s27355_s4 + $0x1e4] sm:$0xf]  ;;  %v11366_v9 = vld [vmem:[%s27355_s4 + $0x58] sm:$0xf0] }
 0x11e   :  { %4186 = vmatpush.bf16.msra.mxu2 %v13509_v11  ;;  %v16898_v11 = vld [vmem:[%s27355_s4 + $0xe4] sm:$0xf]  ;;  %v11566_v42 = vld [vmem:[%s27355_s4 + $0x1e8] sm:$0xf0]  ;;  %v11430_v37 = vld [vmem:[%s27355_s4 + $0xd8] sm:$0xf0] }
 0x11f   :  { %4200 = vmatpush.bf16.msra.mxu3 %v13573_v24  ;;  %v16882_v24 = vld [vmem:[%s27355_s4 + $0x64] sm:$0xf]  ;;  %v16912_v57 = vld [vmem:[%s27355_s4 + $0x154] sm:$0xf]  ;;  %v11494_v61 = vld [vmem:[%s27355_s4 + $0x158] sm:$0xf0] }
 0x120   :  { %4159 = vmatpush.bf16.msra.mxu0 %v13373_v29  ;;  %v20426_v29 = vor.u32 %v16851_v63, %v11318_v6  ;;  %v11377_v53 = vor.u32 %v16882_v24, %v11374_v25  ;;  %v16928_v63 = vld [vmem:[%s27355_s4 + $0x1d4] sm:$0xf]  ;;  %v11558_v6 = vld [vmem:[%s27355_s4 + $0x1d8] sm:$0xf0]  ;;  %v11497_v24 = vor.u32 %v16912_v57, %v11494_v61  ;;  %v16878_v25 = vld [vmem:[%s27355_s4 + $0x44] sm:$0xf] }
 0x121   :  { %4173 = vmatpush.bf16.msra.mxu1 %v13437_v18  ;;  %v11505_v18 = vor.u32 %v16914_v19, %v11502_v54  ;;  %v11422_v19 = vld [vmem:[%s27355_s4 + $0xc8] sm:$0xf0]  ;;  %v16910_v54 = vld [vmem:[%s27355_s4 + $0x144] sm:$0xf]  ;;  %v11414_v57 = vld [vmem:[%s27355_s4 + $0xb8] sm:$0xf0] }
 0x122   :  { %4187 = vmatpush.bf16.msra.mxu2 %v13501_v3  ;;  %27382 = vst [vmem:[#allocation11_spill] sm:$0xff] %v20426_v29  ;;  %v11441_v3 = vor.u32 %v16898_v11, %v11438_v15  ;;  %v11358_v11 = vld [vmem:[%s27355_s4 + $0x48] sm:$0xf0]  ;;  %v11561_v15 = vor.u32 %v16928_v63, %v11558_v6  ;;  %v16908_v61 = vld [vmem:[%s27355_s4 + $0x134] sm:$0xf] }
 0x123   :  { %4201 = vmatpush.bf16.msra.mxu3 %v13565_v2  ;;  %v16896_v2 = vld [vmem:[%s27355_s4 + $0xd4] sm:$0xf]  ;;  %4160 = vmatmul.bf16.vlgmr.msra.gmra.mxu0 %v20405_v27  ;;  %v11478_v63 = vld [vmem:[%s27355_s4 + $0x138] sm:$0xf0] }
 0x124   :  { %4208 = vmatpush.bf16.msrb.mxu0 %v11385_v59  ;;  %v11569_v59 = vor.u32 %v16930_v16, %v11566_v42  ;;  %4174 = vmatmul.bf16.vlgmr.msra.gmra.mxu1 %v20418_v50  ;;  %v11486_v16 = vld [vmem:[%s27355_s4 + $0x148] sm:$0xf0]  ;;  %v16926_v42 = vld [vmem:[%s27355_s4 + $0x1c4] sm:$0xf]  ;;  %v16924_v6 = vld [vmem:[%s27355_s4 + $0x1b4] sm:$0xf] }
 0x125   :  { %4222 = vmatpush.bf16.msrb.mxu1 %v11449_v7  ;;  %4188 = vmatmul.bf16.vlgmr.msra.gmra.mxu2 %v20416_v28  ;;  %v11369_v7 = vor.u32 %v16880_v13, %v11366_v9  ;;  %v11489_v13 = vor.u32 %v16910_v54, %v11486_v16  ;;  %v16876_v9 = vld [vmem:[%s27355_s4 + $0x34] sm:$0xf]  ;;  %v11406_v54 = vld [vmem:[%s27355_s4 + $0xa8] sm:$0xf0]  ;;  %v16906_v16 = vld [vmem:[%s27355_s4 + $0x124] sm:$0xf] }
 0x126   :  { %4236 = vmatpush.bf16.msrb.mxu2 %v11513_v22  ;;  %4202 = vmatmul.bf16.vlgmr.msra.gmra.mxu3 %v20426_v29  ;;  %v11433_v22 = vor.u32 %v16896_v2, %v11430_v37  ;;  %v11350_v2 = vld [vmem:[%s27355_s4 + $0x38] sm:$0xf0] }
 0x127   :  { %4250 = vmatpush.bf16.msrb.mxu3 %v11577_v12  ;;  %v16894_v12 = vld [vmem:[%s27355_s4 + $0xc4] sm:$0xf] }
 0x128   :  { %4209 = vmatpush.bf16.msrb.mxu0 %v11377_v53  ;;  %v11550_v53 = vld [vmem:[%s27355_s4 + $0x1c8] sm:$0xf0] }
 0x129   :  { %4223 = vmatpush.bf16.msrb.mxu1 %v11441_v3  ;;  %v11361_v3 = vor.u32 %v16878_v25, %v11358_v11  ;;  %v11553_v37 = vor.u32 %v16926_v42, %v11550_v53  ;;  %v11481_v25 = vor.u32 %v16908_v61, %v11478_v63  ;;  %v16874_v11 = vld [vmem:[%s27355_s4 + $0x24] sm:$0xf]  ;;  %v11470_v42 = vld [vmem:[%s27355_s4 + $0x128] sm:$0xf0]  ;;  %v11398_v61 = vld [vmem:[%s27355_s4 + $0x98] sm:$0xf0] }
 0x12a   :  { %4237 = vmatpush.bf16.msrb.mxu2 %v11505_v18  ;;  %v11425_v18 = vor.u32 %v16894_v12, %v11422_v19  ;;  %v11342_v12 = vld [vmem:[%s27355_s4 + $0x28] sm:$0xf0]  ;;  %v16922_v53 = vld [vmem:[%s27355_s4 + $0x1a4] sm:$0xf]  ;;  %v16904_v63 = vld [vmem:[%s27355_s4 + $0x114] sm:$0xf] }
 0x12b   :  { %4251 = vmatpush.bf16.msrb.mxu3 %v11569_v59  ;;  %v16892_v59 = vld [vmem:[%s27355_s4 + $0xb4] sm:$0xf] }
 0x12c   :  { %4210 = vmatpush.bf16.msrb.mxu0 %v11369_v7  ;;  %v11542_v7 = vld [vmem:[%s27355_s4 + $0x1b8] sm:$0xf0] }
 0x12d   :  { %4224 = vmatpush.bf16.msrb.mxu1 %v11433_v22  ;;  %v11353_v22 = vor.u32 %v16876_v9, %v11350_v2  ;;  %v11545_v19 = vor.u32 %v16924_v6, %v11542_v7  ;;  %v11473_v9 = vor.u32 %v16906_v16, %v11470_v42  ;;  %v16872_v2 = vld [vmem:[%s27355_s4 + $0x14] sm:$0xf]  ;;  %v11462_v6 = vld [vmem:[%s27355_s4 + $0x118] sm:$0xf0]  ;;  %v16902_v16 = vld [vmem:[%s27355_s4 + $0x104] sm:$0xf] }
 0x12e   :  { %4238 = vmatpush.bf16.msrb.mxu2 %v11497_v24  ;;  %v11417_v24 = vor.u32 %v16892_v59, %v11414_v57  ;;  %v11334_v59 = vld [vmem:[%s27355_s4 + $0x18] sm:$0xf0]  ;;  %v16920_v7 = vld [vmem:[%s27355_s4 + $0x194] sm:$0xf] }
 0x12f   :  { %4252 = vmatpush.bf16.msrb.mxu3 %v11561_v15  ;;  %v16890_v15 = vld [vmem:[%s27355_s4 + $0xa4] sm:$0xf] }
 0x130   :  { %4211 = vmatpush.bf16.msrb.mxu0 %v11361_v3  ;;  %v11534_v3 = vld [vmem:[%s27355_s4 + $0x1a8] sm:$0xf0] }
 0x131   :  { %4225 = vmatpush.bf16.msrb.mxu1 %v11425_v18  ;;  %v11345_v18 = vor.u32 %v16874_v11, %v11342_v12  ;;  %v11537_v57 = vor.u32 %v16922_v53, %v11534_v3  ;;  %v11326_v11 = vld [vmem:[%s27355_s4 + $0x8] sm:$0xf0]  ;;  %v16918_v3 = vld [vmem:[%s27355_s4 + $0x184] sm:$0xf] }
 0x132   :  { %4239 = vmatpush.bf16.msrb.mxu2 %v11489_v13  ;;  %v11409_v13 = vor.u32 %v16890_v15, %v11406_v54  ;;  %v11465_v15 = vor.u32 %v16904_v63, %v11462_v6  ;;  %v11390_v54 = vld [vmem:[%s27355_s4 + $0x88] sm:$0xf0] }
 0x133   :  { %4253 = vmatpush.bf16.msrb.mxu3 %v11553_v37  ;;  %v16888_v37 = vld [vmem:[%s27355_s4 + $0x94] sm:$0xf]  ;;  %v11454_v53 = vld [vmem:[%s27355_s4 + $0x108] sm:$0xf0] }
 0x134   :  { %4212 = vmatpush.bf16.msrb.mxu0 %v11353_v22  ;;  %v11526_v22 = vld [vmem:[%s27355_s4 + $0x198] sm:$0xf0]  ;;  %v11401_v12 = vor.u32 %v16888_v37, %v11398_v61  ;;  %v11457_v6 = vor.u32 %v16902_v16, %v11454_v53  ;;  %v11694_v16 = vld [vmem:[%s27355_s4 + $0x2e8] sm:$0xf0] }
 0x135   :  { %4226 = vmatpush.bf16.msrb.mxu1 %v11417_v24  ;;  %v11337_v24 = vor.u32 %v16872_v2, %v11334_v59  ;;  %v11529_v42 = vor.u32 %v16920_v7, %v11526_v22  ;;  %v16964_v2 = vld [vmem:[%s27355_s4 + $0x2f4] sm:$0xf]  ;;  %v11702_v37 = vld [vmem:[%s27355_s4 + $0x2f8] sm:$0xf0]  ;;  %v11758_v53 = vld [vmem:[%s27355_s4 + $0x368] sm:$0xf0] }
 0x136   :  { %4240 = vmatpush.bf16.msrb.mxu2 %v11481_v25  ;;  %v16870_v25 = vld [vmem:[%s27355_s4 + $0x4] sm:$0xf]  ;;  %v11766_v61 = vld [vmem:[%s27355_s4 + $0x378] sm:$0xf0]  ;;  %v16996_v7 = vld [vmem:[%s27355_s4 + $0x3f4] sm:$0xf] }
 0x137   :  { %4254 = vmatpush.bf16.msrb.mxu3 %v11545_v19  ;;  %v16886_v19 = vld [vmem:[%s27355_s4 + $0x84] sm:$0xf]  ;;  %v11329_v59 = vor.u32 %v16870_v25, %v11326_v11  ;;  %v11830_v22 = vld [vmem:[%s27355_s4 + $0x3f8] sm:$0xf0]  ;;  %v11705_v11 = vor.u32 %v16964_v2, %v11702_v37 }
 0x138   :  { %4213 = vmatpush.bf16.msrb.mxu0 %v11345_v18  ;;  %v11518_v18 = vld [vmem:[%s27355_s4 + $0x188] sm:$0xf0]  ;;  %v11393_v63 = vor.u32 %v16886_v19, %v11390_v54  ;;  %v16962_v19 = vld [vmem:[%s27355_s4 + $0x2e4] sm:$0xf]  ;;  %v11833_v54 = vor.u32 %v16996_v7, %v11830_v22  ;;  %v11622_v37 = vld [vmem:[%s27355_s4 + $0x258] sm:$0xf0] }
 0x139   :  { %4227 = vmatpush.bf16.msrb.mxu1 %v11409_v13  ;;  %v16948_v13 = vld [vmem:[%s27355_s4 + $0x274] sm:$0xf]  ;;  %v11814_v22 = vld [vmem:[%s27355_s4 + $0x3d8] sm:$0xf0] }
 0x13a   :  { %4241 = vmatpush.bf16.msrb.mxu2 %v11473_v9  ;;  %v11638_v9 = vld [vmem:[%s27355_s4 + $0x278] sm:$0xf0]  ;;  %v16992_v7 = vld [vmem:[%s27355_s4 + $0x3d4] sm:$0xf] }
 0x13b   :  { %4255 = vmatpush.bf16.msrb.mxu3 %v11537_v57  ;;  %v16980_v57 = vld [vmem:[%s27355_s4 + $0x374] sm:$0xf]  ;;  %v11641_v25 = vor.u32 %v16948_v13, %v11638_v9  ;;  %v11697_v9 = vor.u32 %v16962_v19, %v11694_v16  ;;  %v11742_v19 = vld [vmem:[%s27355_s4 + $0x348] sm:$0xf0] }
 0x13c   :  { %4214 = vmatpush.bf16.msrb.mxu0 %v11337_v24  ;;  %v11521_v24 = vor.u32 %v16918_v3, %v11518_v18  ;;  %v11769_v29 = vor.u32 %v16980_v57, %v11766_v61  ;;  %v16994_v3 = vld [vmem:[%s27355_s4 + $0x3e4] sm:$0xf]  ;;  %v11822_v18 = vld [vmem:[%s27355_s4 + $0x3e8] sm:$0xf0]  ;;  %v16960_v57 = vld [vmem:[%s27355_s4 + $0x2d4] sm:$0xf] }
 0x13d   :  { %4228 = vmatpush.bf16.msrb.mxu1 %v11401_v12  ;;  %v16946_v12 = vld [vmem:[%s27355_s4 + $0x264] sm:$0xf]  ;;  %v11825_v61 = vor.u32 %v16994_v3, %v11822_v18 }
 0x13e   :  { %4242 = vmatpush.bf16.msrb.mxu2 %v11465_v15  ;;  %v11630_v15 = vld [vmem:[%s27355_s4 + $0x268] sm:$0xf0] }
 0x13f   :  { %4256 = vmatpush.bf16.msrb.mxu3 %v11529_v42  ;;  %v16978_v42 = vld [vmem:[%s27355_s4 + $0x364] sm:$0xf]  ;;  %v11633_v13 = vor.u32 %v16946_v12, %v11630_v15  ;;  %v11614_v12 = vld [vmem:[%s27355_s4 + $0x248] sm:$0xf0] }
 0x140   :  { %4215 = vmatpush.bf16.msrb.mxu0 %v11329_v59  ;;  %v11761_v2 = vor.u32 %v16978_v42, %v11758_v53  ;;  %v16944_v59 = vld [vmem:[%s27355_s4 + $0x254] sm:$0xf]  ;;  %v16974_v15 = vld [vmem:[%s27355_s4 + $0x344] sm:$0xf]  ;;  %v11806_v53 = vld [vmem:[%s27355_s4 + $0x3c8] sm:$0xf0] }
 0x141   :  { %4229 = vmatpush.bf16.msrb.mxu1 %v11393_v63  ;;  %v16976_v63 = vld [vmem:[%s27355_s4 + $0x354] sm:$0xf]  ;;  %v16990_v42 = vld [vmem:[%s27355_s4 + $0x3c4] sm:$0xf] }
 0x142   :  { %4243 = vmatpush.bf16.msrb.mxu2 %v11457_v6  ;;  %v11750_v6 = vld [vmem:[%s27355_s4 + $0x358] sm:$0xf0] }
 0x143   :  { %4257 = vmatpush.bf16.msrb.mxu3 %v11521_v24  ;;  %4216 = vmatmul.bf16.vlgmr.msrb.gmra.mxu0 %v18544_v58  ;;  %v11625_v24 = vor.u32 %v16944_v59, %v11622_v37  ;;  %v11753_v58 = vor.u32 %v16976_v63, %v11750_v6  ;;  %v11670_v59 = vld [vmem:[%s27355_s4 + $0x2b8] sm:$0xf0]  ;;  %v16972_v37 = vld [vmem:[%s27355_s4 + $0x334] sm:$0xf] }
 0x144   :  { %4264 = vmatpush.bf16.msra.mxu0 %v11641_v25  ;;  %4230 = vmatmul.bf16.vlgmr.msrb.gmra.mxu1 %v18580_v10  ;;  %v11817_v10 = vor.u32 %v16992_v7, %v11814_v22  ;;  %v11798_v63 = vld [vmem:[%s27355_s4 + $0x3b8] sm:$0xf0] }
 0x145   :  { %4278 = vmatpush.bf16.msra.mxu1 %v11705_v11  ;;  %4244 = vmatmul.bf16.vlgmr.msrb.gmra.mxu2 %v18558_v1  ;;  %v16942_v11 = vld [vmem:[%s27355_s4 + $0x244] sm:$0xf] }
 0x146   :  { %4292 = vmatpush.bf16.msra.mxu2 %v11769_v29  ;;  %v11686_v29 = vld [vmem:[%s27355_s4 + $0x2d8] sm:$0xf0]  ;;  %4258 = vmatmul.bf16.vlgmr.msrb.gmra.mxu3 %v18594_v17  ;;  %v16958_v1 = vld [vmem:[%s27355_s4 + $0x2c4] sm:$0xf]  ;;  %v11678_v17 = vld [vmem:[%s27355_s4 + $0x2c8] sm:$0xf0]  ;;  %v11617_v3 = vor.u32 %v16942_v11, %v11614_v12 }
 0x147   :  { %4306 = vmatpush.bf16.msra.mxu3 %v11833_v54  ;;  %v11689_v25 = vor.u32 %v16960_v57, %v11686_v29  ;;  %v27383_v54 = vperm.slane %v19485_v4, 0  ;;  %v11681_v18 = vor.u32 %v16958_v1, %v11678_v17  ;;  %v16940_v4 = vld [vmem:[%s27355_s4 + $0x234] sm:$0xf]  ;;  %v11734_v57 = vld [vmem:[%s27355_s4 + $0x338] sm:$0xf0] }
 0x148   :  { %4265 = vmatpush.bf16.msra.mxu0 %v11633_v13  ;;  %v11745_v13 = vor.u32 %v16974_v15, %v11742_v19  ;;  %v16988_v29 = vld [vmem:[%s27355_s4 + $0x3b4] sm:$0xf]  ;;  %v11737_v22 = vor.u32 %v16972_v37, %v11734_v57  ;;  %v11662_v11 = vld [vmem:[%s27355_s4 + $0x2a8] sm:$0xf0]  ;;  %v16970_v12 = vld [vmem:[%s27355_s4 + $0x324] sm:$0xf] }
 0x149   :  { %4279 = vmatpush.bf16.msra.mxu1 %v11697_v9  ;;  %v3716_v16 = vadd.f32 %v19679_v21, %v27383_v54  ;;  %v11606_v21 = vld [vmem:[%s27355_s4 + $0x238] sm:$0xf0]  ;;  %v16956_v9 = vld [vmem:[%s27355_s4 + $0x2b4] sm:$0xf]  ;;  %v11726_v1 = vld [vmem:[%s27355_s4 + $0x328] sm:$0xf0]  ;;  %v20729_v54 = vpop.f32.mrf.mxu0 }
 0x14a   :  { %4293 = vmatpush.bf16.msra.mxu2 %v11761_v2  ;;  %v11809_v2 = vor.u32 %v16990_v42, %v11806_v53  ;;  %v11609_v6 = vor.u32 %v16940_v4, %v11606_v21  ;;  %v11673_v7 = vor.u32 %v16956_v9, %v11670_v59  ;;  %v16986_v17 = vld [vmem:[%s27355_s4 + $0x3a4] sm:$0xf]  ;;  %v11790_v15 = vld [vmem:[%s27355_s4 + $0x3a8] sm:$0xf0]  ;;  %v11729_v42 = vor.u32 %v16970_v12, %v11726_v1  ;;  %v11590_v53 = vld [vmem:[%s27355_s4 + $0x218] sm:$0xf0] }
 0x14b   :  { %4307 = vmatpush.bf16.msra.mxu3 %v11825_v61  ;;  %v3730_v61 = vadd.f32 %v19711_v45, %v3716_v16  ;;  %v11598_v45 = vld [vmem:[%s27355_s4 + $0x228] sm:$0xf0]  ;;  %v11654_v4 = vld [vmem:[%s27355_s4 + $0x298] sm:$0xf0]  ;;  %v16968_v21 = vld [vmem:[%s27355_s4 + $0x314] sm:$0xf] }
 0x14c   :  { %4266 = vmatpush.bf16.msra.mxu0 %v11625_v24  ;;  %v16938_v24 = vld [vmem:[%s27355_s4 + $0x224] sm:$0xf]  ;;  %v11718_v9 = vld [vmem:[%s27355_s4 + $0x318] sm:$0xf0]  ;;  %v16984_v59 = vld [vmem:[%s27355_s4 + $0x394] sm:$0xf] }
 0x14d   :  { %4280 = vmatpush.bf16.msra.mxu1 %v11689_v25  ;;  %v16954_v25 = vld [vmem:[%s27355_s4 + $0x2a4] sm:$0xf]  ;;  %v11601_v19 = vor.u32 %v16938_v24, %v11598_v45  ;;  %v11782_v37 = vld [vmem:[%s27355_s4 + $0x398] sm:$0xf0]  ;;  %v11710_v45 = vld [vmem:[%s27355_s4 + $0x308] sm:$0xf0] }
 0x14e   :  { %4294 = vmatpush.bf16.msra.mxu2 %v11753_v58  ;;  %v11801_v58 = vor.u32 %v16988_v29, %v11798_v63  ;;  %v11665_v16 = vor.u32 %v16954_v25, %v11662_v11  ;;  %v11582_v29 = vld [vmem:[%s27355_s4 + $0x208] sm:$0xf0]  ;;  %v11721_v63 = vor.u32 %v16968_v21, %v11718_v9  ;;  %v11785_v24 = vor.u32 %v16984_v59, %v11782_v37  ;;  %v16982_v25 = vld [vmem:[%s27355_s4 + $0x384] sm:$0xf]  ;;  %v17012_v12 = vld [vmem:[%s27355_s4 + $0x474] sm:$0xf] }
 0x14f   :  { %4308 = vmatpush.bf16.msra.mxu3 %v11817_v10  ;;  %v3744_v10 = vadd.f32 %v19743_v5, %v3730_v61  ;;  %v16936_v5 = vld [vmem:[%s27355_s4 + $0x214] sm:$0xf]  ;;  %v16934_v61 = vld [vmem:[%s27355_s4 + $0x204] sm:$0xf]  ;;  %v11894_v1 = vld [vmem:[%s27355_s4 + $0x478] sm:$0xf0] }
 0x150   :  { %4267 = vmatpush.bf16.msra.mxu0 %v11617_v3  ;;  %v16952_v3 = vld [vmem:[%s27355_s4 + $0x294] sm:$0xf]  ;;  %v11593_v57 = vor.u32 %v16936_v5, %v11590_v53 }
 0x151   :  { %4281 = vmatpush.bf16.msra.mxu1 %v11681_v18  ;;  %v20740_v18 = vpop.f32.mrf.mxu1  ;;  %v20805_v5 = vpop.f32.mrf.mxu0 }
 0x152   :  { %4295 = vmatpush.bf16.msra.mxu2 %v11745_v13  ;;  %v11793_v13 = vor.u32 %v16986_v17, %v11790_v15  ;;  %v20792_v17 = vpop.f32.mrf.mxu2  ;;  %v11585_v15 = vor.u32 %v16934_v61, %v11582_v29  ;;  %v17010_v61 = vld [vmem:[%s27355_s4 + $0x464] sm:$0xf]  ;;  %v11886_v29 = vld [vmem:[%s27355_s4 + $0x468] sm:$0xf0] }
 0x153   :  { %4309 = vmatpush.bf16.msra.mxu3 %v11809_v2  ;;  %v3758_v2 = vadd.f32 %v19754_v14, %v3744_v10  ;;  %v11657_v14 = vor.u32 %v16952_v3, %v11654_v4  ;;  %v17028_v10 = vld [vmem:[%s27355_s4 + $0x4f4] sm:$0xf]  ;;  %v12086_v4 = vld [vmem:[%s27355_s4 + $0x5f8] sm:$0xf0] }
 0x154   :  { %4268 = vmatpush.bf16.msra.mxu0 %v11609_v6  ;;  %v16950_v6 = vld [vmem:[%s27355_s4 + $0x284] sm:$0xf] }
 0x155   :  { %4282 = vmatpush.bf16.msra.mxu1 %v11673_v7  ;;  %v11646_v7 = vld [vmem:[%s27355_s4 + $0x288] sm:$0xf0]  ;;  %v3772_v11 = vadd.f32 %v19938_v0, %v3758_v2  ;;  %v11958_v0 = vld [vmem:[%s27355_s4 + $0x4f8] sm:$0xf0]  ;;  %v11897_v2 = vor.u32 %v17012_v12, %v11894_v1  ;;  %v17024_v1 = vld [vmem:[%s27355_s4 + $0x4d4] sm:$0xf] }
 0x156   :  { %4296 = vmatpush.bf16.msra.mxu2 %v11737_v22  ;;  %v16966_v22 = vld [vmem:[%s27355_s4 + $0x304] sm:$0xf]  ;;  %v11649_v53 = vor.u32 %v16950_v6, %v11646_v7  ;;  %v11961_v37 = vor.u32 %v17028_v10, %v11958_v0  ;;  %v12014_v7 = vld [vmem:[%s27355_s4 + $0x568] sm:$0xf0]  ;;  %v11878_v12 = vld [vmem:[%s27355_s4 + $0x458] sm:$0xf0] }
 0x157   :  { %4310 = vmatpush.bf16.msra.mxu3 %v11801_v58  ;;  %v11774_v58 = vld [vmem:[%s27355_s4 + $0x388] sm:$0xf0]  ;;  %v11713_v3 = vor.u32 %v16966_v22, %v11710_v45  ;;  %v3786_v59 = vadd.f32 %v19950_v8, %v3772_v11  ;;  %v17042_v6 = vld [vmem:[%s27355_s4 + $0x564] sm:$0xf]  ;;  %v11942_v0 = vld [vmem:[%s27355_s4 + $0x4d8] sm:$0xf0] }
 0x158   :  { %4269 = vmatpush.bf16.msra.mxu0 %v11601_v19  ;;  %v17044_v19 = vld [vmem:[%s27355_s4 + $0x574] sm:$0xf]  ;;  %v11777_v9 = vor.u32 %v16982_v25, %v11774_v58  ;;  %v11950_v8 = vld [vmem:[%s27355_s4 + $0x4e8] sm:$0xf0]  ;;  %v11889_v25 = vor.u32 %v17010_v61, %v11886_v29  ;;  %v12017_v11 = vor.u32 %v17042_v6, %v12014_v7  ;;  %v17038_v61 = vld [vmem:[%s27355_s4 + $0x544] sm:$0xf] }
 0x159   :  { %4283 = vmatpush.bf16.msra.mxu1 %v11665_v16  ;;  %v12022_v16 = vld [vmem:[%s27355_s4 + $0x578] sm:$0xf0]  ;;  %v20813_v21 = vpop.f32.mrf.mxu1  ;;  %v3800_v22 = vadd.f32 %v19991_v52, %v3786_v59  ;;  %v12078_v45 = vld [vmem:[%s27355_s4 + $0x5e8] sm:$0xf0]  ;;  %v17008_v52 = vld [vmem:[%s27355_s4 + $0x454] sm:$0xf] }
 0x15a   :  { %4297 = vmatpush.bf16.msra.mxu2 %v11729_v42  ;;  %v20803_v42 = vpop.f32.mrf.mxu3  ;;  %v20850_v10 = vpop.f32.mrf.mxu2  ;;  %v11870_v59 = vld [vmem:[%s27355_s4 + $0x448] sm:$0xf0] }
 0x15b   :  { %4311 = vmatpush.bf16.msra.mxu3 %v11793_v13  ;;  %v17060_v13 = vld [vmem:[%s27355_s4 + $0x5f4] sm:$0xf]  ;;  %v11998_v29 = vld [vmem:[%s27355_s4 + $0x548] sm:$0xf0] }
 0x15c   :  { %4270 = vmatpush.bf16.msra.mxu0 %v11593_v57  ;;  %v12025_v57 = vor.u32 %v17044_v19, %v12022_v16  ;;  %v17040_v19 = vld [vmem:[%s27355_s4 + $0x554] sm:$0xf]  ;;  %v12006_v16 = vld [vmem:[%s27355_s4 + $0x558] sm:$0xf0] }
 0x15d   :  { %4284 = vmatpush.bf16.msra.mxu1 %v11657_v14  ;;  %v17026_v14 = vld [vmem:[%s27355_s4 + $0x4e4] sm:$0xf] }
 0x15e   :  { %4298 = vmatpush.bf16.msra.mxu2 %v11721_v63  ;;  %v12089_v63 = vor.u32 %v17060_v13, %v12086_v4  ;;  %v11953_v58 = vor.u32 %v17026_v14, %v11950_v8  ;;  %v12070_v13 = vld [vmem:[%s27355_s4 + $0x5d8] sm:$0xf0]  ;;  %v11881_v4 = vor.u32 %v17008_v52, %v11878_v12  ;;  %v17054_v14 = vld [vmem:[%s27355_s4 + $0x5c4] sm:$0xf] }
 0x15f   :  { %4312 = vmatpush.bf16.msra.mxu3 %v11785_v24  ;;  %v17058_v24 = vld [vmem:[%s27355_s4 + $0x5e4] sm:$0xf]  ;;  %v11990_v52 = vld [vmem:[%s27355_s4 + $0x538] sm:$0xf0] }
 0x160   :  { %4271 = vmatpush.bf16.msra.mxu0 %v11585_v15  ;;  %v12081_v15 = vor.u32 %v17058_v24, %v12078_v45  ;;  %v17004_v24 = vld [vmem:[%s27355_s4 + $0x434] sm:$0xf]  ;;  %v11862_v45 = vld [vmem:[%s27355_s4 + $0x438] sm:$0xf0] }
 0x161   :  { %4285 = vmatpush.bf16.msra.mxu1 %v11649_v53  ;;  %v3814_v53 = vadd.f32 %v20002_v62, %v3800_v22  ;;  %v12001_v22 = vor.u32 %v17038_v61, %v11998_v29  ;;  %v12046_v61 = vld [vmem:[%s27355_s4 + $0x5a8] sm:$0xf0] }
 0x162   :  { %4299 = vmatpush.bf16.msra.mxu2 %v11713_v3  ;;  %v20863_v3 = vpop.f32.mrf.mxu3 }
 0x163   :  { %4313 = vmatpush.bf16.msra.mxu3 %v11777_v9  ;;  %4272 = vmatmul.bf16.vlgmr.msra.gmra.mxu0 %v18766_v39  ;;  %v17056_v39 = vld [vmem:[%s27355_s4 + $0x5d4] sm:$0xf]  ;;  %v3828_v62 = vadd.f32 %v20177_v20, %v3814_v53  ;;  %v20875_v9 = vpop.f32.mrf.mxu0 }
 0x164   :  { %4320 = vmatpush.bf16.msrb.mxu0 %v11897_v2  ;;  %4286 = vmatmul.bf16.vlgmr.msra.gmra.mxu1 %v18779_v44  ;;  %v12009_v44 = vor.u32 %v17040_v19, %v12006_v16  ;;  %v17006_v2 = vld [vmem:[%s27355_s4 + $0x444] sm:$0xf]  ;;  %v12073_v20 = vor.u32 %v17056_v39, %v12070_v13  ;;  %v11865_v19 = vor.u32 %v17004_v24, %v11862_v45  ;;  %v17032_v24 = vld [vmem:[%s27355_s4 + $0x514] sm:$0xf]  ;;  %v11974_v45 = vld [vmem:[%s27355_s4 + $0x518] sm:$0xf0] }
 0x165   :  { %4334 = vmatpush.bf16.msrb.mxu1 %v11961_v37  ;;  %4300 = vmatmul.bf16.vlgmr.msra.gmra.mxu2 %v18777_v43  ;;  %v11945_v43 = vor.u32 %v17024_v1, %v11942_v0  ;;  %v20886_v37 = vpop.f32.mrf.mxu1  ;;  %v11873_v8 = vor.u32 %v17006_v2, %v11870_v59  ;;  %v3842_v6 = vadd.f32 %v20189_v30, %v3828_v62  ;;  %v11926_v30 = vld [vmem:[%s27355_s4 + $0x4b8] sm:$0xf0]  ;;  %v17052_v1 = vld [vmem:[%s27355_s4 + $0x5b4] sm:$0xf]  ;;  %v20929_v0 = vpop.f32.mrf.mxu2  ;;  %v17002_v13 = vld [vmem:[%s27355_s4 + $0x424] sm:$0xf] }
 0x166   :  { %4348 = vmatpush.bf16.msrb.mxu2 %v12025_v57  ;;  %4314 = vmatmul.bf16.vlgmr.msra.gmra.mxu3 %v18787_v47  ;;  %v17022_v47 = vld [vmem:[%s27355_s4 + $0x4c4] sm:$0xf]  ;;  %v11934_v57 = vld [vmem:[%s27355_s4 + $0x4c8] sm:$0xf0] }
 0x167   :  { %4362 = vmatpush.bf16.msrb.mxu3 %v12089_v63  ;;  %v12062_v63 = vld [vmem:[%s27355_s4 + $0x5c8] sm:$0xf0]  ;;  %v11937_v7 = vor.u32 %v17022_v47, %v11934_v57  ;;  %v3856_v12 = vadd.f32 %v20230_v23, %v3842_v6  ;;  %v17018_v62 = vld [vmem:[%s27355_s4 + $0x4a4] sm:$0xf]  ;;  %v11846_v6 = vld [vmem:[%s27355_s4 + $0x418] sm:$0xf0] }
 0x168   :  { %4321 = vmatpush.bf16.msrb.mxu0 %v11889_v25  ;;  %v17020_v25 = vld [vmem:[%s27355_s4 + $0x4b4] sm:$0xf]  ;;  %v11918_v2 = vld [vmem:[%s27355_s4 + $0x4a8] sm:$0xf0]  ;;  %v17034_v59 = vld [vmem:[%s27355_s4 + $0x524] sm:$0xf] }
 0x169   :  { %4335 = vmatpush.bf16.msrb.mxu1 %v11953_v58  ;;  %v12065_v58 = vor.u32 %v17054_v14, %v12062_v63  ;;  %v11929_v39 = vor.u32 %v17020_v25, %v11926_v30  ;;  %v11982_v47 = vld [vmem:[%s27355_s4 + $0x528] sm:$0xf0]  ;;  %v17050_v57 = vld [vmem:[%s27355_s4 + $0x5a4] sm:$0xf]  ;;  %v11921_v63 = vor.u32 %v17018_v62, %v11918_v2  ;;  %v17048_v25 = vld [vmem:[%s27355_s4 + $0x594] sm:$0xf] }
 0x16a   :  { %4349 = vmatpush.bf16.msrb.mxu2 %v12017_v11  ;;  %v17036_v11 = vld [vmem:[%s27355_s4 + $0x534] sm:$0xf]  ;;  %v20931_v16 = vpop.f32.mrf.mxu3  ;;  %v11966_v62 = vld [vmem:[%s27355_s4 + $0x508] sm:$0xf0] }
 0x16b   :  { %4363 = vmatpush.bf16.msrb.mxu3 %v12081_v15  ;;  %v12054_v15 = vld [vmem:[%s27355_s4 + $0x5b8] sm:$0xf0]  ;;  %v20933_v53 = vpop.f32.mrf.mxu0  ;;  %v11993_v23 = vor.u32 %v17036_v11, %v11990_v52  ;;  %v16998_v52 = vld [vmem:[%s27355_s4 + $0x404] sm:$0xf]  ;;  %v12030_v2 = vld [vmem:[%s27355_s4 + $0x588] sm:$0xf0] }
 0x16c   :  { %4322 = vmatpush.bf16.msrb.mxu0 %v11881_v4  ;;  %v11854_v4 = vld [vmem:[%s27355_s4 + $0x428] sm:$0xf0] }
 0x16d   :  { %4336 = vmatpush.bf16.msrb.mxu1 %v11945_v43  ;;  %v20944_v43 = vpop.f32.mrf.mxu1  ;;  %v11857_v29 = vor.u32 %v17002_v13, %v11854_v4  ;;  %v20987_v30 = vpop.f32.mrf.mxu2  ;;  %v11902_v13 = vld [vmem:[%s27355_s4 + $0x488] sm:$0xf0]  ;;  %v17030_v4 = vld [vmem:[%s27355_s4 + $0x504] sm:$0xf] }
 0x16e   :  { %4350 = vmatpush.bf16.msrb.mxu2 %v12009_v44  ;;  %v12057_v44 = vor.u32 %v17052_v1, %v12054_v15 }
 0x16f   :  { %4364 = vmatpush.bf16.msrb.mxu3 %v12073_v20  ;;  %v3870_v20 = vadd.f32 %v20241_v49, %v3856_v12  ;;  %v17000_v49 = vld [vmem:[%s27355_s4 + $0x414] sm:$0xf]  ;;  %v11838_v12 = vld [vmem:[%s27355_s4 + $0x408] sm:$0xf0] }
 0x170   :  { %4323 = vmatpush.bf16.msrb.mxu0 %v11873_v8  ;;  %v11985_v8 = vor.u32 %v17034_v59, %v11982_v47  ;;  %v11849_v11 = vor.u32 %v17000_v49, %v11846_v6  ;;  %v11969_v6 = vor.u32 %v17030_v4, %v11966_v62  ;;  %v12334_v4 = vld [vmem:[%s27355_s4 + $0x7e8] sm:$0xf0] }
 0x171   :  { %4337 = vmatpush.bf16.msrb.mxu1 %v11937_v7  ;;  %v3884_v14 = vadd.f32 %v20729_v54, %v3870_v20  ;;  %v17016_v7 = vld [vmem:[%s27355_s4 + $0x494] sm:$0xf]  ;;  %v11910_v54 = vld [vmem:[%s27355_s4 + $0x498] sm:$0xf0] }
 0x172   :  { %4351 = vmatpush.bf16.msrb.mxu2 %v12001_v22  ;;  %v12049_v22 = vor.u32 %v17050_v57, %v12046_v61  ;;  %v20996_v15 = vpop.f32.mrf.mxu3  ;;  %v17076_v20 = vld [vmem:[%s27355_s4 + $0x674] sm:$0xf]  ;;  %v12150_v57 = vld [vmem:[%s27355_s4 + $0x678] sm:$0xf0] }
 0x173   :  { %4365 = vmatpush.bf16.msrb.mxu3 %v12065_v58  ;;  %v12038_v58 = vld [vmem:[%s27355_s4 + $0x598] sm:$0xf0]  ;;  %v3898_v1 = vadd.f32 %v20740_v18, %v3884_v14  ;;  %v21017_v47 = vpop.f32.mrf.mxu0  ;;  %v17092_v61 = vld [vmem:[%s27355_s4 + $0x6f4] sm:$0xf]  ;;  %v11841_v14 = vor.u32 %v16998_v52, %v11838_v12  ;;  %v12142_v52 = vld [vmem:[%s27355_s4 + $0x668] sm:$0xf0] }
 0x174   :  { %4324 = vmatpush.bf16.msrb.mxu0 %v11865_v19  ;;  %v11913_v19 = vor.u32 %v17016_v7, %v11910_v54  ;;  %v12041_v18 = vor.u32 %v17048_v25, %v12038_v58  ;;  %v17124_v7 = vld [vmem:[%s27355_s4 + $0x7f4] sm:$0xf]  ;;  %v17090_v12 = vld [vmem:[%s27355_s4 + $0x6e4] sm:$0xf] }
 0x175   :  { %4338 = vmatpush.bf16.msrb.mxu1 %v11929_v39  ;;  %v11977_v39 = vor.u32 %v17032_v24, %v11974_v45  ;;  %v3912_v59 = vadd.f32 %v20792_v17, %v3898_v1  ;;  %v12214_v17 = vld [vmem:[%s27355_s4 + $0x6f8] sm:$0xf0]  ;;  %v12153_v24 = vor.u32 %v17076_v20, %v12150_v57  ;;  %v17072_v20 = vld [vmem:[%s27355_s4 + $0x654] sm:$0xf] }
 0x176   :  { %4352 = vmatpush.bf16.msrb.mxu2 %v11993_v23  ;;  %v17014_v23 = vld [vmem:[%s27355_s4 + $0x484] sm:$0xf]  ;;  %v12217_v25 = vor.u32 %v17092_v61, %v12214_v17  ;;  %v12134_v57 = vld [vmem:[%s27355_s4 + $0x658] sm:$0xf0]  ;;  %v17088_v61 = vld [vmem:[%s27355_s4 + $0x6d4] sm:$0xf] }
 0x177   :  { %4366 = vmatpush.bf16.msrb.mxu3 %v12057_v44  ;;  %v17046_v44 = vld [vmem:[%s27355_s4 + $0x584] sm:$0xf]  ;;  %v11905_v49 = vor.u32 %v17014_v23, %v11902_v13  ;;  %v3926_v45 = vadd.f32 %v20803_v42, %v3912_v59  ;;  %v12206_v42 = vld [vmem:[%s27355_s4 + $0x6e8] sm:$0xf0] }
 0x178   :  { %4325 = vmatpush.bf16.msrb.mxu0 %v11857_v29  ;;  %v21028_v29 = vpop.f32.mrf.mxu1  ;;  %v12033_v54 = vor.u32 %v17046_v44, %v12030_v2  ;;  %v17122_v13 = vld [vmem:[%s27355_s4 + $0x7e4] sm:$0xf] }
 0x179   :  { %4339 = vmatpush.bf16.msrb.mxu1 %v11921_v63  ;;  %v17108_v63 = vld [vmem:[%s27355_s4 + $0x774] sm:$0xf]  ;;  %v3940_v23 = vadd.f32 %v20875_v9, %v3926_v45  ;;  %v12209_v9 = vor.u32 %v17090_v12, %v12206_v42  ;;  %v12337_v17 = vor.u32 %v17122_v13, %v12334_v4  ;;  %v12118_v4 = vld [vmem:[%s27355_s4 + $0x638] sm:$0xf0] }
 0x17a   :  { %4353 = vmatpush.bf16.msrb.mxu2 %v11985_v8  ;;  %v12278_v8 = vld [vmem:[%s27355_s4 + $0x778] sm:$0xf0]  ;;  %v21073_v44 = vpop.f32.mrf.mxu3  ;;  %v17068_v13 = vld [vmem:[%s27355_s4 + $0x634] sm:$0xf] }
 0x17b   :  { %4367 = vmatpush.bf16.msrb.mxu3 %v12049_v22  ;;  %v12342_v22 = vld [vmem:[%s27355_s4 + $0x7f8] sm:$0xf0]  ;;  %v12281_v58 = vor.u32 %v17108_v63, %v12278_v8  ;;  %v21075_v2 = vpop.f32.mrf.mxu0  ;;  %v17104_v8 = vld [vmem:[%s27355_s4 + $0x754] sm:$0xf] }
 0x17c   :  { %4326 = vmatpush.bf16.msrb.mxu0 %v11849_v11  ;;  %v17074_v11 = vld [vmem:[%s27355_s4 + $0x664] sm:$0xf]  ;;  %v12345_v1 = vor.u32 %v17124_v7, %v12342_v22  ;;  %v12198_v63 = vld [vmem:[%s27355_s4 + $0x6d8] sm:$0xf0]  ;;  %v12137_v22 = vor.u32 %v17072_v20, %v12134_v57 }
 0x17d   :  { %4340 = vmatpush.bf16.msrb.mxu1 %v11913_v19  ;;  %v17106_v19 = vld [vmem:[%s27355_s4 + $0x764] sm:$0xf]  ;;  %v12145_v62 = vor.u32 %v17074_v11, %v12142_v52  ;;  %v12326_v7 = vld [vmem:[%s27355_s4 + $0x7d8] sm:$0xf0]  ;;  %v12318_v52 = vld [vmem:[%s27355_s4 + $0x7c8] sm:$0xf0] }
 0x17e   :  { %4354 = vmatpush.bf16.msrb.mxu2 %v11977_v39  ;;  %v12270_v39 = vld [vmem:[%s27355_s4 + $0x768] sm:$0xf0]  ;;  %v17118_v11 = vld [vmem:[%s27355_s4 + $0x7c4] sm:$0xf]  ;;  %v12246_v20 = vld [vmem:[%s27355_s4 + $0x738] sm:$0xf0] }
 0x17f   :  { %4368 = vmatpush.bf16.msrb.mxu3 %v12041_v18  ;;  %v21071_v18 = vpop.f32.mrf.mxu2  ;;  %v12273_v59 = vor.u32 %v17106_v19, %v12270_v39 }
 0x180   :  { %4327 = vmatpush.bf16.msrb.mxu0 %v11841_v14  ;;  %v21086_v14 = vpop.f32.mrf.mxu1 }
 0x181   :  { %4341 = vmatpush.bf16.msrb.mxu1 %v11905_v49  ;;  %v12262_v49 = vld [vmem:[%s27355_s4 + $0x758] sm:$0xf0] }
 0x182   :  { %4355 = vmatpush.bf16.msrb.mxu2 %v11969_v6  ;;  %v3954_v6 = vadd.f32 %v20886_v37, %v3940_v23  ;;  %v12201_v37 = vor.u32 %v17088_v61, %v12198_v63  ;;  %v21136_v19 = vpop.f32.mrf.mxu3  ;;  %v12310_v63 = vld [vmem:[%s27355_s4 + $0x7b8] sm:$0xf0] }
 0x183   :  { %4369 = vmatpush.bf16.msrb.mxu3 %v12033_v54  ;;  %4328 = vmatmul.bf16.vlgmr.msrb.gmra.mxu0 %v18994_v31  ;;  %v17120_v31 = vld [vmem:[%s27355_s4 + $0x7d4] sm:$0xf]  ;;  %v4051_v61 = vpop.f32.mrf.mxu0 }
 0x184   :  { %4376 = vmatpush.bf16.msra.mxu0 %v12153_v24  ;;  %4342 = vmatmul.bf16.vlgmr.msrb.gmra.mxu1 %v19007_v36  ;;  %v3968_v54 = vadd.f32 %v20929_v0, %v3954_v6  ;;  %v17070_v36 = vld [vmem:[%s27355_s4 + $0x644] sm:$0xf]  ;;  %v12126_v24 = vld [vmem:[%s27355_s4 + $0x648] sm:$0xf0]  ;;  %v12329_v45 = vor.u32 %v17120_v31, %v12326_v7 }
 0x185   :  { %4390 = vmatpush.bf16.msra.mxu1 %v12217_v25  ;;  %4356 = vmatmul.bf16.vlgmr.msrb.gmra.mxu2 %v19005_v35  ;;  %v12265_v35 = vor.u32 %v17104_v8, %v12262_v49  ;;  %v12190_v0 = vld [vmem:[%s27355_s4 + $0x6c8] sm:$0xf0]  ;;  %v17102_v25 = vld [vmem:[%s27355_s4 + $0x744] sm:$0xf]  ;;  %v12121_v49 = vor.u32 %v17068_v13, %v12118_v4  ;;  %v12230_v13 = vld [vmem:[%s27355_s4 + $0x718] sm:$0xf0] }
 0x186   :  { %4404 = vmatpush.bf16.msra.mxu2 %v12281_v58  ;;  %4370 = vmatmul.bf16.vlgmr.msrb.gmra.mxu3 %v19015_v40  ;;  %v17086_v40 = vld [vmem:[%s27355_s4 + $0x6c4] sm:$0xf]  ;;  %v12254_v58 = vld [vmem:[%s27355_s4 + $0x748] sm:$0xf0]  ;;  %v3982_v42 = vadd.f32 %v20931_v16, %v3968_v54  ;;  %v12321_v16 = vor.u32 %v17118_v11, %v12318_v52  ;;  %v12102_v52 = vld [vmem:[%s27355_s4 + $0x618] sm:$0xf0] }
 0x187   :  { %4418 = vmatpush.bf16.msra.mxu3 %v12345_v1  ;;  %v21133_v12 = vpop.f32.mrf.mxu2  ;;  %v12129_v1 = vor.u32 %v17070_v36, %v12126_v24  ;;  %v12193_v39 = vor.u32 %v17086_v40, %v12190_v0  ;;  %v12257_v23 = vor.u32 %v17102_v25, %v12254_v58  ;;  %v12110_v7 = vld [vmem:[%s27355_s4 + $0x628] sm:$0xf0]  ;;  %v17114_v40 = vld [vmem:[%s27355_s4 + $0x7a4] sm:$0xf] }
 0x188   :  { %4377 = vmatpush.bf16.msra.mxu0 %v12145_v62  ;;  %v17084_v62 = vld [vmem:[%s27355_s4 + $0x6b4] sm:$0xf]  ;;  %v3996_v57 = vadd.f32 %v21017_v47, %v3982_v42  ;;  %v21163_v8 = vpop.f32.mrf.mxu1  ;;  %v17066_v47 = vld [vmem:[%s27355_s4 + $0x624] sm:$0xf]  ;;  %v12238_v36 = vld [vmem:[%s27355_s4 + $0x728] sm:$0xf0] }
 0x189   :  { %4391 = vmatpush.bf16.msra.mxu1 %v12209_v9  ;;  %v12182_v9 = vld [vmem:[%s27355_s4 + $0x6b8] sm:$0xf0]  ;;  %v12113_v0 = vor.u32 %v17066_v47, %v12110_v7  ;;  %v12158_v47 = vld [vmem:[%s27355_s4 + $0x688] sm:$0xf0]  ;;  %v17094_v7 = vld [vmem:[%s27355_s4 + $0x704] sm:$0xf] }
 0x18a   :  { %4405 = vmatpush.bf16.msra.mxu2 %v12273_v59  ;;  %v17100_v59 = vld [vmem:[%s27355_s4 + $0x734] sm:$0xf]  ;;  %v12185_v6 = vor.u32 %v17084_v62, %v12182_v9  ;;  %v4010_v24 = vadd.f32 %v21028_v29, %v3996_v57  ;;  %v21209_v4 = vpop.f32.mrf.mxu3  ;;  %v12294_v9 = vld [vmem:[%s27355_s4 + $0x798] sm:$0xf0]  ;;  %v17062_v57 = vld [vmem:[%s27355_s4 + $0x604] sm:$0xf] }
 0x18b   :  { %4419 = vmatpush.bf16.msra.mxu3 %v12337_v17  ;;  %v17116_v17 = vld [vmem:[%s27355_s4 + $0x7b4] sm:$0xf]  ;;  %v12249_v31 = vor.u32 %v17100_v59, %v12246_v20  ;;  %v21211_v62 = vpop.f32.mrf.mxu0 }
 0x18c   :  { %4378 = vmatpush.bf16.msra.mxu0 %v12137_v22  ;;  %v17082_v22 = vld [vmem:[%s27355_s4 + $0x6a4] sm:$0xf]  ;;  %v12313_v54 = vor.u32 %v17116_v17, %v12310_v63  ;;  %v4024_v25 = vadd.f32 %v21071_v18, %v4010_v24  ;;  %v17064_v29 = vld [vmem:[%s27355_s4 + $0x614] sm:$0xf]  ;;  %v12166_v18 = vld [vmem:[%s27355_s4 + $0x698] sm:$0xf0] }
 0x18d   :  { %4392 = vmatpush.bf16.msra.mxu1 %v12201_v37  ;;  %v12174_v37 = vld [vmem:[%s27355_s4 + $0x6a8] sm:$0xf0]  ;;  %v12105_v20 = vor.u32 %v17064_v29, %v12102_v52  ;;  %v12406_v24 = vld [vmem:[%s27355_s4 + $0x878] sm:$0xf0]  ;;  %v17188_v29 = vld [vmem:[%s27355_s4 + $0x9f4] sm:$0xf] }
 0x18e   :  { %4406 = vmatpush.bf16.msra.mxu2 %v12265_v35  ;;  %v17098_v35 = vld [vmem:[%s27355_s4 + $0x724] sm:$0xf]  ;;  %v12177_v58 = vor.u32 %v17082_v22, %v12174_v37  ;;  %v12094_v17 = vld [vmem:[%s27355_s4 + $0x608] sm:$0xf0]  ;;  %v4038_v63 = vadd.f32 %v21073_v44, %v4024_v25  ;;  %v12534_v25 = vld [vmem:[%s27355_s4 + $0x978] sm:$0xf0] }
 0x18f   :  { %4420 = vmatpush.bf16.msra.mxu3 %v12329_v45  ;;  %v12302_v45 = vld [vmem:[%s27355_s4 + $0x7a8] sm:$0xf0]  ;;  %v12241_v11 = vor.u32 %v17098_v35, %v12238_v36  ;;  %v4079_v42 = vpop.f32.mrf.mxu2  ;;  %v17140_v36 = vld [vmem:[%s27355_s4 + $0x874] sm:$0xf]  ;;  %v12598_v52 = vld [vmem:[%s27355_s4 + $0x9f8] sm:$0xf0] }
 0x190   :  { %4379 = vmatpush.bf16.msra.mxu0 %v12129_v1  ;;  %v17080_v1 = vld [vmem:[%s27355_s4 + $0x694] sm:$0xf]  ;;  %v21219_v59 = vpop.f32.mrf.mxu1  ;;  %v12222_v44 = vld [vmem:[%s27355_s4 + $0x708] sm:$0xf0]  ;;  %v4052_v35 = vadd.f32 %v4051_v61, %v4038_v63  ;;  %v12601_v63 = vor.u32 %v17188_v29, %v12598_v52 }
 0x191   :  { %4393 = vmatpush.bf16.msra.mxu1 %v12193_v39  ;;  %v12305_v39 = vor.u32 %v17114_v40, %v12302_v45  ;;  %v12286_v37 = vld [vmem:[%s27355_s4 + $0x788] sm:$0xf0]  ;;  %v17156_v40 = vld [vmem:[%s27355_s4 + $0x8f4] sm:$0xf]  ;;  %v12097_v45 = vor.u32 %v17062_v57, %v12094_v17  ;;  %v17154_v17 = vld [vmem:[%s27355_s4 + $0x8e4] sm:$0xf] }
 0x192   :  { %4407 = vmatpush.bf16.msra.mxu2 %v12257_v23  ;;  %v17096_v23 = vld [vmem:[%s27355_s4 + $0x714] sm:$0xf]  ;;  %v12398_v57 = vld [vmem:[%s27355_s4 + $0x868] sm:$0xf0] }
 0x193   :  { %4421 = vmatpush.bf16.msra.mxu3 %v12321_v16  ;;  %v17112_v16 = vld [vmem:[%s27355_s4 + $0x794] sm:$0xf] }
 0x194   :  { %4380 = vmatpush.bf16.msra.mxu0 %v12121_v49  ;;  %v12169_v49 = vor.u32 %v17080_v1, %v12166_v18  ;;  %v12297_v22 = vor.u32 %v17112_v16, %v12294_v9  ;;  %v17172_v61 = vld [vmem:[%s27355_s4 + $0x974] sm:$0xf]  ;;  %v12409_v18 = vor.u32 %v17140_v36, %v12406_v24  ;;  %v12390_v36 = vld [vmem:[%s27355_s4 + $0x858] sm:$0xf0] }
 0x195   :  { %4394 = vmatpush.bf16.msra.mxu1 %v12185_v6  ;;  %v12233_v6 = vor.u32 %v17096_v23, %v12230_v13  ;;  %v4066_v23 = vadd.f32 %v21163_v8, %v4052_v35  ;;  %v21273_v13 = vpop.f32.mrf.mxu3  ;;  %v12537_v9 = vor.u32 %v17172_v61, %v12534_v25  ;;  %v12462_v8 = vld [vmem:[%s27355_s4 + $0x8e8] sm:$0xf0]  ;;  %v17152_v24 = vld [vmem:[%s27355_s4 + $0x8d4] sm:$0xf]  ;;  %v12518_v61 = vld [vmem:[%s27355_s4 + $0x958] sm:$0xf0] }
 0x196   :  { %4408 = vmatpush.bf16.msra.mxu2 %v12249_v31  ;;  %v17078_v31 = vld [vmem:[%s27355_s4 + $0x684] sm:$0xf] }
 0x197   :  { %4422 = vmatpush.bf16.msra.mxu3 %v12313_v54  ;;  %v17110_v54 = vld [vmem:[%s27355_s4 + $0x784] sm:$0xf]  ;;  %v21270_v1 = vpop.f32.mrf.mxu2 }
 0x198   :  { %4381 = vmatpush.bf16.msra.mxu0 %v12113_v0  ;;  %v12470_v0 = vld [vmem:[%s27355_s4 + $0x8f8] sm:$0xf0] }
 0x199   :  { %4395 = vmatpush.bf16.msra.mxu1 %v12177_v58  ;;  %v12161_v58 = vor.u32 %v17078_v31, %v12158_v47  ;;  %v12473_v16 = vor.u32 %v17156_v40, %v12470_v0  ;;  %v4080_v31 = vadd.f32 %v4079_v42, %v4066_v23  ;;  %v4107_v47 = vpop.f32.mrf.mxu0  ;;  %v17136_v42 = vld [vmem:[%s27355_s4 + $0x854] sm:$0xf]  ;;  %v12446_v23 = vld [vmem:[%s27355_s4 + $0x8c8] sm:$0xf0] }
 0x19a   :  { %4409 = vmatpush.bf16.msra.mxu2 %v12241_v11  ;;  %v12225_v11 = vor.u32 %v17094_v7, %v12222_v44  ;;  %v17186_v7 = vld [vmem:[%s27355_s4 + $0x9e4] sm:$0xf]  ;;  %v4121_v44 = vpop.f32.mrf.mxu1  ;;  %v17168_v0 = vld [vmem:[%s27355_s4 + $0x954] sm:$0xf] }
 0x19b   :  { %4423 = vmatpush.bf16.msra.mxu3 %v12305_v39  ;;  %v12289_v39 = vor.u32 %v17110_v54, %v12286_v37  ;;  %v12465_v37 = vor.u32 %v17154_v17, %v12462_v8  ;;  %v4094_v25 = vadd.f32 %v21209_v4, %v4080_v31  ;;  %v12521_v52 = vor.u32 %v17168_v0, %v12518_v61  ;;  %v17182_v17 = vld [vmem:[%s27355_s4 + $0x9c4] sm:$0xf] }
 0x19c   :  { %4382 = vmatpush.bf16.msra.mxu0 %v12105_v20  ;;  %v17138_v20 = vld [vmem:[%s27355_s4 + $0x864] sm:$0xf] }
 0x19d   :  { %4396 = vmatpush.bf16.msra.mxu1 %v12169_v49  ;;  %v17170_v49 = vld [vmem:[%s27355_s4 + $0x964] sm:$0xf]  ;;  %v12401_v54 = vor.u32 %v17138_v20, %v12398_v57  ;;  %v4108_v29 = vadd.f32 %v4107_v47, %v4094_v25  ;;  %v4149_v20 = vpop.f32.mrf.mxu3 }
 0x19e   :  { %4410 = vmatpush.bf16.msra.mxu2 %v12233_v6  ;;  %v12526_v6 = vld [vmem:[%s27355_s4 + $0x968] sm:$0xf0]  ;;  %v17130_v25 = vld [vmem:[%s27355_s4 + $0x824] sm:$0xf] }
 0x19f   :  { %4424 = vmatpush.bf16.msra.mxu3 %v12297_v22  ;;  %v12590_v22 = vld [vmem:[%s27355_s4 + $0x9e8] sm:$0xf0]  ;;  %v12529_v35 = vor.u32 %v17170_v49, %v12526_v6  ;;  %v4122_v6 = vadd.f32 %v4121_v44, %v4108_v29  ;;  %v12438_v44 = vld [vmem:[%s27355_s4 + $0x8b8] sm:$0xf0] }
 0x1a0   :  { %4383 = vmatpush.bf16.msra.mxu0 %v12097_v45  ;;  %v12593_v40 = vor.u32 %v17186_v7, %v12590_v22  ;;  %v12454_v45 = vld [vmem:[%s27355_s4 + $0x8d8] sm:$0xf0]  ;;  %v17132_v7 = vld [vmem:[%s27355_s4 + $0x834] sm:$0xf] }
 0x1a1   :  { %4397 = vmatpush.bf16.msra.mxu1 %v12161_v58  ;;  %v12582_v58 = vld [vmem:[%s27355_s4 + $0x9d8] sm:$0xf0]  ;;  %v12457_v4 = vor.u32 %v17152_v24, %v12454_v45  ;;  %v21346_v57 = vpop.f32.mrf.mxu0  ;;  %v17180_v24 = vld [vmem:[%s27355_s4 + $0x9b4] sm:$0xf] }
 0x1a2   :  { %4411 = vmatpush.bf16.msra.mxu2 %v12225_v11  ;;  %v12393_v11 = vor.u32 %v17136_v42, %v12390_v36  ;;  %v21354_v49 = vpop.f32.mrf.mxu1  ;;  %v12374_v22 = vld [vmem:[%s27355_s4 + $0x838] sm:$0xf0] }
 0x1a3   :  { %4425 = vmatpush.bf16.msra.mxu3 %v12289_v39  ;;  %4384 = vmatmul.bf16.vlgmr.msra.gmra.mxu0 %v19222_v32  ;;  %v17184_v32 = vld [vmem:[%s27355_s4 + $0x9d4] sm:$0xf]  ;;  %v17150_v39 = vld [vmem:[%s27355_s4 + $0x8c4] sm:$0xf]  ;;  %v12502_v42 = vld [vmem:[%s27355_s4 + $0x938] sm:$0xf0]  ;;  %v12377_v45 = vor.u32 %v17132_v7, %v12374_v22 }
 0x1a4   :  { %4432 = vmatpush.bf16.msrb.mxu0 %v12409_v18  ;;  %4398 = vmatmul.bf16.vlgmr.msra.gmra.mxu1 %v19235_v41  ;;  %v12382_v41 = vld [vmem:[%s27355_s4 + $0x848] sm:$0xf0]  ;;  %v12585_v18 = vor.u32 %v17184_v32, %v12582_v58  ;;  %v12449_v31 = vor.u32 %v17150_v39, %v12446_v23  ;;  %v17146_v58 = vld [vmem:[%s27355_s4 + $0x8a4] sm:$0xf]  ;;  %v12422_v7 = vld [vmem:[%s27355_s4 + $0x898] sm:$0xf0] }
 0x1a5   :  { %4446 = vmatpush.bf16.msrb.mxu1 %v12473_v16  ;;  %4412 = vmatmul.bf16.vlgmr.msra.gmra.mxu2 %v19233_v38  ;;  %v17134_v38 = vld [vmem:[%s27355_s4 + $0x844] sm:$0xf]  ;;  %v12366_v32 = vld [vmem:[%s27355_s4 + $0x828] sm:$0xf0]  ;;  %v17160_v22 = vld [vmem:[%s27355_s4 + $0x914] sm:$0xf] }
 0x1a6   :  { %4460 = vmatpush.bf16.msrb.mxu2 %v12537_v9  ;;  %4426 = vmatmul.bf16.vlgmr.msra.gmra.mxu3 %v19243_v46  ;;  %v4135_v46 = vpop.f32.mrf.mxu2  ;;  %v17166_v16 = vld [vmem:[%s27355_s4 + $0x944] sm:$0xf]  ;;  %v12510_v9 = vld [vmem:[%s27355_s4 + $0x948] sm:$0xf0]  ;;  %v12385_v8 = vor.u32 %v17134_v38, %v12382_v41 }
 0x1a7   :  { %4474 = vmatpush.bf16.msrb.mxu3 %v12601_v63  ;;  %v12574_v63 = vld [vmem:[%s27355_s4 + $0x9c8] sm:$0xf0]  ;;  %v12513_v47 = vor.u32 %v17166_v16, %v12510_v9  ;;  %v4136_v36 = vadd.f32 %v4135_v46, %v4122_v6  ;;  %v12369_v16 = vor.u32 %v17130_v25, %v12366_v32  ;;  %v17144_v6 = vld [vmem:[%s27355_s4 + $0x894] sm:$0xf]  ;;  %v17158_v25 = vld [vmem:[%s27355_s4 + $0x904] sm:$0xf] }
 0x1a8   :  { %4433 = vmatpush.bf16.msrb.mxu0 %v12401_v54  ;;  %v17148_v54 = vld [vmem:[%s27355_s4 + $0x8b4] sm:$0xf]  ;;  %v12494_v38 = vld [vmem:[%s27355_s4 + $0x928] sm:$0xf0] }
 0x1a9   :  { %4447 = vmatpush.bf16.msrb.mxu1 %v12465_v37  ;;  %v12577_v37 = vor.u32 %v17182_v17, %v12574_v63  ;;  %v12441_v0 = vor.u32 %v17148_v54, %v12438_v44  ;;  %v4150_v41 = vadd.f32 %v4149_v20, %v4136_v36  ;;  %v4163_v39 = vpop.f32.mrf.mxu0  ;;  %v21400_v46 = vpop.f32.mrf.mxu3  ;;  %v12558_v23 = vld [vmem:[%s27355_s4 + $0x9a8] sm:$0xf0]  ;;  %v17128_v20 = vld [vmem:[%s27355_s4 + $0x814] sm:$0xf]  ;;  %v12486_v54 = vld [vmem:[%s27355_s4 + $0x918] sm:$0xf0] }
 0x1aa   :  { %4461 = vmatpush.bf16.msrb.mxu2 %v12529_v35  ;;  %v17164_v35 = vld [vmem:[%s27355_s4 + $0x934] sm:$0xf]  ;;  %v12550_v44 = vld [vmem:[%s27355_s4 + $0x998] sm:$0xf0]  ;;  %v12350_v36 = vld [vmem:[%s27355_s4 + $0x808] sm:$0xf0] }
 0x1ab   :  { %4475 = vmatpush.bf16.msrb.mxu3 %v12593_v40  ;;  %v12566_v40 = vld [vmem:[%s27355_s4 + $0x9b8] sm:$0xf0]  ;;  %v12505_v61 = vor.u32 %v17164_v35, %v12502_v42  ;;  %v4164_v9 = vadd.f32 %v4163_v39, %v4150_v41  ;;  %v17126_v42 = vld [vmem:[%s27355_s4 + $0x804] sm:$0xf] }
 0x1ac   :  { %4434 = vmatpush.bf16.msrb.mxu0 %v12393_v11  ;;  %v12569_v11 = vor.u32 %v17180_v24, %v12566_v40  ;;  %v12425_v40 = vor.u32 %v17144_v6, %v12422_v7  ;;  %v21450_v32 = vld [vmem:[%s27357_s6 + $0x1] ss:$8 sm:$0x3]  ;;  %v12854_v7 = vld [vmem:[%s27355_s4 + $0xbf8] sm:$0xf0] }
 0x1ad   :  { %4448 = vmatpush.bf16.msrb.mxu1 %v12457_v4  ;;  %v12430_v4 = vld [vmem:[%s27355_s4 + $0x8a8] sm:$0xf0] }
 0x1ae   :  { %4462 = vmatpush.bf16.msrb.mxu2 %v12521_v52  ;;  %v21389_v29 = vpop.f32.mrf.mxu2  ;;  %v17162_v52 = vld [vmem:[%s27355_s4 + $0x924] sm:$0xf]  ;;  %v12433_v17 = vor.u32 %v17146_v58, %v12430_v4  ;;  %v12478_v4 = vld [vmem:[%s27355_s4 + $0x908] sm:$0xf0] }
 0x1af   :  { %4476 = vmatpush.bf16.msrb.mxu3 %v12585_v18  ;;  %v17178_v18 = vld [vmem:[%s27355_s4 + $0x9a4] sm:$0xf]  ;;  %v12497_v63 = vor.u32 %v17162_v52, %v12494_v38  ;;  %v12542_v38 = vld [vmem:[%s27355_s4 + $0x988] sm:$0xf0] }
 0x1b0   :  { %4435 = vmatpush.bf16.msrb.mxu0 %v12385_v8  ;;  %v12358_v8 = vld [vmem:[%s27355_s4 + $0x818] sm:$0xf0]  ;;  %v17174_v52 = vld [vmem:[%s27355_s4 + $0x984] sm:$0xf] }
 0x1b1   :  { %4449 = vmatpush.bf16.msrb.mxu1 %v12449_v31  ;;  %v12561_v31 = vor.u32 %v17178_v18, %v12558_v23  ;;  %v12361_v35 = vor.u32 %v17128_v20, %v12358_v8  ;;  %v4205_v39 = vpop.f32.mrf.mxu3  ;;  %v17204_v18 = vld [vmem:[%s27355_s4 + $0xa74] sm:$0xf]  ;;  %v12662_v23 = vld [vmem:[%s27355_s4 + $0xa78] sm:$0xf0] }
 0x1b2   :  { %4463 = vmatpush.bf16.msrb.mxu2 %v12513_v47  ;;  %v4177_v47 = vpop.f32.mrf.mxu1  ;;  %v12790_v20 = vld [vmem:[%s27355_s4 + $0xb78] sm:$0xf0] }
 0x1b3   :  { %4477 = vmatpush.bf16.msrb.mxu3 %v12577_v37  ;;  %v17176_v37 = vld [vmem:[%s27355_s4 + $0x994] sm:$0xf]  ;;  %v4178_v24 = vadd.f32 %v4177_v47, %v4164_v9  ;;  %v12353_v9 = vor.u32 %v17126_v42, %v12350_v36 }
 0x1b4   :  { %4436 = vmatpush.bf16.msrb.mxu0 %v12377_v45  ;;  %v12489_v45 = vor.u32 %v17160_v22, %v12486_v54  ;;  %v12553_v58 = vor.u32 %v17176_v37, %v12550_v44  ;;  %v17252_v47 = vld [vmem:[%s27355_s4 + $0xbf4] sm:$0xf]  ;;  %v21488_v22 = vld [vmem:[%s27357_s6 + $0x2] ss:$8 sm:$0x3]  ;;  %v12545_v54 = vor.u32 %v17174_v52, %v12542_v38  ;;  %v12665_v37 = vor.u32 %v17204_v18, %v12662_v23 }
 0x1b5   :  { %4450 = vmatpush.bf16.msrb.mxu1 %v12441_v0  ;;  %v17142_v0 = vld [vmem:[%s27355_s4 + $0x884] sm:$0xf]  ;;  %v12846_v38 = vld [vmem:[%s27355_s4 + $0xbe8] sm:$0xf0] }
 0x1b6   :  { %4464 = vmatpush.bf16.msrb.mxu2 %v12505_v61  ;;  %v12414_v61 = vld [vmem:[%s27355_s4 + $0x888] sm:$0xf0]  ;;  %v17202_v44 = vld [vmem:[%s27355_s4 + $0xa64] sm:$0xf] }
 0x1b7   :  { %4478 = vmatpush.bf16.msrb.mxu3 %v12569_v11  ;;  %v4191_v11 = vpop.f32.mrf.mxu2  ;;  %v12417_v6 = vor.u32 %v17142_v0, %v12414_v61  ;;  %v12857_v0 = vor.u32 %v17252_v47, %v12854_v7  ;;  %v12718_v61 = vld [vmem:[%s27355_s4 + $0xae8] sm:$0xf0]  ;;  %v17250_v52 = vld [vmem:[%s27355_s4 + $0xbe4] sm:$0xf] }
 0x1b8   :  { %4437 = vmatpush.bf16.msrb.mxu0 %v12369_v16  ;;  %v4192_v41 = vadd.f32 %v4191_v11, %v4178_v24  ;;  %v17220_v16 = vld [vmem:[%s27355_s4 + $0xaf4] sm:$0xf]  ;;  %v4730_v11 = vperm.slane %v21488_v22, 0  ;;  %v21553_v7 = vld [vmem:[%s27357_s6] ss:$8 sm:$0x3] }
 0x1b9   :  { %4451 = vmatpush.bf16.msrb.mxu1 %v12433_v17  ;;  %v12726_v17 = vld [vmem:[%s27355_s4 + $0xaf8] sm:$0xf0]  ;;  %v17490_v22 = vld [vmem:[%s27355_s4 + $0x1364] sm:$0xf] }
 0x1ba   :  { %4465 = vmatpush.bf16.msrb.mxu2 %v12497_v63  ;;  %v17236_v63 = vld [vmem:[%s27355_s4 + $0xb74] sm:$0xf]  ;;  %v4206_v8 = vadd.f32 %v4205_v39, %v4192_v41  ;;  %v12729_v36 = vor.u32 %v17220_v16, %v12726_v17 }
 0x1bb   :  { %4479 = vmatpush.bf16.msrb.mxu3 %v12561_v31  ;;  %v12481_v31 = vor.u32 %v17158_v25, %v12478_v4  ;;  %v12793_v24 = vor.u32 %v17236_v63, %v12790_v20  ;;  %v17234_v25 = vld [vmem:[%s27355_s4 + $0xb64] sm:$0xf]  ;;  %v17200_v16 = vld [vmem:[%s27355_s4 + $0xa54] sm:$0xf]  ;;  %v12849_v63 = vor.u32 %v17250_v52, %v12846_v38  ;;  %v12710_v20 = vld [vmem:[%s27355_s4 + $0xad8] sm:$0xf0] }
 0x1bc   :  { %4438 = vmatpush.bf16.msrb.mxu0 %v12361_v35  ;;  %v4719_v35 = vperm.slane %v21450_v32, 0  ;;  %v4714_v42 = vmax.f32 %v4206_v8, 0.0  ;;  %v17216_v17 = vld [vmem:[%s27355_s4 + $0xad4] sm:$0xf]  ;;  %v13633_v32 = vld [vmem:[%s27355_s4 + $0x1208] sm:$0xf0] }
 0x1bd   :  { %4452 = vmatpush.bf16.msrb.mxu1 %v12425_v40  ;;  %v12654_v40 = vld [vmem:[%s27355_s4 + $0xa68] sm:$0xf0]  ;;  %v17232_v8 = vld [vmem:[%s27355_s4 + $0xb54] sm:$0xf] }
 0x1be   :  { %4466 = vmatpush.bf16.msrb.mxu2 %v12489_v45  ;;  %v17218_v45 = vld [vmem:[%s27355_s4 + $0xae4] sm:$0xf]  ;;  %v4725_v4 = vmul.f32 %v4719_v35, %v4714_v42  ;;  %v12657_v41 = vor.u32 %v17202_v44, %v12654_v40  ;;  %v12766_v40 = vld [vmem:[%s27355_s4 + $0xb48] sm:$0xf0]  ;;  %v17196_v38 = vld [vmem:[%s27355_s4 + $0xa34] sm:$0xf] }
 0x1bf   :  { %4480 = vmatpush.bf16.msrb.mxu3 %v12553_v58  ;;  %v12782_v58 = vld [vmem:[%s27355_s4 + $0xb68] sm:$0xf0]  ;;  %v12721_v18 = vor.u32 %v17218_v45, %v12718_v61  ;;  %v17214_v44 = vld [vmem:[%s27355_s4 + $0xac4] sm:$0xf] }
 0x1c0   :  { %4439 = vmatpush.bf16.msrb.mxu0 %v12353_v9  ;;  %v21520_v39 = vadd.f32 %v4730_v11, %v4725_v4  ;;  %v12785_v23 = vor.u32 %v17234_v25, %v12782_v58  ;;  %v12646_v9 = vld [vmem:[%s27355_s4 + $0xa58] sm:$0xf0]  ;;  %v17246_v45 = vld [vmem:[%s27355_s4 + $0xbc4] sm:$0xf]  ;;  %v4217_v61 = vpop.f32.mrf.mxu0 }
 0x1c1   :  { %4453 = vmatpush.bf16.msrb.mxu1 %v12417_v6  ;;  %v12774_v6 = vld [vmem:[%s27355_s4 + $0xb58] sm:$0xf0]  ;;  %v12649_v47 = vor.u32 %v17200_v16, %v12646_v9 }
 0x1c2   :  { %4467 = vmatpush.bf16.msrb.mxu2 %v12481_v31  ;;  %v12838_v31 = vld [vmem:[%s27355_s4 + $0xbd8] sm:$0xf0] }
 0x1c3   :  { %4481 = vmatpush.bf16.msrb.mxu3 %v12545_v54  ;;  %4440 = vmatmul.bf16.vlgmr.msrb.gmra.mxu0 %v19450_v51  ;;  %v17248_v51 = vld [vmem:[%s27355_s4 + $0xbd4] sm:$0xf]  ;;  %v12777_v54 = vor.u32 %v17232_v8, %v12774_v6  ;;  %v12694_v9 = vld [vmem:[%s27355_s4 + $0xab8] sm:$0xf0] }
 0x1c4   :  { %4488 = vmatpush.bf16.msra.mxu0 %v12665_v37  ;;  %4454 = vmatmul.bf16.vlgmr.msrb.gmra.mxu1 %v19463_v56  ;;  %v12713_v56 = vor.u32 %v17216_v17, %v12710_v20  ;;  %v17198_v37 = vld [vmem:[%s27355_s4 + $0xa44] sm:$0xf]  ;;  %v12841_v42 = vor.u32 %v17248_v51, %v12838_v31  ;;  %v17228_v17 = vld [vmem:[%s27355_s4 + $0xb34] sm:$0xf]  ;;  %v12822_v6 = vld [vmem:[%s27355_s4 + $0xbb8] sm:$0xf0] }
 0x1c5   :  { %4502 = vmatpush.bf16.msra.mxu1 %v12729_v36  ;;  %4468 = vmatmul.bf16.vlgmr.msrb.gmra.mxu2 %v19461_v55  ;;  %v641_v55 = vperm.slane %v21553_v7, 1  ;;  %v12702_v36 = vld [vmem:[%s27355_s4 + $0xac8] sm:$0xf0]  ;;  %v17244_v8 = vld [vmem:[%s27355_s4 + $0xbb4] sm:$0xf] }
 0x1c6   :  { %4516 = vmatpush.bf16.msra.mxu2 %v12793_v24  ;;  %4482 = vmatmul.bf16.vlgmr.msrb.gmra.mxu3 %v19471_v60  ;;  %v12638_v60 = vld [vmem:[%s27355_s4 + $0xa48] sm:$0xf0]  ;;  %v17230_v24 = vld [vmem:[%s27355_s4 + $0xb44] sm:$0xf]  ;;  %v12705_v4 = vor.u32 %v17214_v44, %v12702_v36  ;;  %v17484_v7 = vld [vmem:[%s27355_s4 + $0x1334] sm:$0xf] }
 0x1c7   :  { %4530 = vmatpush.bf16.msra.mxu3 %v12857_v0  ;;  %v12830_v0 = vld [vmem:[%s27355_s4 + $0xbc8] sm:$0xf0]  ;;  %v12641_v25 = vor.u32 %v17198_v37, %v12638_v60  ;;  %v4218_v58 = vadd.f32 %v4217_v61, %v641_v55  ;;  %v12769_v52 = vor.u32 %v17230_v24, %v12766_v40  ;;  %v17210_v37 = vld [vmem:[%s27355_s4 + $0xaa4] sm:$0xf]  ;;  %v12825_v60 = vor.u32 %v17244_v8, %v12822_v6 }
 0x1c8   :  { %4489 = vmatpush.bf16.msra.mxu0 %v12657_v41  ;;  %v12630_v41 = vld [vmem:[%s27355_s4 + $0xa38] sm:$0xf0]  ;;  %v12833_v16 = vor.u32 %v17246_v45, %v12830_v0  ;;  %v12686_v44 = vld [vmem:[%s27355_s4 + $0xaa8] sm:$0xf0]  ;;  %v4245_v24 = vpop.f32.mrf.mxu2  ;;  %v17242_v40 = vld [vmem:[%s27355_s4 + $0xba4] sm:$0xf] }
 0x1c9   :  { %4503 = vmatpush.bf16.msra.mxu1 %v12721_v18  ;;  %v17212_v18 = vld [vmem:[%s27355_s4 + $0xab4] sm:$0xf]  ;;  %v12633_v51 = vor.u32 %v17196_v38, %v12630_v41  ;;  %v12750_v36 = vld [vmem:[%s27355_s4 + $0xb28] sm:$0xf0]  ;;  %v12614_v38 = vld [vmem:[%s27355_s4 + $0xa18] sm:$0xf0] }
 0x1ca   :  { %4517 = vmatpush.bf16.msra.mxu2 %v12785_v23  ;;  %v4231_v23 = vpop.f32.mrf.mxu1  ;;  %v12697_v31 = vor.u32 %v17212_v18, %v12694_v9  ;;  %v12814_v45 = vld [vmem:[%s27355_s4 + $0xba8] sm:$0xf0]  ;;  %v17208_v41 = vld [vmem:[%s27355_s4 + $0xa94] sm:$0xf]  ;;  %v17190_v6 = vld [vmem:[%s27355_s4 + $0xa04] sm:$0xf] }
 0x1cb   :  { %4531 = vmatpush.bf16.msra.mxu3 %v12849_v63  ;;  %v12758_v63 = vld [vmem:[%s27355_s4 + $0xb38] sm:$0xf0]  ;;  %v4232_v20 = vadd.f32 %v4231_v23, %v4218_v58  ;;  %v12689_v58 = vor.u32 %v17210_v37, %v12686_v44  ;;  %v12817_v23 = vor.u32 %v17242_v40, %v12814_v45  ;;  %v17224_v9 = vld [vmem:[%s27355_s4 + $0xb14] sm:$0xf]  ;;  %v17222_v37 = vld [vmem:[%s27355_s4 + $0xb04] sm:$0xf] }
 0x1cc   :  { %4490 = vmatpush.bf16.msra.mxu0 %v12649_v47  ;;  %v12761_v47 = vor.u32 %v17228_v17, %v12758_v63  ;;  %v12742_v17 = vld [vmem:[%s27355_s4 + $0xb18] sm:$0xf0]  ;;  %v17240_v63 = vld [vmem:[%s27355_s4 + $0xb94] sm:$0xf]  ;;  %v12734_v44 = vld [vmem:[%s27355_s4 + $0xb08] sm:$0xf0] }
 0x1cd   :  { %4504 = vmatpush.bf16.msra.mxu1 %v12713_v56  ;;  %v17194_v56 = vld [vmem:[%s27355_s4 + $0xa24] sm:$0xf]  ;;  %v4246_v0 = vadd.f32 %v4245_v24, %v4232_v20  ;;  %v12806_v20 = vld [vmem:[%s27355_s4 + $0xb98] sm:$0xf0]  ;;  %v17268_v24 = vld [vmem:[%s27355_s4 + $0xc74] sm:$0xf] }
 0x1ce   :  { %4518 = vmatpush.bf16.msra.mxu2 %v12777_v54  ;;  %v12622_v54 = vld [vmem:[%s27355_s4 + $0xa28] sm:$0xf0]  ;;  %v12918_v40 = vld [vmem:[%s27355_s4 + $0xc78] sm:$0xf0]  ;;  %v17284_v45 = vld [vmem:[%s27355_s4 + $0xcf4] sm:$0xf] }
 0x1cf   :  { %4532 = vmatpush.bf16.msra.mxu3 %v12841_v42  ;;  %v17226_v42 = vld [vmem:[%s27355_s4 + $0xb24] sm:$0xf]  ;;  %v12625_v61 = vor.u32 %v17194_v56, %v12622_v54  ;;  %v12670_v54 = vld [vmem:[%s27355_s4 + $0xa88] sm:$0xf0] }
 0x1d0   :  { %4491 = vmatpush.bf16.msra.mxu0 %v12641_v25  ;;  %v4259_v25 = vpop.f32.mrf.mxu3  ;;  %v17206_v56 = vld [vmem:[%s27355_s4 + $0xa84] sm:$0xf] }
 0x1d1   :  { %4505 = vmatpush.bf16.msra.mxu1 %v12705_v4  ;;  %v12753_v4 = vor.u32 %v17226_v42, %v12750_v36  ;;  %v21639_v18 = vadd.f32 %v4259_v25, %v4246_v0  ;;  %v17238_v42 = vld [vmem:[%s27355_s4 + $0xb84] sm:$0xf]  ;;  %v12798_v36 = vld [vmem:[%s27355_s4 + $0xb88] sm:$0xf0]  ;;  %v17300_v25 = vld [vmem:[%s27355_s4 + $0xd74] sm:$0xf] }
 0x1d2   :  { %4519 = vmatpush.bf16.msra.mxu2 %v12769_v52  ;;  %v17192_v52 = vld [vmem:[%s27355_s4 + $0xa14] sm:$0xf] }
 0x1d3   :  { %4533 = vmatpush.bf16.msra.mxu3 %v12833_v16  ;;  %v12678_v16 = vld [vmem:[%s27355_s4 + $0xa98] sm:$0xf0]  ;;  %v12617_v8 = vor.u32 %v17192_v52, %v12614_v38  ;;  %v12737_v52 = vor.u32 %v17222_v37, %v12734_v44  ;;  %v17316_v38 = vld [vmem:[%s27355_s4 + $0xdf4] sm:$0xf] }
 0x1d4   :  { %4492 = vmatpush.bf16.msra.mxu0 %v12633_v51  ;;  %v12606_v51 = vld [vmem:[%s27355_s4 + $0xa08] sm:$0xf0] }
 0x1d5   :  { %4506 = vmatpush.bf16.msra.mxu1 %v12697_v31  ;;  %v12681_v31 = vor.u32 %v17208_v41, %v12678_v16  ;;  %v12609_v0 = vor.u32 %v17190_v6, %v12606_v51  ;;  %v13110_v41 = vld [vmem:[%s27355_s4 + $0xdf8] sm:$0xf0]  ;;  %v12921_v16 = vor.u32 %v17268_v24, %v12918_v40  ;;  %v12974_v51 = vld [vmem:[%s27355_s4 + $0xce8] sm:$0xf0]  ;;  %v17280_v24 = vld [vmem:[%s27355_s4 + $0xcd4] sm:$0xf] }
 0x1d6   :  { %4520 = vmatpush.bf16.msra.mxu2 %v12761_v47  ;;  %v12745_v47 = vor.u32 %v17224_v9, %v12742_v17  ;;  %v13113_v6 = vor.u32 %v17316_v38, %v13110_v41  ;;  %v17278_v38 = vld [vmem:[%s27355_s4 + $0xcc4] sm:$0xf]  ;;  %v12958_v41 = vld [vmem:[%s27355_s4 + $0xcc8] sm:$0xf0] }
 0x1d7   :  { %4534 = vmatpush.bf16.msra.mxu3 %v12825_v60  ;;  %v12809_v60 = vor.u32 %v17240_v63, %v12806_v20  ;;  %v17266_v63 = vld [vmem:[%s27355_s4 + $0xc64] sm:$0xf]  ;;  %v12910_v20 = vld [vmem:[%s27355_s4 + $0xc68] sm:$0xf0] }
 0x1d8   :  { %4493 = vmatpush.bf16.msra.mxu0 %v12625_v61  ;;  %v12982_v61 = vld [vmem:[%s27355_s4 + $0xcf8] sm:$0xf0]  ;;  %v12913_v37 = vor.u32 %v17266_v63, %v12910_v20  ;;  %v12961_v20 = vor.u32 %v17278_v38, %v12958_v41 }
 0x1d9   :  { %4507 = vmatpush.bf16.msra.mxu1 %v12689_v58  ;;  %v13046_v58 = vld [vmem:[%s27355_s4 + $0xd78] sm:$0xf0]  ;;  %v12985_v9 = vor.u32 %v17284_v45, %v12982_v61 }
 0x1da   :  { %4521 = vmatpush.bf16.msra.mxu2 %v12753_v4  ;;  %v12673_v4 = vor.u32 %v17206_v56, %v12670_v54  ;;  %v13049_v17 = vor.u32 %v17300_v25, %v13046_v58  ;;  %v17314_v56 = vld [vmem:[%s27355_s4 + $0xde4] sm:$0xf]  ;;  %v13102_v54 = vld [vmem:[%s27355_s4 + $0xde8] sm:$0xf0]  ;;  %v12966_v45 = vld [vmem:[%s27355_s4 + $0xcd8] sm:$0xf0] }
 0x1db   :  { %4535 = vmatpush.bf16.msra.mxu3 %v12817_v23  ;;  %v12801_v23 = vor.u32 %v17238_v42, %v12798_v36  ;;  %v17264_v42 = vld [vmem:[%s27355_s4 + $0xc54] sm:$0xf]  ;;  %v12902_v36 = vld [vmem:[%s27355_s4 + $0xc58] sm:$0xf0]  ;;  %v13105_v40 = vor.u32 %v17314_v56, %v13102_v54 }
 0x1dc   :  { %4494 = vmatpush.bf16.msra.mxu0 %v12617_v8  ;;  %v17282_v8 = vld [vmem:[%s27355_s4 + $0xce4] sm:$0xf]  ;;  %v13030_v61 = vld [vmem:[%s27355_s4 + $0xd58] sm:$0xf0]  ;;  %v12905_v58 = vor.u32 %v17264_v42, %v12902_v36  ;;  %v17292_v54 = vld [vmem:[%s27355_s4 + $0xd34] sm:$0xf] }
 0x1dd   :  { %4508 = vmatpush.bf16.msra.mxu1 %v12681_v31  ;;  %v17298_v31 = vld [vmem:[%s27355_s4 + $0xd64] sm:$0xf]  ;;  %v13094_v25 = vld [vmem:[%s27355_s4 + $0xdd8] sm:$0xf0] }
 0x1de   :  { %4522 = vmatpush.bf16.msra.mxu2 %v12745_v47  ;;  %v13038_v47 = vld [vmem:[%s27355_s4 + $0xd68] sm:$0xf0]  ;;  %v12950_v56 = vld [vmem:[%s27355_s4 + $0xcb8] sm:$0xf0] }
 0x1df   :  { %4536 = vmatpush.bf16.msra.mxu3 %v12809_v60  ;;  %v12977_v60 = vor.u32 %v17282_v8, %v12974_v51  ;;  %v13041_v44 = vor.u32 %v17298_v31, %v13038_v47  ;;  %v12886_v51 = vld [vmem:[%s27355_s4 + $0xc38] sm:$0xf0]  ;;  %v17276_v31 = vld [vmem:[%s27355_s4 + $0xcb4] sm:$0xf] }
 0x1e0   :  { %4495 = vmatpush.bf16.msra.mxu0 %v12609_v0  ;;  %v17296_v0 = vld [vmem:[%s27355_s4 + $0xd54] sm:$0xf]  ;;  %v12953_v36 = vor.u32 %v17276_v31, %v12950_v56  ;;  %v12870_v41 = vld [vmem:[%s27355_s4 + $0xc18] sm:$0xf0]  ;;  %v12862_v31 = vld [vmem:[%s27355_s4 + $0xc08] sm:$0xf0] }
 0x1e1   :  { %4509 = vmatpush.bf16.msra.mxu1 %v12673_v4  ;;  %v12969_v4 = vor.u32 %v17280_v24, %v12966_v45  ;;  %v12878_v45 = vld [vmem:[%s27355_s4 + $0xc28] sm:$0xf0] }
 0x1e2   :  { %4523 = vmatpush.bf16.msra.mxu2 %v12737_v52  ;;  %v13033_v52 = vor.u32 %v17296_v0, %v13030_v61  ;;  %v17274_v0 = vld [vmem:[%s27355_s4 + $0xca4] sm:$0xf] }
 0x1e3   :  { %4537 = vmatpush.bf16.msra.mxu3 %v12801_v23  ;;  %4496 = vmatmul.bf16.vlgmr.msra.gmra.mxu0 %v19690_v26  ;;  %v17312_v26 = vld [vmem:[%s27355_s4 + $0xdd4] sm:$0xf]  ;;  %v17294_v23 = vld [vmem:[%s27355_s4 + $0xd44] sm:$0xf] }
 0x1e4   :  { %4544 = vmatpush.bf16.msrb.mxu0 %v12921_v16  ;;  %4510 = vmatmul.bf16.vlgmr.msra.gmra.mxu1 %v19703_v34  ;;  %v12894_v34 = vld [vmem:[%s27355_s4 + $0xc48] sm:$0xf0] }
 0x1e5   :  { %4558 = vmatpush.bf16.msrb.mxu1 %v12985_v9  ;;  %4524 = vmatmul.bf16.vlgmr.msra.gmra.mxu2 %v19701_v33  ;;  %v17262_v33 = vld [vmem:[%s27355_s4 + $0xc44] sm:$0xf]  ;;  %v13022_v16 = vld [vmem:[%s27355_s4 + $0xd48] sm:$0xf0] }
 0x1e6   :  { %4572 = vmatpush.bf16.msrb.mxu2 %v13049_v17  ;;  %4538 = vmatmul.bf16.vlgmr.msra.gmra.mxu3 %v19713_v48  ;;  %v13097_v48 = vor.u32 %v17312_v26, %v13094_v25  ;;  %v17310_v9 = vld [vmem:[%s27355_s4 + $0xdc4] sm:$0xf]  ;;  %v13086_v17 = vld [vmem:[%s27355_s4 + $0xdc8] sm:$0xf0]  ;;  %v12897_v63 = vor.u32 %v17262_v33, %v12894_v34  ;;  %v13025_v8 = vor.u32 %v17294_v23, %v13022_v16  ;;  %v17272_v23 = vld [vmem:[%s27355_s4 + $0xc94] sm:$0xf] }
 0x1e7   :  { %4586 = vmatpush.bf16.msrb.mxu3 %v13113_v6  ;;  %v17260_v6 = vld [vmem:[%s27355_s4 + $0xc34] sm:$0xf]  ;;  %v13089_v47 = vor.u32 %v17310_v9, %v13086_v17  ;;  %v12942_v26 = vld [vmem:[%s27355_s4 + $0xca8] sm:$0xf0]  ;;  %v17290_v25 = vld [vmem:[%s27355_s4 + $0xd24] sm:$0xf] }
 0x1e8   :  { %4545 = vmatpush.bf16.msrb.mxu0 %v12913_v37  ;;  %v13014_v37 = vld [vmem:[%s27355_s4 + $0xd38] sm:$0xf0]  ;;  %v12889_v42 = vor.u32 %v17260_v6, %v12886_v51  ;;  %v12945_v34 = vor.u32 %v17274_v0, %v12942_v26  ;;  %v17288_v17 = vld [vmem:[%s27355_s4 + $0xd14] sm:$0xf]  ;;  %v17254_v51 = vld [vmem:[%s27355_s4 + $0xc04] sm:$0xf] }
 0x1e9   :  { %4559 = vmatpush.bf16.msrb.mxu1 %v12977_v60  ;;  %v17308_v60 = vld [vmem:[%s27355_s4 + $0xdb4] sm:$0xf]  ;;  %v13017_v24 = vor.u32 %v17292_v54, %v13014_v37  ;;  %v12934_v9 = vld [vmem:[%s27355_s4 + $0xc98] sm:$0xf0]  ;;  %v17270_v54 = vld [vmem:[%s27355_s4 + $0xc84] sm:$0xf] }
 0x1ea   :  { %4573 = vmatpush.bf16.msrb.mxu2 %v13041_v44  ;;  %v13078_v44 = vld [vmem:[%s27355_s4 + $0xdb8] sm:$0xf0]  ;;  %v12926_v37 = vld [vmem:[%s27355_s4 + $0xc88] sm:$0xf0]  ;;  %v17348_v0 = vld [vmem:[%s27355_s4 + $0xef4] sm:$0xf] }
 0x1eb   :  { %4587 = vmatpush.bf16.msrb.mxu3 %v13105_v40  ;;  %v17258_v40 = vld [vmem:[%s27355_s4 + $0xc24] sm:$0xf]  ;;  %v13081_v61 = vor.u32 %v17308_v60, %v13078_v44  ;;  %v13238_v26 = vld [vmem:[%s27355_s4 + $0xef8] sm:$0xf0] }
 0x1ec   :  { %4546 = vmatpush.bf16.msrb.mxu0 %v12905_v58  ;;  %v13006_v58 = vld [vmem:[%s27355_s4 + $0xd28] sm:$0xf0]  ;;  %v12881_v33 = vor.u32 %v17258_v40, %v12878_v45  ;;  %v17286_v60 = vld [vmem:[%s27355_s4 + $0xd04] sm:$0xf]  ;;  %v17332_v40 = vld [vmem:[%s27355_s4 + $0xe74] sm:$0xf] }
 0x1ed   :  { %4560 = vmatpush.bf16.msrb.mxu1 %v12969_v4  ;;  %v17306_v4 = vld [vmem:[%s27355_s4 + $0xda4] sm:$0xf]  ;;  %v13009_v38 = vor.u32 %v17290_v25, %v13006_v58  ;;  %v13174_v45 = vld [vmem:[%s27355_s4 + $0xe78] sm:$0xf0]  ;;  %v17364_v25 = vld [vmem:[%s27355_s4 + $0xf74] sm:$0xf] }
 0x1ee   :  { %4574 = vmatpush.bf16.msrb.mxu2 %v13033_v52  ;;  %v13070_v52 = vld [vmem:[%s27355_s4 + $0xda8] sm:$0xf0]  ;;  %v13302_v58 = vld [vmem:[%s27355_s4 + $0xf78] sm:$0xf0] }
 0x1ef   :  { %4588 = vmatpush.bf16.msrb.mxu3 %v13097_v48  ;;  %v17256_v48 = vld [vmem:[%s27355_s4 + $0xc14] sm:$0xf]  ;;  %v13073_v16 = vor.u32 %v17306_v4, %v13070_v52  ;;  %v12929_v4 = vor.u32 %v17270_v54, %v12926_v37 }
 0x1f0   :  { %4547 = vmatpush.bf16.msrb.mxu0 %v12897_v63  ;;  %v12998_v63 = vld [vmem:[%s27355_s4 + $0xd18] sm:$0xf0]  ;;  %v12873_v6 = vor.u32 %v17256_v48, %v12870_v41  ;;  %v13177_v48 = vor.u32 %v17332_v40, %v13174_v45  ;;  %v13241_v41 = vor.u32 %v17348_v0, %v13238_v26  ;;  %v17328_v37 = vld [vmem:[%s27355_s4 + $0xe54] sm:$0xf] }
 0x1f1   :  { %4561 = vmatpush.bf16.msrb.mxu1 %v12961_v20  ;;  %v17304_v20 = vld [vmem:[%s27355_s4 + $0xd94] sm:$0xf]  ;;  %v13001_v56 = vor.u32 %v17288_v17, %v12998_v63  ;;  %v17346_v17 = vld [vmem:[%s27355_s4 + $0xee4] sm:$0xf]  ;;  %v13286_v45 = vld [vmem:[%s27355_s4 + $0xf58] sm:$0xf0] }
 0x1f2   :  { %4575 = vmatpush.bf16.msrb.mxu2 %v13025_v8  ;;  %v13062_v8 = vld [vmem:[%s27355_s4 + $0xd98] sm:$0xf0]  ;;  %v17360_v40 = vld [vmem:[%s27355_s4 + $0xf54] sm:$0xf] }
 0x1f3   :  { %4589 = vmatpush.bf16.msrb.mxu3 %v13089_v47  ;;  %v12937_v47 = vor.u32 %v17272_v23, %v12934_v9  ;;  %v13065_v44 = vor.u32 %v17304_v20, %v13062_v8  ;;  %v13305_v23 = vor.u32 %v17364_v25, %v13302_v58  ;;  %v13166_v9 = vld [vmem:[%s27355_s4 + $0xe68] sm:$0xf0]  ;;  %v17362_v8 = vld [vmem:[%s27355_s4 + $0xf64] sm:$0xf]  ;;  %v27385_v0 = vld [vmem:[#allocation3_spill] sm:$0xff] }
 0x1f4   :  { %4548 = vmatpush.bf16.msrb.mxu0 %v12889_v42  ;;  %v12990_v42 = vld [vmem:[%s27355_s4 + $0xd08] sm:$0xf0]  ;;  %v17376_v26 = vld [vmem:[%s27355_s4 + $0xfd4] sm:$0xf]  ;;  %v13350_v25 = vld [vmem:[%s27355_s4 + $0xfd8] sm:$0xf0] }
 0x1f5   :  { %4562 = vmatpush.bf16.msrb.mxu1 %v12953_v36  ;;  %v17302_v36 = vld [vmem:[%s27355_s4 + $0xd84] sm:$0xf]  ;;  %v12993_v52 = vor.u32 %v17286_v60, %v12990_v42  ;;  %v13230_v20 = vld [vmem:[%s27355_s4 + $0xee8] sm:$0xf0]  ;;  %v13158_v60 = vld [vmem:[%s27355_s4 + $0xe58] sm:$0xf0] }
 0x1f6   :  { %4576 = vmatpush.bf16.msrb.mxu2 %v13017_v24  ;;  %v13054_v24 = vld [vmem:[%s27355_s4 + $0xd88] sm:$0xf0]  ;;  %v27387_v58 = vld [vmem:[#allocation5_spill] sm:$0xff] }
 0x1f7   :  { %4590 = vmatpush.bf16.msrb.mxu3 %v13081_v61  ;;  %v12865_v61 = vor.u32 %v17254_v51, %v12862_v31  ;;  %v17378_v51 = vld [vmem:[%s27355_s4 + $0xfe4] sm:$0xf]  ;;  %v13358_v31 = vld [vmem:[%s27355_s4 + $0xfe8] sm:$0xf0] }
 0x1f8   :  { %4549 = vmatpush.bf16.msrb.mxu0 %v12881_v33  ;;  %v17380_v33 = vld [vmem:[%s27355_s4 + $0xff4] sm:$0xf]  ;;  %v27384_v42 = vld [vmem:[#allocation2_spill] sm:$0xff] }
 0x1f9   :  { %4563 = vmatpush.bf16.msrb.mxu1 %v12945_v34  ;;  %v13366_v34 = vld [vmem:[%s27355_s4 + $0xff8] sm:$0xf0] }
 0x1fa   :  { %4577 = vmatpush.bf16.msrb.mxu2 %v13009_v38  ;;  %v13057_v38 = vor.u32 %v17302_v36, %v13054_v24  ;;  %v13369_v63 = vor.u32 %v17380_v33, %v13366_v34  ;;  %v13361_v36 = vor.u32 %v17378_v51, %v13358_v31  ;;  %v13222_v24 = vld [vmem:[%s27355_s4 + $0xed8] sm:$0xf0]  ;;  %v13289_v33 = vor.u32 %v17360_v40, %v13286_v45  ;;  %v17326_v34 = vld [vmem:[%s27355_s4 + $0xe44] sm:$0xf]  ;;  %v17324_v51 = vld [vmem:[%s27355_s4 + $0xe34] sm:$0xf] }
 0x1fb   :  { %4591 = vmatpush.bf16.msrb.mxu3 %v13073_v16  ;;  %v17330_v16 = vld [vmem:[%s27355_s4 + $0xe64] sm:$0xf]  ;;  %v13142_v31 = vld [vmem:[%s27355_s4 + $0xe38] sm:$0xf0] }
 0x1fc   :  { %4550 = vmatpush.bf16.msrb.mxu0 %v12873_v6  ;;  %v13294_v6 = vld [vmem:[%s27355_s4 + $0xf68] sm:$0xf0]  ;;  %v17322_v45 = vld [vmem:[%s27355_s4 + $0xe24] sm:$0xf] }
 0x1fd   :  { %4564 = vmatpush.bf16.msrb.mxu1 %v12937_v47  ;;  %v13169_v47 = vor.u32 %v17330_v16, %v13166_v9  ;;  %v13297_v54 = vor.u32 %v17362_v8, %v13294_v6  ;;  %v17358_v16 = vld [vmem:[%s27355_s4 + $0xf44] sm:$0xf]  ;;  %v13278_v9 = vld [vmem:[%s27355_s4 + $0xf48] sm:$0xf0] }
 0x1fe   :  { %4578 = vmatpush.bf16.msrb.mxu2 %v13001_v56  ;;  %v13233_v56 = vor.u32 %v17346_v17, %v13230_v20  ;;  %v17374_v17 = vld [vmem:[%s27355_s4 + $0xfc4] sm:$0xf]  ;;  %v13281_v6 = vor.u32 %v17358_v16, %v13278_v9  ;;  %v17320_v16 = vld [vmem:[%s27355_s4 + $0xe14] sm:$0xf] }
 0x1ff   :  { %4592 = vmatpush.bf16.msrb.mxu3 %v13065_v44  ;;  %v17344_v44 = vld [vmem:[%s27355_s4 + $0xed4] sm:$0xf] }
 0x200   :  { %4551 = vmatpush.bf16.msrb.mxu0 %v12865_v61  ;;  %v27386_v61 = vld [vmem:[#allocation4_spill] sm:$0xff]  ;;  %v17336_v9 = vld [vmem:[%s27355_s4 + $0xe94] sm:$0xf] }
 0x201   :  { %4565 = vmatpush.bf16.msrb.mxu1 %v12929_v4  ;;  %v13161_v4 = vor.u32 %v17328_v37, %v13158_v60  ;;  %v17356_v37 = vld [vmem:[%s27355_s4 + $0xf34] sm:$0xf]  ;;  %v13270_v60 = vld [vmem:[%s27355_s4 + $0xf38] sm:$0xf0] }
 0x202   :  { %4579 = vmatpush.bf16.msrb.mxu2 %v12993_v52  ;;  %v13225_v52 = vor.u32 %v17344_v44, %v13222_v24  ;;  %v17372_v44 = vld [vmem:[%s27355_s4 + $0xfb4] sm:$0xf]  ;;  %v13273_v40 = vor.u32 %v17356_v37, %v13270_v60 }
 0x203   :  { %4593 = vmatpush.bf16.msrb.mxu3 %v13057_v38  ;;  %4552 = vmatmul.bf16.vlgmr.msrb.gmra.mxu0 %v27384_v42  ;;  %v13150_v38 = vld [vmem:[%s27355_s4 + $0xe48] sm:$0xf0]  ;;  %v13334_v42 = vld [vmem:[%s27355_s4 + $0xfb8] sm:$0xf0] }
 0x204   :  { %4600 = vmatpush.bf16.msra.mxu0 %v13177_v48  ;;  %4566 = vmatmul.bf16.vlgmr.msrb.gmra.mxu1 %v27386_v61  ;;  %v17342_v48 = vld [vmem:[%s27355_s4 + $0xec4] sm:$0xf]  ;;  %v13153_v20 = vor.u32 %v17326_v34, %v13150_v38  ;;  %v13326_v38 = vld [vmem:[%s27355_s4 + $0xfa8] sm:$0xf0] }
 0x205   :  { %4614 = vmatpush.bf16.msra.mxu1 %v13241_v41  ;;  %4580 = vmatmul.bf16.vlgmr.msrb.gmra.mxu2 %v27385_v0  ;;  %v13353_v41 = vor.u32 %v17376_v26, %v13350_v25  ;;  %v13134_v0 = vld [vmem:[%s27355_s4 + $0xe28] sm:$0xf0]  ;;  %v17338_v61 = vld [vmem:[%s27355_s4 + $0xea4] sm:$0xf]  ;;  %v13337_v26 = vor.u32 %v17372_v44, %v13334_v42 }
 0x206   :  { %4628 = vmatpush.bf16.msra.mxu2 %v13305_v23  ;;  %4594 = vmatmul.bf16.vlgmr.msrb.gmra.mxu3 %v27387_v58  ;;  %v13214_v23 = vld [vmem:[%s27355_s4 + $0xec8] sm:$0xf0]  ;;  %v17354_v58 = vld [vmem:[%s27355_s4 + $0xf24] sm:$0xf] }
 0x207   :  { %4642 = vmatpush.bf16.msra.mxu3 %v13369_v63  ;;  %v13342_v63 = vld [vmem:[%s27355_s4 + $0xfc8] sm:$0xf0]  ;;  %v13217_v8 = vor.u32 %v17342_v48, %v13214_v23  ;;  %v17370_v34 = vld [vmem:[%s27355_s4 + $0xfa4] sm:$0xf]  ;;  %v13137_v48 = vor.u32 %v17322_v45, %v13134_v0  ;;  %v17396_v0 = vld [vmem:[%s27355_s4 + $0x1074] sm:$0xf] }
 0x208   :  { %4601 = vmatpush.bf16.msra.mxu0 %v13169_v47  ;;  %v17340_v47 = vld [vmem:[%s27355_s4 + $0xeb4] sm:$0xf]  ;;  %v13198_v25 = vld [vmem:[%s27355_s4 + $0xea8] sm:$0xf0]  ;;  %v17334_v44 = vld [vmem:[%s27355_s4 + $0xe84] sm:$0xf] }
 0x209   :  { %4615 = vmatpush.bf16.msra.mxu1 %v13233_v56  ;;  %v13345_v56 = vor.u32 %v17374_v17, %v13342_v63  ;;  %v13329_v17 = vor.u32 %v17370_v34, %v13326_v38  ;;  %v13190_v63 = vld [vmem:[%s27355_s4 + $0xe98] sm:$0xf0]  ;;  %v13182_v42 = vld [vmem:[%s27355_s4 + $0xe88] sm:$0xf0] }
 0x20a   :  { %4629 = vmatpush.bf16.msra.mxu2 %v13297_v54  ;;  %v13206_v54 = vld [vmem:[%s27355_s4 + $0xeb8] sm:$0xf0]  ;;  %v13193_v37 = vor.u32 %v17336_v9, %v13190_v63  ;;  %v13310_v45 = vld [vmem:[%s27355_s4 + $0xf88] sm:$0xf0]  ;;  %v13185_v34 = vor.u32 %v17334_v44, %v13182_v42  ;;  %v17408_v42 = vld [vmem:[%s27355_s4 + $0x10d4] sm:$0xf] }
 0x20b   :  { %4643 = vmatpush.bf16.msra.mxu3 %v13361_v36  ;;  %v13145_v36 = vor.u32 %v17324_v51, %v13142_v31  ;;  %v13209_v24 = vor.u32 %v17340_v47, %v13206_v54  ;;  %v17368_v51 = vld [vmem:[%s27355_s4 + $0xf94] sm:$0xf]  ;;  %v13318_v31 = vld [vmem:[%s27355_s4 + $0xf98] sm:$0xf0]  ;;  %v13118_v54 = vld [vmem:[%s27355_s4 + $0xe08] sm:$0xf0] }
 0x20c   :  { %4602 = vmatpush.bf16.msra.mxu0 %v13161_v4  ;;  %v13262_v4 = vld [vmem:[%s27355_s4 + $0xf28] sm:$0xf0]  ;;  %v13414_v44 = vld [vmem:[%s27355_s4 + $0x1058] sm:$0xf0] }
 0x20d   :  { %4616 = vmatpush.bf16.msra.mxu1 %v13225_v52  ;;  %v27388_v52 = vld [vmem:[#allocation10_spill] sm:$0xff]  ;;  %v13265_v23 = vor.u32 %v17354_v58, %v13262_v4  ;;  %v13494_v58 = vld [vmem:[%s27355_s4 + $0x10f8] sm:$0xf0]  ;;  %v17428_v4 = vld [vmem:[%s27355_s4 + $0x1174] sm:$0xf] }
 0x20e   :  { %4630 = vmatpush.bf16.msra.mxu2 %v13289_v33  ;;  %v3938_v33 = vadd.f32 %v20805_v5, %v27388_v52  ;;  %v13126_v5 = vld [vmem:[%s27355_s4 + $0xe18] sm:$0xf0]  ;;  %v13422_v63 = vld [vmem:[%s27355_s4 + $0x1068] sm:$0xf0] }
 0x20f   :  { %4644 = vmatpush.bf16.msra.mxu3 %v13353_v41  ;;  %v13201_v41 = vor.u32 %v17338_v61, %v13198_v25  ;;  %v13129_v47 = vor.u32 %v17320_v16, %v13126_v5  ;;  %v13430_v61 = vld [vmem:[%s27355_s4 + $0x1078] sm:$0xf0] }
 0x210   :  { %4603 = vmatpush.bf16.msra.mxu0 %v13153_v20  ;;  %v17352_v20 = vld [vmem:[%s27355_s4 + $0xf14] sm:$0xf]  ;;  %v13558_v52 = vld [vmem:[%s27355_s4 + $0x1178] sm:$0xf0]  ;;  %v13433_v16 = vor.u32 %v17396_v0, %v13430_v61 }
 0x211   :  { %4617 = vmatpush.bf16.msra.mxu1 %v13217_v8  ;;  %v13254_v8 = vld [vmem:[%s27355_s4 + $0xf18] sm:$0xf0]  ;;  %v27390_v0 = vld [vmem:[#allocation7_spill] sm:$0xff] }
 0x212   :  { %4631 = vmatpush.bf16.msra.mxu2 %v13281_v6  ;;  %v3952_v6 = vadd.f32 %v20813_v21, %v3938_v33  ;;  %v13257_v60 = vor.u32 %v17352_v20, %v13254_v8  ;;  %v17410_v20 = vld [vmem:[%s27355_s4 + $0x10e4] sm:$0xf]  ;;  %v27391_v61 = vld [vmem:[#allocation8_spill] sm:$0xff] }
 0x213   :  { %4645 = vmatpush.bf16.msra.mxu3 %v13345_v56  ;;  %v17318_v56 = vld [vmem:[%s27355_s4 + $0xe04] sm:$0xf] }
 0x214   :  { %4604 = vmatpush.bf16.msra.mxu0 %v13145_v36  ;;  %v3966_v21 = vadd.f32 %v20850_v10, %v3952_v6  ;;  %v17350_v36 = vld [vmem:[%s27355_s4 + $0xf04] sm:$0xf]  ;;  %v13246_v10 = vld [vmem:[%s27355_s4 + $0xf08] sm:$0xf0]  ;;  %v13121_v25 = vor.u32 %v17318_v56, %v13118_v54 }
 0x215   :  { %4618 = vmatpush.bf16.msra.mxu1 %v13209_v24  ;;  %v13321_v24 = vor.u32 %v17368_v51, %v13318_v31  ;;  %v13249_v38 = vor.u32 %v17350_v36, %v13246_v10  ;;  %v17426_v6 = vld [vmem:[%s27355_s4 + $0x1164] sm:$0xf]  ;;  %v13550_v51 = vld [vmem:[%s27355_s4 + $0x1168] sm:$0xf0]  ;;  %v17424_v10 = vld [vmem:[%s27355_s4 + $0x1154] sm:$0xf] }
 0x216   :  { %4632 = vmatpush.bf16.msra.mxu2 %v13273_v40  ;;  %v17366_v40 = vld [vmem:[%s27355_s4 + $0xf84] sm:$0xf]  ;;  %v3980_v33 = vadd.f32 %v20863_v3, %v3966_v21  ;;  %v27389_v36 = vld [vmem:[#allocation6_spill] sm:$0xff] }
 0x217   :  { %4646 = vmatpush.bf16.msra.mxu3 %v13337_v26  ;;  %v17412_v26 = vld [vmem:[%s27355_s4 + $0x10f4] sm:$0xf]  ;;  %v17394_v3 = vld [vmem:[%s27355_s4 + $0x1064] sm:$0xf] }
 0x218   :  { %4605 = vmatpush.bf16.msra.mxu0 %v13137_v48  ;;  %v17444_v48 = vld [vmem:[%s27355_s4 + $0x11f4] sm:$0xf]  ;;  %v3994_v5 = vadd.f32 %v20933_v53, %v3980_v33  ;;  %v13497_v9 = vor.u32 %v17412_v26, %v13494_v58  ;;  %v13486_v53 = vld [vmem:[%s27355_s4 + $0x10e8] sm:$0xf0]  ;;  %v17442_v31 = vld [vmem:[%s27355_s4 + $0x11e4] sm:$0xf]  ;;  %v13425_v56 = vor.u32 %v17394_v3, %v13422_v63 }
 0x219   :  { %4619 = vmatpush.bf16.msra.mxu1 %v13201_v41  ;;  %v13622_v41 = vld [vmem:[%s27355_s4 + $0x11f8] sm:$0xf0]  ;;  %v13489_v21 = vor.u32 %v17410_v20, %v13486_v53  ;;  %v17440_v26 = vld [vmem:[%s27355_s4 + $0x11d4] sm:$0xf]  ;;  %v27392_v58 = vld [vmem:[#allocation9_spill] sm:$0xff] }
 0x21a   :  { %4633 = vmatpush.bf16.msra.mxu2 %v13265_v23  ;;  %v13313_v23 = vor.u32 %v17366_v40, %v13310_v45  ;;  %v13625_v8 = vor.u32 %v17444_v48, %v13622_v41  ;;  %v4008_v54 = vadd.f32 %v20944_v43, %v3994_v5  ;;  %v13542_v40 = vld [vmem:[%s27355_s4 + $0x1158] sm:$0xf0]  ;;  %v17390_v33 = vld [vmem:[%s27355_s4 + $0x1044] sm:$0xf]  ;;  %v13470_v41 = vld [vmem:[%s27355_s4 + $0x10c8] sm:$0xf0] }
 0x21b   :  { %4647 = vmatpush.bf16.msra.mxu3 %v13329_v17  ;;  %v13561_v17 = vor.u32 %v17428_v4, %v13558_v52  ;;  %v13398_v53 = vld [vmem:[%s27355_s4 + $0x1038] sm:$0xf0] }
 0x21c   :  { %4606 = vmatpush.bf16.msra.mxu0 %v13129_v47  ;;  %v13614_v47 = vld [vmem:[%s27355_s4 + $0x11e8] sm:$0xf0]  ;;  %v4022_v45 = vadd.f32 %v20987_v30, %v4008_v54  ;;  %v13545_v30 = vor.u32 %v17424_v10, %v13542_v40  ;;  %v13590_v54 = vld [vmem:[%s27355_s4 + $0x11b8] sm:$0xf0]  ;;  %v17418_v10 = vld [vmem:[%s27355_s4 + $0x1124] sm:$0xf] }
 0x21d   :  { %4620 = vmatpush.bf16.msra.mxu1 %v13193_v37  ;;  %v13553_v37 = vor.u32 %v17426_v6, %v13550_v51  ;;  %v13617_v43 = vor.u32 %v17442_v31, %v13614_v47  ;;  %v17404_v6 = vld [vmem:[%s27355_s4 + $0x10b4] sm:$0xf]  ;;  %v13526_v47 = vld [vmem:[%s27355_s4 + $0x1138] sm:$0xf0]  ;;  %v13518_v40 = vld [vmem:[%s27355_s4 + $0x1128] sm:$0xf0] }
 0x21e   :  { %4634 = vmatpush.bf16.msra.mxu2 %v13257_v60  ;;  %v17392_v60 = vld [vmem:[%s27355_s4 + $0x1054] sm:$0xf]  ;;  %v4036_v5 = vadd.f32 %v20996_v15, %v4022_v45 }
 0x21f   :  { %4648 = vmatpush.bf16.msra.mxu3 %v13321_v24  ;;  %v13478_v24 = vld [vmem:[%s27355_s4 + $0x10d8] sm:$0xf0]  ;;  %v13417_v4 = vor.u32 %v17392_v60, %v13414_v44  ;;  %v17388_v15 = vld [vmem:[%s27355_s4 + $0x1034] sm:$0xf] }
 0x220   :  { %4607 = vmatpush.bf16.msra.mxu0 %v13121_v25  ;;  %v13606_v25 = vld [vmem:[%s27355_s4 + $0x11d8] sm:$0xf0]  ;;  %v13481_v52 = vor.u32 %v17408_v42, %v13478_v24  ;;  %v4050_v63 = vadd.f32 %v21075_v2, %v4036_v5  ;;  %v17420_v31 = vld [vmem:[%s27355_s4 + $0x1134] sm:$0xf]  ;;  %v17386_v42 = vld [vmem:[%s27355_s4 + $0x1024] sm:$0xf] }
 0x221   :  { %4621 = vmatpush.bf16.msra.mxu1 %v13185_v34  ;;  %v13406_v34 = vld [vmem:[%s27355_s4 + $0x1048] sm:$0xf0]  ;;  %v13609_v48 = vor.u32 %v17440_v26, %v13606_v25  ;;  %v13462_v2 = vld [vmem:[%s27355_s4 + $0x10b8] sm:$0xf0]  ;;  %v13529_v44 = vor.u32 %v17420_v31, %v13526_v47  ;;  %v13687_v31 = vld [vmem:[%s27355_s4 + $0x1270] sm:$0xf] }
 0x222   :  { %4635 = vmatpush.bf16.msra.mxu2 %v13249_v38  ;;  %v17406_v38 = vld [vmem:[%s27355_s4 + $0x10c4] sm:$0xf]  ;;  %v13409_v3 = vor.u32 %v17390_v33, %v13406_v34  ;;  %v13465_v60 = vor.u32 %v17404_v6, %v13462_v2  ;;  %v13446_v33 = vld [vmem:[%s27355_s4 + $0x1098] sm:$0xf0]  ;;  %v17416_v34 = vld [vmem:[%s27355_s4 + $0x1114] sm:$0xf] }
 0x223   :  { %4649 = vmatpush.bf16.msra.mxu3 %v13313_v23  ;;  %4608 = vmatmul.bf16.vlgmr.msra.gmra.mxu0 %v27389_v36  ;;  %v17422_v23 = vld [vmem:[%s27355_s4 + $0x1144] sm:$0xf]  ;;  %v13473_v20 = vor.u32 %v17406_v38, %v13470_v41  ;;  %v13390_v36 = vld [vmem:[%s27355_s4 + $0x1028] sm:$0xf0]  ;;  %v13510_v38 = vld [vmem:[%s27355_s4 + $0x1118] sm:$0xf0] }
 0x224   :  { %4656 = vmatpush.bf16.msrb.mxu0 %v13433_v16  ;;  %4622 = vmatmul.bf16.vlgmr.msra.gmra.mxu1 %v27391_v61  ;;  %v13534_v16 = vld [vmem:[%s27355_s4 + $0x1148] sm:$0xf0]  ;;  %v13393_v26 = vor.u32 %v17386_v42, %v13390_v36  ;;  %v17432_v41 = vld [vmem:[%s27355_s4 + $0x1194] sm:$0xf]  ;;  %v17430_v6 = vld [vmem:[%s27355_s4 + $0x1184] sm:$0xf] }
 0x225   :  { %4670 = vmatpush.bf16.msrb.mxu1 %v13497_v9  ;;  %4636 = vmatmul.bf16.vlgmr.msra.gmra.mxu2 %v27390_v0  ;;  %v17438_v9 = vld [vmem:[%s27355_s4 + $0x11c4] sm:$0xf]  ;;  %v13582_v61 = vld [vmem:[%s27355_s4 + $0x11a8] sm:$0xf0]  ;;  %v17461_v47 = vld [vmem:[%s27355_s4 + $0x1274] sm:$0xf0] }
 0x226   :  { %4684 = vmatpush.bf16.msrb.mxu2 %v13561_v17  ;;  %4650 = vmatmul.bf16.vlgmr.msra.gmra.mxu3 %v27392_v58  ;;  %v13598_v17 = vld [vmem:[%s27355_s4 + $0x11c8] sm:$0xf0]  ;;  %v17434_v0 = vld [vmem:[%s27355_s4 + $0x11a4] sm:$0xf]  ;;  %v13521_v58 = vor.u32 %v17418_v10, %v13518_v40  ;;  %v13688_v36 = vor.u32 %v17461_v47, %v13687_v31  ;;  %v13679_v10 = vld [vmem:[%s27355_s4 + $0x1260] sm:$0xf]  ;;  %v22308_v40 = vpop.f32.mrf.mxu3 }
 0x227   :  { %4698 = vmatpush.bf16.msrb.mxu3 %v13625_v8  ;;  %v13537_v8 = vor.u32 %v17422_v23, %v13534_v16  ;;  %v13601_v51 = vor.u32 %v17438_v9, %v13598_v17  ;;  %v13574_v23 = vld [vmem:[%s27355_s4 + $0x1198] sm:$0xf0]  ;;  %v22257_v16 = vpop.f32.mrf.mxu0  ;;  %v17382_v9 = vld [vmem:[%s27355_s4 + $0x1004] sm:$0xf]  ;;  %v13566_v2 = vld [vmem:[%s27355_s4 + $0x1188] sm:$0xf0] }
 0x228   :  { %4657 = vmatpush.bf16.msrb.mxu0 %v13425_v56  ;;  %v17436_v56 = vld [vmem:[%s27355_s4 + $0x11b4] sm:$0xf]  ;;  %v13569_v42 = vor.u32 %v17430_v6, %v13566_v2  ;;  %v17451_v6 = vld [vmem:[%s27355_s4 + $0x1224] sm:$0xf0]  ;;  %v17450_v2 = vld [vmem:[%s27355_s4 + $0x1224] sm:$0xf] }
 0x229   :  { %4671 = vmatpush.bf16.msrb.mxu1 %v13489_v21  ;;  %v13401_v21 = vor.u32 %v17388_v15, %v13398_v53  ;;  %v13593_v24 = vor.u32 %v17436_v56, %v13590_v54  ;;  %v13577_v15 = vor.u32 %v17432_v41, %v13574_v23  ;;  %v13502_v53 = vld [vmem:[%s27355_s4 + $0x1108] sm:$0xf0]  ;;  %v17460_v54 = vld [vmem:[%s27355_s4 + $0x1274] sm:$0xf] }
 0x22a   :  { %4685 = vmatpush.bf16.msrb.mxu2 %v13553_v37  ;;  %v4064_v37 = vadd.f32 %v21086_v14, %v4050_v63  ;;  %v13454_v14 = vld [vmem:[%s27355_s4 + $0x10a8] sm:$0xf0] }
 0x22b   :  { %4699 = vmatpush.bf16.msrb.mxu3 %v13617_v43  ;;  %v17402_v43 = vld [vmem:[%s27355_s4 + $0x10a4] sm:$0xf]  ;;  %v13374_v63 = vld [vmem:[%s27355_s4 + $0x1008] sm:$0xf0] }
 0x22c   :  { %4658 = vmatpush.bf16.msrb.mxu0 %v13417_v4  ;;  %v4078_v45 = vadd.f32 %v21133_v12, %v4064_v37  ;;  %v13457_v25 = vor.u32 %v17402_v43, %v13454_v14  ;;  %v17384_v4 = vld [vmem:[%s27355_s4 + $0x1014] sm:$0xf]  ;;  %v13382_v12 = vld [vmem:[%s27355_s4 + $0x1018] sm:$0xf0]  ;;  %v13377_v56 = vor.u32 %v17382_v9, %v13374_v63 }
 0x22d   :  { %4672 = vmatpush.bf16.msrb.mxu1 %v13481_v52  ;;  %v17400_v52 = vld [vmem:[%s27355_s4 + $0x1094] sm:$0xf]  ;;  %v13385_v5 = vor.u32 %v17384_v4, %v13382_v12  ;;  %v17457_v4 = vld [vmem:[%s27355_s4 + $0x1254] sm:$0xf0] }
 0x22e   :  { %4686 = vmatpush.bf16.msrb.mxu2 %v13545_v30  ;;  %v13585_v30 = vor.u32 %v17434_v0, %v13582_v61  ;;  %v22353_v23 = vpop.f32.mrf.mxu3 }
 0x22f   :  { %4700 = vmatpush.bf16.msrb.mxu3 %v13609_v48  ;;  %v4092_v48 = vadd.f32 %v21136_v19, %v4078_v45  ;;  %v13449_v19 = vor.u32 %v17400_v52, %v13446_v33  ;;  %v17458_v45 = vld [vmem:[%s27355_s4 + $0x1264] sm:$0xf]  ;;  %v22316_v0 = vpop.f32.mrf.mxu0 }
 0x230   :  { %4659 = vmatpush.bf16.msrb.mxu0 %v13409_v3  ;;  %v13513_v3 = vor.u32 %v17416_v34, %v13510_v38  ;;  %v17455_v34 = vld [vmem:[%s27355_s4 + $0x1244] sm:$0xf0]  ;;  %v13665_v38 = vld [vmem:[%s27355_s4 + $0x1248] sm:$0xf0] }
 0x231   :  { %4673 = vmatpush.bf16.msrb.mxu1 %v13473_v20  ;;  %v4106_v17 = vadd.f32 %v21211_v62, %v4092_v48  ;;  %v17398_v20 = vld [vmem:[%s27355_s4 + $0x1084] sm:$0xf] }
 0x232   :  { %4687 = vmatpush.bf16.msrb.mxu2 %v13537_v8  ;;  %v13438_v8 = vld [vmem:[%s27355_s4 + $0x1088] sm:$0xf0]  ;;  %v17414_v62 = vld [vmem:[%s27355_s4 + $0x1104] sm:$0xf] }
 0x233   :  { %4701 = vmatpush.bf16.msrb.mxu3 %v13601_v51  ;;  %v22281_v51 = vpop.f32.mrf.mxu1  ;;  %v4120_v37 = vadd.f32 %v21219_v59, %v4106_v17  ;;  %v17459_v59 = vld [vmem:[%s27355_s4 + $0x1264] sm:$0xf0] }
 0x234   :  { %4660 = vmatpush.bf16.msrb.mxu0 %v13401_v21  ;;  %v13689_v21 = vld [vmem:[%s27355_s4 + $0x1278] sm:$0xf0]  ;;  %v13680_v61 = vor.u32 %v17459_v59, %v13679_v10 }
 0x235   :  { %4674 = vmatpush.bf16.msrb.mxu1 %v13465_v60  ;;  %v13441_v60 = vor.u32 %v17398_v20, %v13438_v8  ;;  %v4134_v43 = vadd.f32 %v21270_v1, %v4120_v37  ;;  %v13692_v14 = vor.u32 %v17460_v54, %v13689_v21  ;;  %v13681_v1 = vld [vmem:[%s27355_s4 + $0x1268] sm:$0xf0]  ;;  %v13639_v21 = vld [vmem:[%s27355_s4 + $0x1210] sm:$0xf]  ;;  %v17449_v37 = vld [vmem:[%s27355_s4 + $0x1214] sm:$0xf0] }
 0x236   :  { %4688 = vmatpush.bf16.msrb.mxu2 %v13529_v44  ;;  %v13505_v44 = vor.u32 %v17414_v62, %v13502_v53  ;;  %v13647_v53 = vld [vmem:[%s27355_s4 + $0x1220] sm:$0xf] }
 0x237   :  { %4702 = vmatpush.bf16.msrb.mxu3 %v13593_v24  ;;  %v22300_v24 = vpop.f32.mrf.mxu2  ;;  %v22362_v63 = vpop.f32.mrf.mxu0  ;;  %v13648_v31 = vor.u32 %v17451_v6, %v13647_v53  ;;  %v17486_v6 = vld [vmem:[%s27355_s4 + $0x1344] sm:$0xf] }
 0x238   :  { %4661 = vmatpush.bf16.msrb.mxu0 %v13393_v26  ;;  %v4148_v26 = vadd.f32 %v21273_v13, %v4134_v43  ;;  %v17456_v13 = vld [vmem:[%s27355_s4 + $0x1254] sm:$0xf]  ;;  %v13640_v43 = vor.u32 %v17449_v37, %v13639_v21  ;;  %v13783_v37 = vld [vmem:[%s27355_s4 + $0x1330] sm:$0xf] }
 0x239   :  { %4675 = vmatpush.bf16.msrb.mxu1 %v13457_v25  ;;  %v13684_v25 = vor.u32 %v17458_v45, %v13681_v1  ;;  %v13631_v45 = vld [vmem:[%s27355_s4 + $0x1200] sm:$0xf]  ;;  %v17447_v1 = vld [vmem:[%s27355_s4 + $0x1204] sm:$0xf0] }
 0x23a   :  { %4689 = vmatpush.bf16.msrb.mxu2 %v13521_v58  ;;  %v13671_v58 = vld [vmem:[%s27355_s4 + $0x1250] sm:$0xf]  ;;  %v4162_v12 = vadd.f32 %v21346_v57, %v4148_v26  ;;  %v17454_v57 = vld [vmem:[%s27355_s4 + $0x1244] sm:$0xf]  ;;  %v17493_v26 = vld [vmem:[%s27355_s4 + $0x1374] sm:$0xf0] }
 0x23b   :  { %4703 = vmatpush.bf16.msrb.mxu3 %v13585_v30  ;;  %v22335_v52 = vpop.f32.mrf.mxu1  ;;  %v27393_v30 = vld [vmem:[#allocation11_spill] sm:$0xff]  ;;  %v13672_v33 = vor.u32 %v17457_v4, %v13671_v58  ;;  %v13668_v17 = vor.u32 %v17454_v57, %v13665_v38  ;;  %v13817_v58 = vld [vmem:[%s27355_s4 + $0x1378] sm:$0xf0]  ;;  %v13632_v4 = vor.u32 %v17447_v1, %v13631_v45  ;;  %v13775_v45 = vld [vmem:[%s27355_s4 + $0x1320] sm:$0xf] }
 0x23c   :  { %4662 = vmatpush.bf16.msrb.mxu0 %v13385_v5  ;;  %v4176_v48 = vadd.f32 %v21354_v49, %v4162_v12  ;;  %v17452_v49 = vld [vmem:[%s27355_s4 + $0x1234] sm:$0xf]  ;;  %v17483_v1 = vld [vmem:[%s27355_s4 + $0x1324] sm:$0xf0] }
 0x23d   :  { %4676 = vmatpush.bf16.msrb.mxu1 %v13449_v19  ;;  %v13655_v19 = vld [vmem:[%s27355_s4 + $0x1230] sm:$0xf] }
 0x23e   :  { %4690 = vmatpush.bf16.msrb.mxu2 %v13513_v3  ;;  %v4190_v9 = vadd.f32 %v21389_v29, %v4176_v48  ;;  %v17453_v3 = vld [vmem:[%s27355_s4 + $0x1234] sm:$0xf0]  ;;  %v13657_v29 = vld [vmem:[%s27355_s4 + $0x1238] sm:$0xf0] }
 0x23f   :  { %4704 = vmatpush.bf16.msrb.mxu3 %v13577_v15  ;;  %v22351_v41 = vpop.f32.mrf.mxu2  ;;  %v13656_v20 = vor.u32 %v17453_v3, %v13655_v19  ;;  %v13660_v62 = vor.u32 %v17452_v49, %v13657_v29  ;;  %v17488_v3 = vld [vmem:[%s27355_s4 + $0x1354] sm:$0xf]  ;;  %v13801_v49 = vld [vmem:[%s27355_s4 + $0x1358] sm:$0xf0] }
 0x240   :  { %4663 = vmatpush.bf16.msrb.mxu0 %v13377_v56  ;;  %v4204_v8 = vadd.f32 %v21400_v46, %v4190_v9  ;;  %v13649_v46 = vld [vmem:[%s27355_s4 + $0x1228] sm:$0xf0]  ;;  %v13799_v9 = vld [vmem:[%s27355_s4 + $0x1350] sm:$0xf] }
 0x241   :  { %4677 = vmatpush.bf16.msrb.mxu1 %v13441_v60  ;;  %v13652_v54 = vor.u32 %v17450_v2, %v13649_v46  ;;  %v22393_v60 = vpop.f32.mrf.mxu3  ;;  %v13793_v2 = vld [vmem:[%s27355_s4 + $0x1348] sm:$0xf0]  ;;  %v4220_v46 = vadd.f32 %v22257_v16, %v641_v55  ;;  %v13785_v55 = vld [vmem:[%s27355_s4 + $0x1338] sm:$0xf0] }
 0x242   :  { %4691 = vmatpush.bf16.msrb.mxu2 %v13505_v44  ;;  %v4712_v47 = vmax.f32 %v4204_v8, 0.0  ;;  %v22395_v44 = vpop.f32.mrf.mxu0  ;;  %v13791_v8 = vld [vmem:[%s27355_s4 + $0x1340] sm:$0xf]  ;;  %v13796_v21 = vor.u32 %v17486_v6, %v13793_v2 }
 0x243   :  { %4705 = vmatpush.bf16.msrb.mxu3 %v13569_v42  ;;  %4664 = vmatmul.bf16.vlgmr.msrb.gmra.mxu0 %v20405_v27  ;;  %v13673_v27 = vld [vmem:[%s27355_s4 + $0x1258] sm:$0xf0]  ;;  %v22371_v15 = vpop.f32.mrf.mxu1  ;;  %v17448_v42 = vld [vmem:[%s27355_s4 + $0x1214] sm:$0xf]  ;;  %v4234_v16 = vadd.f32 %v22281_v51, %v4220_v46  ;;  %v17482_v51 = vld [vmem:[%s27355_s4 + $0x1324] sm:$0xf] }
 0x244   :  { %4934 = vmatpush.bf16.msra.mxu0 %v13688_v36  ;;  %4678 = vmatmul.bf16.vlgmr.msrb.gmra.mxu1 %v20418_v50  ;;  %v13676_v50 = vor.u32 %v17456_v13, %v13673_v27  ;;  %v13641_v36 = vld [vmem:[%s27355_s4 + $0x1218] sm:$0xf0]  ;;  %v13935_v2 = vld [vmem:[%s27355_s4 + $0x1460] sm:$0xf]  ;;  %v17523_v46 = vld [vmem:[%s27355_s4 + $0x1464] sm:$0xf0] }
 0x245   :  { %4692 = vmatmul.bf16.vlgmr.msrb.gmra.mxu2 %v20416_v28  ;;  %v13663_v28 = vld [vmem:[%s27355_s4 + $0x1240] sm:$0xf]  ;;  %v13644_v59 = vor.u32 %v17448_v42, %v13641_v36  ;;  %v17485_v42 = vld [vmem:[%s27355_s4 + $0x1334] sm:$0xf0] }
 0x246   :  { %4960 = vmatpush.bf16.msra.mxu2 %v13692_v14  ;;  %4706 = vmatmul.bf16.vlgmr.msrb.gmra.mxu3 %v27393_v30  ;;  %v13664_v5 = vor.u32 %v17455_v34, %v13663_v28  ;;  %v4723_v14 = vmul.f32 %v4719_v35, %v4712_v47  ;;  %v13815_v35 = vld [vmem:[%s27355_s4 + $0x1370] sm:$0xf]  ;;  %v13807_v28 = vld [vmem:[%s27355_s4 + $0x1360] sm:$0xf]  ;;  %v17491_v34 = vld [vmem:[%s27355_s4 + $0x1364] sm:$0xf0] }
 0x247   :  { %v22385_v56 = vpop.f32.mrf.mxu2  ;;  %v13816_v30 = vor.u32 %v17493_v26, %v13815_v35  ;;  %v13808_v48 = vor.u32 %v17491_v34, %v13807_v28  ;;  %v13776_v35 = vor.u32 %v17483_v1, %v13775_v45 }
 0x248   :  { %4935 = vmatpush.bf16.msra.mxu0 %v13680_v61  ;;  %v17446_v61 = vld [vmem:[%s27355_s4 + $0x1204] sm:$0xf]  ;;  %v4734_v13 = vadd.f32 %v4730_v11, %v4723_v14  ;;  %v13809_v11 = vld [vmem:[%s27355_s4 + $0x1368] sm:$0xf0]  ;;  %v4274_v14 = vadd.f32 %v22316_v0, %v21639_v18  ;;  %v4248_v0 = vadd.f32 %v22300_v24, %v4234_v16  ;;  %v17480_v24 = vld [vmem:[%s27355_s4 + $0x1314] sm:$0xf] }
 0x249   :  { %v13636_v12 = vor.u32 %v17446_v61, %v13633_v32  ;;  %v13777_v18 = vld [vmem:[%s27355_s4 + $0x1328] sm:$0xf0]  ;;  %v17522_v16 = vld [vmem:[%s27355_s4 + $0x1464] sm:$0xf] }
 0x24a   :  { %4961 = vmatpush.bf16.msra.mxu2 %v13684_v25  ;;  %v17492_v25 = vld [vmem:[%s27355_s4 + $0x1374] sm:$0xf]  ;;  %v22449_v57 = vpop.f32.mrf.mxu0  ;;  %v22451_v38 = vpack.c.bf16 %v4734_v13, %v4734_v13  ;;  %v4288_v26 = vadd.f32 %v22335_v52, %v4274_v14  ;;  %v17481_v13 = vld [vmem:[%s27355_s4 + $0x1314] sm:$0xf0]  ;;  %v13769_v52 = vld [vmem:[%s27355_s4 + $0x1318] sm:$0xf0] }
 0x24b   :  { %v22405_v10 = vpop.f32.mrf.mxu1  ;;  %v13772_v34 = vor.u32 %v17480_v24, %v13769_v52  ;;  %v17520_v24 = vld [vmem:[%s27355_s4 + $0x1454] sm:$0xf]  ;;  %v13929_v52 = vld [vmem:[%s27355_s4 + $0x1458] sm:$0xf0] }
 0x24c   :  { %4936 = vmatpush.bf16.msra.mxu0 %v13672_v33  ;;  %v22435_v33 = vpop.f32.mrf.mxu3  ;;  %v4302_v28 = vadd.f32 %v22351_v41, %v4288_v26  ;;  %v13943_v41 = vld [vmem:[%s27355_s4 + $0x1470] sm:$0xf]  ;;  %v5027_v1 = vrot.slane %v22451_v38, 1 }
 0x24e   :  { %4962 = vmatpush.bf16.msra.mxu2 %v13676_v50  ;;  %v13820_v50 = vor.u32 %v17492_v25, %v13817_v58  ;;  %v13780_v58 = vor.u32 %v17482_v51, %v13777_v18  ;;  %v13743_v18 = vld [vmem:[%s27355_s4 + $0x12e0] sm:$0xf] }
 0x24f   :  { %v22433_v27 = vpop.f32.mrf.mxu2 }
 0x250   :  { %4937 = vmatpush.bf16.msra.mxu0 %v13664_v5  ;;  %v13812_v5 = vor.u32 %v17490_v22, %v13809_v11  ;;  %v13759_v22 = vld [vmem:[%s27355_s4 + $0x1300] sm:$0xf]  ;;  %v17479_v11 = vld [vmem:[%s27355_s4 + $0x1304] sm:$0xf0] }
 0x252   :  { %4963 = vmatpush.bf16.msra.mxu2 %v13668_v17  ;;  %v17489_v17 = vld [vmem:[%s27355_s4 + $0x1354] sm:$0xf0]  ;;  %v22488_v47 = vpop.f32.mrf.mxu0 }
 0x253   :  { %v22459_v19 = vpop.f32.mrf.mxu1  ;;  %v13800_v29 = vor.u32 %v17489_v17, %v13799_v9  ;;  %v17524_v17 = vld [vmem:[%s27355_s4 + $0x1474] sm:$0xf] }
 0x254   :  { %4938 = vmatpush.bf16.msra.mxu0 %v13656_v20  ;;  %v13804_v20 = vor.u32 %v17488_v3, %v13801_v49  ;;  %v13945_v3 = vld [vmem:[%s27355_s4 + $0x1478] sm:$0xf0] }
 0x256   :  { %4964 = vmatpush.bf16.msra.mxu2 %v13660_v62  ;;  %v17487_v62 = vld [vmem:[%s27355_s4 + $0x1344] sm:$0xf0] }
 0x257   :  { %v22475_v53 = vpop.f32.mrf.mxu2 }
 0x258   :  { %4939 = vmatpush.bf16.msra.mxu0 %v13648_v31  ;;  %v22486_v31 = vpop.f32.mrf.mxu3 }
 0x25a   :  { %4965 = vmatpush.bf16.msra.mxu2 %v13652_v54  ;;  %v13792_v54 = vor.u32 %v17487_v62, %v13791_v8  ;;  %v22525_v25 = vpop.f32.mrf.mxu0 }
 0x25b   :  { %v22496_v36 = vpop.f32.mrf.mxu1 }
 0x25c   :  { %4940 = vmatpush.bf16.msra.mxu0 %v13640_v43  ;;  %v13784_v43 = vor.u32 %v17485_v42, %v13783_v37  ;;  %v17476_v37 = vld [vmem:[%s27355_s4 + $0x12f4] sm:$0xf]  ;;  %v13753_v42 = vld [vmem:[%s27355_s4 + $0x12f8] sm:$0xf0] }
 0x25e   :  { %4966 = vmatpush.bf16.msra.mxu2 %v13644_v59  ;;  %v13788_v59 = vor.u32 %v17484_v7, %v13785_v55 }
 0x25f   :  { %v22513_v61 = vpop.f32.mrf.mxu2 }
 0x260   :  { %4941 = vmatpush.bf16.msra.mxu0 %v13632_v4  ;;  %v22522_v32 = vpop.f32.mrf.mxu3  ;;  %v13767_v4 = vld [vmem:[%s27355_s4 + $0x1310] sm:$0xf] }
 0x262   :  { %4967 = vmatpush.bf16.msra.mxu2 %v13636_v12  ;;  %v4262_v12 = vadd.f32 %v22308_v40, %v4248_v0  ;;  %v17478_v40 = vld [vmem:[%s27355_s4 + $0x1304] sm:$0xf]  ;;  %v22573_v62 = vpop.f32.mrf.mxu0  ;;  %v17475_v0 = vld [vmem:[%s27355_s4 + $0x12e4] sm:$0xf0] }
 0x263   :  { %4942 = vmatmul.bf16.vlgmr.msra.gmra.mxu0 %v22451_v38  ;;  %v13744_v26 = vor.u32 %v17475_v0, %v13743_v18  ;;  %v17515_v0 = vld [vmem:[%s27355_s4 + $0x1424] sm:$0xf0] }
 0x264   :  { %5191 = vmatpush.bf16.msrb.mxu0 %v13816_v30  ;;  %v22540_v30 = vpop.f32.mrf.mxu1  ;;  %v4276_v9 = vadd.f32 %v22362_v63, %v4262_v12 }
 0x265   :  { %4968 = vmatmul.bf16.vlgmr.msra.gmra.mxu2 %v22451_v38 }
 0x266   :  { %5217 = vmatpush.bf16.msrb.mxu2 %v13820_v50  ;;  %v13768_v50 = vor.u32 %v17481_v13, %v13767_v4  ;;  %v4290_v7 = vadd.f32 %v22371_v15, %v4276_v9  ;;  %v13936_v15 = vor.u32 %v17523_v46, %v13935_v2  ;;  %v13745_v4 = vld [vmem:[%s27355_s4 + $0x12e8] sm:$0xf0]  ;;  %v13737_v9 = vld [vmem:[%s27355_s4 + $0x12d8] sm:$0xf0]  ;;  %v13727_v46 = vld [vmem:[%s27355_s4 + $0x12c0] sm:$0xf] }
 0x267   :  { %v22568_v49 = vpop.f32.mrf.mxu2 }
 0x268   :  { %5192 = vmatpush.bf16.msrb.mxu0 %v13808_v48  ;;  %v13761_v48 = vld [vmem:[%s27355_s4 + $0x1308] sm:$0xf0]  ;;  %v22571_v8 = vpop.f32.mrf.mxu3  ;;  %v4304_v51 = vadd.f32 %v22385_v56, %v4290_v7  ;;  %v17521_v56 = vld [vmem:[%s27355_s4 + $0x1454] sm:$0xf0] }
 0x269   :  { %v13764_v63 = vor.u32 %v17478_v40, %v13761_v48  ;;  %v17473_v40 = vld [vmem:[%s27355_s4 + $0x12d4] sm:$0xf0]  ;;  %v17472_v48 = vld [vmem:[%s27355_s4 + $0x12d4] sm:$0xf]  ;;  %v13729_v7 = vld [vmem:[%s27355_s4 + $0x12c8] sm:$0xf0] }
 0x26a   :  { %5218 = vmatpush.bf16.msrb.mxu2 %v13812_v5  ;;  %v17525_v5 = vld [vmem:[%s27355_s4 + $0x1474] sm:$0xf0] }
 0x26b   :  { %v13944_v6 = vor.u32 %v17525_v5, %v13943_v41  ;;  %v17519_v41 = vld [vmem:[%s27355_s4 + $0x1444] sm:$0xf0] }
 0x26c   :  { %5193 = vmatpush.bf16.msrb.mxu0 %v13800_v29  ;;  %v13760_v29 = vor.u32 %v17479_v11, %v13759_v22  ;;  %v22601_v45 = vpop.f32.mrf.mxu1  ;;  %v13735_v11 = vld [vmem:[%s27355_s4 + $0x12d0] sm:$0xf] }
 0x26d   :  { %v13736_v5 = vor.u32 %v17473_v40, %v13735_v11  ;;  %v17467_v11 = vld [vmem:[%s27355_s4 + $0x12a4] sm:$0xf0] }
 0x26e   :  { %5219 = vmatpush.bf16.msrb.mxu2 %v13804_v20  ;;  %v4316_v20 = vadd.f32 %v22353_v23, %v4302_v28  ;;  %v13948_v23 = vor.u32 %v17524_v17, %v13945_v3  ;;  %v4318_v28 = vadd.f32 %v22393_v60, %v4304_v51  ;;  %v13932_v60 = vor.u32 %v17520_v24, %v13929_v52  ;;  %v22655_v3 = vpop.f32.mrf.mxu0  ;;  %v13905_v24 = vld [vmem:[%s27355_s4 + $0x1428] sm:$0xf0] }
 0x270   :  { %5194 = vmatpush.bf16.msrb.mxu0 %v13792_v54  ;;  %v13751_v54 = vld [vmem:[%s27355_s4 + $0x12f0] sm:$0xf]  ;;  %v4330_v55 = vadd.f32 %v22395_v44, %v4316_v20  ;;  %v22634_v22 = vpop.f32.mrf.mxu3  ;;  %v4332_v17 = vadd.f32 %v22449_v57, %v4318_v28  ;;  %v13921_v20 = vld [vmem:[%s27355_s4 + $0x1448] sm:$0xf0] }
 0x271   :  { %v13927_v44 = vld [vmem:[%s27355_s4 + $0x1450] sm:$0xf] }
 0x272   :  { %5220 = vmatpush.bf16.msrb.mxu2 %v13796_v21  ;;  %v17477_v21 = vld [vmem:[%s27355_s4 + $0x12f4] sm:$0xf0]  ;;  %v4344_v13 = vadd.f32 %v22405_v10, %v4330_v55  ;;  %v13928_v10 = vor.u32 %v17521_v56, %v13927_v44  ;;  %v13911_v57 = vld [vmem:[%s27355_s4 + $0x1430] sm:$0xf]  ;;  %v4346_v55 = vadd.f32 %v22459_v19, %v4332_v17  ;;  %v13721_v56 = vld [vmem:[%s27355_s4 + $0x12b8] sm:$0xf0] }
 0x273   :  { %v13752_v14 = vor.u32 %v17477_v21, %v13751_v54  ;;  %v17471_v54 = vld [vmem:[%s27355_s4 + $0x12c4] sm:$0xf0]  ;;  %v13719_v19 = vld [vmem:[%s27355_s4 + $0x12b0] sm:$0xf] }
 0x274   :  { %5195 = vmatpush.bf16.msrb.mxu0 %v13784_v43  ;;  %v13937_v43 = vld [vmem:[%s27355_s4 + $0x1468] sm:$0xf0] }
 0x275   :  { %4947 = vmatpush.bf16.msra.mxu1 %v13752_v14  ;;  %v13913_v14 = vld [vmem:[%s27355_s4 + $0x1438] sm:$0xf0] }
 0x276   :  { %5221 = vmatpush.bf16.msrb.mxu2 %v13788_v59  ;;  %v13756_v59 = vor.u32 %v17476_v37, %v13753_v42  ;;  %v13728_v37 = vor.u32 %v17471_v54, %v13727_v46  ;;  %v17470_v42 = vld [vmem:[%s27355_s4 + $0x12c4] sm:$0xf] }
 0x277   :  { %v17510_v54 = vld [vmem:[%s27355_s4 + $0x1404] sm:$0xf] }
 0x278   :  { %5196 = vmatpush.bf16.msrb.mxu0 %v13776_v35  ;;  %v13940_v35 = vor.u32 %v17522_v16, %v13937_v43  ;;  %4973 = vmatpush.bf16.msra.mxu3 %v13756_v59  ;;  %v17516_v43 = vld [vmem:[%s27355_s4 + $0x1434] sm:$0xf]  ;;  %v13732_v59 = vor.u32 %v17470_v42, %v13729_v7 }
 0x279   :  { %4948 = vmatpush.bf16.msra.mxu1 %v13744_v26  ;;  %v13916_v18 = vor.u32 %v17516_v43, %v13913_v14  ;;  %v17557_v43 = vld [vmem:[%s27355_s4 + $0x1574] sm:$0xf0] }
 0x27a   :  { %5222 = vmatpush.bf16.msrb.mxu2 %v13780_v58  ;;  %v17474_v58 = vld [vmem:[%s27355_s4 + $0x12e4] sm:$0xf] }
 0x27b   :  { %v13748_v12 = vor.u32 %v17474_v58, %v13745_v4  ;;  %v22714_v58 = vpop.f32.mrf.mxu3  ;;  %v22716_v4 = vpop.f32.mrf.mxu0 }
 0x27c   :  { %5197 = vmatpush.bf16.msrb.mxu0 %v13768_v50  ;;  %v22630_v50 = vpop.f32.mrf.mxu2 }
 0x27d   :  { %4974 = vmatpush.bf16.msra.mxu3 %v13748_v12  ;;  %4949 = vmatpush.bf16.msra.mxu1 %v13736_v5  ;;  %v17512_v5 = vld [vmem:[%s27355_s4 + $0x1414] sm:$0xf] }
 0x27e   :  { %5223 = vmatpush.bf16.msrb.mxu2 %v13772_v34  ;;  %v4358_v34 = vadd.f32 %v22433_v27, %v4344_v13  ;;  %v13919_v27 = vld [vmem:[%s27355_s4 + $0x1440] sm:$0xf]  ;;  %v17514_v13 = vld [vmem:[%s27355_s4 + $0x1424] sm:$0xf] }
 0x27f   :  { %v13920_v2 = vor.u32 %v17519_v41, %v13919_v27  ;;  %v13713_v27 = vld [vmem:[%s27355_s4 + $0x12a8] sm:$0xf0] }
 0x280   :  { %5198 = vmatpush.bf16.msrb.mxu0 %v13760_v29  ;;  %v17518_v29 = vld [vmem:[%s27355_s4 + $0x1444] sm:$0xf] }
 0x281   :  { %v13924_v21 = vor.u32 %v17518_v29, %v13921_v20  ;;  %4950 = vmatpush.bf16.msra.mxu1 %v13728_v37  ;;  %v13887_v29 = vld [vmem:[%s27355_s4 + $0x1400] sm:$0xf] }
 0x282   :  { %5224 = vmatpush.bf16.msrb.mxu2 %v13764_v63  ;;  %v13740_v63 = vor.u32 %v17472_v48, %v13737_v9  ;;  %v13897_v9 = vld [vmem:[%s27355_s4 + $0x1418] sm:$0xf0] }
 0x283   :  { %5199 = vmatmul.bf16.vlgmr.msrb.gmra.mxu0 %v5027_v1  ;;  %v13900_v46 = vor.u32 %v17512_v5, %v13897_v9  ;;  %v22779_v7 = vpop.f32.mrf.mxu3 }
 0x284   :  { %5441 = vmatpush.bf16.msra.mxu0 %v13944_v6  ;;  %v4372_v6 = vadd.f32 %v22435_v33, %v4358_v34  ;;  %v17517_v33 = vld [vmem:[%s27355_s4 + $0x1434] sm:$0xf0]  ;;  %4975 = vmatpush.bf16.msra.mxu3 %v13740_v63  ;;  %v22702_v44 = vpop.f32.mrf.mxu2  ;;  %v13895_v34 = vld [vmem:[%s27355_s4 + $0x1410] sm:$0xf] }
 0x285   :  { %5225 = vmatmul.bf16.vlgmr.msrb.gmra.mxu2 %v5027_v1  ;;  %v4360_v1 = vadd.f32 %v22475_v53, %v4346_v55  ;;  %v13912_v51 = vor.u32 %v17517_v33, %v13911_v57  ;;  %v13903_v53 = vld [vmem:[%s27355_s4 + $0x1420] sm:$0xf]  ;;  %v13705_v33 = vld [vmem:[%s27355_s4 + $0x1298] sm:$0xf0]  ;;  %v13889_v55 = vld [vmem:[%s27355_s4 + $0x1408] sm:$0xf0] }
 0x286   :  { %5467 = vmatpush.bf16.msra.mxu2 %v13948_v23  ;;  %v22673_v23 = vpop.f32.mrf.mxu1  ;;  %v4386_v16 = vadd.f32 %v22488_v47, %v4372_v6  ;;  %v17469_v47 = vld [vmem:[%s27355_s4 + $0x12b4] sm:$0xf0] }
 0x287   :  { %v4374_v12 = vadd.f32 %v22486_v31, %v4360_v1  ;;  %v13908_v31 = vor.u32 %v17514_v13, %v13905_v24  ;;  %v17465_v6 = vld [vmem:[%s27355_s4 + $0x1294] sm:$0xf0]  ;;  %v22797_v1 = vpop.f32.mrf.mxu0  ;;  %v17554_v13 = vld [vmem:[%s27355_s4 + $0x1564] sm:$0xf]  ;;  %v14065_v24 = vld [vmem:[%s27355_s4 + $0x1568] sm:$0xf0] }
 0x288   :  { %5442 = vmatpush.bf16.msra.mxu0 %v13936_v15  ;;  %v17468_v15 = vld [vmem:[%s27355_s4 + $0x12b4] sm:$0xf]  ;;  %v4400_v26 = vadd.f32 %v22496_v36, %v4386_v16  ;;  %4976 = vmatpush.bf16.msra.mxu3 %v13732_v59  ;;  %v13904_v36 = vor.u32 %v17515_v0, %v13903_v53  ;;  %v14071_v16 = vld [vmem:[%s27355_s4 + $0x1570] sm:$0xf]  ;;  %v14063_v53 = vld [vmem:[%s27355_s4 + $0x1560] sm:$0xf]  ;;  %v14068_v9 = vor.u32 %v17554_v13, %v14065_v24 }
 0x289   :  { %v13724_v52 = vor.u32 %v17468_v15, %v13721_v56  ;;  %v4388_v41 = vadd.f32 %v22525_v25, %v4374_v12  ;;  %v13703_v25 = vld [vmem:[%s27355_s4 + $0x1290] sm:$0xf]  ;;  %v13892_v15 = vor.u32 %v17510_v54, %v13889_v55  ;;  %v13697_v0 = vld [vmem:[%s27355_s4 + $0x1288] sm:$0xf0]  ;;  %v14041_v13 = vld [vmem:[%s27355_s4 + $0x1538] sm:$0xf0] }
 0x28a   :  { %5468 = vmatpush.bf16.msra.mxu2 %v13940_v35  ;;  %v13720_v35 = vor.u32 %v17469_v47, %v13719_v19  ;;  %v4414_v28 = vadd.f32 %v22513_v61, %v4400_v26  ;;  %v17513_v61 = vld [vmem:[%s27355_s4 + $0x1414] sm:$0xf0]  ;;  %v13695_v19 = vld [vmem:[%s27355_s4 + $0x1280] sm:$0xf]  ;;  %v17463_v47 = vld [vmem:[%s27355_s4 + $0x1284] sm:$0xf0] }
 0x28b   :  { %v13896_v63 = vor.u32 %v17513_v61, %v13895_v34  ;;  %v4402_v37 = vadd.f32 %v22540_v30, %v4388_v41  ;;  %v17556_v30 = vld [vmem:[%s27355_s4 + $0x1574] sm:$0xf]  ;;  %v17555_v26 = vld [vmem:[%s27355_s4 + $0x1564] sm:$0xf0]  ;;  %v13871_v41 = vld [vmem:[%s27355_s4 + $0x13e0] sm:$0xf] }
 0x28c   :  { %5443 = vmatpush.bf16.msra.mxu0 %v13928_v10  ;;  %v13711_v10 = vld [vmem:[%s27355_s4 + $0x12a0] sm:$0xf]  ;;  %4951 = vmatpush.bf16.msra.mxu1 %v13720_v35  ;;  %v4428_v20 = vadd.f32 %v22522_v32, %v4414_v28  ;;  %v22766_v57 = vpop.f32.mrf.mxu2  ;;  %v17511_v32 = vld [vmem:[%s27355_s4 + $0x1404] sm:$0xf0]  ;;  %v17508_v34 = vld [vmem:[%s27355_s4 + $0x13f4] sm:$0xf] }
 0x28d   :  { %v13712_v48 = vor.u32 %v17467_v11, %v13711_v10  ;;  %4977 = vmatpush.bf16.msra.mxu3 %v13724_v52  ;;  %v4416_v59 = vadd.f32 %v22568_v49, %v4402_v37  ;;  %v17462_v49 = vld [vmem:[%s27355_s4 + $0x1284] sm:$0xf]  ;;  %v13696_v52 = vor.u32 %v17463_v47, %v13695_v19  ;;  %v13863_v37 = vld [vmem:[%s27355_s4 + $0x13d0] sm:$0xf] }
 0x28e   :  { %5469 = vmatpush.bf16.msra.mxu2 %v13932_v60  ;;  %v22735_v40 = vpop.f32.mrf.mxu1  ;;  %v17466_v60 = vld [vmem:[%s27355_s4 + $0x12a4] sm:$0xf]  ;;  %v4442_v42 = vadd.f32 %v22573_v62, %v4428_v20  ;;  %v14073_v62 = vld [vmem:[%s27355_s4 + $0x1578] sm:$0xf0]  ;;  %v13700_v28 = vor.u32 %v17462_v49, %v13697_v0  ;;  %v13873_v20 = vld [vmem:[%s27355_s4 + $0x13e8] sm:$0xf0] }
 0x28f   :  { %v13716_v17 = vor.u32 %v17466_v60, %v13713_v27  ;;  %v14076_v56 = vor.u32 %v17556_v30, %v14073_v62  ;;  %v4430_v10 = vadd.f32 %v22571_v8, %v4416_v59  ;;  %v14064_v60 = vor.u32 %v17555_v26, %v14063_v53  ;;  %v14055_v27 = vld [vmem:[%s27355_s4 + $0x1550] sm:$0xf]  ;;  %v17553_v8 = vld [vmem:[%s27355_s4 + $0x1554] sm:$0xf0]  ;;  %v13865_v30 = vld [vmem:[%s27355_s4 + $0x13d8] sm:$0xf0] }
 0x290   :  { %5444 = vmatpush.bf16.msra.mxu0 %v13920_v2  ;;  %v17464_v2 = vld [vmem:[%s27355_s4 + $0x1294] sm:$0xf]  ;;  %4952 = vmatpush.bf16.msra.mxu1 %v13712_v48  ;;  %v4456_v35 = vadd.f32 %v22601_v45, %v4442_v42  ;;  %v13879_v45 = vld [vmem:[%s27355_s4 + $0x13f0] sm:$0xf]  ;;  %v13881_v48 = vld [vmem:[%s27355_s4 + $0x13f8] sm:$0xf0]  ;;  %v14056_v54 = vor.u32 %v17553_v8, %v14055_v27 }
 0x291   :  { %4978 = vmatpush.bf16.msra.mxu3 %v13716_v17  ;;  %v13708_v14 = vor.u32 %v17464_v2, %v13705_v33  ;;  %v4444_v5 = vadd.f32 %v22655_v3, %v4430_v10  ;;  %v17507_v17 = vld [vmem:[%s27355_s4 + $0x13e4] sm:$0xf0]  ;;  %v17552_v3 = vld [vmem:[%s27355_s4 + $0x1554] sm:$0xf]  ;;  %v22869_v2 = vpop.f32.mrf.mxu3  ;;  %v14039_v47 = vld [vmem:[%s27355_s4 + $0x1530] sm:$0xf] }
 0x292   :  { %5470 = vmatpush.bf16.msra.mxu2 %v13924_v21  ;;  %v13704_v21 = vor.u32 %v17465_v6, %v13703_v25  ;;  %v4470_v11 = vadd.f32 %v22630_v50, %v4456_v35  ;;  %v13884_v50 = vor.u32 %v17508_v34, %v13881_v48  ;;  %v14057_v25 = vld [vmem:[%s27355_s4 + $0x1558] sm:$0xf0]  ;;  %v17503_v53 = vld [vmem:[%s27355_s4 + $0x13c4] sm:$0xf0]  ;;  %v17549_v0 = vld [vmem:[%s27355_s4 + $0x1534] sm:$0xf0] }
 0x293   :  { %v4458_v42 = vadd.f32 %v22673_v23, %v4444_v5  ;;  %v17550_v23 = vld [vmem:[%s27355_s4 + $0x1544] sm:$0xf]  ;;  %v14031_v34 = vld [vmem:[%s27355_s4 + $0x1520] sm:$0xf]  ;;  %v17547_v48 = vld [vmem:[%s27355_s4 + $0x1524] sm:$0xf0] }
 0x294   :  { %5445 = vmatpush.bf16.msra.mxu0 %v13912_v51  ;;  %v13888_v51 = vor.u32 %v17511_v32, %v13887_v29  ;;  %4953 = vmatpush.bf16.msra.mxu1 %v13704_v21  ;;  %v17506_v29 = vld [vmem:[%s27355_s4 + $0x13e4] sm:$0xf]  ;;  %v4484_v6 = vadd.f32 %v22634_v22, %v4470_v11  ;;  %v13872_v32 = vor.u32 %v17507_v17, %v13871_v41  ;;  %v14047_v21 = vld [vmem:[%s27355_s4 + $0x1540] sm:$0xf]  ;;  %v17505_v22 = vld [vmem:[%s27355_s4 + $0x13d4] sm:$0xf0] }
 0x295   :  { %4979 = vmatpush.bf16.msra.mxu3 %v13708_v14  ;;  %v13876_v33 = vor.u32 %v17506_v29, %v13873_v20  ;;  %v17504_v14 = vld [vmem:[%s27355_s4 + $0x13d4] sm:$0xf]  ;;  %v4472_v59 = vadd.f32 %v22702_v44, %v4458_v42  ;;  %v17502_v35 = vld [vmem:[%s27355_s4 + $0x13c4] sm:$0xf]  ;;  %v13847_v11 = vld [vmem:[%s27355_s4 + $0x13b0] sm:$0xf] }
 0x296   :  { %5471 = vmatpush.bf16.msra.mxu2 %v13916_v18  ;;  %v14072_v18 = vor.u32 %v17557_v43, %v14071_v16  ;;  %v22824_v12 = vpop.f32.mrf.mxu1  ;;  %v4498_v55 = vadd.f32 %v22716_v4, %v4484_v6  ;;  %v14060_v16 = vor.u32 %v17552_v3, %v14057_v25  ;;  %v17551_v43 = vld [vmem:[%s27355_s4 + $0x1544] sm:$0xf0]  ;;  %v14049_v4 = vld [vmem:[%s27355_s4 + $0x1548] sm:$0xf0]  ;;  %v13849_v27 = vld [vmem:[%s27355_s4 + $0x13b8] sm:$0xf0] }
 0x297   :  { %v14048_v19 = vor.u32 %v17551_v43, %v14047_v21  ;;  %v14052_v49 = vor.u32 %v17550_v23, %v14049_v4  ;;  %v4486_v24 = vadd.f32 %v22714_v58, %v4472_v59  ;;  %v17501_v58 = vld [vmem:[%s27355_s4 + $0x13b4] sm:$0xf0]  ;;  %v14033_v8 = vld [vmem:[%s27355_s4 + $0x1528] sm:$0xf0]  ;;  %v14023_v17 = vld [vmem:[%s27355_s4 + $0x1510] sm:$0xf] }
 0x298   :  { %5446 = vmatpush.bf16.msra.mxu0 %v13904_v36  ;;  %v17509_v36 = vld [vmem:[%s27355_s4 + $0x13f4] sm:$0xf0]  ;;  %4954 = vmatpush.bf16.msra.mxu1 %v13696_v52  ;;  %v4512_v44 = vadd.f32 %v22735_v40, %v4498_v55  ;;  %v17548_v40 = vld [vmem:[%s27355_s4 + $0x1534] sm:$0xf]  ;;  %v13848_v41 = vor.u32 %v17501_v58, %v13847_v11  ;;  %v13839_v20 = vld [vmem:[%s27355_s4 + $0x13a0] sm:$0xf] }
 0x299   :  { %v13880_v61 = vor.u32 %v17509_v36, %v13879_v45  ;;  %4980 = vmatpush.bf16.msra.mxu3 %v13700_v28  ;;  %v22931_v28 = vpop.f32.mrf.mxu3  ;;  %v14040_v36 = vor.u32 %v17549_v0, %v14039_v47  ;;  %v13841_v21 = vld [vmem:[%s27355_s4 + $0x13a8] sm:$0xf0]  ;;  %v17542_v43 = vld [vmem:[%s27355_s4 + $0x1504] sm:$0xf]  ;;  %v17496_v47 = vld [vmem:[%s27355_s4 + $0x1394] sm:$0xf] }
 0x29a   :  { %5472 = vmatpush.bf16.msra.mxu2 %v13908_v31  ;;  %v5277_v31 = vrot.slane %v22451_v38, 2  ;;  %v4526_v52 = vadd.f32 %v22766_v57, %v4512_v44  ;;  %v4500_v57 = vadd.f32 %v22797_v1, %v4486_v24  ;;  %v17546_v1 = vld [vmem:[%s27355_s4 + $0x1524] sm:$0xf]  ;;  %v14201_v0 = vld [vmem:[%s27355_s4 + $0x1678] sm:$0xf0] }
 0x29b   :  { %v14036_v6 = vor.u32 %v17546_v1, %v14033_v8  ;;  %v14191_v11 = vld [vmem:[%s27355_s4 + $0x1660] sm:$0xf]  ;;  %v17587_v58 = vld [vmem:[%s27355_s4 + $0x1664] sm:$0xf0] }
 0x29c   :  { %5447 = vmatpush.bf16.msra.mxu0 %v13896_v63  ;;  %v22860_v63 = vpop.f32.mrf.mxu2  ;;  %5204 = vmatpush.bf16.msrb.mxu1 %v13880_v61  ;;  %v14044_v61 = vor.u32 %v17548_v40, %v14041_v13  ;;  %v4514_v3 = vadd.f32 %v22824_v12, %v4500_v57  ;;  %v17544_v12 = vld [vmem:[%s27355_s4 + $0x1514] sm:$0xf] }
 0x29d   :  { %5230 = vmatpush.bf16.msrb.mxu3 %v13884_v50  ;;  %v4540_v50 = vadd.f32 %v22779_v7, %v4526_v52  ;;  %v17499_v7 = vld [vmem:[%s27355_s4 + $0x13a4] sm:$0xf0] }
 0x29e   :  { %5473 = vmatpush.bf16.msra.mxu2 %v13900_v46  ;;  %v22871_v46 = vpop.f32.mrf.mxu0  ;;  %v22893_v62 = vpop.f32.mrf.mxu1 }
 0x29f   :  { %v4554_v25 = vadd.f32 %v22871_v46, %v4540_v50  ;;  %v14025_v46 = vld [vmem:[%s27355_s4 + $0x1518] sm:$0xf0] }
 0x2a0   :  { %5448 = vmatpush.bf16.msra.mxu0 %v13888_v51  ;;  %5205 = vmatpush.bf16.msrb.mxu1 %v13872_v32  ;;  %v13864_v51 = vor.u32 %v17505_v22, %v13863_v37  ;;  %v17545_v32 = vld [vmem:[%s27355_s4 + $0x1514] sm:$0xf0]  ;;  %v14015_v37 = vld [vmem:[%s27355_s4 + $0x1500] sm:$0xf]  ;;  %v13840_v22 = vor.u32 %v17499_v7, %v13839_v20  ;;  %v14028_v59 = vor.u32 %v17544_v12, %v14025_v46 }
 0x2a1   :  { %5231 = vmatpush.bf16.msrb.mxu3 %v13876_v33  ;;  %v4528_v33 = vadd.f32 %v22860_v63, %v4514_v3  ;;  %v14024_v55 = vor.u32 %v17545_v32, %v14023_v17  ;;  %v13831_v63 = vld [vmem:[%s27355_s4 + $0x1390] sm:$0xf]  ;;  %v23003_v23 = vpop.f32.mrf.mxu3 }
 0x2a2   :  { %5474 = vmatpush.bf16.msra.mxu2 %v13892_v15  ;;  %v13868_v15 = vor.u32 %v17504_v14, %v13865_v30  ;;  %v4568_v30 = vadd.f32 %v22893_v62, %v4554_v25  ;;  %v14199_v62 = vld [vmem:[%s27355_s4 + $0x1670] sm:$0xf] }
 0x2a3   :  { %5449 = vmatmul.bf16.vlgmr.msra.gmra.mxu0 %v5277_v31  ;;  %v14183_v17 = vld [vmem:[%s27355_s4 + $0x1650] sm:$0xf] }
 0x2a4   :  { %5691 = vmatpush.bf16.msrb.mxu0 %v14072_v18  ;;  %v13855_v18 = vld [vmem:[%s27355_s4 + $0x13c0] sm:$0xf]  ;;  %v22921_v26 = vpop.f32.mrf.mxu2  ;;  %5206 = vmatpush.bf16.msrb.mxu1 %v13864_v51  ;;  %v14017_v51 = vld [vmem:[%s27355_s4 + $0x1508] sm:$0xf0] }
 0x2a5   :  { %5475 = vmatmul.bf16.vlgmr.msra.gmra.mxu2 %v5277_v31  ;;  %v13856_v45 = vor.u32 %v17503_v53, %v13855_v18  ;;  %5232 = vmatpush.bf16.msrb.mxu3 %v13868_v15  ;;  %v17589_v15 = vld [vmem:[%s27355_s4 + $0x1674] sm:$0xf0]  ;;  %v13833_v18 = vld [vmem:[%s27355_s4 + $0x1398] sm:$0xf0]  ;;  %v4542_v53 = vadd.f32 %v22869_v2, %v4528_v33  ;;  %v4582_v44 = vadd.f32 %v22921_v26, %v4568_v30  ;;  %v13823_v2 = vld [vmem:[%s27355_s4 + $0x1380] sm:$0xf] }
 0x2a6   :  { %5717 = vmatpush.bf16.msrb.mxu2 %v14076_v56  ;;  %v13857_v56 = vld [vmem:[%s27355_s4 + $0x13c8] sm:$0xf0]  ;;  %v22943_v31 = vpop.f32.mrf.mxu0  ;;  %v22961_v5 = vpop.f32.mrf.mxu1  ;;  %v13836_v13 = vor.u32 %v17496_v47, %v13833_v18  ;;  %v17495_v26 = vld [vmem:[%s27355_s4 + $0x1384] sm:$0xf0]  ;;  %v14020_v52 = vor.u32 %v17542_v43, %v14017_v51  ;;  %v17582_v33 = vld [vmem:[%s27355_s4 + $0x1644] sm:$0xf] }
 0x2a7   :  { %v13860_v10 = vor.u32 %v17502_v35, %v13857_v56  ;;  %v4556_v24 = vadd.f32 %v22943_v31, %v4542_v53  ;;  %v4596_v57 = vadd.f32 %v22931_v28, %v4582_v44  ;;  %v17586_v31 = vld [vmem:[%s27355_s4 + $0x1664] sm:$0xf]  ;;  %v5527_v28 = vrot.slane %v22451_v38, 3  ;;  %v14185_v38 = vld [vmem:[%s27355_s4 + $0x1658] sm:$0xf0] }
 0x2a8   :  { %5692 = vmatpush.bf16.msrb.mxu0 %v14064_v60  ;;  %v17500_v60 = vld [vmem:[%s27355_s4 + $0x13b4] sm:$0xf]  ;;  %5207 = vmatpush.bf16.msrb.mxu1 %v13856_v45  ;;  %v14200_v45 = vor.u32 %v17589_v15, %v14199_v62  ;;  %v14167_v43 = vld [vmem:[%s27355_s4 + $0x1630] sm:$0xf]  ;;  %v14159_v18 = vld [vmem:[%s27355_s4 + $0x1620] sm:$0xf] }
 0x2a9   :  { %5233 = vmatpush.bf16.msrb.mxu3 %v13860_v10  ;;  %v13852_v29 = vor.u32 %v17500_v60, %v13849_v27  ;;  %v4570_v1 = vadd.f32 %v22961_v5, %v4556_v24  ;;  %v4651_v50 = vpop.f32.mrf.mxu3  ;;  %v17584_v5 = vld [vmem:[%s27355_s4 + $0x1654] sm:$0xf]  ;;  %v17579_v53 = vld [vmem:[%s27355_s4 + $0x1624] sm:$0xf0] }
 0x2aa   :  { %5718 = vmatpush.bf16.msrb.mxu2 %v14068_v9  ;;  %v14032_v9 = vor.u32 %v17547_v48, %v14031_v34  ;;  %v13825_v34 = vld [vmem:[%s27355_s4 + $0x1388] sm:$0xf0]  ;;  %v13824_v48 = vor.u32 %v17495_v26, %v13823_v2  ;;  %v14188_v32 = vor.u32 %v17584_v5, %v14185_v38  ;;  %v14151_v2 = vld [vmem:[%s27355_s4 + $0x1610] sm:$0xf]  ;;  %v17577_v26 = vld [vmem:[%s27355_s4 + $0x1614] sm:$0xf0] }
 0x2ac   :  { %5693 = vmatpush.bf16.msrb.mxu0 %v14056_v54  ;;  %v17498_v54 = vld [vmem:[%s27355_s4 + $0x13a4] sm:$0xf]  ;;  %5208 = vmatpush.bf16.msrb.mxu1 %v13848_v41  ;;  %v4583_v42 = vpop.f32.mrf.mxu2  ;;  %v14192_v41 = vor.u32 %v17587_v58, %v14191_v11  ;;  %v23123_v58 = vld [vmem:[%s27357_s6 + $0x1] ss:$8 sm:$0x3] }
 0x2ad   :  { %5234 = vmatpush.bf16.msrb.mxu3 %v13852_v29  ;;  %v13844_v14 = vor.u32 %v17498_v54, %v13841_v21  ;;  %v17585_v29 = vld [vmem:[%s27355_s4 + $0x1654] sm:$0xf0]  ;;  %v4584_v20 = vadd.f32 %v4583_v42, %v4570_v1  ;;  %v14175_v54 = vld [vmem:[%s27355_s4 + $0x1640] sm:$0xf]  ;;  %v17583_v21 = vld [vmem:[%s27355_s4 + $0x1644] sm:$0xf0] }
 0x2ae   :  { %5719 = vmatpush.bf16.msrb.mxu2 %v14060_v16  ;;  %v17543_v16 = vld [vmem:[%s27355_s4 + $0x1504] sm:$0xf0]  ;;  %v4609_v4 = vpop.f32.mrf.mxu0  ;;  %v4623_v56 = vpop.f32.mrf.mxu1  ;;  %v14184_v25 = vor.u32 %v17585_v29, %v14183_v17  ;;  %v14176_v42 = vor.u32 %v17583_v21, %v14175_v54  ;;  %v17574_v1 = vld [vmem:[%s27355_s4 + $0x1604] sm:$0xf]  ;;  %v17621_v17 = vld [vmem:[%s27355_s4 + $0x1774] sm:$0xf0] }
 0x2af   :  { %v14016_v40 = vor.u32 %v17543_v16, %v14015_v37  ;;  %v4610_v8 = vadd.f32 %v4609_v4, %v4596_v57  ;;  %v4598_v12 = vadd.f32 %v23003_v23, %v4584_v20  ;;  %v14177_v37 = vld [vmem:[%s27355_s4 + $0x1648] sm:$0xf0]  ;;  %v17580_v4 = vld [vmem:[%s27355_s4 + $0x1634] sm:$0xf]  ;;  %v4720_v57 = vperm.slane %v23123_v58, 1 }
 0x2b0   :  { %5694 = vmatpush.bf16.msrb.mxu0 %v14048_v19  ;;  %v17497_v19 = vld [vmem:[%s27355_s4 + $0x1394] sm:$0xf0]  ;;  %5209 = vmatpush.bf16.msrb.mxu1 %v13840_v22  ;;  %v14180_v16 = vor.u32 %v17582_v33, %v14177_v37  ;;  %v17620_v20 = vld [vmem:[%s27355_s4 + $0x1774] sm:$0xf]  ;;  %v17614_v58 = vld [vmem:[%s27355_s4 + $0x1744] sm:$0xf] }
 0x2b1   :  { %v13832_v35 = vor.u32 %v17497_v19, %v13831_v63  ;;  %5235 = vmatpush.bf16.msrb.mxu3 %v13844_v14  ;;  %v4624_v3 = vadd.f32 %v4623_v56, %v4610_v8  ;;  %v17581_v14 = vld [vmem:[%s27355_s4 + $0x1634] sm:$0xf0]  ;;  %v4653_v30 = vpop.f32.mrf.mxu3  ;;  %v14160_v56 = vor.u32 %v17579_v53, %v14159_v18  ;;  %v14145_v8 = vld [vmem:[%s27355_s4 + $0x1608] sm:$0xf0] }
 0x2b2   :  { %5720 = vmatpush.bf16.msrb.mxu2 %v14052_v49  ;;  %v17588_v49 = vld [vmem:[%s27355_s4 + $0x1674] sm:$0xf]  ;;  %v14168_v47 = vor.u32 %v17581_v14, %v14167_v43  ;;  %v14148_v54 = vor.u32 %v17574_v1, %v14145_v8  ;;  %v17618_v14 = vld [vmem:[%s27355_s4 + $0x1764] sm:$0xf]  ;;  %v13985_v1 = vld [vmem:[%s27355_s4 + $0x14c8] sm:$0xf0] }
 0x2b3   :  { %v14204_v10 = vor.u32 %v17588_v49, %v14201_v0  ;;  %v17578_v49 = vld [vmem:[%s27355_s4 + $0x1624] sm:$0xf]  ;;  %v14161_v0 = vld [vmem:[%s27355_s4 + $0x1628] sm:$0xf0] }
 0x2b4   :  { %5695 = vmatpush.bf16.msrb.mxu0 %v14040_v36  ;;  %v17494_v36 = vld [vmem:[%s27355_s4 + $0x1384] sm:$0xf]  ;;  %5210 = vmatpush.bf16.msrb.mxu1 %v13832_v35  ;;  %v4637_v60 = vpop.f32.mrf.mxu2 }
 0x2b5   :  { %5236 = vmatpush.bf16.msrb.mxu3 %v13836_v13  ;;  %v13828_v27 = vor.u32 %v17494_v36, %v13825_v34  ;;  %v4638_v46 = vadd.f32 %v4637_v60, %v4624_v3  ;;  %v14164_v13 = vor.u32 %v17578_v49, %v14161_v0  ;;  %v17576_v34 = vld [vmem:[%s27355_s4 + $0x1614] sm:$0xf]  ;;  %v17617_v49 = vld [vmem:[%s27355_s4 + $0x1754] sm:$0xf0] }
 0x2b6   :  { %5721 = vmatpush.bf16.msrb.mxu2 %v14044_v61  ;;  %v14193_v61 = vld [vmem:[%s27355_s4 + $0x1668] sm:$0xf0]  ;;  %v4611_v7 = vpop.f32.mrf.mxu0 }
 0x2b7   :  { %v4612_v22 = vadd.f32 %v4611_v7, %v4598_v12  ;;  %v4652_v63 = vadd.f32 %v4651_v50, %v4638_v46  ;;  %v14329_v7 = vld [vmem:[%s27355_s4 + $0x1778] sm:$0xf0]  ;;  %v17540_v12 = vld [vmem:[%s27355_s4 + $0x14f4] sm:$0xf] }
 0x2b8   :  { %5696 = vmatpush.bf16.msrb.mxu0 %v14032_v9  ;;  %v14196_v9 = vor.u32 %v17586_v31, %v14193_v61  ;;  %5211 = vmatpush.bf16.msrb.mxu1 %v13824_v48  ;;  %v14152_v61 = vor.u32 %v17577_v26, %v14151_v2  ;;  %v14143_v48 = vld [vmem:[%s27355_s4 + $0x1600] sm:$0xf]  ;;  %v14009_v46 = vld [vmem:[%s27355_s4 + $0x14f8] sm:$0xf0]  ;;  %v17537_v2 = vld [vmem:[%s27355_s4 + $0x14d4] sm:$0xf0] }
 0x2b9   :  { %5237 = vmatpush.bf16.msrb.mxu3 %v13828_v27  ;;  %v17575_v27 = vld [vmem:[%s27355_s4 + $0x1604] sm:$0xf0] }
 0x2ba   :  { %5722 = vmatpush.bf16.msrb.mxu2 %v14036_v6  ;;  %v4625_v6 = vpop.f32.mrf.mxu1  ;;  %v14144_v3 = vor.u32 %v17575_v27, %v14143_v48  ;;  %v17535_v48 = vld [vmem:[%s27355_s4 + $0x14c4] sm:$0xf0]  ;;  %v17534_v27 = vld [vmem:[%s27355_s4 + $0x14c4] sm:$0xf] }
 0x2bb   :  { %v4626_v51 = vadd.f32 %v4625_v6, %v4612_v22  ;;  %v17541_v6 = vld [vmem:[%s27355_s4 + $0x14f4] sm:$0xf0]  ;;  %v14332_v22 = vor.u32 %v17620_v20, %v14329_v7  ;;  %v13988_v20 = vor.u32 %v17534_v27, %v13985_v1  ;;  %v13975_v7 = vld [vmem:[%s27355_s4 + $0x14b0] sm:$0xf] }
 0x2bc   :  { %5697 = vmatpush.bf16.msrb.mxu0 %v14024_v55  ;;  %v4639_v55 = vpop.f32.mrf.mxu2 }
 0x2bd   :  { %v4640_v44 = vadd.f32 %v4639_v55, %v4626_v51  ;;  %v17619_v55 = vld [vmem:[%s27355_s4 + $0x1764] sm:$0xf0] }
 0x2be   :  { %5723 = vmatpush.bf16.msrb.mxu2 %v14028_v59  ;;  %v14169_v59 = vld [vmem:[%s27355_s4 + $0x1638] sm:$0xf0]  ;;  %v17539_v51 = vld [vmem:[%s27355_s4 + $0x14e4] sm:$0xf0] }
 0x2bf   :  { %v14172_v15 = vor.u32 %v17580_v4, %v14169_v59  ;;  %v4654_v24 = vadd.f32 %v4653_v30, %v4640_v44  ;;  %v14012_v4 = vor.u32 %v17540_v12, %v14009_v46  ;;  %v13999_v59 = vld [vmem:[%s27355_s4 + $0x14e0] sm:$0xf]  ;;  %v14311_v44 = vld [vmem:[%s27355_s4 + $0x1750] sm:$0xf]  ;;  %v17610_v12 = vld [vmem:[%s27355_s4 + $0x1724] sm:$0xf] }
 0x2c0   :  { %5698 = vmatpush.bf16.msrb.mxu0 %v14016_v40  ;;  %v4665_v23 = vpop.f32.mrf.mxu0  ;;  %v14000_v0 = vor.u32 %v17539_v51, %v13999_v59  ;;  %v14312_v26 = vor.u32 %v17617_v49, %v14311_v44  ;;  %v14289_v46 = vld [vmem:[%s27355_s4 + $0x1728] sm:$0xf0]  ;;  %v17608_v51 = vld [vmem:[%s27355_s4 + $0x1714] sm:$0xf] }
 0x2c1   :  { %v4666_v19 = vadd.f32 %v4665_v23, %v4652_v63  ;;  %v14321_v63 = vld [vmem:[%s27355_s4 + $0x1768] sm:$0xf0]  ;;  %v17528_v49 = vld [vmem:[%s27355_s4 + $0x1494] sm:$0xf] }
 0x2c2   :  { %5724 = vmatpush.bf16.msrb.mxu2 %v14020_v52  ;;  %v4679_v62 = vpop.f32.mrf.mxu1  ;;  %v14324_v53 = vor.u32 %v17618_v14, %v14321_v63  ;;  %v14292_v14 = vor.u32 %v17610_v12, %v14289_v46  ;;  %v14279_v63 = vld [vmem:[%s27355_s4 + $0x1710] sm:$0xf]  ;;  %v17569_v46 = vld [vmem:[%s27355_s4 + $0x15d4] sm:$0xf0] }
 0x2c3   :  { %5699 = vmatmul.bf16.vlgmr.msrb.gmra.mxu0 %v5527_v28  ;;  %v4680_v35 = vadd.f32 %v4679_v62, %v4666_v19  ;;  %v14001_v62 = vld [vmem:[%s27355_s4 + $0x14e8] sm:$0xf0] }
 0x2c4   :  { %5939 = vmatpush.bf16.msra.mxu0 %v14200_v45 }
 0x2c5   :  { %5725 = vmatmul.bf16.vlgmr.msrb.gmra.mxu2 %v5527_v28  ;;  %v23141_v28 = vld [vmem:[%s27357_s6 + $0x2] ss:$8 sm:$0x3] }
 0x2c6   :  { %5965 = vmatpush.bf16.msra.mxu2 %v14204_v10  ;;  %v14153_v10 = vld [vmem:[%s27355_s4 + $0x1618] sm:$0xf0] }
 0x2c7   :  { %v14156_v60 = vor.u32 %v17576_v34, %v14153_v10  ;;  %v14303_v34 = vld [vmem:[%s27355_s4 + $0x1740] sm:$0xf]  ;;  %v17615_v10 = vld [vmem:[%s27355_s4 + $0x1744] sm:$0xf0] }
 0x2c8   :  { %5940 = vmatpush.bf16.msra.mxu0 %v14192_v41  ;;  %v4693_v40 = vpop.f32.mrf.mxu2  ;;  %v4667_v36 = vpop.f32.mrf.mxu0  ;;  %v4731_v41 = vperm.slane %v23141_v28, 1  ;;  %v17613_v28 = vld [vmem:[%s27355_s4 + $0x1734] sm:$0xf0] }
 0x2c9   :  { %v4694_v52 = vadd.f32 %v4693_v40, %v4680_v35  ;;  %v4707_v45 = vpop.f32.mrf.mxu3  ;;  %v4668_v31 = vadd.f32 %v4667_v36, %v4654_v24  ;;  %v14313_v35 = vld [vmem:[%s27355_s4 + $0x1758] sm:$0xf0]  ;;  %v17536_v24 = vld [vmem:[%s27355_s4 + $0x14d4] sm:$0xf] }
 0x2ca   :  { %5966 = vmatpush.bf16.msra.mxu2 %v14196_v9  ;;  %v14327_v9 = vld [vmem:[%s27355_s4 + $0x1770] sm:$0xf]  ;;  %v4681_v29 = vpop.f32.mrf.mxu1 }
 0x2cb   :  { %v4708_v11 = vadd.f32 %v4707_v45, %v4694_v52  ;;  %v4682_v38 = vadd.f32 %v4681_v29, %v4668_v31  ;;  %v14328_v21 = vor.u32 %v17621_v17, %v14327_v9  ;;  %v13993_v52 = vld [vmem:[%s27355_s4 + $0x14d8] sm:$0xf0]  ;;  %v17612_v9 = vld [vmem:[%s27355_s4 + $0x1734] sm:$0xf] }
 0x2cc   :  { %5941 = vmatpush.bf16.msra.mxu0 %v14184_v25  ;;  %v14007_v25 = vld [vmem:[%s27355_s4 + $0x14f0] sm:$0xf]  ;;  %v13996_v31 = vor.u32 %v17536_v24, %v13993_v52  ;;  %v14297_v17 = vld [vmem:[%s27355_s4 + $0x1738] sm:$0xf0] }
 0x2cd   :  { %v4713_v50 = vmax.f32 %v4708_v11, 0.0  ;;  %v14008_v43 = vor.u32 %v17541_v6, %v14007_v25  ;;  %v13977_v25 = vld [vmem:[%s27355_s4 + $0x14b8] sm:$0xf0]  ;;  %v14300_v6 = vor.u32 %v17612_v9, %v14297_v17  ;;  %v17668_v24 = vld [vmem:[%s27358_s3 + $0xec] sm:$0xf0] }
 0x2ce   :  { %5967 = vmatpush.bf16.msra.mxu2 %v14188_v32  ;;  %v17664_v9 = vld [vmem:[%s27358_s3 + $0xcc] sm:$0xf0] }
 0x2cf   :  { %v4724_v5 = vmul.f32 %v4720_v57, %v4713_v50  ;;  %v14295_v50 = vld [vmem:[%s27355_s4 + $0x1730] sm:$0xf] }
 0x2d0   :  { %5942 = vmatpush.bf16.msra.mxu0 %v14176_v42  ;;  %v4695_v32 = vpop.f32.mrf.mxu2  ;;  %v14319_v42 = vld [vmem:[%s27355_s4 + $0x1760] sm:$0xf] }
 0x2d1   :  { %v4735_v33 = vadd.f32 %v4731_v41, %v4724_v5  ;;  %v4696_v37 = vadd.f32 %v4695_v32, %v4682_v38  ;;  %v14320_v19 = vor.u32 %v17619_v55, %v14319_v42  ;;  %v17533_v5 = vld [vmem:[%s27355_s4 + $0x14b4] sm:$0xf0]  ;;  %v14296_v38 = vor.u32 %v17613_v28, %v14295_v50  ;;  %v14287_v32 = vld [vmem:[%s27355_s4 + $0x1720] sm:$0xf]  ;;  %v17531_v42 = vld [vmem:[%s27355_s4 + $0x14a4] sm:$0xf0] }
 0x2d2   :  { %5968 = vmatpush.bf16.msra.mxu2 %v14180_v16  ;;  %v4709_v16 = vpop.f32.mrf.mxu3 }
 0x2d3   :  { %v23180_v30 = vpack.c.bf16 %v4735_v33, %v4735_v33  ;;  %v4710_v23 = vadd.f32 %v4709_v16, %v4696_v37  ;;  %v17530_v16 = vld [vmem:[%s27355_s4 + $0x14a4] sm:$0xf] }
 0x2d4   :  { %5943 = vmatpush.bf16.msra.mxu0 %v14168_v47  ;;  %v17538_v47 = vld [vmem:[%s27355_s4 + $0x14e4] sm:$0xf] }
 0x2d5   :  { %v4715_v18 = vmax.f32 %v4710_v23, 0.0  ;;  %4955 = vmatmul.bf16.vlgmr.msra.gmra.mxu1 %v23180_v30  ;;  %4981 = vmatmul.bf16.vlgmr.msra.gmra.mxu3 %v23180_v30  ;;  %v14004_v40 = vor.u32 %v17538_v47, %v14001_v62  ;;  %v5028_v33 = vrot.slane %v23180_v30, 1  ;;  %v17609_v23 = vld [vmem:[%s27355_s4 + $0x1714] sm:$0xf0] }
 0x2d6   :  { %5969 = vmatpush.bf16.msra.mxu2 %v14172_v15  ;;  %v23196_v15 = vpack.c.bf16 %v21520_v39, %v21520_v39  ;;  %5454 = vmatpush.bf16.msra.mxu1 %v14008_v43  ;;  %v17616_v39 = vld [vmem:[%s27355_s4 + $0x1754] sm:$0xf]  ;;  %v13969_v43 = vld [vmem:[%s27355_s4 + $0x14a8] sm:$0xf0]  ;;  %v14280_v44 = vor.u32 %v17609_v23, %v14279_v63  ;;  %v17567_v63 = vld [vmem:[%s27355_s4 + $0x15c4] sm:$0xf0] }
 0x2d7   :  { %5480 = vmatpush.bf16.msra.mxu3 %v14012_v4  ;;  %v14316_v36 = vor.u32 %v17616_v39, %v14313_v35  ;;  %v13972_v62 = vor.u32 %v17530_v16, %v13969_v43  ;;  %v14271_v35 = vld [vmem:[%s27355_s4 + $0x1700] sm:$0xf]  ;;  %v17656_v16 = vld [vmem:[%s27358_s3 + $0x8c] sm:$0xf0]  ;;  %v17566_v23 = vld [vmem:[%s27355_s4 + $0x15c4] sm:$0xf] }
 0x2d8   :  { %5944 = vmatpush.bf16.msra.mxu0 %v14160_v56  ;;  %v4726_v56 = vmul.f32 %v4720_v57, %v4715_v18  ;;  %v14305_v57 = vld [vmem:[%s27355_s4 + $0x1748] sm:$0xf0]  ;;  %v13959_v18 = vld [vmem:[%s27355_s4 + $0x1490] sm:$0xf] }
 0x2d9   :  { %v14308_v8 = vor.u32 %v17614_v58, %v14305_v57  ;;  %v13953_v58 = vld [vmem:[%s27355_s4 + $0x1488] sm:$0xf0]  ;;  %v14135_v57 = vld [vmem:[%s27355_s4 + $0x15f0] sm:$0xf] }
 0x2da   :  { %5970 = vmatpush.bf16.msra.mxu2 %v14164_v13  ;;  %v13991_v13 = vld [vmem:[%s27355_s4 + $0x14d0] sm:$0xf]  ;;  %v23226_v45 = vadd.f32 %v4731_v41, %v4726_v56  ;;  %5455 = vmatpush.bf16.msra.mxu1 %v14000_v0  ;;  %v13961_v0 = vld [vmem:[%s27355_s4 + $0x1498] sm:$0xf0]  ;;  %v17607_v56 = vld [vmem:[%s27355_s4 + $0x1704] sm:$0xf0] }
 0x2db   :  { %v13992_v11 = vor.u32 %v17537_v2, %v13991_v13  ;;  %5481 = vmatpush.bf16.msra.mxu3 %v14004_v40  ;;  %v17606_v40 = vld [vmem:[%s27355_s4 + $0x1704] sm:$0xf]  ;;  %v14273_v2 = vld [vmem:[%s27355_s4 + $0x1708] sm:$0xf0]  ;;  %v13964_v52 = vor.u32 %v17528_v49, %v13961_v0  ;;  %v17565_v49 = vld [vmem:[%s27355_s4 + $0x15b4] sm:$0xf0] }
 0x2dc   :  { %5945 = vmatpush.bf16.msra.mxu0 %v14152_v61  ;;  %v13983_v61 = vld [vmem:[%s27355_s4 + $0x14c0] sm:$0xf]  ;;  %v17564_v0 = vld [vmem:[%s27355_s4 + $0x15b4] sm:$0xf] }
 0x2dd   :  { %v13984_v41 = vor.u32 %v17535_v48, %v13983_v61  ;;  %v14276_v61 = vor.u32 %v17606_v40, %v14273_v2  ;;  %v17572_v48 = vld [vmem:[%s27355_s4 + $0x15f4] sm:$0xf]  ;;  %v14432_v40 = vld [vmem:[%s27358_s3 + $0x40] sm:$0xf] }
 0x2de   :  { %5971 = vmatpush.bf16.msra.mxu2 %v14156_v60  ;;  %v14304_v60 = vor.u32 %v17615_v10, %v14303_v34  ;;  %5456 = vmatpush.bf16.msra.mxu1 %v13992_v11  ;;  %v17527_v34 = vld [vmem:[%s27355_s4 + $0x1484] sm:$0xf0]  ;;  %v17526_v10 = vld [vmem:[%s27355_s4 + $0x1484] sm:$0xf]  ;;  %v14272_v11 = vor.u32 %v17607_v56, %v14271_v35 }
 0x2df   :  { %5482 = vmatpush.bf16.msra.mxu3 %v13996_v31  ;;  %v17573_v31 = vld [vmem:[%s27355_s4 + $0x15f4] sm:$0xf0]  ;;  %v13956_v50 = vor.u32 %v17526_v10, %v13953_v58  ;;  %v14416_v58 = vld [vmem:[%s27358_s3 + $0x20] sm:$0xf] }
 0x2e0   :  { %5946 = vmatpush.bf16.msra.mxu0 %v14144_v3  ;;  %v23264_v29 = vpop.f32.mrf.mxu0  ;;  %v17532_v3 = vld [vmem:[%s27355_s4 + $0x14b4] sm:$0xf]  ;;  %v14136_v28 = vor.u32 %v17573_v31, %v14135_v57  ;;  %v17644_v57 = vld [vmem:[%s27358_s3 + $0x2c] sm:$0xf0] }
 0x2e1   :  { %v13980_v37 = vor.u32 %v17532_v3, %v13977_v25  ;;  %v6027_v3 = vrot.slane %v23196_v15, 1 }
 0x2e2   :  { %5972 = vmatpush.bf16.msra.mxu2 %v14148_v54  ;;  %v17611_v54 = vld [vmem:[%s27355_s4 + $0x1724] sm:$0xf0]  ;;  %5457 = vmatpush.bf16.msra.mxu1 %v13984_v41  ;;  %v14496_v41 = vld [vmem:[%s27358_s3 + $0xc0] sm:$0xf] }
 0x2e3   :  { %5947 = vmatmul.bf16.vlgmr.msra.gmra.mxu0 %v23196_v15  ;;  %5483 = vmatpush.bf16.msra.mxu3 %v13988_v20  ;;  %v14288_v55 = vor.u32 %v17611_v54, %v14287_v32  ;;  %v14127_v20 = vld [vmem:[%s27355_s4 + $0x15e0] sm:$0xf]  ;;  %v14497_v25 = vor.u32 %v17664_v9, %v14496_v41  ;;  %v17559_v41 = vld [vmem:[%s27355_s4 + $0x1584] sm:$0xf0] }
 0x2e4   :  { %6191 = vmatpush.bf16.msrb.mxu0 %v14328_v21  ;;  %v13976_v21 = vor.u32 %v17533_v5, %v13975_v7  ;;  %v17571_v7 = vld [vmem:[%s27355_s4 + $0x15e4] sm:$0xf0]  ;;  %v17570_v5 = vld [vmem:[%s27355_s4 + $0x15e4] sm:$0xf]  ;;  %v14480_v54 = vld [vmem:[%s27358_s3 + $0xa0] sm:$0xf] }
 0x2e5   :  { %5973 = vmatmul.bf16.vlgmr.msra.gmra.mxu2 %v23196_v15  ;;  %5212 = vmatmul.bf16.vlgmr.msrb.gmra.mxu1 %v5028_v33  ;;  %v14128_v32 = vor.u32 %v17571_v7, %v14127_v20  ;;  %v14119_v15 = vld [vmem:[%s27355_s4 + $0x15d0] sm:$0xf]  ;;  %v14400_v9 = vld [vmem:[%s27358_s3] sm:$0xf]  ;;  %v17558_v7 = vld [vmem:[%s27355_s4 + $0x1584] sm:$0xf] }
 0x2e6   :  { %6217 = vmatpush.bf16.msrb.mxu2 %v14332_v22  ;;  %v13967_v22 = vld [vmem:[%s27355_s4 + $0x14a0] sm:$0xf]  ;;  %5238 = vmatmul.bf16.vlgmr.msrb.gmra.mxu3 %v5028_v33  ;;  %v17568_v33 = vld [vmem:[%s27355_s4 + $0x15d4] sm:$0xf] }
 0x2e7   :  { %5458 = vmatpush.bf16.msra.mxu1 %v13976_v21  ;;  %v13968_v59 = vor.u32 %v17531_v42, %v13967_v22  ;;  %5484 = vmatpush.bf16.msra.mxu3 %v13980_v37  ;;  %v17660_v21 = vld [vmem:[%s27358_s3 + $0xac] sm:$0xf0]  ;;  %v14121_v37 = vld [vmem:[%s27355_s4 + $0x15d8] sm:$0xf0]  ;;  %v14120_v42 = vor.u32 %v17569_v46, %v14119_v15 }
 0x2e8   :  { %6192 = vmatpush.bf16.msrb.mxu0 %v14320_v19  ;;  %v23309_v4 = vpop.f32.mrf.mxu2  ;;  %v14281_v19 = vld [vmem:[%s27355_s4 + $0x1718] sm:$0xf0]  ;;  %v4945_v47 = vpop.f32.mrf.mxu0  ;;  %v14481_v22 = vor.u32 %v17660_v21, %v14480_v54  ;;  %v14124_v43 = vor.u32 %v17568_v33, %v14121_v37 }
 0x2e9   :  { %v14284_v39 = vor.u32 %v17608_v51, %v14281_v19  ;;  %v14448_v47 = vld [vmem:[%s27358_s3 + $0x60] sm:$0xf]  ;;  %v14265_v54 = vld [vmem:[%s27355_s4 + $0x16f8] sm:$0xf0] }
 0x2ea   :  { %6218 = vmatpush.bf16.msrb.mxu2 %v14324_v53  ;;  %v17529_v53 = vld [vmem:[%s27355_s4 + $0x1494] sm:$0xf0] }
 0x2eb   :  { %5459 = vmatpush.bf16.msra.mxu1 %v13968_v59  ;;  %v13960_v13 = vor.u32 %v17529_v53, %v13959_v18  ;;  %5485 = vmatpush.bf16.msra.mxu3 %v13972_v62  ;;  %v14113_v59 = vld [vmem:[%s27355_s4 + $0x15c8] sm:$0xf0]  ;;  %v17652_v62 = vld [vmem:[%s27358_s3 + $0x6c] sm:$0xf0] }
 0x2ec   :  { %6193 = vmatpush.bf16.msrb.mxu0 %v14312_v26  ;;  %v14512_v26 = vld [vmem:[%s27358_s3 + $0xe0] sm:$0xf]  ;;  %v14116_v53 = vor.u32 %v17566_v23, %v14113_v59  ;;  %v14449_v35 = vor.u32 %v17652_v62, %v14448_v47  ;;  %v17788_v62 = vld [vmem:[%s27358_s3 + $0x4ac] sm:$0xf0] }
 0x2ed   :  { %v14513_v27 = vor.u32 %v17668_v24, %v14512_v26  ;;  %v14095_v26 = vld [vmem:[%s27355_s4 + $0x15a0] sm:$0xf]  ;;  %v17563_v24 = vld [vmem:[%s27355_s4 + $0x15a4] sm:$0xf0] }
 0x2ee   :  { %6219 = vmatpush.bf16.msrb.mxu2 %v14316_v36  ;;  %v13951_v36 = vld [vmem:[%s27355_s4 + $0x1480] sm:$0xf] }
 0x2ef   :  { %5460 = vmatpush.bf16.msra.mxu1 %v13960_v13  ;;  %5486 = vmatpush.bf16.msra.mxu3 %v13964_v52  ;;  %v17648_v13 = vld [vmem:[%s27358_s3 + $0x4c] sm:$0xf0]  ;;  %v17562_v52 = vld [vmem:[%s27355_s4 + $0x15a4] sm:$0xf]  ;;  %v14992_v47 = vld [vmem:[%s27358_s3 + $0x4a0] sm:$0xf] }
 0x2f0   :  { %6194 = vmatpush.bf16.msrb.mxu0 %v14304_v60  ;;  %v14137_v60 = vld [vmem:[%s27355_s4 + $0x15f8] sm:$0xf0]  ;;  %v4971_v1 = vpop.f32.mrf.mxu2  ;;  %v6245_v23 = vld [vmem:[%s27359_s1] sm:$0xff] }
 0x2f1   :  { %v14140_v17 = vor.u32 %v17572_v48, %v14137_v60  ;;  %v14087_v48 = vld [vmem:[%s27355_s4 + $0x1590] sm:$0xf]  ;;  %v17561_v60 = vld [vmem:[%s27355_s4 + $0x1594] sm:$0xf0]  ;;  %v14089_v1 = vld [vmem:[%s27355_s4 + $0x1598] sm:$0xf0] }
 0x2f2   :  { %6220 = vmatpush.bf16.msrb.mxu2 %v14308_v8  ;;  %v13952_v8 = vor.u32 %v17527_v34, %v13951_v36  ;;  %v14097_v36 = vld [vmem:[%s27355_s4 + $0x15a8] sm:$0xf0]  ;;  %v14433_v34 = vor.u32 %v17648_v13, %v14432_v40  ;;  %6514 = vst [vmem:[#allocation1] ss:$9 sm:$0xff] %v6245_v23  ;;  %v17784_v40 = vld [vmem:[%s27358_s3 + $0x48c] sm:$0xf0] }
 0x2f3   :  { %5487 = vmatpush.bf16.msra.mxu3 %v13956_v50  ;;  %v14417_v50 = vor.u32 %v17644_v57, %v14416_v58  ;;  %v17780_v58 = vld [vmem:[%s27358_s3 + $0x46c] sm:$0xf0] }
 0x2f4   :  { %6195 = vmatpush.bf16.msrb.mxu0 %v14296_v38  ;;  %v14129_v38 = vld [vmem:[%s27355_s4 + $0x15e8] sm:$0xf0]  ;;  %5461 = vmatpush.bf16.msra.mxu1 %v13952_v8  ;;  %v14079_v8 = vld [vmem:[%s27355_s4 + $0x1580] sm:$0xf] }
 0x2f5   :  { %v14132_v12 = vor.u32 %v17570_v5, %v14129_v38  ;;  %v15024_v5 = vld [vmem:[%s27358_s3 + $0x4e0] sm:$0xf]  ;;  %v17796_v38 = vld [vmem:[%s27358_s3 + $0x4ec] sm:$0xf0]  ;;  %v14080_v15 = vor.u32 %v17559_v41, %v14079_v8 }
 0x2f6   :  { %6221 = vmatpush.bf16.msrb.mxu2 %v14300_v6  ;;  %v5278_v6 = vrot.slane %v23180_v30, 2  ;;  %v15025_v46 = vor.u32 %v17796_v38, %v15024_v5  ;;  %v17776_v41 = vld [vmem:[%s27358_s3 + $0x44c] sm:$0xf0]  ;;  %v14225_v5 = vld [vmem:[%s27355_s4 + $0x16a8] sm:$0xf0] }
 0x2f7   :  { %5730 = vmatpush.bf16.msrb.mxu3 %v14140_v17  ;;  %v17640_v17 = vld [vmem:[%s27358_s3 + $0xc] sm:$0xf0]  ;;  %v14768_v38 = vld [vmem:[%s27358_s3 + $0x2e0] sm:$0xf] }
 0x2f8   :  { %6196 = vmatpush.bf16.msrb.mxu0 %v14288_v55  ;;  %5704 = vmatpush.bf16.msrb.mxu1 %v14136_v28  ;;  %v14464_v55 = vld [vmem:[%s27358_s3 + $0x80] sm:$0xf]  ;;  %v14088_v28 = vor.u32 %v17561_v60, %v14087_v48  ;;  %v14401_v21 = vor.u32 %v17640_v17, %v14400_v9  ;;  %v14231_v48 = vld [vmem:[%s27355_s4 + $0x16b0] sm:$0xf]  ;;  %v17597_v60 = vld [vmem:[%s27355_s4 + $0x16b4] sm:$0xf0] }
 0x2f9   :  { %5462 = vmatmul.bf16.vlgmr.msra.gmra.mxu1 %v5278_v6  ;;  %5488 = vmatmul.bf16.vlgmr.msra.gmra.mxu3 %v5278_v6  ;;  %v14465_v51 = vor.u32 %v17656_v16, %v14464_v55  ;;  %v17605_v6 = vld [vmem:[%s27355_s4 + $0x16f4] sm:$0xf0]  ;;  %v14255_v16 = vld [vmem:[%s27355_s4 + $0x16e0] sm:$0xf] }
 0x2fa   :  { %6222 = vmatpush.bf16.msrb.mxu2 %v14292_v14  ;;  %v14111_v14 = vld [vmem:[%s27355_s4 + $0x15c0] sm:$0xf] }
 0x2fb   :  { %5731 = vmatpush.bf16.msrb.mxu3 %v14132_v12  ;;  %v14112_v19 = vor.u32 %v17567_v63, %v14111_v14  ;;  %v17602_v14 = vld [vmem:[%s27355_s4 + $0x16e4] sm:$0xf]  ;;  %v14257_v63 = vld [vmem:[%s27355_s4 + $0x16e8] sm:$0xf0]  ;;  %v14223_v17 = vld [vmem:[%s27355_s4 + $0x16a0] sm:$0xf] }
 0x2fc   :  { %6197 = vmatpush.bf16.msrb.mxu0 %v14280_v44  ;;  %5705 = vmatpush.bf16.msrb.mxu1 %v14128_v32  ;;  %v14103_v44 = vld [vmem:[%s27355_s4 + $0x15b0] sm:$0xf]  ;;  %v17604_v32 = vld [vmem:[%s27355_s4 + $0x16f4] sm:$0xf]  ;;  %v23585_v57 = vld [vmem:[#allocation1] sm:$0xff] }
 0x2fd   :  { %v14104_v56 = vor.u32 %v17565_v49, %v14103_v44  ;;  %v14268_v55 = vor.u32 %v17604_v32, %v14265_v54  ;;  %v14247_v44 = vld [vmem:[%s27355_s4 + $0x16d0] sm:$0xf]  ;;  %v17601_v49 = vld [vmem:[%s27355_s4 + $0x16d4] sm:$0xf0] }
 0x2fe   :  { %6223 = vmatpush.bf16.msrb.mxu2 %v14284_v39  ;;  %v14105_v39 = vld [vmem:[%s27355_s4 + $0x15b8] sm:$0xf0] }
 0x2ff   :  { %5732 = vmatpush.bf16.msrb.mxu3 %v14124_v43  ;;  %v14108_v2 = vor.u32 %v17564_v0, %v14105_v39  ;;  %v17603_v43 = vld [vmem:[%s27355_s4 + $0x16e4] sm:$0xf0]  ;;  %v14249_v0 = vld [vmem:[%s27355_s4 + $0x16d8] sm:$0xf0]  ;;  %v14993_v39 = vor.u32 %v17788_v62, %v14992_v47  ;;  %v14912_v47 = vld [vmem:[%s27358_s3 + $0x400] sm:$0xf] }
 0x300   :  { %6198 = vmatpush.bf16.msrb.mxu0 %v14272_v11  ;;  %5706 = vmatpush.bf16.msrb.mxu1 %v14120_v42  ;;  %v23433_v18 = vpop.f32.mrf.mxu0  ;;  %v14096_v11 = vor.u32 %v17563_v24, %v14095_v26  ;;  %v17792_v42 = vld [vmem:[%s27358_s3 + $0x4cc] sm:$0xf0]  ;;  %v17599_v26 = vld [vmem:[%s27355_s4 + $0x16c4] sm:$0xf0]  ;;  %v17598_v24 = vld [vmem:[%s27355_s4 + $0x16c4] sm:$0xf] }
 0x301   :  { %v17768_v62 = vld [vmem:[%s27358_s3 + $0x40c] sm:$0xf0] }
 0x302   :  { %6224 = vmatpush.bf16.msrb.mxu2 %v14276_v61  ;;  %v14100_v61 = vor.u32 %v17562_v52, %v14097_v36  ;;  %v14241_v52 = vld [vmem:[%s27355_s4 + $0x16c8] sm:$0xf0] }
 0x303   :  { %6199 = vmatmul.bf16.vlgmr.msrb.gmra.mxu0 %v6027_v3  ;;  %5733 = vmatpush.bf16.msrb.mxu3 %v14116_v53  ;;  %v14260_v53 = vor.u32 %v17602_v14, %v14257_v63  ;;  %v17591_v14 = vld [vmem:[%s27355_s4 + $0x1684] sm:$0xf0] }
 0x304   :  { %7811 = vmatpush.bf16.msra.mxu0 %v14513_v27  ;;  %5707 = vmatpush.bf16.msrb.mxu1 %v14112_v19  ;;  %v17560_v27 = vld [vmem:[%s27355_s4 + $0x1594] sm:$0xf]  ;;  %v14256_v19 = vor.u32 %v17603_v43, %v14255_v16  ;;  %v17728_v16 = vld [vmem:[%s27358_s3 + $0x2cc] sm:$0xf0]  ;;  %v14207_v43 = vld [vmem:[%s27355_s4 + $0x1680] sm:$0xf] }
 0x305   :  { %6225 = vmatmul.bf16.vlgmr.msrb.gmra.mxu2 %v6027_v3  ;;  %v14092_v20 = vor.u32 %v17560_v27, %v14089_v1  ;;  %v14081_v3 = vld [vmem:[%s27355_s4 + $0x1588] sm:$0xf0]  ;;  %v17596_v27 = vld [vmem:[%s27355_s4 + $0x16b4] sm:$0xf]  ;;  %v14233_v1 = vld [vmem:[%s27355_s4 + $0x16b8] sm:$0xf0] }
 0x306   :  { %v14084_v33 = vor.u32 %v17558_v7, %v14081_v3  ;;  %v14236_v9 = vor.u32 %v17596_v27, %v14233_v1  ;;  %v17594_v7 = vld [vmem:[%s27355_s4 + $0x16a4] sm:$0xf]  ;;  %v17732_v3 = vld [vmem:[%s27358_s3 + $0x2ec] sm:$0xf0]  ;;  %v14720_v27 = vld [vmem:[%s27358_s3 + $0x280] sm:$0xf] }
 0x307   :  { %5734 = vmatpush.bf16.msrb.mxu3 %v14108_v2  ;;  %v14239_v2 = vld [vmem:[%s27355_s4 + $0x16c0] sm:$0xf]  ;;  %v17720_v1 = vld [vmem:[%s27358_s3 + $0x28c] sm:$0xf0] }
 0x308   :  { %7812 = vmatpush.bf16.msra.mxu0 %v14497_v25  ;;  %v23465_v10 = vpop.f32.mrf.mxu2  ;;  %5708 = vmatpush.bf16.msrb.mxu1 %v14104_v56  ;;  %v5202_v31 = vpop.f32.mrf.mxu0  ;;  %v14263_v25 = vld [vmem:[%s27355_s4 + $0x16f0] sm:$0xf]  ;;  %v14976_v56 = vld [vmem:[%s27358_s3 + $0x480] sm:$0xf] }
 0x309   :  { %v14264_v37 = vor.u32 %v17605_v6, %v14263_v25  ;;  %v14977_v36 = vor.u32 %v17784_v40, %v14976_v56  ;;  %v14769_v6 = vor.u32 %v17732_v3, %v14768_v38  ;;  %v17636_v56 = vld [vmem:[%s27355_s4 + $0x17f4] sm:$0xf]  ;;  %v14393_v40 = vld [vmem:[%s27355_s4 + $0x17f8] sm:$0xf0]  ;;  %v14704_v3 = vld [vmem:[%s27358_s3 + $0x260] sm:$0xf] }
 0x30b   :  { %5735 = vmatpush.bf16.msrb.mxu3 %v14100_v61  ;;  %v14244_v61 = vor.u32 %v17598_v24, %v14241_v52  ;;  %7837 = vmatpush.bf16.msra.mxu2 %v14769_v6  ;;  %v14208_v24 = vor.u32 %v17591_v14, %v14207_v43  ;;  %v17632_v6 = vld [vmem:[%s27355_s4 + $0x17d4] sm:$0xf]  ;;  %v17630_v43 = vld [vmem:[%s27355_s4 + $0x17c4] sm:$0xf]  ;;  %v14369_v14 = vld [vmem:[%s27355_s4 + $0x17c8] sm:$0xf0] }
 0x30c   :  { %7813 = vmatpush.bf16.msra.mxu0 %v14481_v22  ;;  %5709 = vmatpush.bf16.msrb.mxu1 %v14096_v11  ;;  %v15008_v22 = vld [vmem:[%s27358_s3 + $0x4c0] sm:$0xf] }
 0x30d   :  { %v15009_v59 = vor.u32 %v17792_v42, %v15008_v22  ;;  %v14960_v11 = vld [vmem:[%s27358_s3 + $0x460] sm:$0xf]  ;;  %v17592_v22 = vld [vmem:[%s27355_s4 + $0x1694] sm:$0xf]  ;;  %v14217_v42 = vld [vmem:[%s27355_s4 + $0x1698] sm:$0xf0] }
 0x30e   :  { %v14961_v8 = vor.u32 %v17780_v58, %v14960_v11  ;;  %v14383_v11 = vld [vmem:[%s27355_s4 + $0x17e0] sm:$0xf]  ;;  %v17662_v58 = vld [vmem:[%s27358_s3 + $0xc4] sm:$0xf] }
 0x30f   :  { %5736 = vmatpush.bf16.msrb.mxu3 %v14092_v20  ;;  %v17595_v20 = vld [vmem:[%s27355_s4 + $0x16a4] sm:$0xf0] }
 0x310   :  { %7814 = vmatpush.bf16.msra.mxu0 %v14465_v51  ;;  %v5228_v12 = vpop.f32.mrf.mxu2  ;;  %5710 = vmatpush.bf16.msrb.mxu1 %v14088_v28  ;;  %v5528_v51 = vrot.slane %v23180_v30, 3  ;;  %v17600_v30 = vld [vmem:[%s27355_s4 + $0x16d4] sm:$0xf]  ;;  %v14944_v28 = vld [vmem:[%s27358_s3 + $0x440] sm:$0xf]  ;;  %v14224_v54 = vor.u32 %v17595_v20, %v14223_v17 }
 0x311   :  { %v14252_v13 = vor.u32 %v17600_v30, %v14249_v0  ;;  %v14945_v25 = vor.u32 %v17776_v41, %v14944_v28  ;;  %v17772_v12 = vld [vmem:[%s27358_s3 + $0x42c] sm:$0xf0]  ;;  %v14514_v30 = vld [vmem:[%s27358_s3 + $0xf0] sm:$0xf0]  ;;  %v17637_v0 = vld [vmem:[%s27355_s4 + $0x17f4] sm:$0xf0]  ;;  %v14721_v28 = vor.u32 %v17720_v1, %v14720_v27 }
 0x312   :  { %v14375_v20 = vld [vmem:[%s27355_s4 + $0x17d0] sm:$0xf] }
 0x313   :  { %5737 = vmatpush.bf16.msrb.mxu3 %v14084_v33  ;;  %v14215_v33 = vld [vmem:[%s27355_s4 + $0x1690] sm:$0xf] }
 0x314   :  { %7815 = vmatpush.bf16.msra.mxu0 %v14449_v35  ;;  %5711 = vmatpush.bf16.msrb.mxu1 %v14080_v15  ;;  %v14248_v35 = vor.u32 %v17601_v49, %v14247_v44  ;;  %v14391_v44 = vld [vmem:[%s27355_s4 + $0x17f0] sm:$0xf]  ;;  %v17666_v49 = vld [vmem:[%s27358_s3 + $0xe4] sm:$0xf] }
 0x315   :  { %v14517_v52 = vor.u32 %v17666_v49, %v14514_v30  ;;  %v17629_v49 = vld [vmem:[%s27355_s4 + $0x17b4] sm:$0xf0]  ;;  %v14672_v30 = vld [vmem:[%s27358_s3 + $0x220] sm:$0xf]  ;;  %v17860_v27 = vld [vmem:[%s27358_s3 + $0x6ec] sm:$0xf0] }
 0x316   :  { %5738 = vmatmul.bf16.vlgmr.msrb.gmra.mxu3 %v5528_v51 }
 0x317   :  { %5978 = vmatpush.bf16.msra.mxu3 %v14268_v55  ;;  %5712 = vmatmul.bf16.vlgmr.msrb.gmra.mxu1 %v5528_v51  ;;  %v14752_v55 = vld [vmem:[%s27358_s3 + $0x2c0] sm:$0xf]  ;;  %v17590_v51 = vld [vmem:[%s27355_s4 + $0x1684] sm:$0xf] }
 0x318   :  { %7816 = vmatpush.bf16.msra.mxu0 %v14433_v34  ;;  %5952 = vmatpush.bf16.msra.mxu1 %v14264_v37  ;;  %v14240_v34 = vor.u32 %v17599_v26, %v14239_v2  ;;  %v17593_v37 = vld [vmem:[%s27355_s4 + $0x1694] sm:$0xf0]  ;;  %v14753_v23 = vor.u32 %v17728_v16, %v14752_v55  ;;  %v14688_v55 = vld [vmem:[%s27358_s3 + $0x240] sm:$0xf]  ;;  %v17712_v16 = vld [vmem:[%s27358_s3 + $0x24c] sm:$0xf0] }
 0x31a   :  { %7838 = vmatpush.bf16.msra.mxu2 %v14753_v23  ;;  %v14689_v23 = vor.u32 %v17712_v16, %v14688_v55  ;;  %v14640_v16 = vld [vmem:[%s27358_s3 + $0x1e0] sm:$0xf] }
 0x31b   :  { %5979 = vmatpush.bf16.msra.mxu3 %v14260_v53  ;;  %v14220_v53 = vor.u32 %v17592_v22, %v14217_v42  ;;  %v17631_v42 = vld [vmem:[%s27355_s4 + $0x17c4] sm:$0xf0] }
 0x31c   :  { %7817 = vmatpush.bf16.msra.mxu0 %v14417_v50  ;;  %5953 = vmatpush.bf16.msra.mxu1 %v14256_v19  ;;  %v14232_v50 = vor.u32 %v17597_v60, %v14231_v48  ;;  %v14209_v19 = vld [vmem:[%s27355_s4 + $0x1688] sm:$0xf0]  ;;  %v14396_v48 = vor.u32 %v17636_v56, %v14393_v40  ;;  %v17635_v60 = vld [vmem:[%s27355_s4 + $0x17e4] sm:$0xf0]  ;;  %v14351_v40 = vld [vmem:[%s27355_s4 + $0x17a0] sm:$0xf] }
 0x31d   :  { %v14384_v17 = vor.u32 %v17635_v60, %v14383_v11  ;;  %v14656_v11 = vld [vmem:[%s27358_s3 + $0x200] sm:$0xf] }
 0x31e   :  { %v15280_v60 = vld [vmem:[%s27358_s3 + $0x6e0] sm:$0xf] }
 0x31f   :  { %5980 = vmatpush.bf16.msra.mxu3 %v14252_v13  ;;  %v14913_v13 = vor.u32 %v17768_v62, %v14912_v47  ;;  %v17650_v47 = vld [vmem:[%s27358_s3 + $0x64] sm:$0xf]  ;;  %v14450_v62 = vld [vmem:[%s27358_s3 + $0x70] sm:$0xf0] }
 0x320   :  { %7818 = vmatpush.bf16.msra.mxu0 %v14401_v21  ;;  %5954 = vmatpush.bf16.msra.mxu1 %v14248_v35  ;;  %v23587_v31 = vpop.f32.mrf.mxu0  ;;  %v14928_v21 = vld [vmem:[%s27358_s3 + $0x420] sm:$0xf]  ;;  %v17724_v35 = vld [vmem:[%s27358_s3 + $0x2ac] sm:$0xf0] }
 0x321   :  { %v14929_v63 = vor.u32 %v17772_v12, %v14928_v21 }
 0x323   :  { %7819 = vmatmul.bf16.vlgmr.msra.gmra.mxu0 %v23585_v57  ;;  %5981 = vmatpush.bf16.msra.mxu3 %v14244_v61  ;;  %v14498_v61 = vld [vmem:[%s27358_s3 + $0xd0] sm:$0xf0] }
 0x324   :  { %7863 = vmatpush.bf16.msrb.mxu0 %v15025_v46  ;;  %5955 = vmatpush.bf16.msra.mxu1 %v14240_v34  ;;  %v14228_v46 = vor.u32 %v17594_v7, %v14225_v5  ;;  %v14392_v34 = vor.u32 %v17637_v0, %v14391_v44  ;;  %v14501_v41 = vor.u32 %v17662_v58, %v14498_v61  ;;  %v17658_v7 = vld [vmem:[%s27358_s3 + $0xa4] sm:$0xf]  ;;  %v14482_v5 = vld [vmem:[%s27358_s3 + $0xb0] sm:$0xf0]  ;;  %v17708_v0 = vld [vmem:[%s27358_s3 + $0x22c] sm:$0xf0] }
 0x325   :  { %v14485_v12 = vor.u32 %v17658_v7, %v14482_v5  ;;  %v14372_v44 = vor.u32 %v17630_v43, %v14369_v14  ;;  %v14673_v56 = vor.u32 %v17708_v0, %v14672_v30  ;;  %v17704_v58 = vld [vmem:[%s27358_s3 + $0x20c] sm:$0xf0]  ;;  %v14353_v61 = vld [vmem:[%s27355_s4 + $0x17a8] sm:$0xf0]  ;;  %v17794_v43 = vld [vmem:[%s27358_s3 + $0x4e4] sm:$0xf] }
 0x326   :  { %v14343_v5 = vld [vmem:[%s27355_s4 + $0x1790] sm:$0xf]  ;;  %v15026_v14 = vld [vmem:[%s27358_s3 + $0x4f0] sm:$0xf0] }
 0x327   :  { %5982 = vmatpush.bf16.msra.mxu3 %v14236_v9  ;;  %v23720_v9 = vpack.c.bf16 %v23226_v45, %v23226_v45  ;;  %v17633_v45 = vld [vmem:[%s27355_s4 + $0x17d4] sm:$0xf0]  ;;  %v15029_v0 = vor.u32 %v17794_v43, %v15026_v14  ;;  %v14962_v43 = vld [vmem:[%s27358_s3 + $0x470] sm:$0xf0] }
 0x328   :  { %7864 = vmatpush.bf16.msrb.mxu0 %v15009_v59  ;;  %v23626_v32 = vpop.f32.mrf.mxu2  ;;  %5956 = vmatpush.bf16.msra.mxu1 %v14232_v50  ;;  %v5452_v15 = vpop.f32.mrf.mxu0  ;;  %v14216_v59 = vor.u32 %v17593_v37, %v14215_v33  ;;  %v14385_v50 = vld [vmem:[%s27355_s4 + $0x17e8] sm:$0xf0]  ;;  %v17654_v33 = vld [vmem:[%s27358_s3 + $0x84] sm:$0xf]  ;;  %v14466_v37 = vld [vmem:[%s27358_s3 + $0x90] sm:$0xf0] }
 0x329   :  { %v14376_v15 = vor.u32 %v17633_v45, %v14375_v20  ;;  %v17624_v45 = vld [vmem:[%s27355_s4 + $0x1794] sm:$0xf] }
 0x32b   :  { %5983 = vmatpush.bf16.msra.mxu3 %v14228_v46  ;;  %v14367_v46 = vld [vmem:[%s27355_s4 + $0x17c0] sm:$0xf] }
 0x32c   :  { %7865 = vmatpush.bf16.msrb.mxu0 %v14993_v39  ;;  %5957 = vmatpush.bf16.msra.mxu1 %v14224_v54  ;;  %v14736_v39 = vld [vmem:[%s27358_s3 + $0x2a0] sm:$0xf]  ;;  %v14377_v54 = vld [vmem:[%s27355_s4 + $0x17d8] sm:$0xf0] }
 0x32d   :  { %v14737_v2 = vor.u32 %v17724_v35, %v14736_v39  ;;  %v14380_v22 = vor.u32 %v17632_v6, %v14377_v54  ;;  %v17628_v39 = vld [vmem:[%s27355_s4 + $0x17b4] sm:$0xf]  ;;  %v14361_v35 = vld [vmem:[%s27355_s4 + $0x17b8] sm:$0xf0]  ;;  %v17856_v6 = vld [vmem:[%s27358_s3 + $0x6cc] sm:$0xf0] }
 0x32e   :  { %v14335_v54 = vld [vmem:[%s27355_s4 + $0x1780] sm:$0xf] }
 0x32f   :  { %5984 = vmatpush.bf16.msra.mxu3 %v14220_v53  ;;  %7839 = vmatpush.bf16.msra.mxu2 %v14737_v2 }
 0x330   :  { %7866 = vmatpush.bf16.msrb.mxu0 %v14977_v36  ;;  %v5478_v26 = vpop.f32.mrf.mxu2  ;;  %5958 = vmatpush.bf16.msra.mxu1 %v14216_v59  ;;  %v14212_v36 = vor.u32 %v17590_v51, %v14209_v19  ;;  %v14469_v59 = vor.u32 %v17654_v33, %v14466_v37  ;;  %v14368_v51 = vor.u32 %v17631_v42, %v14367_v46  ;;  %v14359_v19 = vld [vmem:[%s27355_s4 + $0x17b0] sm:$0xf]  ;;  %v17622_v33 = vld [vmem:[%s27355_s4 + $0x1784] sm:$0xf]  ;;  %v14337_v37 = vld [vmem:[%s27355_s4 + $0x1788] sm:$0xf0] }
 0x331   :  { %v14360_v2 = vor.u32 %v17629_v49, %v14359_v19  ;;  %v17627_v26 = vld [vmem:[%s27355_s4 + $0x17a4] sm:$0xf0]  ;;  %v14402_v42 = vld [vmem:[%s27358_s3 + $0x10] sm:$0xf0]  ;;  %v14896_v19 = vld [vmem:[%s27358_s3 + $0x3e0] sm:$0xf] }
 0x333   :  { %5985 = vmatpush.bf16.msra.mxu3 %v14212_v36  ;;  %7840 = vmatpush.bf16.msra.mxu2 %v14721_v28  ;;  %v14364_v36 = vor.u32 %v17628_v39, %v14361_v35  ;;  %v14352_v28 = vor.u32 %v17627_v26, %v14351_v40  ;;  %v14340_v39 = vor.u32 %v17622_v33, %v14337_v37  ;;  %v17790_v40 = vld [vmem:[%s27358_s3 + $0x4c4] sm:$0xf]  ;;  %v17696_v26 = vld [vmem:[%s27358_s3 + $0x1cc] sm:$0xf0] }
 0x334   :  { %7867 = vmatpush.bf16.msrb.mxu0 %v14961_v8  ;;  %v17634_v8 = vld [vmem:[%s27355_s4 + $0x17e4] sm:$0xf]  ;;  %5959 = vmatpush.bf16.msra.mxu1 %v14208_v24 }
 0x335   :  { %v14388_v38 = vor.u32 %v17634_v8, %v14385_v50  ;;  %v17646_v24 = vld [vmem:[%s27358_s3 + $0x44] sm:$0xf]  ;;  %v15281_v8 = vor.u32 %v17860_v27, %v15280_v60  ;;  %v14608_v60 = vld [vmem:[%s27358_s3 + $0x1a0] sm:$0xf] }
 0x336   :  { %5986 = vmatmul.bf16.vlgmr.msra.gmra.mxu3 %v23720_v9  ;;  %v17786_v27 = vld [vmem:[%s27358_s3 + $0x4a4] sm:$0xf] }
 0x337   :  { %6230 = vmatpush.bf16.msrb.mxu3 %v14396_v48  ;;  %5960 = vmatmul.bf16.vlgmr.msra.gmra.mxu1 %v23720_v9  ;;  %v14657_v48 = vor.u32 %v17704_v58, %v14656_v11  ;;  %v6028_v58 = vrot.slane %v23720_v9, 1 }
 0x338   :  { %7868 = vmatpush.bf16.msrb.mxu0 %v14945_v25  ;;  %6204 = vmatpush.bf16.msrb.mxu1 %v14392_v34  ;;  %v17716_v25 = vld [vmem:[%s27358_s3 + $0x26c] sm:$0xf0]  ;;  %v17626_v34 = vld [vmem:[%s27355_s4 + $0x17a4] sm:$0xf] }
 0x339   :  { %v14705_v21 = vor.u32 %v17716_v25, %v14704_v3  ;;  %v14356_v7 = vor.u32 %v17626_v34, %v14353_v61  ;;  %v14345_v3 = vld [vmem:[%s27355_s4 + $0x1798] sm:$0xf0]  ;;  %v15264_v25 = vld [vmem:[%s27358_s3 + $0x6c0] sm:$0xf]  ;;  %v17760_v34 = vld [vmem:[%s27358_s3 + $0x3cc] sm:$0xf0] }
 0x33a   :  { %v14348_v55 = vor.u32 %v17624_v45, %v14345_v3  ;;  %v14592_v45 = vld [vmem:[%s27358_s3 + $0x180] sm:$0xf]  ;;  %v17782_v3 = vld [vmem:[%s27358_s3 + $0x484] sm:$0xf] }
 0x33b   :  { %6231 = vmatpush.bf16.msrb.mxu3 %v14388_v38  ;;  %7841 = vmatpush.bf16.msra.mxu2 %v14705_v21  ;;  %v17625_v38 = vld [vmem:[%s27355_s4 + $0x1794] sm:$0xf0]  ;;  %v17623_v21 = vld [vmem:[%s27355_s4 + $0x1784] sm:$0xf0] }
 0x33c   :  { %7869 = vmatpush.bf16.msrb.mxu0 %v14929_v63  ;;  %6205 = vmatpush.bf16.msrb.mxu1 %v14384_v17  ;;  %v23772_v63 = vld [vmem:[#allocation1 + $0x24] sm:$0xff]  ;;  %v14418_v17 = vld [vmem:[%s27358_s3 + $0x30] sm:$0xf0]  ;;  %v14344_v46 = vor.u32 %v17625_v38, %v14343_v5  ;;  %v14336_v30 = vor.u32 %v17623_v21, %v14335_v54  ;;  %v17688_v54 = vld [vmem:[%s27358_s3 + $0x18c] sm:$0xf0] }
 0x33d   :  { %v15200_v21 = vld [vmem:[%s27358_s3 + $0x640] sm:$0xf] }
 0x33f   :  { %6232 = vmatpush.bf16.msrb.mxu3 %v14380_v22  ;;  %7842 = vmatpush.bf16.msra.mxu2 %v14689_v23  ;;  %v17638_v22 = vld [vmem:[%s27358_s3 + $0x4] sm:$0xf]  ;;  %v17700_v23 = vld [vmem:[%s27358_s3 + $0x1ec] sm:$0xf0] }
 0x340   :  { %7870 = vmatpush.bf16.msrb.mxu0 %v14913_v13  ;;  %6206 = vmatpush.bf16.msrb.mxu1 %v14376_v15  ;;  %v23784_v53 = vpop.f32.mrf.mxu0  ;;  %v14453_v13 = vor.u32 %v17650_v47, %v14450_v62  ;;  %v15265_v15 = vor.u32 %v17856_v6, %v15264_v25  ;;  %v17764_v47 = vld [vmem:[%s27358_s3 + $0x3ec] sm:$0xf0]  ;;  %v14405_v62 = vor.u32 %v17638_v22, %v14402_v42  ;;  %v14978_v25 = vld [vmem:[%s27358_s3 + $0x490] sm:$0xf0] }
 0x341   :  { %v14641_v35 = vor.u32 %v17700_v23, %v14640_v16  ;;  %v14981_v37 = vor.u32 %v17782_v3, %v14978_v25  ;;  %v14593_v42 = vor.u32 %v17688_v54, %v14592_v45  ;;  %v17778_v16 = vld [vmem:[%s27358_s3 + $0x464] sm:$0xf]  ;;  %v17684_v23 = vld [vmem:[%s27358_s3 + $0x16c] sm:$0xf0]  ;;  %v14754_v3 = vld [vmem:[%s27358_s3 + $0x2d0] sm:$0xf0] }
 0x342   :  { %v17726_v45 = vld [vmem:[%s27358_s3 + $0x2c4] sm:$0xf]  ;;  %v17672_v54 = vld [vmem:[%s27358_s3 + $0x10c] sm:$0xf0] }
 0x343   :  { %7871 = vmatmul.bf16.vlgmr.msrb.gmra.mxu0 %v23772_v63  ;;  %6233 = vmatpush.bf16.msrb.mxu3 %v14372_v44 }
 0x344   :  { %7915 = vmatpush.bf16.msra.mxu0 %v14517_v52  ;;  %6207 = vmatpush.bf16.msrb.mxu1 %v14368_v51  ;;  %v14434_v52 = vld [vmem:[%s27358_s3 + $0x50] sm:$0xf0]  ;;  %v17852_v51 = vld [vmem:[%s27358_s3 + $0x6ac] sm:$0xf0] }
 0x345   :  { %7843 = vmatpush.bf16.msra.mxu2 %v14673_v56  ;;  %v14437_v1 = vor.u32 %v17646_v24, %v14434_v52  ;;  %v14624_v56 = vld [vmem:[%s27358_s3 + $0x1c0] sm:$0xf]  ;;  %v17848_v52 = vld [vmem:[%s27358_s3 + $0x68c] sm:$0xf0] }
 0x346   :  { %v15232_v24 = vld [vmem:[%s27358_s3 + $0x680] sm:$0xf] }
 0x347   :  { %6234 = vmatpush.bf16.msrb.mxu3 %v14364_v36  ;;  %v14880_v36 = vld [vmem:[%s27358_s3 + $0x3c0] sm:$0xf]  ;;  %v15233_v11 = vor.u32 %v17848_v52, %v15232_v24  ;;  %v17832_v24 = vld [vmem:[%s27358_s3 + $0x60c] sm:$0xf0] }
 0x348   :  { %7916 = vmatpush.bf16.msra.mxu0 %v14501_v41  ;;  %v23831_v50 = vpop.f32.mrf.mxu2  ;;  %6208 = vmatpush.bf16.msrb.mxu1 %v14360_v2  ;;  %v17642_v41 = vld [vmem:[%s27358_s3 + $0x24] sm:$0xf]  ;;  %v5702_v20 = vpop.f32.mrf.mxu0  ;;  %v14897_v2 = vor.u32 %v17764_v47, %v14896_v19  ;;  %v14881_v9 = vor.u32 %v17760_v34, %v14880_v36  ;;  %v14832_v47 = vld [vmem:[%s27358_s3 + $0x360] sm:$0xf]  ;;  %v17744_v52 = vld [vmem:[%s27358_s3 + $0x34c] sm:$0xf0] }
 0x349   :  { %7844 = vmatpush.bf16.msra.mxu2 %v14657_v48  ;;  %v14625_v48 = vor.u32 %v17696_v26, %v14624_v56  ;;  %v17756_v20 = vld [vmem:[%s27358_s3 + $0x3ac] sm:$0xf0]  ;;  %v17774_v56 = vld [vmem:[%s27358_s3 + $0x444] sm:$0xf]  ;;  %v15168_v26 = vld [vmem:[%s27358_s3 + $0x600] sm:$0xf] }
 0x34a   :  { %v15169_v36 = vor.u32 %v17832_v24, %v15168_v26  ;;  %v17730_v34 = vld [vmem:[%s27358_s3 + $0x2e4] sm:$0xf] }
 0x34b   :  { %6235 = vmatpush.bf16.msrb.mxu3 %v14356_v7 }
 0x34c   :  { %7917 = vmatpush.bf16.msra.mxu0 %v14485_v12  ;;  %v14421_v12 = vor.u32 %v17642_v41, %v14418_v17  ;;  %6209 = vmatpush.bf16.msrb.mxu1 %v14352_v28  ;;  %v15216_v28 = vld [vmem:[%s27358_s3 + $0x660] sm:$0xf]  ;;  %v17844_v41 = vld [vmem:[%s27358_s3 + $0x66c] sm:$0xf0] }
 0x34d   :  { %7889 = vmatpush.bf16.msrb.mxu2 %v15281_v8  ;;  %v17692_v8 = vld [vmem:[%s27358_s3 + $0x1ac] sm:$0xf0]  ;;  %v14864_v17 = vld [vmem:[%s27358_s3 + $0x3a0] sm:$0xf]  ;;  %v15217_v7 = vor.u32 %v17844_v41, %v15216_v28 }
 0x34e   :  { %v14609_v38 = vor.u32 %v17692_v8, %v14608_v60  ;;  %v14865_v6 = vor.u32 %v17756_v20, %v14864_v17  ;;  %v14930_v8 = vld [vmem:[%s27358_s3 + $0x430] sm:$0xf0]  ;;  %v14544_v17 = vld [vmem:[%s27358_s3 + $0x120] sm:$0xf]  ;;  %v17676_v20 = vld [vmem:[%s27358_s3 + $0x12c] sm:$0xf0] }
 0x34f   :  { %6236 = vmatpush.bf16.msrb.mxu3 %v14348_v55  ;;  %v14576_v55 = vld [vmem:[%s27358_s3 + $0x160] sm:$0xf] }
 0x350   :  { %7918 = vmatpush.bf16.msra.mxu0 %v14469_v59  ;;  %v15248_v59 = vld [vmem:[%s27358_s3 + $0x6a0] sm:$0xf]  ;;  %v5728_v49 = vpop.f32.mrf.mxu2  ;;  %6210 = vmatpush.bf16.msrb.mxu1 %v14344_v46  ;;  %v17752_v46 = vld [vmem:[%s27358_s3 + $0x38c] sm:$0xf0] }
 0x351   :  { %7890 = vmatpush.bf16.msrb.mxu2 %v15265_v15  ;;  %v15249_v44 = vor.u32 %v17852_v51, %v15248_v59  ;;  %v14848_v15 = vld [vmem:[%s27358_s3 + $0x380] sm:$0xf]  ;;  %v17836_v51 = vld [vmem:[%s27358_s3 + $0x62c] sm:$0xf0] }
 0x352   :  { %v23973_v22 = vpop.f32.mrf.mxu1  ;;  %v14849_v14 = vor.u32 %v17752_v46, %v14848_v15  ;;  %v15184_v59 = vld [vmem:[%s27358_s3 + $0x620] sm:$0xf]  ;;  %v14545_v15 = vor.u32 %v17676_v20, %v14544_v17 }
 0x353   :  { %6237 = vmatpush.bf16.msrb.mxu3 %v14340_v39  ;;  %v15185_v49 = vor.u32 %v17836_v51, %v15184_v59  ;;  %v14577_v39 = vor.u32 %v17684_v23, %v14576_v55  ;;  %v14784_v46 = vld [vmem:[%s27358_s3 + $0x300] sm:$0xf]  ;;  %v4957_v55 = vadd.f32 %v23973_v22, %v23264_v29  ;;  %v17669_v23 = vld [vmem:[%s27358_s3 + $0xf4] sm:$0xf0]  ;;  %v17828_v59 = vld [vmem:[%s27358_s3 + $0x5ec] sm:$0xf0] }
 0x354   :  { %7919 = vmatpush.bf16.msra.mxu0 %v14453_v13  ;;  %v15010_v13 = vld [vmem:[%s27358_s3 + $0x4d0] sm:$0xf0]  ;;  %6211 = vmatpush.bf16.msrb.mxu1 %v14336_v30  ;;  %v14560_v30 = vld [vmem:[%s27358_s3 + $0x140] sm:$0xf]  ;;  %v17722_v29 = vld [vmem:[%s27358_s3 + $0x2a4] sm:$0xf] }
 0x355   :  { %7891 = vmatpush.bf16.msrb.mxu2 %v15249_v44  ;;  %v15013_v61 = vor.u32 %v17790_v40, %v15010_v13  ;;  %v24001_v44 = vld [vmem:[#allocation1 + $0x12] sm:$0xff]  ;;  %v15120_v20 = vld [vmem:[%s27358_s3 + $0x5a0] sm:$0xf] }
 0x356   :  { %6238 = vmatmul.bf16.vlgmr.msrb.gmra.mxu3 %v6028_v58  ;;  %7845 = vmatmul.bf16.vlgmr.msra.gmra.mxu2 %v24001_v44  ;;  %v14946_v40 = vld [vmem:[%s27358_s3 + $0x450] sm:$0xf0] }
 0x357   :  { %7850 = vmatpush.bf16.msra.mxu3 %v14897_v2  ;;  %6212 = vmatmul.bf16.vlgmr.msrb.gmra.mxu1 %v6028_v58  ;;  %v14816_v2 = vld [vmem:[%s27358_s3 + $0x340] sm:$0xf]  ;;  %v14738_v22 = vld [vmem:[%s27358_s3 + $0x2b0] sm:$0xf0] }
 0x358   :  { %7920 = vmatpush.bf16.msra.mxu0 %v14437_v1  ;;  %7824 = vmatpush.bf16.msra.mxu1 %v14641_v35  ;;  %v14994_v1 = vld [vmem:[%s27358_s3 + $0x4b0] sm:$0xf0]  ;;  %v17680_v35 = vld [vmem:[%s27358_s3 + $0x14c] sm:$0xf0]  ;;  %v14817_v41 = vor.u32 %v17744_v52, %v14816_v2 }
 0x359   :  { %7892 = vmatpush.bf16.msrb.mxu2 %v15233_v11  ;;  %v14997_v5 = vor.u32 %v17786_v27, %v14994_v1  ;;  %v14770_v11 = vld [vmem:[%s27358_s3 + $0x2f0] sm:$0xf0]  ;;  %v24037_v58 = vld [vmem:[%s27357_s6 + $0x3] ss:$8 sm:$0x3]  ;;  %v14561_v1 = vor.u32 %v17680_v35, %v14560_v30  ;;  %v14741_v30 = vor.u32 %v17722_v29, %v14738_v22 }
 0x35a   :  { %v14773_v60 = vor.u32 %v17730_v34, %v14770_v11  ;;  %v4958_v27 = vpop.f32.mrf.mxu1  ;;  %v4987_v25 = vperm.slane %v24037_v58, 0  ;;  %v15136_v35 = vld [vmem:[%s27358_s3 + $0x5c0] sm:$0xf]  ;;  %v17824_v52 = vld [vmem:[%s27358_s3 + $0x5cc] sm:$0xf0]  ;;  %v4988_v17 = vperm.slane %v24037_v58, 1 }
 0x35b   :  { %7851 = vmatpush.bf16.msra.mxu3 %v14881_v9  ;;  %v17770_v9 = vld [vmem:[%s27358_s3 + $0x424] sm:$0xf]  ;;  %v17665_v34 = vld [vmem:[%s27358_s3 + $0xd4] sm:$0xf0]  ;;  %v15137_v58 = vor.u32 %v17824_v52, %v15136_v35  ;;  %v14674_v52 = vld [vmem:[%s27358_s3 + $0x230] sm:$0xf0] }
 0x35c   :  { %7921 = vmatpush.bf16.msra.mxu0 %v14421_v12  ;;  %7825 = vmatpush.bf16.msra.mxu1 %v14625_v48  ;;  %v17840_v12 = vld [vmem:[%s27358_s3 + $0x64c] sm:$0xf0]  ;;  %v14949_v48 = vor.u32 %v17774_v56, %v14946_v40  ;;  %v4991_v40 = vadd.f32 %v4987_v25, %v4957_v55  ;;  %v8890_v25 = vld [vmem:[%s27360_s2] sm:$0x7]  ;;  %v17657_v29 = vld [vmem:[%s27358_s3 + $0x94] sm:$0xf0] }
 0x35d   :  { %7893 = vmatpush.bf16.msrb.mxu2 %v15217_v7  ;;  %v15201_v33 = vor.u32 %v17840_v12, %v15200_v21  ;;  %v14800_v7 = vld [vmem:[%s27358_s3 + $0x320] sm:$0xf]  ;;  %v14933_v21 = vor.u32 %v17770_v9, %v14930_v8  ;;  %v14757_v12 = vor.u32 %v17726_v45, %v14754_v3  ;;  %v14722_v8 = vld [vmem:[%s27358_s3 + $0x290] sm:$0xf0]  ;;  %v17661_v45 = vld [vmem:[%s27358_s3 + $0xb4] sm:$0xf0] }
 0x35e   :  { %v24138_v9 = vld [vmem:[#allocation1 + $0x1b] sm:$0xff]  ;;  %v24160_v3 = vld [vmem:[#allocation1 + $0x2d] sm:$0xff] }
 0x35f   :  { %7852 = vmatpush.bf16.msra.mxu3 %v14865_v6  ;;  %v14528_v6 = vld [vmem:[%s27358_s3 + $0x100] sm:$0xf] }
 0x360   :  { %7922 = vmatpush.bf16.msra.mxu0 %v14405_v62  ;;  %7826 = vmatpush.bf16.msra.mxu1 %v14609_v38  ;;  %v23993_v19 = vpop.f32.mrf.mxu0  ;;  %v17748_v62 = vld [vmem:[%s27358_s3 + $0x36c] sm:$0xf0] }
 0x361   :  { %7894 = vmatpush.bf16.msrb.mxu2 %v15201_v33  ;;  %v14833_v13 = vor.u32 %v17748_v62, %v14832_v47  ;;  %v17740_v38 = vld [vmem:[%s27358_s3 + $0x32c] sm:$0xf0]  ;;  %v15408_v47 = vld [vmem:[%s27358_s3 + $0x7e0] sm:$0xf] }
 0x362   :  { %v17736_v33 = vld [vmem:[%s27358_s3 + $0x30c] sm:$0xf0] }
 0x363   :  { %7923 = vmatmul.bf16.vlgmr.msra.gmra.mxu0 %v23585_v57  ;;  %7853 = vmatpush.bf16.msra.mxu3 %v14849_v14  ;;  %v14520_v14 = vld [vmem:[%s27358_s3 + $0xe8] sm:$0xf]  ;;  %v17892_v62 = vld [vmem:[%s27358_s3 + $0x7ec] sm:$0xf0]  ;;  %v14785_v26 = vor.u32 %v17736_v33, %v14784_v46  ;;  %v17714_v33 = vld [vmem:[%s27358_s3 + $0x264] sm:$0xf] }
 0x364   :  { %7967 = vmatpush.bf16.msrb.mxu0 %v15029_v0  ;;  %v14965_v0 = vor.u32 %v17778_v16, %v14962_v43  ;;  %7827 = vmatpush.bf16.msra.mxu1 %v14593_v42  ;;  %v14914_v42 = vld [vmem:[%s27358_s3 + $0x410] sm:$0xf0]  ;;  %v14801_v16 = vor.u32 %v17740_v38, %v14800_v7  ;;  %v15152_v43 = vld [vmem:[%s27358_s3 + $0x5e0] sm:$0xf]  ;;  %v14521_v56 = vor.u32 %v17669_v23, %v14520_v14  ;;  %v14488_v38 = vld [vmem:[%s27358_s3 + $0xa8] sm:$0xf] }
 0x365   :  { %7895 = vmatpush.bf16.msrb.mxu2 %v15185_v49  ;;  %v15153_v24 = vor.u32 %v17828_v59, %v15152_v43  ;;  %v15409_v11 = vor.u32 %v17892_v62, %v15408_v47  ;;  %v14489_v46 = vor.u32 %v17661_v45, %v14488_v38  ;;  %v15104_v23 = vld [vmem:[%s27358_s3 + $0x580] sm:$0xf]  ;;  %v14472_v59 = vld [vmem:[%s27358_s3 + $0x88] sm:$0xf]  ;;  %v17710_v47 = vld [vmem:[%s27358_s3 + $0x244] sm:$0xf] }
 0x366   :  { %v14690_v62 = vld [vmem:[%s27358_s3 + $0x250] sm:$0xf0]  ;;  %v14440_v38 = vld [vmem:[%s27358_s3 + $0x48] sm:$0xf]  ;;  %v17649_v45 = vld [vmem:[%s27358_s3 + $0x54] sm:$0xf0] }
 0x367   :  { %7854 = vmatpush.bf16.msra.mxu3 %v14833_v13 }
 0x368   :  { %7968 = vmatpush.bf16.msrb.mxu0 %v15013_v61  ;;  %v24039_v61 = vpop.f32.mrf.mxu3  ;;  %7828 = vmatpush.bf16.msra.mxu1 %v14577_v39  ;;  %v24047_v28 = vpop.f32.mrf.mxu2  ;;  %v14529_v39 = vor.u32 %v17672_v54, %v14528_v6  ;;  %v17820_v54 = vld [vmem:[%s27358_s3 + $0x5ac] sm:$0xf0] }
 0x369   :  { %7896 = vmatpush.bf16.msrb.mxu2 %v15169_v36  ;;  %v14504_v36 = vld [vmem:[%s27358_s3 + $0xc8] sm:$0xf]  ;;  %v15121_v14 = vor.u32 %v17820_v54, %v15120_v20  ;;  %v17872_v54 = vld [vmem:[%s27358_s3 + $0x74c] sm:$0xf0] }
 0x36a   :  { %v14505_v7 = vor.u32 %v17665_v34, %v14504_v36 }
 0x36b   :  { %7855 = vmatpush.bf16.msra.mxu3 %v14817_v41  ;;  %v4983_v41 = vadd.f32 %v24039_v61, %v23309_v4  ;;  %v24158_v61 = vld [vmem:[#allocation1 + $0x3f] sm:$0xff] }
 0x36c   :  { %7969 = vmatpush.bf16.msrb.mxu0 %v14997_v5  ;;  %v5950_v5 = vpop.f32.mrf.mxu0  ;;  %7829 = vmatpush.bf16.msra.mxu1 %v14561_v1  ;;  %v17888_v1 = vld [vmem:[%s27358_s3 + $0x7cc] sm:$0xf0] }
 0x36d   :  { %7941 = vmatpush.bf16.msra.mxu2 %v14773_v60  ;;  %v17718_v60 = vld [vmem:[%s27358_s3 + $0x284] sm:$0xf]  ;;  %v24150_v5 = vld [vmem:[#allocation1 + $0x9] sm:$0xff] }
 0x36e   :  { %v14725_v4 = vor.u32 %v17718_v60, %v14722_v8  ;;  %v15072_v8 = vld [vmem:[%s27358_s3 + $0x540] sm:$0xf] }
 0x36f   :  { %7856 = vmatpush.bf16.msra.mxu3 %v14801_v16 }
 0x370   :  { %7970 = vmatpush.bf16.msrb.mxu0 %v14981_v37  ;;  %v17766_v37 = vld [vmem:[%s27358_s3 + $0x404] sm:$0xf]  ;;  %v4984_v51 = vpop.f32.mrf.mxu3  ;;  %7830 = vmatpush.bf16.msra.mxu1 %v14545_v15  ;;  %v5976_v13 = vpop.f32.mrf.mxu2  ;;  %v17884_v15 = vld [vmem:[%s27358_s3 + $0x7ac] sm:$0xf0] }
 0x371   :  { %7942 = vmatpush.bf16.msra.mxu2 %v14757_v12  ;;  %v14917_v49 = vor.u32 %v17766_v37, %v14914_v42  ;;  %v14706_v37 = vld [vmem:[%s27358_s3 + $0x270] sm:$0xf0]  ;;  %v4992_v42 = vadd.f32 %v4988_v17, %v4983_v41  ;;  %v17816_v51 = vld [vmem:[%s27358_s3 + $0x58c] sm:$0xf0]  ;;  %v17653_v13 = vld [vmem:[%s27358_s3 + $0x74] sm:$0xf0] }
 0x372   :  { %v14709_v43 = vor.u32 %v17714_v33, %v14706_v37  ;;  %v15105_v35 = vor.u32 %v17816_v51, %v15104_v23  ;;  %v15312_v23 = vld [vmem:[%s27358_s3 + $0x720] sm:$0xf]  ;;  %v17854_v51 = vld [vmem:[%s27358_s3 + $0x6c4] sm:$0xf] }
 0x373   :  { %7857 = vmatpush.bf16.msra.mxu3 %v14785_v26  ;;  %v17812_v26 = vld [vmem:[%s27358_s3 + $0x56c] sm:$0xf0] }
 0x374   :  { %7971 = vmatpush.bf16.msrb.mxu0 %v14965_v0  ;;  %v5213_v0 = vpop.f32.mrf.mxu1  ;;  %7831 = vmatpush.bf16.msra.mxu1 %v14529_v39  ;;  %v14473_v39 = vor.u32 %v17657_v29, %v14472_v59 }
 0x375   :  { %v5214_v2 = vadd.f32 %v5213_v0, %v23433_v18  ;;  %7943 = vmatpush.bf16.msra.mxu2 %v14741_v30  ;;  %v24128_v18 = vld [vmem:[#allocation1 + $0x36] sm:$0xff]  ;;  %v17880_v30 = vld [vmem:[%s27358_s3 + $0x78c] sm:$0xf0]  ;;  %v14693_v0 = vor.u32 %v17710_v47, %v14690_v62 }
 0x376   :  { %7897 = vmatmul.bf16.vlgmr.msrb.gmra.mxu2 %v24128_v18  ;;  %8947 = vst [vmem:[#allocation1] ss:$9 sm:$0xff] %v8890_v25  ;;  %7858 = vmatmul.bf16.vlgmr.msra.gmra.mxu3 %v24138_v9  ;;  %v14658_v25 = vld [vmem:[%s27358_s3 + $0x210] sm:$0xf0] }
 0x377   :  { %v24133_v27 = vadd.f32 %v5214_v2, %v4991_v40  ;;  %7902 = vmatpush.bf16.msrb.mxu3 %v15409_v11  ;;  %7832 = vmatmul.bf16.vlgmr.msra.gmra.mxu1 %v24150_v5  ;;  %v14456_v40 = vld [vmem:[%s27358_s3 + $0x68] sm:$0xf]  ;;  %v15344_v11 = vld [vmem:[%s27358_s3 + $0x760] sm:$0xf]  ;;  %v15266_v47 = vld [vmem:[%s27358_s3 + $0x6d0] sm:$0xf0] }
 0x378   :  { %7972 = vmatpush.bf16.msrb.mxu0 %v14949_v48  ;;  %v15392_v48 = vld [vmem:[%s27358_s3 + $0x7c0] sm:$0xf]  ;;  %7876 = vmatpush.bf16.msrb.mxu1 %v15153_v24  ;;  %v5239_v12 = vpop.f32.mrf.mxu3  ;;  %v17706_v24 = vld [vmem:[%s27358_s3 + $0x224] sm:$0xf]  ;;  %v14457_v41 = vor.u32 %v17653_v13, %v14456_v40  ;;  %v14408_v13 = vld [vmem:[%s27358_s3 + $0x8] sm:$0xf] }
 0x379   :  { %v15393_v6 = vor.u32 %v17888_v1, %v15392_v48  ;;  %7944 = vmatpush.bf16.msra.mxu2 %v14725_v4  ;;  %v5240_v55 = vadd.f32 %v5239_v12, %v23465_v10  ;;  %v17876_v48 = vld [vmem:[%s27358_s3 + $0x76c] sm:$0xf0]  ;;  %v14677_v60 = vor.u32 %v17706_v24, %v14674_v52  ;;  %v17858_v12 = vld [vmem:[%s27358_s3 + $0x6e4] sm:$0xf]  ;;  %v15296_v40 = vld [vmem:[%s27358_s3 + $0x700] sm:$0xf] }
 0x37a   :  { %v15345_v4 = vor.u32 %v17876_v48, %v15344_v11  ;;  %v17698_v52 = vld [vmem:[%s27358_s3 + $0x1e4] sm:$0xf]  ;;  %v17797_v11 = vld [vmem:[%s27358_s3 + $0x4f4] sm:$0xf0]  ;;  %v14642_v48 = vld [vmem:[%s27358_s3 + $0x1f0] sm:$0xf0] }
 0x37b   :  { %v24193_v10 = vadd.f32 %v5240_v55, %v4992_v42  ;;  %7903 = vmatpush.bf16.msrb.mxu3 %v15393_v6  ;;  %v17645_v42 = vld [vmem:[%s27358_s3 + $0x34] sm:$0xf0] }
 0x37c   :  { %7973 = vmatpush.bf16.msrb.mxu0 %v14933_v21  ;;  %v15376_v21 = vld [vmem:[%s27358_s3 + $0x7a0] sm:$0xf]  ;;  %v5215_v16 = vpop.f32.mrf.mxu1  ;;  %7877 = vmatpush.bf16.msrb.mxu1 %v15137_v58  ;;  %v17702_v58 = vld [vmem:[%s27358_s3 + $0x204] sm:$0xf] }
 0x37d   :  { %v15377_v22 = vor.u32 %v17884_v15, %v15376_v21  ;;  %7945 = vmatpush.bf16.msra.mxu2 %v14709_v43  ;;  %v14661_v21 = vor.u32 %v17702_v58, %v14658_v25  ;;  %v15282_v15 = vld [vmem:[%s27358_s3 + $0x6f0] sm:$0xf0]  ;;  %v15056_v43 = vld [vmem:[%s27358_s3 + $0x520] sm:$0xf]  ;;  %v15016_v58 = vld [vmem:[%s27358_s3 + $0x4c8] sm:$0xf] }
 0x37e   :  { %v15285_v33 = vor.u32 %v17858_v12, %v15282_v15  ;;  %v17793_v25 = vld [vmem:[%s27358_s3 + $0x4d4] sm:$0xf0]  ;;  %v14626_v12 = vld [vmem:[%s27358_s3 + $0x1d0] sm:$0xf0]  ;;  %v17846_v15 = vld [vmem:[%s27358_s3 + $0x684] sm:$0xf] }
 0x37f   :  { %7904 = vmatpush.bf16.msrb.mxu3 %v15377_v22  ;;  %v17868_v22 = vld [vmem:[%s27358_s3 + $0x72c] sm:$0xf0] }
 0x380   :  { %7974 = vmatpush.bf16.msrb.mxu0 %v14917_v49  ;;  %v15360_v49 = vld [vmem:[%s27358_s3 + $0x780] sm:$0xf]  ;;  %7878 = vmatpush.bf16.msrb.mxu1 %v15121_v14  ;;  %v5241_v36 = vpop.f32.mrf.mxu3  ;;  %v24228_v34 = vpop.f32.mrf.mxu0  ;;  %v17804_v14 = vld [vmem:[%s27358_s3 + $0x52c] sm:$0xf0]  ;;  %v15313_v24 = vor.u32 %v17868_v22, %v15312_v23  ;;  %v17789_v23 = vld [vmem:[%s27358_s3 + $0x4b4] sm:$0xf0] }
 0x381   :  { %v15361_v2 = vor.u32 %v17880_v30, %v15360_v49  ;;  %7946 = vmatpush.bf16.msra.mxu2 %v14693_v0  ;;  %v15040_v30 = vld [vmem:[%s27358_s3 + $0x500] sm:$0xf]  ;;  %v17800_v0 = vld [vmem:[%s27358_s3 + $0x50c] sm:$0xf0]  ;;  %v15032_v36 = vld [vmem:[%s27358_s3 + $0x4e8] sm:$0xf] }
 0x382   :  { %v17842_v22 = vld [vmem:[%s27358_s3 + $0x664] sm:$0xf] }
 0x383   :  { %7975 = vmatmul.bf16.vlgmr.msrb.gmra.mxu0 %v23772_v63  ;;  %7905 = vmatpush.bf16.msrb.mxu3 %v15361_v2  ;;  %v17641_v2 = vld [vmem:[%s27358_s3 + $0x14] sm:$0xf0] }
 0x384   :  { %8019 = vmatpush.bf16.msra.mxu0 %v14521_v56  ;;  %v15088_v56 = vld [vmem:[%s27358_s3 + $0x560] sm:$0xf]  ;;  %v5463_v1 = vpop.f32.mrf.mxu1  ;;  %7879 = vmatpush.bf16.msrb.mxu1 %v15105_v35  ;;  %v15269_v35 = vor.u32 %v17854_v51, %v15266_v47  ;;  %v15218_v51 = vld [vmem:[%s27358_s3 + $0x670] sm:$0xf0]  ;;  %v17754_v47 = vld [vmem:[%s27358_s3 + $0x3a4] sm:$0xf] }
 0x385   :  { %v5464_v17 = vadd.f32 %v5463_v1, %v23587_v31  ;;  %v15089_v20 = vor.u32 %v17812_v26, %v15088_v56  ;;  %v15328_v31 = vld [vmem:[%s27358_s3 + $0x740] sm:$0xf]  ;;  %7947 = vmatpush.bf16.msra.mxu2 %v14677_v60  ;;  %v15057_v56 = vor.u32 %v17804_v14, %v15056_v43  ;;  %v15250_v60 = vld [vmem:[%s27358_s3 + $0x6b0] sm:$0xf0]  ;;  %v17762_v1 = vld [vmem:[%s27358_s3 + $0x3e4] sm:$0xf] }
 0x386   :  { %v15329_v16 = vor.u32 %v17872_v54, %v15328_v31  ;;  %v17694_v31 = vld [vmem:[%s27358_s3 + $0x1c4] sm:$0xf]  ;;  %v15000_v14 = vld [vmem:[%s27358_s3 + $0x4a8] sm:$0xf] }
 0x387   :  { %v24259_v6 = vadd.f32 %v5464_v17, %v24133_v27  ;;  %v14424_v27 = vld [vmem:[%s27358_s3 + $0x28] sm:$0xf]  ;;  %7906 = vmatpush.bf16.msrb.mxu3 %v15345_v4  ;;  %v14645_v4 = vor.u32 %v17698_v52, %v14642_v48  ;;  %v17690_v43 = vld [vmem:[%s27358_s3 + $0x1a4] sm:$0xf]  ;;  %v14850_v52 = vld [vmem:[%s27358_s3 + $0x390] sm:$0xf0] }
 0x388   :  { %8020 = vmatpush.bf16.msra.mxu0 %v14505_v7  ;;  %v17808_v7 = vld [vmem:[%s27358_s3 + $0x54c] sm:$0xf0]  ;;  %7880 = vmatpush.bf16.msrb.mxu1 %v15089_v20  ;;  %v24276_v55 = vpop.f32.mrf.mxu2  ;;  %v5489_v59 = vpop.f32.mrf.mxu3  ;;  %v15041_v20 = vor.u32 %v17800_v0, %v15040_v30  ;;  %v15001_v30 = vor.u32 %v17789_v23, %v15000_v14  ;;  %v17733_v14 = vld [vmem:[%s27358_s3 + $0x2f4] sm:$0xf0] }
 0x389   :  { %v15073_v37 = vor.u32 %v17808_v7, %v15072_v8  ;;  %7948 = vmatpush.bf16.msra.mxu2 %v14661_v21  ;;  %v6202_v29 = vpop.f32.mrf.mxu0  ;;  %v5490_v62 = vadd.f32 %v5489_v59, %v23626_v32  ;;  %v17864_v32 = vld [vmem:[%s27358_s3 + $0x70c] sm:$0xf0]  ;;  %v14898_v8 = vld [vmem:[%s27358_s3 + $0x3f0] sm:$0xf0]  ;;  %v15033_v7 = vor.u32 %v17797_v11, %v15032_v36 }
 0x38a   :  { %v14901_v21 = vor.u32 %v17762_v1, %v14898_v8  ;;  %v14610_v29 = vld [vmem:[%s27358_s3 + $0x1b0] sm:$0xf0]  ;;  %v17781_v1 = vld [vmem:[%s27358_s3 + $0x474] sm:$0xf0] }
 0x38b   :  { %v24317_v26 = vadd.f32 %v5490_v62, %v24193_v10  ;;  %7907 = vmatpush.bf16.msrb.mxu3 %v15329_v16  ;;  %v17850_v10 = vld [vmem:[%s27358_s3 + $0x6a4] sm:$0xf]  ;;  %v14629_v16 = vor.u32 %v17694_v31, %v14626_v12  ;;  %v14866_v62 = vld [vmem:[%s27358_s3 + $0x3b0] sm:$0xf0]  ;;  %v14613_v0 = vor.u32 %v17690_v43, %v14610_v29  ;;  %v14952_v12 = vld [vmem:[%s27358_s3 + $0x448] sm:$0xf] }
 0x38c   :  { %8021 = vmatpush.bf16.msra.mxu0 %v14489_v46  ;;  %v14441_v46 = vor.u32 %v17649_v45, %v14440_v38  ;;  %v5465_v49 = vpop.f32.mrf.mxu1  ;;  %7881 = vmatpush.bf16.msrb.mxu1 %v15073_v37  ;;  %v15253_v17 = vor.u32 %v17850_v10, %v15250_v60  ;;  %v15297_v45 = vor.u32 %v17864_v32, %v15296_v40  ;;  %v14882_v37 = vld [vmem:[%s27358_s3 + $0x3d0] sm:$0xf0]  ;;  %v17682_v10 = vld [vmem:[%s27358_s3 + $0x164] sm:$0xf]  ;;  %v14968_v60 = vld [vmem:[%s27358_s3 + $0x468] sm:$0xf] }
 0x38d   :  { %7993 = vmatpush.bf16.msrb.mxu2 %v15285_v33  ;;  %v17758_v33 = vld [vmem:[%s27358_s3 + $0x3c4] sm:$0xf]  ;;  %v15221_v49 = vor.u32 %v17842_v22, %v15218_v51  ;;  %v14869_v40 = vor.u32 %v17754_v47, %v14866_v62  ;;  %v14594_v32 = vld [vmem:[%s27358_s3 + $0x190] sm:$0xf0]  ;;  %v14776_v43 = vld [vmem:[%s27358_s3 + $0x2e8] sm:$0xf] }
 0x38e   :  { %7949 = vmatmul.bf16.vlgmr.msra.gmra.mxu2 %v24001_v44  ;;  %v14885_v59 = vor.u32 %v17758_v33, %v14882_v37  ;;  %v17678_v31 = vld [vmem:[%s27358_s3 + $0x144] sm:$0xf]  ;;  %v15170_v37 = vld [vmem:[%s27358_s3 + $0x610] sm:$0xf0]  ;;  %v17773_v22 = vld [vmem:[%s27358_s3 + $0x434] sm:$0xf0] }
 0x38f   :  { %7908 = vmatpush.bf16.msrb.mxu3 %v15313_v24  ;;  %v17750_v24 = vld [vmem:[%s27358_s3 + $0x384] sm:$0xf]  ;;  %v14546_v62 = vld [vmem:[%s27358_s3 + $0x130] sm:$0xf0] }
 0x390   :  { %8022 = vmatpush.bf16.msra.mxu0 %v14473_v39  ;;  %v14425_v39 = vor.u32 %v17645_v42, %v14424_v27  ;;  %7882 = vmatpush.bf16.msrb.mxu1 %v15057_v56  ;;  %v6228_v38 = vpop.f32.mrf.mxu2  ;;  %v5491_v54 = vpop.f32.mrf.mxu3  ;;  %v15017_v42 = vor.u32 %v17793_v25, %v15016_v58  ;;  %v17785_v56 = vld [vmem:[%s27358_s3 + $0x494] sm:$0xf0]  ;;  %v14853_v8 = vor.u32 %v17750_v24, %v14850_v52  ;;  %v17830_v33 = vld [vmem:[%s27358_s3 + $0x604] sm:$0xf] }
 0x391   :  { %7994 = vmatpush.bf16.msrb.mxu2 %v15269_v35  ;;  %v14984_v35 = vld [vmem:[%s27358_s3 + $0x488] sm:$0xf]  ;;  %v14834_v38 = vld [vmem:[%s27358_s3 + $0x370] sm:$0xf0]  ;;  %v14969_v58 = vor.u32 %v17781_v1, %v14968_v60  ;;  %v17674_v47 = vld [vmem:[%s27358_s3 + $0x124] sm:$0xf] }
 0x392   :  { %v14985_v11 = vor.u32 %v17785_v56, %v14984_v35  ;;  %v17729_v35 = vld [vmem:[%s27358_s3 + $0x2d4] sm:$0xf0]  ;;  %v14549_v52 = vor.u32 %v17674_v47, %v14546_v62  ;;  %v17826_v1 = vld [vmem:[%s27358_s3 + $0x5e4] sm:$0xf]  ;;  %v15122_v47 = vld [vmem:[%s27358_s3 + $0x5b0] sm:$0xf0] }
 0x393   :  { %7909 = vmatpush.bf16.msrb.mxu3 %v15297_v45  ;;  %v14712_v62 = vld [vmem:[%s27358_s3 + $0x268] sm:$0xf] }
 0x394   :  { %8023 = vmatpush.bf16.msra.mxu0 %v14457_v41  ;;  %v14409_v41 = vor.u32 %v17641_v2, %v14408_v13  ;;  %7883 = vmatpush.bf16.msrb.mxu1 %v15041_v20  ;;  %v17838_v13 = vld [vmem:[%s27358_s3 + $0x644] sm:$0xf]  ;;  %v15202_v2 = vld [vmem:[%s27358_s3 + $0x650] sm:$0xf0] }
 0x395   :  { %7995 = vmatpush.bf16.msrb.mxu2 %v15253_v17  ;;  %v15205_v36 = vor.u32 %v17838_v13, %v15202_v2  ;;  %v17834_v17 = vld [vmem:[%s27358_s3 + $0x624] sm:$0xf]  ;;  %v15186_v20 = vld [vmem:[%s27358_s3 + $0x630] sm:$0xf0] }
 0x396   :  { %7910 = vmatmul.bf16.vlgmr.msrb.gmra.mxu3 %v24158_v61  ;;  %v15189_v45 = vor.u32 %v17834_v17, %v15186_v20  ;;  %v14530_v13 = vld [vmem:[%s27358_s3 + $0x110] sm:$0xf0]  ;;  %v17725_v20 = vld [vmem:[%s27358_s3 + $0x2b4] sm:$0xf0] }
 0x397   :  { %7954 = vmatpush.bf16.msra.mxu3 %v14901_v21  ;;  %7884 = vmatmul.bf16.vlgmr.msrb.gmra.mxu1 %v24160_v3  ;;  %v14562_v21 = vld [vmem:[%s27358_s3 + $0x150] sm:$0xf0] }
 0x398   :  { %8024 = vmatpush.bf16.msra.mxu0 %v14441_v46  ;;  %v15234_v46 = vld [vmem:[%s27358_s3 + $0x690] sm:$0xf0]  ;;  %7928 = vmatpush.bf16.msra.mxu1 %v14645_v4  ;;  %v5713_v4 = vpop.f32.mrf.mxu1  ;;  %v14565_v29 = vor.u32 %v17678_v31, %v14562_v21  ;;  %v17822_v21 = vld [vmem:[%s27358_s3 + $0x5c4] sm:$0xf] }
 0x399   :  { %v15237_v27 = vor.u32 %v17846_v15, %v15234_v46  ;;  %v5714_v25 = vadd.f32 %v5713_v4, %v23784_v53  ;;  %v17777_v15 = vld [vmem:[%s27358_s3 + $0x454] sm:$0xf0]  ;;  %v17742_v53 = vld [vmem:[%s27358_s3 + $0x344] sm:$0xf]  ;;  %v15154_v17 = vld [vmem:[%s27358_s3 + $0x5f0] sm:$0xf0] }
 0x39a   :  { %v14953_v23 = vor.u32 %v17777_v15, %v14952_v12  ;;  %v17663_v12 = vld [vmem:[%s27358_s3 + $0xcc] sm:$0xf]  ;;  %v14506_v15 = vld [vmem:[%s27358_s3 + $0xd8] sm:$0xf0] }
 0x39b   :  { %7996 = vmatpush.bf16.msrb.mxu2 %v15237_v27  ;;  %7955 = vmatpush.bf16.msra.mxu3 %v14885_v59  ;;  %v24465_v27 = vadd.f32 %v5714_v25, %v24259_v6  ;;  %v14777_v59 = vor.u32 %v17733_v14, %v14776_v43  ;;  %v14936_v6 = vld [vmem:[%s27358_s3 + $0x428] sm:$0xf]  ;;  %v15394_v43 = vld [vmem:[%s27358_s3 + $0x7d0] sm:$0xf0] }
 0x39c   :  { %8025 = vmatpush.bf16.msra.mxu0 %v14425_v39  ;;  %7929 = vmatpush.bf16.msra.mxu1 %v14629_v16  ;;  %v17686_v39 = vld [vmem:[%s27358_s3 + $0x184] sm:$0xf]  ;;  %v15173_v16 = vor.u32 %v17830_v33, %v15170_v37  ;;  %v14937_v2 = vor.u32 %v17773_v22, %v14936_v6  ;;  %v15138_v33 = vld [vmem:[%s27358_s3 + $0x5d0] sm:$0xf0]  ;;  %v14728_v37 = vld [vmem:[%s27358_s3 + $0x288] sm:$0xf] }
 0x39d   :  { %v14597_v48 = vor.u32 %v17686_v39, %v14594_v32  ;;  %v14760_v39 = vld [vmem:[%s27358_s3 + $0x2c8] sm:$0xf]  ;;  %v17670_v32 = vld [vmem:[%s27358_s3 + $0x104] sm:$0xf]  ;;  %v17659_v6 = vld [vmem:[%s27358_s3 + $0xac] sm:$0xf] }
 0x39e   :  { %v14761_v24 = vor.u32 %v17729_v35, %v14760_v39  ;;  %v14533_v31 = vor.u32 %v17670_v32, %v14530_v13  ;;  %v14490_v22 = vld [vmem:[%s27358_s3 + $0xb8] sm:$0xf0]  ;;  %v17655_v32 = vld [vmem:[%s27358_s3 + $0x8c] sm:$0xf] }
 0x39f   :  { %7997 = vmatpush.bf16.msrb.mxu2 %v15221_v49  ;;  %7956 = vmatpush.bf16.msra.mxu3 %v14869_v40  ;;  %v17738_v49 = vld [vmem:[%s27358_s3 + $0x324] sm:$0xf]  ;;  %v14493_v35 = vor.u32 %v17659_v6, %v14490_v22  ;;  %v14474_v13 = vld [vmem:[%s27358_s3 + $0x98] sm:$0xf0] }
 0x3a0   :  { %8026 = vmatpush.bf16.msra.mxu0 %v14409_v41  ;;  %7930 = vmatpush.bf16.msra.mxu1 %v14613_v0  ;;  %v14578_v41 = vld [vmem:[%s27358_s3 + $0x170] sm:$0xf0]  ;;  %v5715_v40 = vpop.f32.mrf.mxu1 }
 0x3a1   :  { %v14581_v54 = vor.u32 %v17682_v10, %v14578_v41  ;;  %v14802_v0 = vld [vmem:[%s27358_s3 + $0x330] sm:$0xf0]  ;;  %v14522_v41 = vld [vmem:[%s27358_s3 + $0xf8] sm:$0xf0]  ;;  %v17814_v40 = vld [vmem:[%s27358_s3 + $0x584] sm:$0xf] }
 0x3a2   :  { %v14805_v60 = vor.u32 %v17738_v49, %v14802_v0  ;;  %v17717_v49 = vld [vmem:[%s27358_s3 + $0x274] sm:$0xf0]  ;;  %v15378_v0 = vld [vmem:[%s27358_s3 + $0x7b0] sm:$0xf0] }
 0x3a3   :  { %8027 = vmatmul.bf16.vlgmr.msra.gmra.mxu0 %v23585_v57  ;;  %7998 = vmatpush.bf16.msrb.mxu2 %v15205_v36  ;;  %v17734_v36 = vld [vmem:[%s27358_s3 + $0x304] sm:$0xf]  ;;  %v14713_v39 = vor.u32 %v17717_v49, %v14712_v62  ;;  %v15058_v49 = vld [vmem:[%s27358_s3 + $0x530] sm:$0xf0] }
 0x3a4   :  { %8071 = vmatpush.bf16.msrb.mxu0 %v15033_v7  ;;  %v17746_v7 = vld [vmem:[%s27358_s3 + $0x364] sm:$0xf]  ;;  %7931 = vmatpush.bf16.msra.mxu1 %v14597_v48  ;;  %v17769_v48 = vld [vmem:[%s27358_s3 + $0x414] sm:$0xf0] }
 0x3a5   :  { %7957 = vmatpush.bf16.msra.mxu3 %v14853_v8  ;;  %v14837_v46 = vor.u32 %v17746_v7, %v14834_v38  ;;  %v17667_v8 = vld [vmem:[%s27358_s3 + $0xec] sm:$0xf]  ;;  %v17890_v7 = vld [vmem:[%s27358_s3 + $0x7e4] sm:$0xf]  ;;  %v15410_v38 = vld [vmem:[%s27358_s3 + $0x7f0] sm:$0xf0] }
 0x3a6   :  { %v17802_v62 = vld [vmem:[%s27358_s3 + $0x524] sm:$0xf] }
 0x3a7   :  { %7999 = vmatpush.bf16.msrb.mxu2 %v15189_v45 }
 0x3a8   :  { %8072 = vmatpush.bf16.msrb.mxu0 %v15017_v42  ;;  %v14818_v42 = vld [vmem:[%s27358_s3 + $0x350] sm:$0xf0]  ;;  %7932 = vmatpush.bf16.msra.mxu1 %v14581_v54  ;;  %v15157_v54 = vor.u32 %v17826_v1, %v15154_v17  ;;  %v14458_v17 = vld [vmem:[%s27358_s3 + $0x78] sm:$0xf0] }
 0x3a9   :  { %7958 = vmatpush.bf16.msra.mxu3 %v14837_v46  ;;  %v14821_v51 = vor.u32 %v17742_v53, %v14818_v42  ;;  %v15413_v53 = vor.u32 %v17890_v7, %v15410_v38  ;;  %v17721_v42 = vld [vmem:[%s27358_s3 + $0x294] sm:$0xf0]  ;;  %v14680_v7 = vld [vmem:[%s27358_s3 + $0x228] sm:$0xf] }
 0x3aa   :  { %v14729_v14 = vor.u32 %v17721_v42, %v14728_v37  ;;  %v17709_v38 = vld [vmem:[%s27358_s3 + $0x234] sm:$0xf0]  ;;  %v14664_v37 = vld [vmem:[%s27358_s3 + $0x208] sm:$0xf] }
 0x3ab   :  { %8000 = vmatpush.bf16.msrb.mxu2 %v15173_v16  ;;  %v17886_v16 = vld [vmem:[%s27358_s3 + $0x7c4] sm:$0xf]  ;;  %v17705_v42 = vld [vmem:[%s27358_s3 + $0x214] sm:$0xf0] }
 0x3ac   :  { %8073 = vmatpush.bf16.msrb.mxu0 %v15001_v30  ;;  %v5739_v30 = vpop.f32.mrf.mxu3  ;;  %7933 = vmatpush.bf16.msra.mxu1 %v14565_v29  ;;  %v17818_v29 = vld [vmem:[%s27358_s3 + $0x5a4] sm:$0xf] }
 0x3ad   :  { %v5740_v56 = vadd.f32 %v5739_v30, %v23831_v50  ;;  %v14786_v50 = vld [vmem:[%s27358_s3 + $0x310] sm:$0xf0]  ;;  %7959 = vmatpush.bf16.msra.mxu3 %v14821_v51  ;;  %v15397_v51 = vor.u32 %v17886_v16, %v15394_v43  ;;  %v17882_v30 = vld [vmem:[%s27358_s3 + $0x7a4] sm:$0xf] }
 0x3ae   :  { %8001 = vmatmul.bf16.vlgmr.msrb.gmra.mxu2 %v24128_v18  ;;  %v14789_v25 = vor.u32 %v17734_v36, %v14786_v50  ;;  %v17713_v36 = vld [vmem:[%s27358_s3 + $0x254] sm:$0xf0]  ;;  %v17878_v50 = vld [vmem:[%s27358_s3 + $0x784] sm:$0xf]  ;;  %v15330_v43 = vld [vmem:[%s27358_s3 + $0x750] sm:$0xf0] }
 0x3af   :  { %8045 = vmatpush.bf16.msra.mxu2 %v14777_v59  ;;  %v24521_v10 = vadd.f32 %v5740_v56, %v24317_v26  ;;  %v14744_v26 = vld [vmem:[%s27358_s3 + $0x2a8] sm:$0xf]  ;;  %v15141_v59 = vor.u32 %v17822_v21, %v15138_v33  ;;  %v15125_v56 = vor.u32 %v17818_v29, %v15122_v47 }
 0x3b0   :  { %8074 = vmatpush.bf16.msrb.mxu0 %v14985_v11  ;;  %v14920_v11 = vld [vmem:[%s27358_s3 + $0x408] sm:$0xf]  ;;  %v14745_v4 = vor.u32 %v17725_v20, %v14744_v26  ;;  %7934 = vmatpush.bf16.msra.mxu1 %v14549_v52  ;;  %v15090_v20 = vld [vmem:[%s27358_s3 + $0x570] sm:$0xf0] }
 0x3b1   :  { %v14921_v45 = vor.u32 %v17769_v48, %v14920_v11  ;;  %7960 = vmatpush.bf16.msra.mxu3 %v14805_v60  ;;  %v14696_v52 = vld [vmem:[%s27358_s3 + $0x248] sm:$0xf]  ;;  %v15362_v11 = vld [vmem:[%s27358_s3 + $0x790] sm:$0xf0]  ;;  %v14477_v60 = vor.u32 %v17655_v32, %v14474_v13  ;;  %v17798_v13 = vld [vmem:[%s27358_s3 + $0x504] sm:$0xf] }
 0x3b2   :  { %v14697_v48 = vor.u32 %v17713_v36, %v14696_v52  ;;  %v15365_v26 = vor.u32 %v17878_v50, %v15362_v11  ;;  %v15061_v36 = vor.u32 %v17802_v62, %v15058_v49  ;;  %v17862_v50 = vld [vmem:[%s27358_s3 + $0x704] sm:$0xf]  ;;  %v17639_v11 = vld [vmem:[%s27358_s3 + $0xc] sm:$0xf]  ;;  %v17845_v62 = vld [vmem:[%s27358_s3 + $0x674] sm:$0xf0] }
 0x3b3   :  { %8046 = vmatpush.bf16.msra.mxu2 %v14761_v24  ;;  %v15106_v24 = vld [vmem:[%s27358_s3 + $0x590] sm:$0xf0]  ;;  %v14872_v49 = vld [vmem:[%s27358_s3 + $0x3a8] sm:$0xf] }
 0x3b4   :  { %8075 = vmatpush.bf16.msrb.mxu0 %v14969_v58  ;;  %v14525_v58 = vor.u32 %v17667_v8, %v14522_v41  ;;  %v5741_v46 = vpop.f32.mrf.mxu3  ;;  %7935 = vmatpush.bf16.msra.mxu1 %v14533_v31  ;;  %v15109_v1 = vor.u32 %v17814_v40, %v15106_v24  ;;  %v17810_v8 = vld [vmem:[%s27358_s3 + $0x564] sm:$0xf]  ;;  %v17651_v41 = vld [vmem:[%s27358_s3 + $0x6c] sm:$0xf]  ;;  %v14681_v31 = vor.u32 %v17709_v38, %v14680_v7  ;;  %v14904_v7 = vld [vmem:[%s27358_s3 + $0x3e8] sm:$0xf] }
 0x3b5   :  { %7961 = vmatpush.bf16.msra.mxu3 %v14789_v25  ;;  %v17806_v25 = vld [vmem:[%s27358_s3 + $0x544] sm:$0xf]  ;;  %v17647_v46 = vld [vmem:[%s27358_s3 + $0x4c] sm:$0xf]  ;;  %v17765_v38 = vld [vmem:[%s27358_s3 + $0x3f4] sm:$0xf0] }
 0x3b7   :  { %8047 = vmatpush.bf16.msra.mxu2 %v14745_v4  ;;  %7936 = vmatmul.bf16.vlgmr.msra.gmra.mxu1 %v24150_v5  ;;  %v15346_v4 = vld [vmem:[%s27358_s3 + $0x770] sm:$0xf0] }
 0x3b8   :  { %8076 = vmatpush.bf16.msrb.mxu0 %v14953_v23  ;;  %v14509_v23 = vor.u32 %v17663_v12, %v14506_v15  ;;  %7980 = vmatpush.bf16.msrb.mxu1 %v15157_v54  ;;  %v14461_v54 = vor.u32 %v17651_v41, %v14458_v17  ;;  %v15093_v12 = vor.u32 %v17810_v8, %v15090_v20  ;;  %v15074_v15 = vld [vmem:[%s27358_s3 + $0x550] sm:$0xf0]  ;;  %v14648_v8 = vld [vmem:[%s27358_s3 + $0x1e8] sm:$0xf]  ;;  %v17795_v41 = vld [vmem:[%s27358_s3 + $0x4ec] sm:$0xf] }
 0x3b9   :  { %8006 = vmatpush.bf16.msrb.mxu3 %v15413_v53  ;;  %v14442_v53 = vld [vmem:[%s27358_s3 + $0x58] sm:$0xf0]  ;;  %v15077_v22 = vor.u32 %v17806_v25, %v15074_v15  ;;  %v17853_v20 = vld [vmem:[%s27358_s3 + $0x6b4] sm:$0xf0] }
 0x3ba   :  { %7962 = vmatmul.bf16.vlgmr.msra.gmra.mxu3 %v24138_v9  ;;  %v14445_v29 = vor.u32 %v17647_v46, %v14442_v53  ;;  %v15034_v17 = vld [vmem:[%s27358_s3 + $0x4f8] sm:$0xf0]  ;;  %v14905_v53 = vor.u32 %v17765_v38, %v14904_v7  ;;  %v17749_v7 = vld [vmem:[%s27358_s3 + $0x374] sm:$0xf0] }
 0x3bb   :  { %8048 = vmatpush.bf16.msra.mxu2 %v14729_v14  ;;  %v14665_v14 = vor.u32 %v17705_v42, %v14664_v37  ;;  %v15018_v15 = vld [vmem:[%s27358_s3 + $0x4d8] sm:$0xf0]  ;;  %v17849_v37 = vld [vmem:[%s27358_s3 + $0x694] sm:$0xf0]  ;;  %v14888_v42 = vld [vmem:[%s27358_s3 + $0x3c8] sm:$0xf] }
 0x3bc   :  { %8077 = vmatpush.bf16.msrb.mxu0 %v14937_v2  ;;  %7981 = vmatpush.bf16.msrb.mxu1 %v15141_v59  ;;  %v15381_v2 = vor.u32 %v17882_v30, %v15378_v0  ;;  %v17861_v59 = vld [vmem:[%s27358_s3 + $0x6f4] sm:$0xf0]  ;;  %v17866_v30 = vld [vmem:[%s27358_s3 + $0x724] sm:$0xf]  ;;  %v5987_v0 = vpop.f32.mrf.mxu3 }
 0x3bd   :  { %8007 = vmatpush.bf16.msrb.mxu3 %v15397_v51  ;;  %v14426_v51 = vld [vmem:[%s27358_s3 + $0x38] sm:$0xf0]  ;;  %v5988_v40 = vadd.f32 %v5987_v0, %v24047_v28  ;;  %v15298_v28 = vld [vmem:[%s27358_s3 + $0x710] sm:$0xf0] }
 0x3be   :  { %v15301_v25 = vor.u32 %v17862_v50, %v15298_v28 }
 0x3bf   :  { %8049 = vmatpush.bf16.msra.mxu2 %v14713_v39  ;;  %v15314_v39 = vld [vmem:[%s27358_s3 + $0x730] sm:$0xf0] }
 0x3c0   :  { %8078 = vmatpush.bf16.msrb.mxu0 %v14921_v45  ;;  %7982 = vmatpush.bf16.msrb.mxu1 %v15125_v56  ;;  %v17874_v45 = vld [vmem:[%s27358_s3 + $0x764] sm:$0xf]  ;;  %v17857_v56 = vld [vmem:[%s27358_s3 + $0x6d4] sm:$0xf0] }
 0x3c1   :  { %8008 = vmatpush.bf16.msrb.mxu3 %v15381_v2  ;;  %v15349_v33 = vor.u32 %v17874_v45, %v15346_v4  ;;  %v15042_v2 = vld [vmem:[%s27358_s3 + $0x510] sm:$0xf0] }
 0x3c3   :  { %8079 = vmatmul.bf16.vlgmr.msrb.gmra.mxu0 %v23772_v63  ;;  %8050 = vmatpush.bf16.msra.mxu2 %v14697_v48  ;;  %v14410_v48 = vld [vmem:[%s27358_s3 + $0x18] sm:$0xf0] }
 0x3c4   :  { %8123 = vmatpush.bf16.msra.mxu0 %v14525_v58  ;;  %v5961_v58 = vpop.f32.mrf.mxu1  ;;  %7983 = vmatpush.bf16.msrb.mxu1 %v15109_v1  ;;  %v15317_v1 = vor.u32 %v17866_v30, %v15314_v39  ;;  %v14413_v45 = vor.u32 %v17639_v11, %v14410_v48  ;;  %v5989_v46 = vpop.f32.mrf.mxu3  ;;  %v17757_v30 = vld [vmem:[%s27358_s3 + $0x3b4] sm:$0xf0]  ;;  %v14584_v48 = vld [vmem:[%s27358_s3 + $0x168] sm:$0xf] }
 0x3c5   :  { %v5962_v21 = vadd.f32 %v5961_v58, %v23993_v19  ;;  %8009 = vmatpush.bf16.msrb.mxu3 %v15365_v26  ;;  %v17870_v19 = vld [vmem:[%s27358_s3 + $0x744] sm:$0xf]  ;;  %v17701_v26 = vld [vmem:[%s27358_s3 + $0x1f4] sm:$0xf0]  ;;  %v15037_v58 = vor.u32 %v17795_v41, %v15034_v17  ;;  %v15176_v46 = vld [vmem:[%s27358_s3 + $0x608] sm:$0xf] }
 0x3c6   :  { %v15333_v47 = vor.u32 %v17870_v19, %v15330_v43  ;;  %v15240_v19 = vld [vmem:[%s27358_s3 + $0x688] sm:$0xf]  ;;  %v17761_v43 = vld [vmem:[%s27358_s3 + $0x3d4] sm:$0xf0] }
 0x3c7   :  { %8051 = vmatpush.bf16.msra.mxu2 %v14681_v31  ;;  %v24669_v16 = vadd.f32 %v5962_v21, %v24465_v27  ;;  %v17643_v27 = vld [vmem:[%s27358_s3 + $0x2c] sm:$0xf]  ;;  %v15045_v31 = vor.u32 %v17798_v13, %v15042_v2  ;;  %v14632_v21 = vld [vmem:[%s27358_s3 + $0x1c8] sm:$0xf]  ;;  %v17689_v13 = vld [vmem:[%s27358_s3 + $0x194] sm:$0xf0] }
 0x3c8   :  { %8124 = vmatpush.bf16.msra.mxu0 %v14509_v23  ;;  %v15288_v23 = vld [vmem:[%s27358_s3 + $0x6e8] sm:$0xf]  ;;  %7984 = vmatpush.bf16.msrb.mxu1 %v15093_v12  ;;  %v14429_v24 = vor.u32 %v17643_v27, %v14426_v51  ;;  %v17791_v12 = vld [vmem:[%s27358_s3 + $0x4cc] sm:$0xf]  ;;  %v14889_v27 = vor.u32 %v17761_v43, %v14888_v42  ;;  %v17693_v51 = vld [vmem:[%s27358_s3 + $0x1b4] sm:$0xf0] }
 0x3c9   :  { %v15289_v6 = vor.u32 %v17861_v59, %v15288_v23  ;;  %8010 = vmatpush.bf16.msrb.mxu3 %v15349_v33  ;;  %v17697_v33 = vld [vmem:[%s27358_s3 + $0x1d4] sm:$0xf0]  ;;  %v15021_v23 = vor.u32 %v17791_v12, %v15018_v15  ;;  %v15208_v2 = vld [vmem:[%s27358_s3 + $0x648] sm:$0xf]  ;;  %v14954_v12 = vld [vmem:[%s27358_s3 + $0x458] sm:$0xf0] }
 0x3ca   :  { %v14633_v59 = vor.u32 %v17697_v33, %v14632_v21  ;;  %v17685_v17 = vld [vmem:[%s27358_s3 + $0x174] sm:$0xf0]  ;;  %v17775_v21 = vld [vmem:[%s27358_s3 + $0x44c] sm:$0xf]  ;;  %v14778_v43 = vld [vmem:[%s27358_s3 + $0x2f8] sm:$0xf0] }
 0x3cb   :  { %8052 = vmatpush.bf16.msra.mxu2 %v14665_v14  ;;  %v15241_v14 = vor.u32 %v17849_v37, %v15240_v19  ;;  %v17745_v19 = vld [vmem:[%s27358_s3 + $0x354] sm:$0xf0]  ;;  %v17731_v42 = vld [vmem:[%s27358_s3 + $0x2ec] sm:$0xf] }
 0x3cc   :  { %8125 = vmatpush.bf16.msra.mxu0 %v14493_v35  ;;  %v15272_v35 = vld [vmem:[%s27358_s3 + $0x6c8] sm:$0xf]  ;;  %v5963_v32 = vpop.f32.mrf.mxu1  ;;  %7985 = vmatpush.bf16.msrb.mxu1 %v15077_v22  ;;  %v15002_v22 = vld [vmem:[%s27358_s3 + $0x4b8] sm:$0xf0] }
 0x3cd   :  { %v15273_v52 = vor.u32 %v17857_v56, %v15272_v35  ;;  %8011 = vmatpush.bf16.msrb.mxu3 %v15333_v47  ;;  %v15224_v47 = vld [vmem:[%s27358_s3 + $0x668] sm:$0xf]  ;;  %v14986_v32 = vld [vmem:[%s27358_s3 + $0x498] sm:$0xf0] }
 0x3ce   :  { %8053 = vmatmul.bf16.vlgmr.msra.gmra.mxu2 %v24001_v44  ;;  %v15225_v0 = vor.u32 %v17845_v62, %v15224_v47  ;;  %v14600_v56 = vld [vmem:[%s27358_s3 + $0x188] sm:$0xf]  ;;  %v17741_v62 = vld [vmem:[%s27358_s3 + $0x334] sm:$0xf0] }
 0x3cf   :  { %8097 = vmatpush.bf16.msrb.mxu2 %v15289_v6  ;;  %v17787_v6 = vld [vmem:[%s27358_s3 + $0x4ac] sm:$0xf]  ;;  %v14601_v11 = vor.u32 %v17689_v13, %v14600_v56  ;;  %v14536_v56 = vld [vmem:[%s27358_s3 + $0x108] sm:$0xf] }
 0x3d0   :  { %8126 = vmatpush.bf16.msra.mxu0 %v14477_v60  ;;  %v24725_v60 = vadd.f32 %v5988_v40, %v24521_v10  ;;  %v15256_v10 = vld [vmem:[%s27358_s3 + $0x6a8] sm:$0xf]  ;;  %7986 = vmatpush.bf16.msrb.mxu1 %v15061_v36  ;;  %v15005_v39 = vor.u32 %v17787_v6, %v15002_v22  ;;  %v17783_v40 = vld [vmem:[%s27358_s3 + $0x48c] sm:$0xf]  ;;  %v17753_v36 = vld [vmem:[%s27358_s3 + $0x394] sm:$0xf0] }
 0x3d1   :  { %v15257_v4 = vor.u32 %v17853_v20, %v15256_v10  ;;  %8012 = vmatpush.bf16.msrb.mxu3 %v15317_v1  ;;  %v14989_v28 = vor.u32 %v17783_v40, %v14986_v32  ;;  %v17779_v1 = vld [vmem:[%s27358_s3 + $0x46c] sm:$0xf]  ;;  %v17837_v10 = vld [vmem:[%s27358_s3 + $0x634] sm:$0xf0]  ;;  %v14840_v20 = vld [vmem:[%s27358_s3 + $0x368] sm:$0xf] }
 0x3d2   :  { %v14841_v15 = vor.u32 %v17749_v7, %v14840_v20  ;;  %v14552_v22 = vld [vmem:[%s27358_s3 + $0x128] sm:$0xf]  ;;  %v17673_v40 = vld [vmem:[%s27358_s3 + $0x114] sm:$0xf0] }
 0x3d3   :  { %8098 = vmatpush.bf16.msrb.mxu2 %v15273_v52  ;;  %v14856_v52 = vld [vmem:[%s27358_s3 + $0x388] sm:$0xf]  ;;  %v14537_v20 = vor.u32 %v17673_v40, %v14536_v56  ;;  %v17817_v56 = vld [vmem:[%s27358_s3 + $0x594] sm:$0xf0] }
 0x3d4   :  { %8127 = vmatpush.bf16.msra.mxu0 %v14461_v54  ;;  %v14649_v54 = vor.u32 %v17701_v26, %v14648_v8  ;;  %7987 = vmatpush.bf16.msrb.mxu1 %v15045_v31  ;;  %v14970_v8 = vld [vmem:[%s27358_s3 + $0x478] sm:$0xf0]  ;;  %v14857_v41 = vor.u32 %v17753_v36, %v14856_v52  ;;  %v15192_v26 = vld [vmem:[%s27358_s3 + $0x628] sm:$0xf] }
 0x3d5   :  { %8013 = vmatpush.bf16.msrb.mxu3 %v15301_v25  ;;  %v15193_v38 = vor.u32 %v17837_v10, %v15192_v26  ;;  %v14973_v31 = vor.u32 %v17779_v1, %v14970_v8  ;;  %v14585_v25 = vor.u32 %v17685_v17, %v14584_v48  ;;  %v14922_v52 = vld [vmem:[%s27358_s3 + $0x418] sm:$0xf0]  ;;  %v17909_v48 = vld [vmem:[%s27355_s4 + $0x1874] sm:$0xf0] }
 0x3d6   :  { %v17829_v1 = vld [vmem:[%s27358_s3 + $0x5f4] sm:$0xf0]  ;;  %v14746_v8 = vld [vmem:[%s27358_s3 + $0x2b8] sm:$0xf0] }
 0x3d7   :  { %8099 = vmatpush.bf16.msrb.mxu2 %v15257_v4  ;;  %7988 = vmatmul.bf16.vlgmr.msrb.gmra.mxu1 %v24160_v3  ;;  %v14568_v4 = vld [vmem:[%s27358_s3 + $0x148] sm:$0xf]  ;;  %v17893_v17 = vld [vmem:[%s27358_s3 + $0x7f4] sm:$0xf0] }
 0x3d8   :  { %8128 = vmatpush.bf16.msra.mxu0 %v14445_v29  ;;  %8032 = vmatpush.bf16.msra.mxu1 %v14649_v54  ;;  %v14616_v29 = vld [vmem:[%s27358_s3 + $0x1a8] sm:$0xf]  ;;  %v17681_v54 = vld [vmem:[%s27358_s3 + $0x154] sm:$0xf0] }
 0x3d9   :  { %8058 = vmatpush.bf16.msra.mxu3 %v14905_v53  ;;  %v14617_v35 = vor.u32 %v17693_v51, %v14616_v29  ;;  %v17833_v53 = vld [vmem:[%s27358_s3 + $0x614] sm:$0xf0]  ;;  %v14938_v29 = vld [vmem:[%s27358_s3 + $0x438] sm:$0xf0]  ;;  %v14808_v51 = vld [vmem:[%s27358_s3 + $0x328] sm:$0xf]  ;;  %v6239_v47 = vpop.f32.mrf.mxu3 }
 0x3da   :  { %8014 = vmatmul.bf16.vlgmr.msrb.gmra.mxu3 %v24158_v61  ;;  %v15177_v37 = vor.u32 %v17833_v53, %v15176_v46  ;;  %v15400_v46 = vld [vmem:[%s27358_s3 + $0x7c8] sm:$0xf]  ;;  %v17889_v53 = vld [vmem:[%s27358_s3 + $0x7d4] sm:$0xf0] }
 0x3db   :  { %8100 = vmatpush.bf16.msrb.mxu2 %v15241_v14  ;;  %v14957_v14 = vor.u32 %v17775_v21, %v14954_v12  ;;  %v17825_v21 = vld [vmem:[%s27358_s3 + $0x5d4] sm:$0xf0]  ;;  %v24969_v12 = vpop.f32.mrf.mxu2 }
 0x3dc   :  { %8129 = vmatpush.bf16.msra.mxu0 %v14429_v24  ;;  %8033 = vmatpush.bf16.msra.mxu1 %v14633_v59  ;;  %v17841_v24 = vld [vmem:[%s27358_s3 + $0x654] sm:$0xf0]  ;;  %v14569_v59 = vor.u32 %v17681_v54, %v14568_v4  ;;  %v15144_v4 = vld [vmem:[%s27358_s3 + $0x5c8] sm:$0xf] }
 0x3dd   :  { %8059 = vmatpush.bf16.msra.mxu3 %v14889_v27  ;;  %v15209_v50 = vor.u32 %v17841_v24, %v15208_v2  ;;  %v17677_v27 = vld [vmem:[%s27358_s3 + $0x134] sm:$0xf0]  ;;  %v14792_v2 = vld [vmem:[%s27358_s3 + $0x308] sm:$0xf]  ;;  %v17767_v24 = vld [vmem:[%s27358_s3 + $0x40c] sm:$0xf] }
 0x3de   :  { %v14553_v13 = vor.u32 %v17677_v27, %v14552_v22  ;;  %v14925_v26 = vor.u32 %v17767_v24, %v14922_v52  ;;  %v14714_v22 = vld [vmem:[%s27358_s3 + $0x278] sm:$0xf0]  ;;  %v15384_v27 = vld [vmem:[%s27358_s3 + $0x7a8] sm:$0xf] }
 0x3df   :  { %8101 = vmatpush.bf16.msrb.mxu2 %v15225_v0  ;;  %v24908_v0 = vpop.f32.mrf.mxu0 }
 0x3e0   :  { %8130 = vmatpush.bf16.msra.mxu0 %v14413_v45  ;;  %8034 = vmatpush.bf16.msra.mxu1 %v14617_v35  ;;  %v6213_v45 = vpop.f32.mrf.mxu1 }
 0x3e3   :  { %8131 = vmatmul.bf16.vlgmr.msra.gmra.mxu0 %v23585_v57  ;;  %v14873_v57 = vor.u32 %v17757_v30, %v14872_v49  ;;  %8102 = vmatpush.bf16.msrb.mxu2 %v15209_v50  ;;  %v17727_v49 = vld [vmem:[%s27358_s3 + $0x2cc] sm:$0xf]  ;;  %v14762_v30 = vld [vmem:[%s27358_s3 + $0x2d8] sm:$0xf0]  ;;  %v14809_v50 = vor.u32 %v17741_v62, %v14808_v51  ;;  %v17885_v51 = vld [vmem:[%s27358_s3 + $0x7b4] sm:$0xf0]  ;;  %v7848_v40 = vpop.f32.mrf.mxu2 }
 0x3e4   :  { %8175 = vmatpush.bf16.msrb.mxu0 %v15037_v58  ;;  %v6214_v58 = vadd.f32 %v6213_v45, %v24228_v34  ;;  %8035 = vmatpush.bf16.msra.mxu1 %v14601_v11  ;;  %v14824_v34 = vld [vmem:[%s27358_s3 + $0x348] sm:$0xf]  ;;  %v15481_v11 = vld [vmem:[%s27355_s4 + $0x1870] sm:$0xf] }
 0x3e5   :  { %8060 = vmatpush.bf16.msra.mxu3 %v14873_v57  ;;  %v14825_v6 = vor.u32 %v17745_v19, %v14824_v34  ;;  %v14765_v57 = vor.u32 %v17727_v49, %v14762_v30  ;;  %v15482_v7 = vor.u32 %v17909_v48, %v15481_v11  ;;  %v14730_v34 = vld [vmem:[%s27358_s3 + $0x298] sm:$0xf0]  ;;  %v15112_v30 = vld [vmem:[%s27358_s3 + $0x588] sm:$0xf]  ;;  %v15449_v11 = vld [vmem:[%s27355_s4 + $0x1830] sm:$0xf] }
 0x3e6   :  { %v24873_v33 = vadd.f32 %v6214_v58, %v24669_v16  ;;  %v17771_v16 = vld [vmem:[%s27358_s3 + $0x42c] sm:$0xf]  ;;  %v17907_v58 = vld [vmem:[%s27355_s4 + $0x1864] sm:$0xf0]  ;;  %v17901_v48 = vld [vmem:[%s27355_s4 + $0x1834] sm:$0xf0] }
 0x3e7   :  { %8103 = vmatpush.bf16.msrb.mxu2 %v15193_v38  ;;  %v14941_v32 = vor.u32 %v17771_v16, %v14938_v29  ;;  %v15401_v16 = vor.u32 %v17889_v53, %v15400_v46  ;;  %v17821_v29 = vld [vmem:[%s27358_s3 + $0x5b4] sm:$0xf0]  ;;  %v14666_v46 = vld [vmem:[%s27358_s3 + $0x218] sm:$0xf0] }
 0x3e8   :  { %8176 = vmatpush.bf16.msrb.mxu0 %v15021_v23  ;;  %v14781_v23 = vor.u32 %v17731_v42, %v14778_v43  ;;  %8036 = vmatpush.bf16.msra.mxu1 %v14585_v25  ;;  %v6215_v35 = vpop.f32.mrf.mxu1  ;;  %v6241_v25 = vpop.f32.mrf.mxu3  ;;  %v15145_v43 = vor.u32 %v17825_v21, %v15144_v4  ;;  %v17809_v4 = vld [vmem:[%s27358_s3 + $0x554] sm:$0xf0]  ;;  %v15336_v21 = vld [vmem:[%s27358_s3 + $0x748] sm:$0xf] }
 0x3e9   :  { %8061 = vmatpush.bf16.msra.mxu3 %v14857_v41  ;;  %v15416_v41 = vld [vmem:[%s27358_s3 + $0x7e8] sm:$0xf]  ;;  %v17873_v53 = vld [vmem:[%s27358_s3 + $0x754] sm:$0xf0] }
 0x3ea   :  { %v15417_v54 = vor.u32 %v17893_v17, %v15416_v41  ;;  %v17903_v35 = vld [vmem:[%s27355_s4 + $0x1844] sm:$0xf0]  ;;  %v14682_v41 = vld [vmem:[%s27358_s3 + $0x238] sm:$0xf0] }
 0x3eb   :  { %8104 = vmatpush.bf16.msrb.mxu2 %v15177_v37  ;;  %v7822_v37 = vpop.f32.mrf.mxu0  ;;  %v15352_v17 = vld [vmem:[%s27358_s3 + $0x768] sm:$0xf] }
 0x3ec   :  { %8177 = vmatpush.bf16.msrb.mxu0 %v15005_v39  ;;  %v6240_v39 = vadd.f32 %v6239_v47, %v24276_v55  ;;  %8037 = vmatpush.bf16.msra.mxu1 %v14569_v59  ;;  %v17737_v55 = vld [vmem:[%s27358_s3 + $0x314] sm:$0xf0]  ;;  %v17899_v25 = vld [vmem:[%s27355_s4 + $0x1824] sm:$0xf0]  ;;  %v17859_v37 = vld [vmem:[%s27358_s3 + $0x6ec] sm:$0xf] }
 0x3ed   :  { %8062 = vmatpush.bf16.msra.mxu3 %v14841_v15  ;;  %v14793_v38 = vor.u32 %v17737_v55, %v14792_v2  ;;  %v17719_v15 = vld [vmem:[%s27358_s3 + $0x28c] sm:$0xf]  ;;  %v17905_v59 = vld [vmem:[%s27355_s4 + $0x1854] sm:$0xf0] }
 0x3ee   :  { %8105 = vmatmul.bf16.vlgmr.msrb.gmra.mxu2 %v24128_v18  ;;  %v24931_v36 = vadd.f32 %v6240_v39, %v24725_v60  ;;  %v17723_v60 = vld [vmem:[%s27358_s3 + $0x2ac] sm:$0xf]  ;;  %v14733_v19 = vor.u32 %v17719_v15, %v14730_v34  ;;  %v15457_v39 = vld [vmem:[%s27355_s4 + $0x1840] sm:$0xf]  ;;  %v17881_v2 = vld [vmem:[%s27358_s3 + $0x794] sm:$0xf0] }
 0x3ef   :  { %8149 = vmatpush.bf16.msra.mxu2 %v14781_v23  ;;  %v14749_v10 = vor.u32 %v17723_v60, %v14746_v8  ;;  %v15465_v23 = vld [vmem:[%s27355_s4 + $0x1850] sm:$0xf]  ;;  %v15458_v52 = vor.u32 %v17903_v35, %v15457_v39  ;;  %v17813_v60 = vld [vmem:[%s27358_s3 + $0x574] sm:$0xf0]  ;;  %v17707_v8 = vld [vmem:[%s27358_s3 + $0x22c] sm:$0xf] }
 0x3f0   :  { %8178 = vmatpush.bf16.msrb.mxu0 %v14989_v28  ;;  %v15160_v28 = vld [vmem:[%s27358_s3 + $0x5e8] sm:$0xf]  ;;  %8038 = vmatpush.bf16.msra.mxu1 %v14553_v13  ;;  %v15466_v62 = vor.u32 %v17905_v59, %v15465_v23  ;;  %v17703_v34 = vld [vmem:[%s27358_s3 + $0x20c] sm:$0xf]  ;;  %v15274_v39 = vld [vmem:[%s27358_s3 + $0x6d8] sm:$0xf0] }
 0x3f1   :  { %8063 = vmatpush.bf16.msra.mxu3 %v14825_v6  ;;  %v15161_v45 = vor.u32 %v17829_v1, %v15160_v28  ;;  %v17715_v6 = vld [vmem:[%s27358_s3 + $0x26c] sm:$0xf]  ;;  %v15368_v13 = vld [vmem:[%s27358_s3 + $0x788] sm:$0xf] }
 0x3f2   :  { %v14717_v47 = vor.u32 %v17715_v6, %v14714_v22  ;;  %v15096_v28 = vld [vmem:[%s27358_s3 + $0x568] sm:$0xf]  ;;  %v15369_v1 = vor.u32 %v17881_v2, %v15368_v13  ;;  %v17897_v6 = vld [vmem:[%s27355_s4 + $0x1814] sm:$0xf0]  ;;  %v15337_v22 = vor.u32 %v17873_v53, %v15336_v21  ;;  %v15475_v21 = vld [vmem:[%s27355_s4 + $0x1868] sm:$0xf0] }
 0x3f3   :  { %8150 = vmatpush.bf16.msra.mxu2 %v14765_v57  ;;  %v14698_v57 = vld [vmem:[%s27358_s3 + $0x258] sm:$0xf0]  ;;  %v25034_v24 = vpop.f32.mrf.mxu0  ;;  %v15048_v35 = vld [vmem:[%s27358_s3 + $0x508] sm:$0xf]  ;;  %v17865_v2 = vld [vmem:[%s27358_s3 + $0x714] sm:$0xf0] }
 0x3f4   :  { %8179 = vmatpush.bf16.msrb.mxu0 %v14973_v31  ;;  %v15473_v31 = vld [vmem:[%s27355_s4 + $0x1860] sm:$0xf]  ;;  %8039 = vmatpush.bf16.msra.mxu1 %v14537_v20  ;;  %v15080_v20 = vld [vmem:[%s27358_s3 + $0x548] sm:$0xf]  ;;  %v17847_v53 = vld [vmem:[%s27358_s3 + $0x68c] sm:$0xf] }
 0x3f5   :  { %8064 = vmatpush.bf16.msra.mxu3 %v14809_v50  ;;  %v15474_v42 = vor.u32 %v17907_v58, %v15473_v31  ;;  %v15113_v50 = vor.u32 %v17817_v56, %v15112_v30  ;;  %v25071_v31 = vld [vmem:[%s27357_s6 + $0x4] ss:$8 sm:$0xf]  ;;  %v15441_v58 = vld [vmem:[%s27355_s4 + $0x1820] sm:$0xf]  ;;  %v15081_v59 = vor.u32 %v17809_v4, %v15080_v20 }
 0x3f6   :  { %v17855_v30 = vld [vmem:[%s27358_s3 + $0x6cc] sm:$0xf]  ;;  %v15304_v13 = vld [vmem:[%s27358_s3 + $0x708] sm:$0xf] }
 0x3f7   :  { %8151 = vmatpush.bf16.msra.mxu2 %v14749_v10  ;;  %8040 = vmatmul.bf16.vlgmr.msra.gmra.mxu1 %v24150_v5  ;;  %v14685_v10 = vor.u32 %v17707_v8, %v14682_v41  ;;  %v15258_v8 = vld [vmem:[%s27358_s3 + $0x6b8] sm:$0xf0]  ;;  %v17763_v41 = vld [vmem:[%s27358_s3 + $0x3ec] sm:$0xf]  ;;  %v15305_v4 = vor.u32 %v17865_v2, %v15304_v13 }
 0x3f8   :  { %8180 = vmatpush.bf16.msrb.mxu0 %v14957_v14  ;;  %8084 = vmatpush.bf16.msrb.mxu1 %v15161_v45  ;;  %v15128_v14 = vld [vmem:[%s27358_s3 + $0x5a8] sm:$0xf]  ;;  %v15097_v45 = vor.u32 %v17813_v60, %v15096_v28  ;;  %v17839_v13 = vld [vmem:[%s27358_s3 + $0x64c] sm:$0xf]  ;;  %v15210_v2 = vld [vmem:[%s27358_s3 + $0x658] sm:$0xf0] }
 0x3f9   :  { %8065 = vmatpush.bf16.msra.mxu3 %v14793_v38  ;;  %v15129_v49 = vor.u32 %v17821_v29, %v15128_v14  ;;  %v25063_v38 = vpop.f32.mrf.mxu1  ;;  %v25082_v15 = vpop.f32.mrf.mxu2  ;;  %v15442_v14 = vor.u32 %v17899_v25, %v15441_v58  ;;  %v15433_v29 = vld [vmem:[%s27355_s4 + $0x1810] sm:$0xf]  ;;  %v17695_v25 = vld [vmem:[%s27358_s3 + $0x1cc] sm:$0xf] }
 0x3fa   :  { %v15434_v56 = vor.u32 %v17897_v6, %v15433_v29  ;;  %v17904_v29 = vld [vmem:[%s27355_s4 + $0x1854] sm:$0xf]  ;;  %v15467_v6 = vld [vmem:[%s27355_s4 + $0x1858] sm:$0xf0] }
 0x3fb   :  { %8152 = vmatpush.bf16.msra.mxu2 %v14733_v19  ;;  %v14669_v19 = vor.u32 %v17703_v34, %v14666_v46  ;;  %v14634_v46 = vld [vmem:[%s27358_s3 + $0x1d8] sm:$0xf0] }
 0x3fc   :  { %8181 = vmatpush.bf16.msrb.mxu0 %v14941_v32  ;;  %8066 = vmatmul.bf16.vlgmr.msra.gmra.mxu3 %v24138_v9  ;;  %v17711_v32 = vld [vmem:[%s27358_s3 + $0x24c] sm:$0xf] }
 0x3fd   :  { %8110 = vmatpush.bf16.msrb.mxu3 %v15417_v54  ;;  %8085 = vmatpush.bf16.msrb.mxu1 %v15145_v43  ;;  %v14701_v55 = vor.u32 %v17711_v32, %v14698_v57  ;;  %v7874_v43 = vpop.f32.mrf.mxu0  ;;  %v15277_v32 = vor.u32 %v17855_v30, %v15274_v39  ;;  %v15470_v39 = vor.u32 %v17904_v29, %v15467_v6  ;;  %v17675_v29 = vld [vmem:[%s27358_s3 + $0x12c] sm:$0xf] }
 0x3ff   :  { %8153 = vmatpush.bf16.msra.mxu2 %v14717_v47  ;;  %v15320_v47 = vld [vmem:[%s27358_s3 + $0x728] sm:$0xf] }
 0x400   :  { %8182 = vmatpush.bf16.msrb.mxu0 %v14925_v26  ;;  %v17877_v26 = vld [vmem:[%s27358_s3 + $0x774] sm:$0xf0] }
 0x401   :  { %8111 = vmatpush.bf16.msrb.mxu3 %v15401_v16  ;;  %8086 = vmatpush.bf16.msrb.mxu1 %v15129_v49  ;;  %v15353_v54 = vor.u32 %v17877_v26, %v15352_v17  ;;  %v15064_v16 = vld [vmem:[%s27358_s3 + $0x528] sm:$0xf]  ;;  %v25118_v49 = vpop.f32.mrf.mxu3  ;;  %v7835_v40 = vpop.f32.mrf.mxu1  ;;  %v14906_v17 = vld [vmem:[%s27358_s3 + $0x3f8] sm:$0xf0] }
 0x402   :  { %v7900_v60 = vpop.f32.mrf.mxu2  ;;  %v14909_v34 = vor.u32 %v17763_v41, %v14906_v17  ;;  %v17902_v40 = vld [vmem:[%s27355_s4 + $0x1844] sm:$0xf]  ;;  %v15194_v41 = vld [vmem:[%s27358_s3 + $0x638] sm:$0xf0]  ;;  %v17747_v17 = vld [vmem:[%s27358_s3 + $0x36c] sm:$0xf] }
 0x403   :  { %8183 = vmatmul.bf16.vlgmr.msrb.gmra.mxu0 %v23772_v63  ;;  %v15385_v63 = vor.u32 %v17885_v51, %v15384_v27  ;;  %8154 = vmatpush.bf16.msra.mxu2 %v14701_v55  ;;  %v6505_v27 = vperm.slane %v25071_v31, 0  ;;  %v17805_v51 = vld [vmem:[%s27358_s3 + $0x534] sm:$0xf0]  ;;  %v15425_v55 = vld [vmem:[%s27355_s4 + $0x1800] sm:$0xf] }
 0x404   :  { %8626 = vmatpush.bf16.msra.mxu0 %v15482_v7  ;;  %v15450_v7 = vor.u32 %v17901_v48, %v15449_v11  ;;  %v15065_v57 = vor.u32 %v17805_v51, %v15064_v16  ;;  %v17699_v11 = vld [vmem:[%s27358_s3 + $0x1ec] sm:$0xf]  ;;  %v17908_v48 = vld [vmem:[%s27355_s4 + $0x1874] sm:$0xf]  ;;  %v15226_v51 = vld [vmem:[%s27358_s3 + $0x678] sm:$0xf0] }
 0x405   :  { %8112 = vmatpush.bf16.msrb.mxu3 %v15385_v63  ;;  %8087 = vmatpush.bf16.msrb.mxu1 %v15113_v50  ;;  %v17801_v63 = vld [vmem:[%s27358_s3 + $0x514] sm:$0xf0]  ;;  %v7821_v50 = vadd.f32 %v24908_v0, %v6505_v27  ;;  %v17851_v0 = vld [vmem:[%s27358_s3 + $0x6ac] sm:$0xf]  ;;  %v17900_v60 = vld [vmem:[%s27355_s4 + $0x1834] sm:$0xf] }
 0x406   :  { %v15049_v20 = vor.u32 %v17801_v63, %v15048_v35  ;;  %v17691_v16 = vld [vmem:[%s27358_s3 + $0x1ac] sm:$0xf] }
 0x407   :  { %8155 = vmatpush.bf16.msra.mxu2 %v14685_v10  ;;  %v15261_v10 = vor.u32 %v17851_v0, %v15258_v8  ;;  %v17843_v27 = vld [vmem:[%s27358_s3 + $0x66c] sm:$0xf]  ;;  %v14586_v8 = vld [vmem:[%s27358_s3 + $0x178] sm:$0xf0] }
 0x408   :  { %8627 = vmatpush.bf16.msra.mxu0 %v15474_v42  ;;  %v15290_v42 = vld [vmem:[%s27358_s3 + $0x6f8] sm:$0xf0]  ;;  %v15229_v30 = vor.u32 %v17843_v27, %v15226_v51  ;;  %v25315_v27 = vpop.f32.mrf.mxu0 }
 0x409   :  { %8113 = vmatpush.bf16.msrb.mxu3 %v15369_v1  ;;  %v15293_v23 = vor.u32 %v17859_v37, %v15290_v42  ;;  %8088 = vmatpush.bf16.msrb.mxu1 %v15097_v45  ;;  %v15483_v1 = vld [vmem:[%s27355_s4 + $0x1878] sm:$0xf0]  ;;  %v7834_v45 = vadd.f32 %v25063_v38, %v7821_v50  ;;  %v7861_v38 = vpop.f32.mrf.mxu3  ;;  %v17759_v37 = vld [vmem:[%s27358_s3 + $0x3cc] sm:$0xf]  ;;  %v15213_v50 = vor.u32 %v17839_v13, %v15210_v2 }
 0x40a   :  { %v14890_v42 = vld [vmem:[%s27358_s3 + $0x3d8] sm:$0xf0]  ;;  %v17827_v13 = vld [vmem:[%s27358_s3 + $0x5ec] sm:$0xf] }
 0x40b   :  { %8156 = vmatpush.bf16.msra.mxu2 %v14669_v19  ;;  %v15242_v19 = vld [vmem:[%s27358_s3 + $0x698] sm:$0xf0] }
 0x40c   :  { %8628 = vmatpush.bf16.msra.mxu0 %v15466_v62  ;;  %v17869_v62 = vld [vmem:[%s27358_s3 + $0x734] sm:$0xf0]  ;;  %v15245_v43 = vor.u32 %v17847_v53, %v15242_v19  ;;  %v15178_v38 = vld [vmem:[%s27358_s3 + $0x618] sm:$0xf0]  ;;  %v17743_v53 = vld [vmem:[%s27358_s3 + $0x34c] sm:$0xf] }
 0x40d   :  { %8114 = vmatpush.bf16.msrb.mxu3 %v15353_v54  ;;  %8089 = vmatpush.bf16.msrb.mxu1 %v15081_v59  ;;  %v15321_v28 = vor.u32 %v17869_v62, %v15320_v47  ;;  %v17906_v54 = vld [vmem:[%s27355_s4 + $0x1864] sm:$0xf]  ;;  %v14637_v59 = vor.u32 %v17695_v25, %v14634_v46  ;;  %v17755_v47 = vld [vmem:[%s27358_s3 + $0x3ac] sm:$0xf]  ;;  %v14874_v62 = vld [vmem:[%s27358_s3 + $0x3b8] sm:$0xf0] }
 0x40e   :  { %8157 = vmatmul.bf16.vlgmr.msra.gmra.mxu2 %v24001_v44  ;;  %v14650_v44 = vld [vmem:[%s27358_s3 + $0x1f8] sm:$0xf0]  ;;  %v17898_v25 = vld [vmem:[%s27355_s4 + $0x1824] sm:$0xf]  ;;  %v17831_v46 = vld [vmem:[%s27358_s3 + $0x60c] sm:$0xf] }
 0x40f   :  { %8201 = vmatpush.bf16.msrb.mxu2 %v15293_v23  ;;  %v14653_v58 = vor.u32 %v17699_v11, %v14650_v44  ;;  %v7847_v23 = vadd.f32 %v24969_v12, %v7834_v45  ;;  %v14618_v12 = vld [vmem:[%s27358_s3 + $0x1b8] sm:$0xf0] }
 0x410   :  { %8629 = vmatpush.bf16.msra.mxu0 %v15458_v52  ;;  %v17895_v52 = vld [vmem:[%s27355_s4 + $0x1804] sm:$0xf0]  ;;  %v14621_v63 = vor.u32 %v17691_v16, %v14618_v12  ;;  %v15451_v44 = vld [vmem:[%s27355_s4 + $0x1838] sm:$0xf0] }
 0x411   :  { %8115 = vmatpush.bf16.msrb.mxu3 %v15337_v22  ;;  %v15426_v26 = vor.u32 %v17895_v52, %v15425_v55  ;;  %8090 = vmatpush.bf16.msrb.mxu1 %v15065_v57  ;;  %v14893_v22 = vor.u32 %v17759_v37, %v14890_v42  ;;  %v7860_v35 = vadd.f32 %v25118_v49, %v7847_v23  ;;  %v14602_v49 = vld [vmem:[%s27358_s3 + $0x198] sm:$0xf0]  ;;  %v17751_v55 = vld [vmem:[%s27358_s3 + $0x38c] sm:$0xf]  ;;  %v17896_v23 = vld [vmem:[%s27355_s4 + $0x1814] sm:$0xf] }
 0x412   :  { %v14877_v57 = vor.u32 %v17755_v47, %v14874_v62  ;;  %v14858_v52 = vld [vmem:[%s27358_s3 + $0x398] sm:$0xf0]  ;;  %v15181_v37 = vor.u32 %v17831_v46, %v15178_v38 }
 0x413   :  { %8202 = vmatpush.bf16.msrb.mxu2 %v15277_v32  ;;  %v15459_v32 = vld [vmem:[%s27355_s4 + $0x1848] sm:$0xf0]  ;;  %v7873_v11 = vadd.f32 %v25034_v24, %v7860_v35  ;;  %v14861_v0 = vor.u32 %v17751_v55, %v14858_v52  ;;  %v14826_v19 = vld [vmem:[%s27358_s3 + $0x358] sm:$0xf0]  ;;  %v17894_v35 = vld [vmem:[%s27355_s4 + $0x1804] sm:$0xf] }
 0x414   :  { %8630 = vmatpush.bf16.msra.mxu0 %v15450_v7  ;;  %v15486_v7 = vor.u32 %v17908_v48, %v15483_v1  ;;  %v17683_v1 = vld [vmem:[%s27358_s3 + $0x16c] sm:$0xf]  ;;  %v14829_v16 = vor.u32 %v17743_v53, %v14826_v19  ;;  %v14810_v12 = vld [vmem:[%s27358_s3 + $0x338] sm:$0xf0] }
 0x415   :  { %8116 = vmatpush.bf16.msrb.mxu3 %v15321_v28  ;;  %8091 = vmatpush.bf16.msrb.mxu1 %v15049_v20  ;;  %v15462_v28 = vor.u32 %v17902_v40, %v15459_v32  ;;  %v17835_v24 = vld [vmem:[%s27358_s3 + $0x62c] sm:$0xf]  ;;  %v7885_v20 = vpop.f32.mrf.mxu1  ;;  %v14538_v32 = vld [vmem:[%s27358_s3 + $0x118] sm:$0xf0] }
 0x416   :  { %v7886_v45 = vadd.f32 %v7885_v20, %v7873_v11  ;;  %v17891_v55 = vld [vmem:[%s27358_s3 + $0x7ec] sm:$0xf]  ;;  %v15418_v52 = vld [vmem:[%s27358_s3 + $0x7f8] sm:$0xf0] }
 0x417   :  { %8203 = vmatpush.bf16.msrb.mxu2 %v15261_v10  ;;  %v15197_v10 = vor.u32 %v17835_v24, %v15194_v41  ;;  %v17887_v24 = vld [vmem:[%s27358_s3 + $0x7cc] sm:$0xf]  ;;  %v15402_v41 = vld [vmem:[%s27358_s3 + $0x7d8] sm:$0xf0] }
 0x418   :  { %8631 = vmatpush.bf16.msra.mxu0 %v15442_v14  ;;  %v15478_v14 = vor.u32 %v17906_v54, %v15475_v21  ;;  %8092 = vmatmul.bf16.vlgmr.msrb.gmra.mxu1 %v24160_v3  ;;  %v15443_v54 = vld [vmem:[%s27355_s4 + $0x1828] sm:$0xf0]  ;;  %v7899_v42 = vadd.f32 %v25082_v15, %v7886_v45  ;;  %v14554_v15 = vld [vmem:[%s27358_s3 + $0x138] sm:$0xf0] }
 0x419   :  { %8117 = vmatpush.bf16.msrb.mxu3 %v15305_v4  ;;  %8136 = vmatpush.bf16.msra.mxu1 %v14653_v58  ;;  %v14589_v4 = vor.u32 %v17683_v1, %v14586_v8  ;;  %v17679_v58 = vld [vmem:[%s27358_s3 + $0x14c] sm:$0xf]  ;;  %v7911_v6 = vpop.f32.mrf.mxu3  ;;  %v15421_v1 = vor.u32 %v17891_v55, %v15418_v52  ;;  %v7926_v8 = vpop.f32.mrf.mxu0  ;;  %v15130_v20 = vld [vmem:[%s27358_s3 + $0x5b8] sm:$0xf0] }
 0x41a   :  { %v7912_v51 = vadd.f32 %v7911_v6, %v7899_v42  ;;  %v17883_v45 = vld [vmem:[%s27358_s3 + $0x7ac] sm:$0xf]  ;;  %v15098_v19 = vld [vmem:[%s27358_s3 + $0x578] sm:$0xf0] }
 0x41b   :  { %8204 = vmatpush.bf16.msrb.mxu2 %v15245_v43  ;;  %v15446_v43 = vor.u32 %v17898_v25, %v15443_v54  ;;  %v17815_v54 = vld [vmem:[%s27358_s3 + $0x58c] sm:$0xf]  ;;  %v15306_v52 = vld [vmem:[%s27358_s3 + $0x718] sm:$0xf0] }
 0x41c   :  { %8632 = vmatpush.bf16.msra.mxu0 %v15434_v56  ;;  %8118 = vmatmul.bf16.vlgmr.msrb.gmra.mxu3 %v24158_v61  ;;  %v17687_v56 = vld [vmem:[%s27358_s3 + $0x18c] sm:$0xf] }
 0x41d   :  { %8162 = vmatpush.bf16.msra.mxu3 %v14909_v34  ;;  %8137 = vmatpush.bf16.msra.mxu1 %v14637_v59  ;;  %v14605_v48 = vor.u32 %v17687_v56, %v14602_v49  ;;  %v14570_v34 = vld [vmem:[%s27358_s3 + $0x158] sm:$0xf0]  ;;  %v7887_v62 = vpop.f32.mrf.mxu1  ;;  %v8227_v56 = vmax.f32 %v7912_v51, 0.0  ;;  %v17811_v53 = vld [vmem:[%s27358_s3 + $0x56c] sm:$0xf] }
 0x41e   :  { %v15435_v59 = vld [vmem:[%s27355_s4 + $0x1818] sm:$0xf0]  ;;  %v17875_v42 = vld [vmem:[%s27358_s3 + $0x76c] sm:$0xf] }
 0x41f   :  { %8205 = vmatpush.bf16.msrb.mxu2 %v15229_v30  ;;  %v15438_v47 = vor.u32 %v17896_v23, %v15435_v59  ;;  %v14557_v30 = vor.u32 %v17675_v29, %v14554_v15  ;;  %v14794_v49 = vld [vmem:[%s27358_s3 + $0x318] sm:$0xf0]  ;;  %v8231_v2 = vpack.c.bf16 %v8227_v56, %v8227_v56  ;;  %v15101_v23 = vor.u32 %v17811_v53, %v15098_v19  ;;  %v17871_v6 = vld [vmem:[%s27358_s3 + $0x74c] sm:$0xf] }
 0x420   :  { %8633 = vmatpush.bf16.msra.mxu0 %v15426_v26  ;;  %v14842_v26 = vld [vmem:[%s27358_s3 + $0x378] sm:$0xf0]  ;;  %v17803_v62 = vld [vmem:[%s27358_s3 + $0x52c] sm:$0xf] }
 0x421   :  { %8163 = vmatpush.bf16.msra.mxu3 %v14893_v22  ;;  %8138 = vmatpush.bf16.msra.mxu1 %v14621_v63  ;;  %v14845_v21 = vor.u32 %v17747_v17, %v14842_v26  ;;  %v17739_v22 = vld [vmem:[%s27358_s3 + $0x32c] sm:$0xf]  ;;  %v15405_v26 = vor.u32 %v17887_v24, %v15402_v41  ;;  %v15082_v29 = vld [vmem:[%s27358_s3 + $0x558] sm:$0xf0] }
 0x422   :  { %v15427_v63 = vld [vmem:[%s27355_s4 + $0x1808] sm:$0xf0]  ;;  %v14813_v40 = vor.u32 %v17739_v22, %v14810_v12  ;;  %v15338_v22 = vld [vmem:[%s27358_s3 + $0x758] sm:$0xf0] }
 0x423   :  { %8206 = vmatpush.bf16.msrb.mxu2 %v15213_v50  ;;  %v15430_v50 = vor.u32 %v17894_v35, %v15427_v63  ;;  %8634 = vmatmul.bf16.vlgmr.msra.gmra.mxu0 %v8231_v2  ;;  %v15341_v51 = vor.u32 %v17871_v6, %v15338_v22  ;;  %v17867_v35 = vld [vmem:[%s27358_s3 + $0x72c] sm:$0xf]  ;;  %v15322_v63 = vld [vmem:[%s27358_s3 + $0x738] sm:$0xf0]  ;;  %v17935_v6 = vld [vmem:[%s27355_s4 + $0x1944] sm:$0xf0] }
 0x424   :  { %8678 = vmatpush.bf16.msrb.mxu0 %v15486_v7  ;;  %v15454_v7 = vor.u32 %v17900_v60, %v15451_v44  ;;  %v17823_v60 = vld [vmem:[%s27358_s3 + $0x5cc] sm:$0xf]  ;;  %v15146_v44 = vld [vmem:[%s27358_s3 + $0x5d8] sm:$0xf0]  ;;  %v15497_v22 = vld [vmem:[%s27355_s4 + $0x1890] sm:$0xf] }
 0x425   :  { %8164 = vmatpush.bf16.msra.mxu3 %v14877_v57  ;;  %8139 = vmatpush.bf16.msra.mxu1 %v14605_v48  ;;  %v17735_v57 = vld [vmem:[%s27358_s3 + $0x30c] sm:$0xf]  ;;  %v15149_v17 = vor.u32 %v17823_v60, %v15146_v44  ;;  %v15537_v44 = vld [vmem:[%s27355_s4 + $0x18e0] sm:$0xf] }
 0x426   :  { %v14797_v11 = vor.u32 %v17735_v57, %v14794_v49  ;;  %v15325_v49 = vor.u32 %v17867_v35, %v15322_v63  ;;  %v15577_v63 = vld [vmem:[%s27355_s4 + $0x1930] sm:$0xf] }
 0x427   :  { %8207 = vmatpush.bf16.msrb.mxu2 %v15197_v10  ;;  %v17819_v10 = vld [vmem:[%s27358_s3 + $0x5ac] sm:$0xf] }
 0x428   :  { %8679 = vmatpush.bf16.msrb.mxu0 %v15478_v14  ;;  %v14573_v14 = vor.u32 %v17679_v58, %v14570_v34  ;;  %v15133_v58 = vor.u32 %v17819_v10, %v15130_v20  ;;  %v25382_v34 = vpop.f32.mrf.mxu0  ;;  %v17921_v10 = vld [vmem:[%s27355_s4 + $0x18d4] sm:$0xf0] }
 0x429   :  { %8165 = vmatpush.bf16.msra.mxu3 %v14861_v0  ;;  %8140 = vmatpush.bf16.msra.mxu1 %v14589_v4  ;;  %v7913_v0 = vpop.f32.mrf.mxu3  ;;  %v15386_v4 = vld [vmem:[%s27358_s3 + $0x7b8] sm:$0xf0] }
 0x42a   :  { %v15389_v25 = vor.u32 %v17883_v45, %v15386_v4  ;;  %v17923_v0 = vld [vmem:[%s27355_s4 + $0x18e4] sm:$0xf0]  ;;  %v17941_v4 = vld [vmem:[%s27355_s4 + $0x1974] sm:$0xf0] }
 0x42b   :  { %8208 = vmatpush.bf16.msrb.mxu2 %v15181_v37  ;;  %v15538_v24 = vor.u32 %v17923_v0, %v15537_v44 }
 0x42c   :  { %8680 = vmatpush.bf16.msrb.mxu0 %v15470_v39  ;;  %v17671_v39 = vld [vmem:[%s27358_s3 + $0x10c] sm:$0xf] }
 0x42d   :  { %8166 = vmatpush.bf16.msra.mxu3 %v14845_v21  ;;  %8141 = vmatpush.bf16.msra.mxu1 %v14573_v14  ;;  %v15114_v21 = vld [vmem:[%s27358_s3 + $0x598] sm:$0xf0] }
 0x42e   :  { %8209 = vmatmul.bf16.vlgmr.msrb.gmra.mxu2 %v24128_v18  ;;  %v15162_v18 = vld [vmem:[%s27358_s3 + $0x5f8] sm:$0xf0]  ;;  %v15117_v46 = vor.u32 %v17815_v54, %v15114_v21  ;;  %v15601_v21 = vld [vmem:[%s27355_s4 + $0x1960] sm:$0xf] }
 0x42f   :  { %v15165_v48 = vor.u32 %v17827_v13, %v15162_v18  ;;  %v17799_v13 = vld [vmem:[%s27358_s3 + $0x50c] sm:$0xf]  ;;  %v15050_v18 = vld [vmem:[%s27358_s3 + $0x518] sm:$0xf0] }
 0x430   :  { %8681 = vmatpush.bf16.msrb.mxu0 %v15462_v28  ;;  %v14541_v28 = vor.u32 %v17671_v39, %v14538_v32  ;;  %v7978_v15 = vpop.f32.mrf.mxu0 }
 0x431   :  { %8167 = vmatpush.bf16.msra.mxu3 %v14829_v16  ;;  %8142 = vmatpush.bf16.msra.mxu1 %v14557_v30  ;;  %v17807_v16 = vld [vmem:[%s27358_s3 + $0x54c] sm:$0xf]  ;;  %v15066_v30 = vld [vmem:[%s27358_s3 + $0x538] sm:$0xf0]  ;;  %v15585_v15 = vld [vmem:[%s27355_s4 + $0x1940] sm:$0xf] }
 0x432   :  { %v15085_v12 = vor.u32 %v17807_v16, %v15082_v29  ;;  %v15069_v32 = vor.u32 %v17803_v62, %v15066_v30 }
 0x434   :  { %8682 = vmatpush.bf16.msrb.mxu0 %v15454_v7  ;;  %v25366_v7 = vpop.f32.mrf.mxu2  ;;  %v7937_v14 = vpop.f32.mrf.mxu1 }
 0x435   :  { %8168 = vmatpush.bf16.msra.mxu3 %v14813_v40  ;;  %8143 = vmatpush.bf16.msra.mxu1 %v14541_v28  ;;  %v15053_v28 = vor.u32 %v17799_v13, %v15050_v18  ;;  %v17924_v13 = vld [vmem:[%s27355_s4 + $0x18f4] sm:$0xf]  ;;  %v15547_v18 = vld [vmem:[%s27355_s4 + $0x18f8] sm:$0xf0] }
 0x438   :  { %8683 = vmatpush.bf16.msrb.mxu0 %v15446_v43  ;;  %8144 = vmatmul.bf16.vlgmr.msra.gmra.mxu1 %v24150_v5  ;;  %v17879_v5 = vld [vmem:[%s27358_s3 + $0x78c] sm:$0xf]  ;;  %v15354_v43 = vld [vmem:[%s27358_s3 + $0x778] sm:$0xf0]  ;;  %v25439_v55 = vpop.f32.mrf.mxu0 }
 0x439   :  { %8169 = vmatpush.bf16.msra.mxu3 %v14797_v11  ;;  %8188 = vmatpush.bf16.msrb.mxu1 %v15165_v48  ;;  %v15357_v59 = vor.u32 %v17875_v42, %v15354_v43  ;;  %v15593_v42 = vld [vmem:[%s27355_s4 + $0x1950] sm:$0xf]  ;;  %v17937_v43 = vld [vmem:[%s27355_s4 + $0x1954] sm:$0xf0] }
 0x43c   :  { %8684 = vmatpush.bf16.msrb.mxu0 %v15438_v47  ;;  %8170 = vmatmul.bf16.vlgmr.msra.gmra.mxu3 %v24138_v9  ;;  %v15370_v9 = vld [vmem:[%s27358_s3 + $0x798] sm:$0xf0]  ;;  %v7952_v37 = vpop.f32.mrf.mxu2  ;;  %v6506_v47 = vperm.slane %v25071_v31, 1  ;;  %v7939_v40 = vpop.f32.mrf.mxu1 }
 0x43d   :  { %8214 = vmatpush.bf16.msrb.mxu3 %v15421_v1  ;;  %8189 = vmatpush.bf16.msrb.mxu1 %v15149_v17  ;;  %v15373_v38 = vor.u32 %v17879_v5, %v15370_v9  ;;  %v7963_v56 = vpop.f32.mrf.mxu3  ;;  %v17939_v5 = vld [vmem:[%s27355_s4 + $0x1964] sm:$0xf0]  ;;  %v15513_v9 = vld [vmem:[%s27355_s4 + $0x18b0] sm:$0xf]  ;;  %v15489_v40 = vld [vmem:[%s27355_s4 + $0x1880] sm:$0xf] }
 0x43e   :  { %v7925_v57 = vadd.f32 %v25315_v27, %v6506_v47  ;;  %v15545_v27 = vld [vmem:[%s27355_s4 + $0x18f0] sm:$0xf] }
 0x440   :  { %8685 = vmatpush.bf16.msrb.mxu0 %v15430_v50  ;;  %v17925_v50 = vld [vmem:[%s27355_s4 + $0x18f4] sm:$0xf0]  ;;  %v7938_v1 = vadd.f32 %v7937_v14, %v7925_v57  ;;  %v8030_v17 = vpop.f32.mrf.mxu0  ;;  %v15505_v14 = vld [vmem:[%s27355_s4 + $0x18a0] sm:$0xf] }
 0x441   :  { %8215 = vmatpush.bf16.msrb.mxu3 %v15405_v26  ;;  %8190 = vmatpush.bf16.msrb.mxu1 %v15133_v58  ;;  %v15546_v48 = vor.u32 %v17925_v50, %v15545_v27  ;;  %v15529_v26 = vld [vmem:[%s27355_s4 + $0x18d0] sm:$0xf]  ;;  %v15521_v58 = vld [vmem:[%s27355_s4 + $0x18c0] sm:$0xf]  ;;  %v17931_v50 = vld [vmem:[%s27355_s4 + $0x1924] sm:$0xf0] }
 0x442   :  { %v7951_v41 = vadd.f32 %v25366_v7, %v7938_v1  ;;  %v15530_v45 = vor.u32 %v17921_v10, %v15529_v26  ;;  %v15609_v7 = vld [vmem:[%s27355_s4 + $0x1970] sm:$0xf]  ;;  %v15569_v27 = vld [vmem:[%s27355_s4 + $0x1920] sm:$0xf]  ;;  %v17922_v1 = vld [vmem:[%s27355_s4 + $0x18e4] sm:$0xf] }
 0x443   :  { %8686 = vmatmul.bf16.vlgmr.msrb.gmra.mxu0 %v8231_v2  ;;  %v17863_v2 = vld [vmem:[%s27358_s3 + $0x70c] sm:$0xf] }
 0x444   :  { %v25421_v39 = vpop.f32.mrf.mxu2  ;;  %v15309_v11 = vor.u32 %v17863_v2, %v15306_v52  ;;  %v7964_v20 = vadd.f32 %v7963_v56, %v7951_v41  ;;  %v17933_v56 = vld [vmem:[%s27355_s4 + $0x1934] sm:$0xf0]  ;;  %v15553_v41 = vld [vmem:[%s27355_s4 + $0x1900] sm:$0xf] }
 0x445   :  { %8216 = vmatpush.bf16.msrb.mxu3 %v15389_v25  ;;  %8191 = vmatpush.bf16.msrb.mxu1 %v15117_v46  ;;  %v7965_v8 = vpop.f32.mrf.mxu3  ;;  %v17917_v46 = vld [vmem:[%s27355_s4 + $0x18b4] sm:$0xf0]  ;;  %v15578_v57 = vor.u32 %v17933_v56, %v15577_v63 }
 0x446   :  { %v7977_v25 = vadd.f32 %v25382_v34, %v7964_v20  ;;  %v15514_v19 = vor.u32 %v17917_v46, %v15513_v9  ;;  %v15561_v8 = vld [vmem:[%s27355_s4 + $0x1910] sm:$0xf]  ;;  %v17927_v20 = vld [vmem:[%s27355_s4 + $0x1904] sm:$0xf0]  ;;  %v17938_v46 = vld [vmem:[%s27355_s4 + $0x1964] sm:$0xf] }
 0x448   :  { %v25490_v53 = vpop.f32.mrf.mxu0 }
 0x449   :  { %8217 = vmatpush.bf16.msrb.mxu3 %v15373_v38  ;;  %8192 = vmatpush.bf16.msrb.mxu1 %v15101_v23  ;;  %v15602_v38 = vor.u32 %v17939_v5, %v15601_v21  ;;  %v17915_v23 = vld [vmem:[%s27355_s4 + $0x18a4] sm:$0xf0]  ;;  %v17918_v21 = vld [vmem:[%s27355_s4 + $0x18c4] sm:$0xf]  ;;  %v15523_v5 = vld [vmem:[%s27355_s4 + $0x18c8] sm:$0xf0] }
 0x44a   :  { %v15506_v29 = vor.u32 %v17915_v23, %v15505_v14  ;;  %v15526_v9 = vor.u32 %v17918_v21, %v15523_v5  ;;  %v17936_v23 = vld [vmem:[%s27355_s4 + $0x1954] sm:$0xf] }
 0x44c   :  { %v8004_v60 = vpop.f32.mrf.mxu2 }
 0x44d   :  { %8218 = vmatpush.bf16.msrb.mxu3 %v15357_v59  ;;  %8193 = vmatpush.bf16.msrb.mxu1 %v15085_v12  ;;  %v15594_v59 = vor.u32 %v17937_v43, %v15593_v42  ;;  %v17913_v12 = vld [vmem:[%s27355_s4 + $0x1894] sm:$0xf0]  ;;  %v15539_v60 = vld [vmem:[%s27355_s4 + $0x18e8] sm:$0xf0] }
 0x44e   :  { %v15498_v35 = vor.u32 %v17913_v12, %v15497_v22  ;;  %v15542_v17 = vor.u32 %v17922_v1, %v15539_v60  ;;  %v17934_v12 = vld [vmem:[%s27355_s4 + $0x1944] sm:$0xf] }
 0x450   :  { %v8082_v47 = vpop.f32.mrf.mxu0 }
 0x451   :  { %8219 = vmatpush.bf16.msrb.mxu3 %v15341_v51  ;;  %8194 = vmatpush.bf16.msrb.mxu1 %v15069_v32  ;;  %v15586_v51 = vor.u32 %v17935_v6, %v15585_v15  ;;  %v17911_v32 = vld [vmem:[%s27355_s4 + $0x1884] sm:$0xf0]  ;;  %v6507_v47 = vperm.slane %v25071_v31, 2 }
 0x452   :  { %v15490_v52 = vor.u32 %v17911_v32, %v15489_v40  ;;  %v17932_v32 = vld [vmem:[%s27355_s4 + $0x1934] sm:$0xf] }
 0x454   :  { %v7989_v34 = vpop.f32.mrf.mxu1 }
 0x455   :  { %8220 = vmatpush.bf16.msrb.mxu3 %v15325_v49  ;;  %8195 = vmatpush.bf16.msrb.mxu1 %v15053_v28  ;;  %v7990_v37 = vadd.f32 %v7989_v34, %v7977_v25  ;;  %v25529_v49 = vpop.f32.mrf.mxu2  ;;  %v15550_v28 = vor.u32 %v17924_v13, %v15547_v18  ;;  %v17916_v34 = vld [vmem:[%s27355_s4 + $0x18b4] sm:$0xf]  ;;  %v8029_v13 = vadd.f32 %v25439_v55, %v6507_v47  ;;  %v17910_v18 = vld [vmem:[%s27355_s4 + $0x1884] sm:$0xf]  ;;  %v15625_v47 = vld [vmem:[%s27355_s4 + $0x1990] sm:$0xf] }
 0x457   :  { %v8003_v16 = vadd.f32 %v25421_v39, %v7990_v37 }
 0x458   :  { %8196 = vmatmul.bf16.vlgmr.msrb.gmra.mxu1 %v24160_v3  ;;  %v17919_v3 = vld [vmem:[%s27355_s4 + $0x18c4] sm:$0xf0] }
 0x459   :  { %8221 = vmatpush.bf16.msrb.mxu3 %v15309_v11  ;;  %8639 = vmatpush.bf16.msra.mxu1 %v15546_v48  ;;  %v15522_v54 = vor.u32 %v17919_v3, %v15521_v58  ;;  %v15570_v11 = vor.u32 %v17931_v50, %v15569_v27  ;;  %v15531_v58 = vld [vmem:[%s27355_s4 + $0x18d8] sm:$0xf0]  ;;  %v15554_v3 = vor.u32 %v17927_v20, %v15553_v41  ;;  %v17930_v27 = vld [vmem:[%s27355_s4 + $0x1924] sm:$0xf]  ;;  %v15571_v50 = vld [vmem:[%s27355_s4 + $0x1928] sm:$0xf0] }
 0x45a   :  { %v15574_v55 = vor.u32 %v17930_v27, %v15571_v50  ;;  %v15667_v27 = vld [vmem:[%s27355_s4 + $0x19e8] sm:$0xf0] }
 0x45c   :  { %8222 = vmatmul.bf16.vlgmr.msrb.gmra.mxu3 %v24158_v61  ;;  %v15610_v61 = vor.u32 %v17941_v4, %v15609_v7  ;;  %v7991_v39 = vpop.f32.mrf.mxu1  ;;  %v15611_v7 = vld [vmem:[%s27355_s4 + $0x1978] sm:$0xf0]  ;;  %v17920_v4 = vld [vmem:[%s27355_s4 + $0x18d4] sm:$0xf] }
 0x45d   :  { %8640 = vmatpush.bf16.msra.mxu1 %v15538_v24  ;;  %v8015_v62 = vpop.f32.mrf.mxu3  ;;  %v17929_v24 = vld [vmem:[%s27355_s4 + $0x1914] sm:$0xf0]  ;;  %v8056_v10 = vpop.f32.mrf.mxu2  ;;  %v15534_v25 = vor.u32 %v17920_v4, %v15531_v58  ;;  %v15665_v4 = vld [vmem:[%s27355_s4 + $0x19e0] sm:$0xf]  ;;  %v17955_v58 = vld [vmem:[%s27355_s4 + $0x19e4] sm:$0xf0] }
 0x45e   :  { %8652 = vmatpush.bf16.msra.mxu2 %v15610_v61  ;;  %v8016_v30 = vadd.f32 %v8015_v62, %v8003_v16  ;;  %v15562_v26 = vor.u32 %v17929_v24, %v15561_v8  ;;  %v17914_v16 = vld [vmem:[%s27355_s4 + $0x18a4] sm:$0xf]  ;;  %v17912_v62 = vld [vmem:[%s27355_s4 + $0x1894] sm:$0xf]  ;;  %v15563_v8 = vld [vmem:[%s27355_s4 + $0x1918] sm:$0xf0] }
 0x45f   :  { %v15673_v10 = vld [vmem:[%s27355_s4 + $0x19f0] sm:$0xf] }
 0x460   :  { %v8228_v2 = vmax.f32 %v8016_v30, 0.0  ;;  %v25543_v48 = vpop.f32.mrf.mxu0  ;;  %v15499_v30 = vld [vmem:[%s27355_s4 + $0x1898] sm:$0xf0] }
 0x461   :  { %8641 = vmatpush.bf16.msra.mxu1 %v15530_v45  ;;  %v17940_v45 = vld [vmem:[%s27355_s4 + $0x1974] sm:$0xf]  ;;  %v15502_v40 = vor.u32 %v17912_v62, %v15499_v30  ;;  %v17945_v62 = vld [vmem:[%s27355_s4 + $0x1994] sm:$0xf0] }
 0x462   :  { %8653 = vmatpush.bf16.msra.mxu2 %v15602_v38  ;;  %v25551_v0 = vpack.c.bf16 %v8228_v2, %v8228_v2  ;;  %v15614_v61 = vor.u32 %v17940_v45, %v15611_v7  ;;  %v15603_v38 = vld [vmem:[%s27355_s4 + $0x1968] sm:$0xf0]  ;;  %v15626_v30 = vor.u32 %v17945_v62, %v15625_v47 }
 0x463   :  { %v15606_v37 = vor.u32 %v17938_v46, %v15603_v38  ;;  %v15491_v2 = vld [vmem:[%s27355_s4 + $0x1888] sm:$0xf0]  ;;  %v15649_v46 = vld [vmem:[%s27355_s4 + $0x19c0] sm:$0xf]  ;;  %v17951_v38 = vld [vmem:[%s27355_s4 + $0x19c4] sm:$0xf0] }
 0x465   :  { %8642 = vmatpush.bf16.msra.mxu1 %v15522_v54  ;;  %v8017_v44 = vpop.f32.mrf.mxu3 }
 0x466   :  { %8654 = vmatpush.bf16.msra.mxu2 %v15594_v59  ;;  %v15595_v59 = vld [vmem:[%s27355_s4 + $0x1958] sm:$0xf0]  ;;  %v17928_v44 = vld [vmem:[%s27355_s4 + $0x1914] sm:$0xf] }
 0x467   :  { %v15598_v15 = vor.u32 %v17936_v23, %v15595_v59  ;;  %v15566_v41 = vor.u32 %v17928_v44, %v15563_v8  ;;  %v15641_v23 = vld [vmem:[%s27355_s4 + $0x19b0] sm:$0xf]  ;;  %v17950_v8 = vld [vmem:[%s27355_s4 + $0x19c4] sm:$0xf] }
 0x468   :  { %v8134_v54 = vpop.f32.mrf.mxu0 }
 0x469   :  { %8643 = vmatpush.bf16.msra.mxu1 %v15514_v19  ;;  %v15515_v19 = vld [vmem:[%s27355_s4 + $0x18b8] sm:$0xf0] }
 0x46a   :  { %8655 = vmatpush.bf16.msra.mxu2 %v15586_v51  ;;  %v15518_v14 = vor.u32 %v17916_v34, %v15515_v19  ;;  %v15587_v51 = vld [vmem:[%s27355_s4 + $0x1948] sm:$0xf0]  ;;  %v15650_v34 = vor.u32 %v17951_v38, %v15649_v46 }
 0x46b   :  { %v15590_v39 = vor.u32 %v17934_v12, %v15587_v51 }
 0x46d   :  { %8644 = vmatpush.bf16.msra.mxu1 %v15506_v29  ;;  %v15507_v29 = vld [vmem:[%s27355_s4 + $0x18a8] sm:$0xf0] }
 0x46e   :  { %8656 = vmatpush.bf16.msra.mxu2 %v15578_v57  ;;  %v15510_v22 = vor.u32 %v17914_v16, %v15507_v29  ;;  %v15579_v57 = vld [vmem:[%s27355_s4 + $0x1938] sm:$0xf0] }
 0x471   :  { %8645 = vmatpush.bf16.msra.mxu1 %v15498_v35  ;;  %v25596_v42 = vpop.f32.mrf.mxu2 }
 0x472   :  { %8657 = vmatpush.bf16.msra.mxu2 %v15570_v11  ;;  %v15494_v11 = vor.u32 %v17910_v18, %v15491_v2 }
 0x474   :  { %v8041_v43 = vpop.f32.mrf.mxu1 }
 0x475   :  { %8646 = vmatpush.bf16.msra.mxu1 %v15490_v52  ;;  %v15582_v52 = vor.u32 %v17932_v32, %v15579_v57  ;;  %v8042_v1 = vadd.f32 %v8041_v43, %v8029_v13  ;;  %v6508_v57 = vperm.slane %v25071_v31, 3  ;;  %v17952_v31 = vld [vmem:[%s27355_s4 + $0x19d4] sm:$0xf] }
 0x476   :  { %8658 = vmatpush.bf16.msra.mxu2 %v15562_v26  ;;  %v15555_v26 = vld [vmem:[%s27355_s4 + $0x1908] sm:$0xf0] }
 0x477   :  { %v8055_v24 = vadd.f32 %v25529_v49, %v8042_v1  ;;  %v17957_v49 = vld [vmem:[%s27355_s4 + $0x19f4] sm:$0xf0]  ;;  %v8133_v2 = vadd.f32 %v25543_v48, %v6508_v57  ;;  %v15659_v48 = vld [vmem:[%s27355_s4 + $0x19d8] sm:$0xf0]  ;;  %v15866_v57 = vld [vmem:[%s27355_s4 + $0x1af0] sm:$0xf] }
 0x478   :  { %8647 = vmatmul.bf16.vlgmr.msra.gmra.mxu1 %v25551_v0  ;;  %v15662_v1 = vor.u32 %v17952_v31, %v15659_v48  ;;  %v15786_v31 = vld [vmem:[%s27355_s4 + $0x1a50] sm:$0xf] }
 0x479   :  { %8691 = vmatpush.bf16.msrb.mxu1 %v15550_v28  ;;  %v8108_v35 = vpop.f32.mrf.mxu2 }
 0x47a   :  { %8659 = vmatpush.bf16.msra.mxu2 %v15554_v3  ;;  %v15666_v3 = vor.u32 %v17955_v58, %v15665_v4  ;;  %v17943_v35 = vld [vmem:[%s27355_s4 + $0x1984] sm:$0xf0]  ;;  %v17946_v4 = vld [vmem:[%s27355_s4 + $0x19a4] sm:$0xf]  ;;  %v15635_v58 = vld [vmem:[%s27355_s4 + $0x19a8] sm:$0xf0] }
 0x47c   :  { %v8043_v56 = vpop.f32.mrf.mxu1 }
 0x47d   :  { %8692 = vmatpush.bf16.msrb.mxu1 %v15542_v17  ;;  %v17926_v17 = vld [vmem:[%s27355_s4 + $0x1904] sm:$0xf]  ;;  %v15675_v56 = vld [vmem:[%s27355_s4 + $0x19f8] sm:$0xf0] }
 0x47e   :  { %8704 = vmatpush.bf16.msrb.mxu2 %v15614_v61  ;;  %v15558_v45 = vor.u32 %v17926_v17, %v15555_v26  ;;  %v15657_v61 = vld [vmem:[%s27355_s4 + $0x19d0] sm:$0xf] }
 0x47f   :  { %v8067_v63 = vpop.f32.mrf.mxu3 }
 0x480   :  { %v25610_v6 = vpop.f32.mrf.mxu0  ;;  %v8068_v20 = vadd.f32 %v8067_v63, %v8055_v24  ;;  %v17956_v63 = vld [vmem:[%s27355_s4 + $0x19f4] sm:$0xf]  ;;  %v15651_v24 = vld [vmem:[%s27355_s4 + $0x19c8] sm:$0xf0] }
 0x481   :  { %8693 = vmatpush.bf16.msrb.mxu1 %v15534_v25  ;;  %v17953_v25 = vld [vmem:[%s27355_s4 + $0x19d4] sm:$0xf0]  ;;  %v15678_v32 = vor.u32 %v17956_v63, %v15675_v56  ;;  %v15802_v63 = vld [vmem:[%s27355_s4 + $0x1a70] sm:$0xf] }
 0x482   :  { %8705 = vmatpush.bf16.msrb.mxu2 %v15606_v37  ;;  %v8081_v7 = vadd.f32 %v25490_v53, %v8068_v20  ;;  %v15658_v53 = vor.u32 %v17953_v25, %v15657_v61  ;;  %v17948_v20 = vld [vmem:[%s27355_s4 + $0x19b4] sm:$0xf]  ;;  %v15627_v25 = vld [vmem:[%s27355_s4 + $0x1998] sm:$0xf0]  ;;  %v17989_v56 = vld [vmem:[%s27355_s4 + $0x1a74] sm:$0xf0] }
 0x483   :  { %v17944_v61 = vld [vmem:[%s27355_s4 + $0x1994] sm:$0xf] }
 0x485   :  { %8694 = vmatpush.bf16.msrb.mxu1 %v15526_v9 }
 0x486   :  { %8706 = vmatpush.bf16.msrb.mxu2 %v15598_v15  ;;  %v15633_v15 = vld [vmem:[%s27355_s4 + $0x19a0] sm:$0xf] }
 0x487   :  { %v8069_v60 = vpop.f32.mrf.mxu3 }
 0x488   :  { %v8186_v28 = vpop.f32.mrf.mxu0 }
 0x489   :  { %8695 = vmatpush.bf16.msrb.mxu1 %v15518_v14 }
 0x48a   :  { %8707 = vmatpush.bf16.msrb.mxu2 %v15590_v39  ;;  %v15617_v39 = vld [vmem:[%s27355_s4 + $0x1980] sm:$0xf] }
 0x48d   :  { %8696 = vmatpush.bf16.msrb.mxu1 %v15510_v22  ;;  %v17947_v22 = vld [vmem:[%s27355_s4 + $0x19a4] sm:$0xf0] }
 0x48e   :  { %8708 = vmatpush.bf16.msrb.mxu2 %v15582_v52  ;;  %v15634_v12 = vor.u32 %v17947_v22, %v15633_v15  ;;  %v17954_v52 = vld [vmem:[%s27355_s4 + $0x19e4] sm:$0xf] }
 0x48f   :  { %v15670_v50 = vor.u32 %v17954_v52, %v15667_v27  ;;  %v15794_v52 = vld [vmem:[%s27355_s4 + $0x1a60] sm:$0xf]  ;;  %v17987_v27 = vld [vmem:[%s27355_s4 + $0x1a64] sm:$0xf0] }
 0x491   :  { %8697 = vmatpush.bf16.msrb.mxu1 %v15502_v40  ;;  %v8158_v54 = vpop.f32.mrf.mxu2  ;;  %v15618_v40 = vor.u32 %v17943_v35, %v15617_v39  ;;  %v17965_v35 = vld [vmem:[%s27361_s5 + $0x38] sm:$0xff] }
 0x492   :  { %8709 = vmatpush.bf16.msrb.mxu2 %v15574_v55  ;;  %8863 = vmatpush.bf16.msra.mxu0 %v17965_v35  ;;  %v17975_v35 = vld [vmem:[%s27355_s4 + $0x1a04] sm:$0xf0] }
 0x495   :  { %8698 = vmatpush.bf16.msrb.mxu1 %v15494_v11  ;;  %v8093_v21 = vpop.f32.mrf.mxu1 }
 0x496   :  { %8710 = vmatpush.bf16.msrb.mxu2 %v15566_v41  ;;  %v8094_v5 = vadd.f32 %v8093_v21, %v8081_v7  ;;  %v15654_v41 = vor.u32 %v17950_v8, %v15651_v24  ;;  %v17942_v21 = vld [vmem:[%s27355_s4 + $0x1984] sm:$0xf] }
 0x497   :  { %v17962_v8 = vld [vmem:[%s27361_s5 + $0x20] sm:$0xff] }
 0x498   :  { %8699 = vmatmul.bf16.vlgmr.msrb.gmra.mxu1 %v25551_v0  ;;  %v15674_v0 = vor.u32 %v17957_v49, %v15673_v10  ;;  %v8107_v9 = vadd.f32 %v25596_v42, %v8094_v5  ;;  %v17949_v42 = vld [vmem:[%s27355_s4 + $0x19b4] sm:$0xf0] }
 0x499   :  { %v8160_v37 = vpop.f32.mrf.mxu2  ;;  %v15642_v59 = vor.u32 %v17949_v42, %v15641_v23 }
 0x49a   :  { %8711 = vmatpush.bf16.msrb.mxu2 %v15558_v45  ;;  %8665 = vmatpush.bf16.msra.mxu3 %v15674_v0  ;;  %v15643_v45 = vld [vmem:[%s27355_s4 + $0x19b8] sm:$0xf0] }
 0x49b   :  { %v15646_v7 = vor.u32 %v17948_v20, %v15643_v45  ;;  %v15842_v45 = vld [vmem:[%s27355_s4 + $0x1ac0] sm:$0xf] }
 0x49d   :  { %v8095_v14 = vpop.f32.mrf.mxu1 }
 0x49e   :  { %8666 = vmatpush.bf16.msra.mxu3 %v15666_v3  ;;  %v15638_v3 = vor.u32 %v17946_v4, %v15635_v58  ;;  %v15770_v4 = vld [vmem:[%s27355_s4 + $0x1a30] sm:$0xf]  ;;  %v17981_v58 = vld [vmem:[%s27355_s4 + $0x1a34] sm:$0xf0] }
 0x49f   :  { %v8119_v19 = vpop.f32.mrf.mxu3 }
 0x4a0   :  { %v8120_v43 = vadd.f32 %v8119_v19, %v8107_v9  ;;  %v8635_v13 = vpop.f32.mrf.mxu0 }
 0x4a2   :  { %8667 = vmatpush.bf16.msra.mxu3 %v15658_v53  ;;  %v8229_v16 = vmax.f32 %v8120_v43, 0.0  ;;  %v15619_v53 = vld [vmem:[%s27355_s4 + $0x1988] sm:$0xf0] }
 0x4a3   :  { %v15622_v9 = vor.u32 %v17942_v21, %v15619_v53  ;;  %v15771_v21 = vor.u32 %v17981_v58, %v15770_v4  ;;  %v15762_v53 = vld [vmem:[%s27355_s4 + $0x1a20] sm:$0xf]  ;;  %v18000_v58 = vld [vmem:[%s27355_s4 + $0x1ad4] sm:$0xf] }
 0x4a4   :  { %v8233_v29 = vpack.c.bf16 %v8229_v16, %v8229_v16 }
 0x4a6   :  { %8668 = vmatpush.bf16.msra.mxu3 %v15650_v34  ;;  %8660 = vmatmul.bf16.vlgmr.msra.gmra.mxu2 %v8233_v29 }
 0x4a7   :  { %v8121_v51 = vpop.f32.mrf.mxu3 }
 0x4a8   :  { %v8637_v11 = vpop.f32.mrf.mxu0 }
 0x4a9   :  { %v17985_v11 = vld [vmem:[%s27355_s4 + $0x1a54] sm:$0xf0] }
 0x4aa   :  { %8669 = vmatpush.bf16.msra.mxu3 %v15642_v59  ;;  %v15422_v59 = vld [vmem:[%s27357_s6 + $0x5] ss:$8 sm:$0x3]  ;;  %v15787_v24 = vor.u32 %v17985_v11, %v15786_v31 }
 0x4ab   :  { %v8302_v16 = vperm.slane %v15422_v59, 0  ;;  %v8303_v51 = vperm.slane %v15422_v59, 1 }
 0x4ae   :  { %8670 = vmatpush.bf16.msra.mxu3 %v15634_v12 }
 0x4b1   :  { %v8210_v18 = vpop.f32.mrf.mxu2 }
 0x4b2   :  { %8671 = vmatpush.bf16.msra.mxu3 %v15626_v30 }
 0x4b5   :  { %v8145_v28 = vpop.f32.mrf.mxu1 }
 0x4b6   :  { %8672 = vmatpush.bf16.msra.mxu3 %v15618_v40  ;;  %8712 = vmatmul.bf16.vlgmr.msrb.gmra.mxu2 %v8233_v29  ;;  %v8146_v55 = vadd.f32 %v8145_v28, %v8133_v2  ;;  %v8636_v29 = vadd.f32 %v8635_v13, %v8302_v16  ;;  %v17964_v40 = vld [vmem:[%s27361_s5 + $0x30] sm:$0xff]  ;;  %v18005_v13 = vld [vmem:[%s27355_s4 + $0x1af4] sm:$0xf0]  ;;  %v15795_v28 = vor.u32 %v17987_v27, %v15794_v52  ;;  %v17991_v52 = vld [vmem:[%s27355_s4 + $0x1a84] sm:$0xf0] }
 0x4b7   :  { %8864 = vmatpush.bf16.msra.mxu0 %v17964_v40  ;;  %v15867_v2 = vor.u32 %v18005_v13, %v15866_v57  ;;  %v15930_v16 = vld [vmem:[%s27355_s4 + $0x1b70] sm:$0xf]  ;;  %v18004_v57 = vld [vmem:[%s27355_s4 + $0x1af4] sm:$0xf]  ;;  %v15868_v13 = vld [vmem:[%s27355_s4 + $0x1af8] sm:$0xf0] }
 0x4b8   :  { %v8159_v44 = vadd.f32 %v8158_v54, %v8146_v55  ;;  %v15630_v54 = vor.u32 %v17944_v61, %v15627_v25  ;;  %v18003_v55 = vld [vmem:[%s27355_s4 + $0x1ae4] sm:$0xf0]  ;;  %v15834_v25 = vld [vmem:[%s27355_s4 + $0x1ab0] sm:$0xf]  ;;  %v15871_v31 = vor.u32 %v18004_v57, %v15868_v13  ;;  %v18009_v13 = vld [vmem:[%s27355_s4 + $0x1b14] sm:$0xf0] }
 0x4b9   :  { %v8212_v60 = vpop.f32.mrf.mxu2  ;;  %v15882_v57 = vld [vmem:[%s27355_s4 + $0x1b10] sm:$0xf] }
 0x4ba   :  { %8717 = vmatpush.bf16.msrb.mxu3 %v15678_v32  ;;  %v15803_v32 = vor.u32 %v17989_v56, %v15802_v63  ;;  %v18001_v60 = vld [vmem:[%s27355_s4 + $0x1ad4] sm:$0xf0]  ;;  %v15922_v63 = vld [vmem:[%s27355_s4 + $0x1b60] sm:$0xf]  ;;  %v17968_v56 = vld [vmem:[%s27361_s5 + $0x50] sm:$0xff] }
 0x4bc   :  { %9194 = vmatpush.bf16.msra.mxu2 %v15803_v32  ;;  %v18019_v32 = vld [vmem:[%s27355_s4 + $0x1b64] sm:$0xf0] }
 0x4bd   :  { %v8147_v10 = vpop.f32.mrf.mxu1 }
 0x4be   :  { %8718 = vmatpush.bf16.msrb.mxu3 %v15670_v50  ;;  %v15858_v50 = vld [vmem:[%s27355_s4 + $0x1ae0] sm:$0xf] }
 0x4bf   :  { %v8171_v17 = vpop.f32.mrf.mxu3  ;;  %v15859_v48 = vor.u32 %v18003_v55, %v15858_v50  ;;  %v18020_v50 = vld [vmem:[%s27355_s4 + $0x1b74] sm:$0xf]  ;;  %v15923_v55 = vor.u32 %v18019_v32, %v15922_v63 }
 0x4c0   :  { %v8172_v26 = vadd.f32 %v8171_v17, %v8159_v44  ;;  %v8687_v49 = vpop.f32.mrf.mxu0  ;;  %v17973_v44 = vld [vmem:[%s27361_s5 + $0x78] sm:$0xff]  ;;  %9195 = vmatpush.bf16.msra.mxu2 %v15795_v28  ;;  %v17983_v17 = vld [vmem:[%s27355_s4 + $0x1a44] sm:$0xf0]  ;;  %v18012_v63 = vld [vmem:[%s27355_s4 + $0x1b34] sm:$0xf] }
 0x4c1   :  { %v8688_v47 = vadd.f32 %v8687_v49, %v8303_v51  ;;  %8876 = vmatpush.bf16.msra.mxu1 %v17973_v44  ;;  %v17999_v49 = vld [vmem:[%s27355_s4 + $0x1ac4] sm:$0xf0]  ;;  %v17958_v51 = vld [vmem:[%s27361_s5] sm:$0xff]  ;;  %v15932_v28 = vld [vmem:[%s27355_s4 + $0x1b78] sm:$0xf0] }
 0x4c2   :  { %8719 = vmatpush.bf16.msrb.mxu3 %v15662_v1  ;;  %v8185_v0 = vadd.f32 %v25610_v6, %v8172_v26  ;;  %v15850_v1 = vld [vmem:[%s27355_s4 + $0x1ad0] sm:$0xf]  ;;  %v15843_v61 = vor.u32 %v17999_v49, %v15842_v45  ;;  %v15935_v11 = vor.u32 %v18020_v50, %v15932_v28  ;;  %v18002_v44 = vld [vmem:[%s27355_s4 + $0x1ae4] sm:$0xf]  ;;  %v17967_v49 = vld [vmem:[%s27361_s5 + $0x48] sm:$0xff] }
 0x4c3   :  { %v17972_v26 = vld [vmem:[%s27361_s5 + $0x70] sm:$0xff]  ;;  %v15851_v10 = vor.u32 %v18001_v60, %v15850_v1  ;;  %v18017_v60 = vld [vmem:[%s27355_s4 + $0x1b54] sm:$0xf0]  ;;  %v17994_v50 = vld [vmem:[%s27355_s4 + $0x1aa4] sm:$0xf] }
 0x4c4   :  { %9196 = vmatpush.bf16.msra.mxu2 %v15787_v24  ;;  %v15914_v1 = vld [vmem:[%s27355_s4 + $0x1b50] sm:$0xf]  ;;  %v15828_v28 = vld [vmem:[%s27355_s4 + $0x1aa8] sm:$0xf0] }
 0x4c5   :  { %8877 = vmatpush.bf16.msra.mxu1 %v17972_v26  ;;  %v15915_v24 = vor.u32 %v18017_v60, %v15914_v1  ;;  %v18018_v26 = vld [vmem:[%s27355_s4 + $0x1b64] sm:$0xf]  ;;  %v15874_v60 = vld [vmem:[%s27355_s4 + $0x1b00] sm:$0xf] }
 0x4c6   :  { %8720 = vmatpush.bf16.msrb.mxu3 %v15654_v41  ;;  %v15778_v41 = vld [vmem:[%s27355_s4 + $0x1a40] sm:$0xf] }
 0x4c7   :  { %v8173_v6 = vpop.f32.mrf.mxu3 }
 0x4c8   :  { %v8689_v5 = vpop.f32.mrf.mxu0  ;;  %v17997_v6 = vld [vmem:[%s27355_s4 + $0x1ab4] sm:$0xf0] }
 0x4c9   :  { %v17979_v5 = vld [vmem:[%s27355_s4 + $0x1a24] sm:$0xf0] }
 0x4ca   :  { %8721 = vmatpush.bf16.msrb.mxu3 %v15646_v7  ;;  %v15779_v7 = vor.u32 %v17983_v17, %v15778_v41  ;;  %v15860_v41 = vld [vmem:[%s27355_s4 + $0x1ae8] sm:$0xf0] }
 0x4cb   :  { %v15863_v17 = vor.u32 %v18002_v44, %v15860_v41  ;;  %v18007_v44 = vld [vmem:[%s27355_s4 + $0x1b04] sm:$0xf0]  ;;  %v15780_v41 = vld [vmem:[%s27355_s4 + $0x1a48] sm:$0xf0] }
 0x4cc   :  { %9197 = vmatpush.bf16.msra.mxu2 %v15779_v7  ;;  %v18015_v7 = vld [vmem:[%s27355_s4 + $0x1b44] sm:$0xf0] }
 0x4ce   :  { %8722 = vmatpush.bf16.msrb.mxu3 %v15638_v3  ;;  %v17971_v3 = vld [vmem:[%s27361_s5 + $0x68] sm:$0xff] }
 0x4cf   :  { %8878 = vmatpush.bf16.msra.mxu1 %v17971_v3  ;;  %v15852_v3 = vld [vmem:[%s27355_s4 + $0x1ad8] sm:$0xf0] }
 0x4d0   :  { %9198 = vmatpush.bf16.msra.mxu2 %v15771_v21  ;;  %v17966_v21 = vld [vmem:[%s27361_s5 + $0x40] sm:$0xff] }
 0x4d2   :  { %8723 = vmatpush.bf16.msrb.mxu3 %v15630_v54  ;;  %v17960_v54 = vld [vmem:[%s27361_s5 + $0x10] sm:$0xff] }
 0x4d5   :  { %v8197_v46 = vpop.f32.mrf.mxu1 }
 0x4d6   :  { %8724 = vmatpush.bf16.msrb.mxu3 %v15622_v9  ;;  %v8198_v38 = vadd.f32 %v8197_v46, %v8185_v0  ;;  %v17961_v0 = vld [vmem:[%s27361_s5 + $0x18] sm:$0xff]  ;;  %v17970_v9 = vld [vmem:[%s27361_s5 + $0x60] sm:$0xff]  ;;  %v15835_v46 = vor.u32 %v17997_v6, %v15834_v25  ;;  %v18016_v25 = vld [vmem:[%s27355_s4 + $0x1b54] sm:$0xf] }
 0x4d7   :  { %8879 = vmatpush.bf16.msra.mxu1 %v17970_v9  ;;  %v15916_v6 = vld [vmem:[%s27355_s4 + $0x1b58] sm:$0xf0] }
 0x4d8   :  { %v8211_v34 = vadd.f32 %v8210_v18, %v8198_v38  ;;  %v17963_v18 = vld [vmem:[%s27361_s5 + $0x28] sm:$0xff] }
 0x4d9   :  { %8865 = vmatpush.bf16.msra.mxu0 %v17963_v18 }
 0x4dd   :  { %v8199_v43 = vpop.f32.mrf.mxu1  ;;  %8866 = vmatpush.bf16.msra.mxu0 %v17962_v8 }
 0x4de   :  { %v15763_v43 = vor.u32 %v17979_v5, %v15762_v53  ;;  %v15898_v53 = vld [vmem:[%s27355_s4 + $0x1b30] sm:$0xf]  ;;  %v18013_v5 = vld [vmem:[%s27355_s4 + $0x1b34] sm:$0xf0] }
 0x4df   :  { %v8223_v19 = vpop.f32.mrf.mxu3  ;;  %v15899_v9 = vor.u32 %v18013_v5, %v15898_v53  ;;  %v17978_v5 = vld [vmem:[%s27355_s4 + $0x1a24] sm:$0xf] }
 0x4e0   :  { %v8224_v37 = vadd.f32 %v8223_v19, %v8211_v34  ;;  %v15826_v34 = vld [vmem:[%s27355_s4 + $0x1aa0] sm:$0xf]  ;;  %v17995_v19 = vld [vmem:[%s27355_s4 + $0x1aa4] sm:$0xf0]  ;;  %9199 = vmatpush.bf16.msra.mxu2 %v15763_v43  ;;  %v18014_v43 = vld [vmem:[%s27355_s4 + $0x1b44] sm:$0xf] }
 0x4e1   :  { %8867 = vmatpush.bf16.msra.mxu0 %v17961_v0  ;;  %v15827_v59 = vor.u32 %v17995_v19, %v15826_v34  ;;  %v15906_v0 = vld [vmem:[%s27355_s4 + $0x1b40] sm:$0xf]  ;;  %v17998_v34 = vld [vmem:[%s27355_s4 + $0x1ac4] sm:$0xf] }
 0x4e2   :  { %v8230_v14 = vmax.f32 %v8224_v37, 0.0  ;;  %v17959_v37 = vld [vmem:[%s27361_s5 + $0x8] sm:$0xff]  ;;  %v15907_v4 = vor.u32 %v18015_v7, %v15906_v0  ;;  %v15884_v0 = vld [vmem:[%s27355_s4 + $0x1b18] sm:$0xf0] }
 0x4e4   :  { %v8234_v23 = vpack.c.bf16 %v8230_v14, %v8230_v14  ;;  %v15754_v14 = vld [vmem:[%s27355_s4 + $0x1a10] sm:$0xf] }
 0x4e5   :  { %8868 = vmatpush.bf16.msra.mxu0 %v17960_v54  ;;  %v15919_v54 = vor.u32 %v18016_v25, %v15916_v6  ;;  %v15812_v25 = vld [vmem:[%s27355_s4 + $0x1a88] sm:$0xf0] }
 0x4e6   :  { %8673 = vmatmul.bf16.vlgmr.msra.gmra.mxu3 %v8234_v23 }
 0x4e7   :  { %v8225_v42 = vpop.f32.mrf.mxu3  ;;  %9207 = vmatpush.bf16.msra.mxu3 %v15867_v2  ;;  %v15810_v2 = vld [vmem:[%s27355_s4 + $0x1a80] sm:$0xf] }
 0x4e8   :  { %v17969_v42 = vld [vmem:[%s27361_s5 + $0x58] sm:$0xff] }
 0x4e9   :  { %8869 = vmatpush.bf16.msra.mxu0 %v17959_v37  ;;  %8880 = vmatpush.bf16.msra.mxu1 %v17969_v42  ;;  %v15844_v37 = vld [vmem:[%s27355_s4 + $0x1ac8] sm:$0xf0] }
 0x4eb   :  { %9208 = vmatpush.bf16.msra.mxu3 %v15859_v48  ;;  %v15811_v48 = vor.u32 %v17991_v52, %v15810_v2  ;;  %v17984_v2 = vld [vmem:[%s27355_s4 + $0x1a54] sm:$0xf]  ;;  %v15883_v52 = vor.u32 %v18009_v13, %v15882_v57  ;;  %v18050_v13 = vld [vmem:[%s27355_s4 + $0x1c64] sm:$0xf] }
 0x4ed   :  { %8870 = vmatpush.bf16.msra.mxu0 %v17958_v51  ;;  %8881 = vmatpush.bf16.msra.mxu1 %v17968_v56  ;;  %v15796_v51 = vld [vmem:[%s27355_s4 + $0x1a68] sm:$0xf0] }
 0x4ef   :  { %9209 = vmatpush.bf16.msra.mxu3 %v15851_v10  ;;  %v15924_v10 = vld [vmem:[%s27355_s4 + $0x1b68] sm:$0xf0] }
 0x4f0   :  { %v15927_v45 = vor.u32 %v18018_v26, %v15924_v10  ;;  %v15820_v26 = vld [vmem:[%s27355_s4 + $0x1a98] sm:$0xf0] }
 0x4f1   :  { %8882 = vmatpush.bf16.msra.mxu1 %v17967_v49  ;;  %v18008_v49 = vld [vmem:[%s27355_s4 + $0x1b14] sm:$0xf] }
 0x4f2   :  { %v15887_v7 = vor.u32 %v18008_v49, %v15884_v0  ;;  %v18046_v49 = vld [vmem:[%s27355_s4 + $0x1c44] sm:$0xf]  ;;  %v16037_v0 = vld [vmem:[%s27355_s4 + $0x1c48] sm:$0xf0] }
 0x4f3   :  { %9210 = vmatpush.bf16.msra.mxu3 %v15843_v61  ;;  %v15855_v61 = vor.u32 %v18000_v58, %v15852_v3  ;;  %v15772_v58 = vld [vmem:[%s27355_s4 + $0x1a38] sm:$0xf0]  ;;  %v17990_v3 = vld [vmem:[%s27355_s4 + $0x1a84] sm:$0xf] }
 0x4f4   :  { %v15815_v6 = vor.u32 %v17990_v3, %v15812_v25  ;;  %v18026_v3 = vld [vmem:[%s27355_s4 + $0x1ba4] sm:$0xf] }
 0x4f5   :  { %v8648_v15 = vpop.f32.mrf.mxu1  ;;  %8883 = vmatpush.bf16.msra.mxu1 %v17966_v21  ;;  %v15876_v21 = vld [vmem:[%s27355_s4 + $0x1b08] sm:$0xf0] }
 0x4f6   :  { %v25762_v22 = vadd.f32 %v8648_v15, %v8636_v29  ;;  %8725 = vmatmul.bf16.vlgmr.msrb.gmra.mxu3 %v8234_v23  ;;  %v17977_v23 = vld [vmem:[%s27355_s4 + $0x1a14] sm:$0xf0]  ;;  %v15818_v15 = vld [vmem:[%s27355_s4 + $0x1a90] sm:$0xf] }
 0x4f7   :  { %9211 = vmatpush.bf16.msra.mxu3 %v15835_v46  ;;  %v18021_v29 = vld [vmem:[%s27355_s4 + $0x1b74] sm:$0xf0]  ;;  %v17988_v46 = vld [vmem:[%s27355_s4 + $0x1a74] sm:$0xf] }
 0x4fb   :  { %9212 = vmatpush.bf16.msra.mxu3 %v15827_v59  ;;  %v25998_v59 = vld [vmem:[#allocation1] sm:$0xff] }
 0x4fd   :  { %v8650_v12 = vpop.f32.mrf.mxu1 }
 0x4fe   :  { %v17993_v12 = vld [vmem:[%s27355_s4 + $0x1a94] sm:$0xf0] }
 0x4ff   :  { %v15819_v40 = vor.u32 %v17993_v12, %v15818_v15  ;;  %v17986_v12 = vld [vmem:[%s27355_s4 + $0x1a64] sm:$0xf] }
 0x501   :  { %9213 = vmatpush.bf16.msra.mxu3 %v15819_v40  ;;  %v15900_v40 = vld [vmem:[%s27355_s4 + $0x1b38] sm:$0xf0] }
 0x502   :  { %v15903_v32 = vor.u32 %v18012_v63, %v15900_v40  ;;  %v18032_v63 = vld [vmem:[%s27355_s4 + $0x1bd4] sm:$0xf] }
 0x503   :  { %v18052_v40 = vld [vmem:[%s27355_s4 + $0x1c74] sm:$0xf] }
 0x505   :  { %9214 = vmatpush.bf16.msra.mxu3 %v15811_v48  ;;  %v18010_v48 = vld [vmem:[%s27355_s4 + $0x1b24] sm:$0xf] }
 0x509   :  { %9259 = vmatpush.bf16.msrb.mxu3 %v15935_v11  ;;  %v15892_v11 = vld [vmem:[%s27355_s4 + $0x1b28] sm:$0xf0] }
 0x50a   :  { %v15895_v1 = vor.u32 %v18010_v48, %v15892_v11 }
 0x50d   :  { %9260 = vmatpush.bf16.msrb.mxu3 %v15927_v45 }
 0x511   :  { %9261 = vmatpush.bf16.msrb.mxu3 %v15919_v54  ;;  %v18006_v54 = vld [vmem:[%s27355_s4 + $0x1b04] sm:$0xf] }
 0x512   :  { %v15879_v53 = vor.u32 %v18006_v54, %v15876_v21  ;;  %v18024_v54 = vld [vmem:[%s27355_s4 + $0x1b94] sm:$0xf]  ;;  %v15949_v21 = vld [vmem:[%s27355_s4 + $0x1b98] sm:$0xf0] }
 0x515   :  { %v8700_v62 = vpop.f32.mrf.mxu1 }
 0x516   :  { %v25764_v30 = vadd.f32 %v8700_v62, %v8688_v47  ;;  %v15755_v47 = vor.u32 %v17977_v23, %v15754_v14  ;;  %v15746_v62 = vld [vmem:[%s27355_s4 + $0x1a00] sm:$0xf]  ;;  %v15908_v14 = vld [vmem:[%s27355_s4 + $0x1b48] sm:$0xf0]  ;;  %v15847_v23 = vor.u32 %v17998_v34, %v15844_v37  ;;  %v15756_v34 = vld [vmem:[%s27355_s4 + $0x1a18] sm:$0xf0] }
 0x517   :  { %v15747_v27 = vor.u32 %v17975_v35, %v15746_v62  ;;  %v15911_v42 = vor.u32 %v18014_v43, %v15908_v14  ;;  %v15799_v62 = vor.u32 %v17986_v12, %v15796_v51  ;;  %v8949_v35 = vld [vmem:[#allocation1 + $0x9] sm:$0xff]  ;;  %v17974_v43 = vld [vmem:[%s27355_s4 + $0x1a04] sm:$0xf]  ;;  %v18036_v51 = vld [vmem:[%s27355_s4 + $0x1bf4] sm:$0xf] }
 0x518   :  { %9200 = vmatpush.bf16.msra.mxu2 %v15755_v47  ;;  %v17996_v47 = vld [vmem:[%s27355_s4 + $0x1ab4] sm:$0xf]  ;;  %9215 = vmatmul.bf16.vlgmr.msra.gmra.mxu3 %v8949_v35  ;;  %v15748_v14 = vld [vmem:[%s27355_s4 + $0x1a08] sm:$0xf0] }
 0x519   :  { %9262 = vmatpush.bf16.msrb.mxu3 %v15911_v42 }
 0x51c   :  { %9201 = vmatpush.bf16.msra.mxu2 %v15747_v27  ;;  %v15788_v27 = vld [vmem:[%s27355_s4 + $0x1a58] sm:$0xf0] }
 0x51d   :  { %v8702_v39 = vpop.f32.mrf.mxu1  ;;  %9263 = vmatpush.bf16.msrb.mxu3 %v15903_v32  ;;  %v16061_v32 = vld [vmem:[%s27355_s4 + $0x1c78] sm:$0xf0] }
 0x51e   :  { %v15931_v39 = vor.u32 %v18021_v29, %v15930_v16  ;;  %v15890_v16 = vld [vmem:[%s27355_s4 + $0x1b20] sm:$0xf]  ;;  %v18011_v29 = vld [vmem:[%s27355_s4 + $0x1b24] sm:$0xf0]  ;;  %v16064_v57 = vor.u32 %v18052_v40, %v16061_v32 }
 0x51f   :  { %9202 = vmatmul.bf16.vlgmr.msra.gmra.mxu2 %v25998_v59  ;;  %v15891_v15 = vor.u32 %v18011_v29, %v15890_v16  ;;  %v15751_v29 = vor.u32 %v17974_v43, %v15748_v14  ;;  %v18160_v43 = vld [vmem:[%s27358_s3 + $0xacc] sm:$0xf0] }
 0x520   :  { %9220 = vmatpush.bf16.msrb.mxu0 %v15931_v39  ;;  %9246 = vmatpush.bf16.msrb.mxu2 %v15871_v31  ;;  %v15836_v39 = vld [vmem:[%s27355_s4 + $0x1ab8] sm:$0xf0]  ;;  %v15831_v31 = vor.u32 %v17994_v50, %v15828_v28  ;;  %v18030_v28 = vld [vmem:[%s27355_s4 + $0x1bc4] sm:$0xf] }
 0x521   :  { %v15839_v56 = vor.u32 %v17996_v47, %v15836_v39  ;;  %9264 = vmatpush.bf16.msrb.mxu3 %v15895_v1  ;;  %v15997_v47 = vld [vmem:[%s27355_s4 + $0x1bf8] sm:$0xf0]  ;;  %v15989_v39 = vld [vmem:[%s27355_s4 + $0x1be8] sm:$0xf0]  ;;  %v18048_v1 = vld [vmem:[%s27355_s4 + $0x1c54] sm:$0xf] }
 0x524   :  { %9221 = vmatpush.bf16.msrb.mxu0 %v15923_v55  ;;  %9247 = vmatpush.bf16.msrb.mxu2 %v15863_v17  ;;  %v15791_v55 = vor.u32 %v17984_v2, %v15788_v27  ;;  %v17992_v17 = vld [vmem:[%s27355_s4 + $0x1a94] sm:$0xf]  ;;  %v16053_v2 = vld [vmem:[%s27355_s4 + $0x1c68] sm:$0xf0]  ;;  %v18037_v27 = vld [vmem:[%s27355_s4 + $0x1bf4] sm:$0xf0] }
 0x525   :  { %v15823_v45 = vor.u32 %v17992_v17, %v15820_v26  ;;  %9265 = vmatpush.bf16.msrb.mxu3 %v15887_v7  ;;  %v18028_v17 = vld [vmem:[%s27355_s4 + $0x1bb4] sm:$0xf]  ;;  %v15965_v26 = vld [vmem:[%s27355_s4 + $0x1bb8] sm:$0xf0] }
 0x528   :  { %9222 = vmatpush.bf16.msrb.mxu0 %v15915_v24  ;;  %9248 = vmatpush.bf16.msrb.mxu2 %v15855_v61  ;;  %v15875_v24 = vor.u32 %v18007_v44, %v15874_v60  ;;  %v16045_v60 = vld [vmem:[%s27355_s4 + $0x1c58] sm:$0xf0]  ;;  %v15987_v44 = vld [vmem:[%s27355_s4 + $0x1be0] sm:$0xf] }
 0x529   :  { %v25826_v20 = vpop.f32.mrf.mxu2  ;;  %9266 = vmatpush.bf16.msrb.mxu3 %v15879_v53  ;;  %v15952_v53 = vor.u32 %v18024_v54, %v15949_v21  ;;  %v16147_v54 = vld [vmem:[%s27358_s3 + $0xa20] sm:$0xf]  ;;  %v18140_v21 = vld [vmem:[%s27358_s3 + $0xa2c] sm:$0xf0] }
 0x52c   :  { %9223 = vmatpush.bf16.msrb.mxu0 %v15907_v4  ;;  %9249 = vmatpush.bf16.msrb.mxu2 %v15847_v23  ;;  %v17980_v4 = vld [vmem:[%s27355_s4 + $0x1a34] sm:$0xf]  ;;  %v8662_v23 = vadd.f32 %v25826_v20, %v25762_v22  ;;  %v18034_v22 = vld [vmem:[%s27355_s4 + $0x1be4] sm:$0xf] }
 0x52d   :  { %v15775_v61 = vor.u32 %v17980_v4, %v15772_v58  ;;  %9514 = vmatpush.bf16.msra.mxu3 %v16064_v57  ;;  %v15968_v4 = vor.u32 %v18028_v17, %v15965_v26  ;;  %v16040_v58 = vor.u32 %v18046_v49, %v16037_v0  ;;  %v15963_v57 = vld [vmem:[%s27355_s4 + $0x1bb0] sm:$0xf]  ;;  %v16163_v26 = vld [vmem:[%s27358_s3 + $0xa40] sm:$0xf]  ;;  %v16245_v0 = vld [vmem:[%s27358_s3 + $0xaf0] sm:$0xf0] }
 0x530   :  { %9224 = vmatpush.bf16.msrb.mxu0 %v15899_v9  ;;  %9250 = vmatpush.bf16.msrb.mxu2 %v15839_v56  ;;  %v15764_v9 = vld [vmem:[%s27355_s4 + $0x1a28] sm:$0xf0]  ;;  %v15981_v56 = vld [vmem:[%s27355_s4 + $0x1bd8] sm:$0xf0] }
 0x531   :  { %v8663_v38 = vpop.f32.mrf.mxu2  ;;  %v15984_v50 = vor.u32 %v18032_v63, %v15981_v56  ;;  %v16195_v63 = vld [vmem:[%s27358_s3 + $0xa80] sm:$0xf]  ;;  %v18152_v56 = vld [vmem:[%s27358_s3 + $0xa8c] sm:$0xf0] }
 0x532   :  { %v15804_v38 = vld [vmem:[%s27355_s4 + $0x1a78] sm:$0xf0]  ;;  %v16196_v32 = vor.u32 %v18152_v56, %v16195_v63  ;;  %v16027_v63 = vld [vmem:[%s27355_s4 + $0x1c30] sm:$0xf]  ;;  %v18045_v56 = vld [vmem:[%s27355_s4 + $0x1c34] sm:$0xf0] }
 0x533   :  { %v15807_v19 = vor.u32 %v17988_v46, %v15804_v38  ;;  %v15767_v46 = vor.u32 %v17978_v5, %v15764_v9  ;;  %v17976_v38 = vld [vmem:[%s27355_s4 + $0x1a14] sm:$0xf]  ;;  %v18022_v5 = vld [vmem:[%s27355_s4 + $0x1b84] sm:$0xf]  ;;  %v15941_v9 = vld [vmem:[%s27355_s4 + $0x1b88] sm:$0xf0] }
 0x534   :  { %9225 = vmatpush.bf16.msrb.mxu0 %v15891_v15  ;;  %9251 = vmatpush.bf16.msrb.mxu2 %v15831_v31  ;;  %v15759_v37 = vor.u32 %v17976_v38, %v15756_v34  ;;  %v16056_v31 = vor.u32 %v18050_v13, %v16053_v2  ;;  %v18164_v38 = vld [vmem:[%s27358_s3 + $0xaec] sm:$0xf0]  ;;  %v15944_v34 = vor.u32 %v18022_v5, %v15941_v9  ;;  %v18029_v13 = vld [vmem:[%s27355_s4 + $0x1bb4] sm:$0xf0] }
 0x535   :  { %9233 = vmatpush.bf16.msrb.mxu1 %v15807_v19  ;;  %v26103_v19 = vld [vmem:[#allocation1 + $0x12] sm:$0xff]  ;;  %v15964_v2 = vor.u32 %v18029_v13, %v15963_v57  ;;  %v16148_v9 = vor.u32 %v18140_v21, %v16147_v54  ;;  %v18146_v57 = vld [vmem:[%s27358_s3 + $0xa64] sm:$0xf] }
 0x536   :  { %9267 = vmatmul.bf16.vlgmr.msrb.gmra.mxu3 %v26103_v19  ;;  %v16181_v13 = vld [vmem:[%s27358_s3 + $0xa70] sm:$0xf0] }
 0x537   :  { %9515 = vmatpush.bf16.msra.mxu3 %v16056_v31 }
 0x538   :  { %9226 = vmatpush.bf16.msrb.mxu0 %v15883_v52  ;;  %9252 = vmatpush.bf16.msrb.mxu2 %v15823_v45  ;;  %v15995_v52 = vld [vmem:[%s27355_s4 + $0x1bf0] sm:$0xf] }
 0x539   :  { %v25918_v18 = vpop.f32.mrf.mxu2  ;;  %9234 = vmatpush.bf16.msrb.mxu1 %v15799_v62  ;;  %v16000_v62 = vor.u32 %v18036_v51, %v15997_v47  ;;  %v15996_v48 = vor.u32 %v18037_v27, %v15995_v52  ;;  %v18156_v51 = vld [vmem:[%s27358_s3 + $0xaac] sm:$0xf0]  ;;  %v18040_v52 = vld [vmem:[%s27355_s4 + $0x1c14] sm:$0xf]  ;;  %v16013_v27 = vld [vmem:[%s27355_s4 + $0x1c18] sm:$0xf0] }
 0x53a   :  { %v8714_v11 = vadd.f32 %v25918_v18, %v25764_v30 }
 0x53c   :  { %9227 = vmatpush.bf16.msrb.mxu0 %v15875_v24  ;;  %9253 = vmatpush.bf16.msrb.mxu2 %v15815_v6  ;;  %v18035_v24 = vld [vmem:[%s27355_s4 + $0x1be4] sm:$0xf0] }
 0x53d   :  { %9235 = vmatpush.bf16.msrb.mxu1 %v15791_v55  ;;  %v15973_v55 = vld [vmem:[%s27355_s4 + $0x1bc8] sm:$0xf0]  ;;  %v15988_v30 = vor.u32 %v18035_v24, %v15987_v44  ;;  %v18053_v24 = vld [vmem:[%s27355_s4 + $0x1c74] sm:$0xf0] }
 0x53e   :  { %v15976_v18 = vor.u32 %v18030_v28, %v15973_v55  ;;  %v16179_v28 = vld [vmem:[%s27358_s3 + $0xa60] sm:$0xf]  ;;  %v18148_v55 = vld [vmem:[%s27358_s3 + $0xa6c] sm:$0xf0] }
 0x53f   :  { %9254 = vmatmul.bf16.vlgmr.msrb.gmra.mxu2 %v8949_v35  ;;  %v15992_v35 = vor.u32 %v18034_v22, %v15989_v39  ;;  %v15971_v22 = vld [vmem:[%s27355_s4 + $0x1bc0] sm:$0xf] }
 0x540   :  { %9501 = vmatpush.bf16.msra.mxu2 %v16000_v62  ;;  %v18042_v62 = vld [vmem:[%s27355_s4 + $0x1c24] sm:$0xf] }
 0x541   :  { %v8715_v8 = vpop.f32.mrf.mxu2 }
 0x542   :  { %v17982_v8 = vld [vmem:[%s27355_s4 + $0x1a44] sm:$0xf] }
 0x543   :  { %v15783_v10 = vor.u32 %v17982_v8, %v15780_v41 }
 0x544   :  { %9502 = vmatpush.bf16.msra.mxu2 %v15992_v35  ;;  %v16021_v35 = vld [vmem:[%s27355_s4 + $0x1c28] sm:$0xf0] }
 0x545   :  { %9236 = vmatpush.bf16.msrb.mxu1 %v15783_v10  ;;  %v16048_v10 = vor.u32 %v18048_v1, %v16045_v60  ;;  %v16024_v40 = vor.u32 %v18042_v62, %v16021_v35  ;;  %v18027_v1 = vld [vmem:[%s27355_s4 + $0x1ba4] sm:$0xf0]  ;;  %v16059_v60 = vld [vmem:[%s27355_s4 + $0x1c70] sm:$0xf]  ;;  %v18150_v62 = vld [vmem:[%s27358_s3 + $0xa84] sm:$0xf] }
 0x547   :  { %9516 = vmatpush.bf16.msra.mxu3 %v16048_v10  ;;  %v18144_v10 = vld [vmem:[%s27358_s3 + $0xa4c] sm:$0xf0] }
 0x548   :  { %9503 = vmatpush.bf16.msra.mxu2 %v15984_v50  ;;  %v16016_v50 = vor.u32 %v18040_v52, %v16013_v27  ;;  %v16164_v49 = vor.u32 %v18144_v10, %v16163_v26  ;;  %v16184_v52 = vor.u32 %v18146_v57, %v16181_v13  ;;  %v16019_v27 = vld [vmem:[%s27355_s4 + $0x1c20] sm:$0xf] }
 0x549   :  { %9237 = vmatpush.bf16.msrb.mxu1 %v15775_v61  ;;  %v15957_v61 = vld [vmem:[%s27355_s4 + $0x1ba8] sm:$0xf0] }
 0x54a   :  { %v15960_v6 = vor.u32 %v18026_v3, %v15957_v61  ;;  %v16051_v3 = vld [vmem:[%s27355_s4 + $0x1c60] sm:$0xf] }
 0x54b   :  { %9517 = vmatpush.bf16.msra.mxu3 %v16040_v58  ;;  %v18025_v58 = vld [vmem:[%s27355_s4 + $0x1b94] sm:$0xf0] }
 0x54c   :  { %9504 = vmatpush.bf16.msra.mxu2 %v15976_v18  ;;  %v16060_v18 = vor.u32 %v18053_v24, %v16059_v60  ;;  %v18041_v24 = vld [vmem:[%s27355_s4 + $0x1c14] sm:$0xf0] }
 0x54d   :  { %9238 = vmatpush.bf16.msrb.mxu1 %v15767_v46  ;;  %v16243_v46 = vld [vmem:[%s27358_s3 + $0xae0] sm:$0xf] }
 0x550   :  { %9505 = vmatpush.bf16.msra.mxu2 %v15968_v4  ;;  %v15947_v4 = vld [vmem:[%s27355_s4 + $0x1b90] sm:$0xf] }
 0x551   :  { %9239 = vmatpush.bf16.msrb.mxu1 %v15759_v37  ;;  %v16227_v37 = vld [vmem:[%s27358_s3 + $0xac0] sm:$0xf]  ;;  %v15948_v61 = vor.u32 %v18025_v58, %v15947_v4  ;;  %v18134_v58 = vld [vmem:[%s27358_s3 + $0xa04] sm:$0xf] }
 0x552   :  { %v16228_v14 = vor.u32 %v18160_v43, %v16227_v37  ;;  %v16043_v37 = vld [vmem:[%s27355_s4 + $0x1c50] sm:$0xf] }
 0x554   :  { %9506 = vmatpush.bf16.msra.mxu2 %v15960_v6 }
 0x555   :  { %9240 = vmatpush.bf16.msrb.mxu1 %v15751_v29  ;;  %v18044_v29 = vld [vmem:[%s27355_s4 + $0x1c34] sm:$0xf] }
 0x558   :  { %9507 = vmatpush.bf16.msra.mxu2 %v15952_v53  ;;  %v18158_v53 = vld [vmem:[%s27358_s3 + $0xac4] sm:$0xf] }
 0x55c   :  { %9508 = vmatpush.bf16.msra.mxu2 %v15944_v34  ;;  %v15939_v34 = vld [vmem:[%s27355_s4 + $0x1b80] sm:$0xf] }
 0x569   :  { %v8674_v42 = vpop.f32.mrf.mxu3 }
 0x56a   :  { %v8675_v16 = vadd.f32 %v8674_v42, %v8662_v23  ;;  %v15979_v23 = vld [vmem:[%s27355_s4 + $0x1bd0] sm:$0xf]  ;;  %v18033_v42 = vld [vmem:[%s27355_s4 + $0x1bd4] sm:$0xf0] }
 0x56c   :  { %v8730_v15 = vmax.f32 %v8675_v16, 0.0  ;;  %v15980_v16 = vor.u32 %v18033_v42, %v15979_v23  ;;  %v18049_v23 = vld [vmem:[%s27355_s4 + $0x1c54] sm:$0xf0] }
 0x56d   :  { %v16044_v42 = vor.u32 %v18049_v23, %v16043_v37  ;;  %v16339_v23 = vld [vmem:[%s27358_s3 + $0x8a0] sm:$0xf] }
 0x56e   :  { %v8732_v12 = vpack.c.bf16 %v8730_v15, %v8730_v15 }
 0x570   :  { %8871 = vmatmul.bf16.vlgmr.msra.gmra.mxu0 %v8732_v12  ;;  %v16211_v12 = vld [vmem:[%s27358_s3 + $0xaa0] sm:$0xf] }
 0x571   :  { %v8676_v20 = vpop.f32.mrf.mxu3  ;;  %9475 = vmatpush.bf16.msra.mxu0 %v15996_v48  ;;  %v16212_v47 = vor.u32 %v18156_v51, %v16211_v12  ;;  %v16180_v48 = vor.u32 %v18148_v55, %v16179_v28  ;;  %v16213_v12 = vld [vmem:[%s27358_s3 + $0xab0] sm:$0xf0] }
 0x572   :  { %v18031_v20 = vld [vmem:[%s27355_s4 + $0x1bc4] sm:$0xf0] }
 0x573   :  { %v15972_v39 = vor.u32 %v18031_v20, %v15971_v22  ;;  %v18047_v22 = vld [vmem:[%s27355_s4 + $0x1c44] sm:$0xf0] }
 0x575   :  { %9476 = vmatpush.bf16.msra.mxu0 %v15988_v30  ;;  %v16005_v30 = vld [vmem:[%s27355_s4 + $0x1c08] sm:$0xf0] }
 0x579   :  { %v8726_v8 = vpop.f32.mrf.mxu3  ;;  %9477 = vmatpush.bf16.msra.mxu0 %v15980_v16  ;;  %v16131_v16 = vld [vmem:[%s27358_s3 + $0xa00] sm:$0xf] }
 0x57a   :  { %v8727_v41 = vadd.f32 %v8726_v8, %v8714_v11  ;;  %v15955_v11 = vld [vmem:[%s27355_s4 + $0x1ba0] sm:$0xf] }
 0x57b   :  { %v15956_v8 = vor.u32 %v18027_v1, %v15955_v11  ;;  %v16165_v11 = vld [vmem:[%s27358_s3 + $0xa50] sm:$0xf0]  ;;  %v15743_v1 = vld [vmem:[%s27357_s6 + $0x7] ss:$8 sm:$0x3] }
 0x57c   :  { %v8731_v45 = vmax.f32 %v8727_v41, 0.0  ;;  %v18038_v41 = vld [vmem:[%s27355_s4 + $0x1c04] sm:$0xf]  ;;  %v8942_v26 = vperm.slane %v15743_v1, 0 }
 0x57d   :  { %9478 = vmatpush.bf16.msra.mxu0 %v15972_v39  ;;  %v16008_v17 = vor.u32 %v18038_v41, %v16005_v30  ;;  %v16197_v39 = vld [vmem:[%s27358_s3 + $0xa90] sm:$0xf0] }
 0x57e   :  { %v8733_v7 = vpack.c.bf16 %v8731_v45, %v8731_v45  ;;  %v18162_v45 = vld [vmem:[%s27358_s3 + $0xae4] sm:$0xf]  ;;  %v16200_v35 = vor.u32 %v18150_v62, %v16197_v39  ;;  %v16307_v39 = vld [vmem:[%s27358_s3 + $0x860] sm:$0xf] }
 0x580   :  { %8884 = vmatmul.bf16.vlgmr.msra.gmra.mxu1 %v8733_v7  ;;  %9228 = vmatmul.bf16.vlgmr.msrb.gmra.mxu0 %v26103_v19  ;;  %v16244_v19 = vor.u32 %v18164_v38, %v16243_v46  ;;  %v16248_v7 = vor.u32 %v18162_v45, %v16245_v0  ;;  %v16229_v46 = vld [vmem:[%s27358_s3 + $0xad0] sm:$0xf0]  ;;  %v18039_v0 = vld [vmem:[%s27355_s4 + $0x1c04] sm:$0xf0] }
 0x581   :  { %v8728_v25 = vpop.f32.mrf.mxu3  ;;  %9479 = vmatpush.bf16.msra.mxu0 %v15964_v2  ;;  %9488 = vmatpush.bf16.msra.mxu1 %v16060_v18  ;;  %v16232_v38 = vor.u32 %v18158_v53, %v16229_v46  ;;  %v18138_v18 = vld [vmem:[%s27358_s3 + $0xa24] sm:$0xf] }
 0x582   :  { %9946 = vmatpush.bf16.msrb.mxu2 %v16244_v19  ;;  %v18051_v25 = vld [vmem:[%s27355_s4 + $0x1c64] sm:$0xf0] }
 0x583   :  { %v16052_v6 = vor.u32 %v18051_v25, %v16051_v3  ;;  %v18023_v19 = vld [vmem:[%s27355_s4 + $0x1b84] sm:$0xf0]  ;;  %v16133_v3 = vld [vmem:[%s27358_s3 + $0xa10] sm:$0xf0] }
 0x584   :  { %v16136_v25 = vor.u32 %v18134_v58, %v16133_v3  ;;  %v18120_v58 = vld [vmem:[%s27358_s3 + $0x98c] sm:$0xf0]  ;;  %v16363_v3 = vld [vmem:[%s27358_s3 + $0x8c8] sm:$0xf] }
 0x585   :  { %9480 = vmatpush.bf16.msra.mxu0 %v15956_v8  ;;  %9489 = vmatpush.bf16.msra.mxu1 %v16052_v6  ;;  %v16011_v8 = vld [vmem:[%s27355_s4 + $0x1c10] sm:$0xf] }
 0x586   :  { %9947 = vmatpush.bf16.msrb.mxu2 %v16228_v14  ;;  %v15940_v14 = vor.u32 %v18023_v19, %v15939_v34  ;;  %v16012_v41 = vor.u32 %v18041_v24, %v16011_v8  ;;  %v8766_v19 = vld [vmem:[%s27357_s6 + $0x6] ss:$0 sm:$0xff]  ;;  %v18128_v8 = vld [vmem:[%s27358_s3 + $0x9cc] sm:$0xf0] }
 0x589   :  { %9481 = vmatpush.bf16.msra.mxu0 %v15948_v61  ;;  %9490 = vmatpush.bf16.msra.mxu1 %v16044_v42  ;;  %v18092_v42 = vld [vmem:[%s27358_s3 + $0x8ac] sm:$0xf0] }
 0x58a   :  { %9948 = vmatpush.bf16.msrb.mxu2 %v16212_v47  ;;  %v16035_v47 = vld [vmem:[%s27355_s4 + $0x1c40] sm:$0xf] }
 0x58b   :  { %v16036_v20 = vor.u32 %v18047_v22, %v16035_v47 }
 0x58d   :  { %9482 = vmatpush.bf16.msra.mxu0 %v15940_v14  ;;  %9491 = vmatpush.bf16.msra.mxu1 %v16036_v20 }
 0x58e   :  { %9949 = vmatpush.bf16.msrb.mxu2 %v16196_v32 }
 0x590   :  { %9241 = vmatmul.bf16.vlgmr.msrb.gmra.mxu1 %v25998_v59  ;;  %v16029_v59 = vld [vmem:[%s27355_s4 + $0x1c38] sm:$0xf0] }
 0x591   :  { %v16032_v15 = vor.u32 %v18044_v29, %v16029_v59  ;;  %v18136_v29 = vld [vmem:[%s27358_s3 + $0xa0c] sm:$0xf0]  ;;  %v18154_v59 = vld [vmem:[%s27358_s3 + $0xaa4] sm:$0xf] }
 0x592   :  { %9950 = vmatpush.bf16.msrb.mxu2 %v16180_v48  ;;  %v16216_v51 = vor.u32 %v18154_v59, %v16213_v12  ;;  %v18142_v48 = vld [vmem:[%s27358_s3 + $0xa44] sm:$0xf]  ;;  %v16323_v12 = vld [vmem:[%s27358_s3 + $0x880] sm:$0xf] }
 0x593   :  { %9518 = vmatpush.bf16.msra.mxu3 %v16032_v15  ;;  %v16132_v15 = vor.u32 %v18136_v29, %v16131_v16  ;;  %v16168_v60 = vor.u32 %v18142_v48, %v16165_v11  ;;  %v16340_v29 = vor.u32 %v18092_v42, %v16339_v23  ;;  %v16315_v23 = vld [vmem:[%s27358_s3 + $0x868] sm:$0xf]  ;;  %v18085_v42 = vld [vmem:[%s27358_s3 + $0x874] sm:$0xf0] }
 0x596   :  { %9951 = vmatpush.bf16.msrb.mxu2 %v16164_v49  ;;  %v16003_v49 = vld [vmem:[%s27355_s4 + $0x1c00] sm:$0xf] }
 0x597   :  { %9519 = vmatpush.bf16.msra.mxu3 %v16024_v40  ;;  %v16028_v40 = vor.u32 %v18045_v56, %v16027_v63 }
 0x599   :  { %9492 = vmatpush.bf16.msra.mxu1 %v16028_v40  ;;  %v16291_v40 = vld [vmem:[%s27358_s3 + $0x840] sm:$0xf] }
 0x59a   :  { %9952 = vmatpush.bf16.msrb.mxu2 %v16148_v9  ;;  %v18100_v9 = vld [vmem:[%s27358_s3 + $0x8ec] sm:$0xf0] }
 0x59b   :  { %9520 = vmatpush.bf16.msra.mxu3 %v16016_v50  ;;  %v26279_v44 = vpop.f32.mrf.mxu3  ;;  %v18043_v50 = vld [vmem:[%s27355_s4 + $0x1c24] sm:$0xf0] }
 0x59c   :  { %v16020_v28 = vor.u32 %v18043_v50, %v16019_v27  ;;  %v16499_v27 = vld [vmem:[%s27358_s3 + $0x9e0] sm:$0xf] }
 0x59e   :  { %9953 = vmatpush.bf16.msrb.mxu2 %v16132_v15  ;;  %9493 = vmatpush.bf16.msra.mxu1 %v16020_v28  ;;  %v8943_v15 = vperm.slane %v15743_v1, 1  ;;  %v18076_v1 = vld [vmem:[%s27358_s3 + $0x82c] sm:$0xf0] }
 0x59f   :  { %9521 = vmatpush.bf16.msra.mxu3 %v16008_v17  ;;  %v16149_v17 = vld [vmem:[%s27358_s3 + $0xa30] sm:$0xf0] }
 0x5a0   :  { %v16152_v45 = vor.u32 %v18138_v18, %v16149_v17  ;;  %v18072_v18 = vld [vmem:[%s27358_s3 + $0x80c] sm:$0xf0]  ;;  %v16467_v17 = vld [vmem:[%s27358_s3 + $0x9a0] sm:$0xf] }
 0x5a2   :  { %v26268_v31 = vpop.f32.mrf.mxu2  ;;  %9494 = vmatpush.bf16.msra.mxu1 %v16012_v41 }
 0x5a3   :  { %9959 = vmatpush.bf16.msrb.mxu3 %v16248_v7  ;;  %v9218_v43 = vpop.f32.mrf.mxu3  ;;  %v16004_v7 = vor.u32 %v18039_v0, %v16003_v49  ;;  %v9204_v61 = vadd.f32 %v26268_v31, %v8942_v26  ;;  %v16355_v31 = vld [vmem:[%s27358_s3 + $0x8c0] sm:$0xf]  ;;  %v18124_v26 = vld [vmem:[%s27358_s3 + $0x9ac] sm:$0xf0] }
 0x5a4   :  { %v16468_v0 = vor.u32 %v18124_v26, %v16467_v17  ;;  %v16443_v17 = vld [vmem:[%s27358_s3 + $0x968] sm:$0xf]  ;;  %v18117_v26 = vld [vmem:[%s27358_s3 + $0x974] sm:$0xf0] }
 0x5a5   :  { %v9217_v6 = vadd.f32 %v26279_v44, %v9204_v61  ;;  %v18096_v44 = vld [vmem:[%s27358_s3 + $0x8cc] sm:$0xf0]  ;;  %v18097_v61 = vld [vmem:[%s27358_s3 + $0x8d4] sm:$0xf0] }
 0x5a6   :  { %9495 = vmatpush.bf16.msra.mxu1 %v16004_v7  ;;  %v16356_v43 = vor.u32 %v18096_v44, %v16355_v31  ;;  %v16331_v31 = vld [vmem:[%s27358_s3 + $0x888] sm:$0xf]  ;;  %v18089_v44 = vld [vmem:[%s27358_s3 + $0x894] sm:$0xf0] }
 0x5a7   :  { %9960 = vmatpush.bf16.msrb.mxu3 %v16232_v38 }
 0x5aa   :  { %v9205_v5 = vpop.f32.mrf.mxu2 }
 0x5ab   :  { %9961 = vmatpush.bf16.msrb.mxu3 %v16216_v51  ;;  %v16371_v5 = vld [vmem:[%s27358_s3 + $0x8e0] sm:$0xf]  ;;  %v18088_v51 = vld [vmem:[%s27358_s3 + $0x88c] sm:$0xf0] }
 0x5ac   :  { %v16372_v38 = vor.u32 %v18100_v9, %v16371_v5  ;;  %v16324_v22 = vor.u32 %v18088_v51, %v16323_v12  ;;  %v16347_v5 = vld [vmem:[%s27358_s3 + $0x8a8] sm:$0xf]  ;;  %v18093_v9 = vld [vmem:[%s27358_s3 + $0x8b4] sm:$0xf0] }
 0x5ad   :  { %v16299_v12 = vld [vmem:[%s27358_s3 + $0x848] sm:$0xf]  ;;  %v18081_v51 = vld [vmem:[%s27358_s3 + $0x854] sm:$0xf0] }
 0x5af   :  { %9962 = vmatpush.bf16.msrb.mxu3 %v16200_v35  ;;  %v18084_v35 = vld [vmem:[%s27358_s3 + $0x86c] sm:$0xf0] }
 0x5b0   :  { %v16308_v56 = vor.u32 %v18084_v35, %v16307_v39  ;;  %v16283_v35 = vld [vmem:[%s27358_s3 + $0x828] sm:$0xf] }
 0x5b3   :  { %9963 = vmatpush.bf16.msrb.mxu3 %v16184_v52  ;;  %v18080_v52 = vld [vmem:[%s27358_s3 + $0x84c] sm:$0xf0] }
 0x5b7   :  { %9964 = vmatpush.bf16.msrb.mxu3 %v16168_v60  ;;  %v16483_v60 = vld [vmem:[%s27358_s3 + $0x9c0] sm:$0xf] }
 0x5b8   :  { %v16484_v41 = vor.u32 %v18128_v8, %v16483_v60  ;;  %v16459_v8 = vld [vmem:[%s27358_s3 + $0x988] sm:$0xf] }
 0x5b9   :  { %v26376_v2 = vpop.f32.mrf.mxu3 }
 0x5bb   :  { %9965 = vmatpush.bf16.msrb.mxu3 %v16152_v45  ;;  %v18101_v45 = vld [vmem:[%s27358_s3 + $0x8f4] sm:$0xf0] }
 0x5bf   :  { %9966 = vmatpush.bf16.msrb.mxu3 %v16136_v25 }
 0x5c1   :  { %v9270_v10 = vpop.f32.mrf.mxu3 }
 0x5c2   :  { %v26368_v32 = vpop.f32.mrf.mxu2  ;;  %v16379_v10 = vld [vmem:[%s27358_s3 + $0x8e8] sm:$0xf] }
 0x5c3   :  { %v16380_v7 = vor.u32 %v18101_v45, %v16379_v10  ;;  %v18058_v10 = vld [vmem:[%s27361_s5 + $0xa0] sm:$0xff] }
 0x5c4   :  { %v18066_v45 = vld [vmem:[%s27361_s5 + $0xe0] sm:$0xff] }
 0x5ca   :  { %v9257_v30 = vpop.f32.mrf.mxu2 }
 0x5cb   :  { %v16259_v30 = vld [vmem:[%s27358_s3 + $0x800] sm:$0xf] }
 0x5cc   :  { %v16260_v49 = vor.u32 %v18072_v18, %v16259_v30  ;;  %v18067_v30 = vld [vmem:[%s27361_s5 + $0xe8] sm:$0xff] }
 0x5ed   :  { %v8872_v55 = vpop.f32.mrf.mxu0 }
 0x5ee   :  { %v8873_v16 = vadd.f32 %v8872_v55, %v8766_v19  ;;  %v16292_v55 = vor.u32 %v18080_v52, %v16291_v40  ;;  %v18129_v40 = vld [vmem:[%s27358_s3 + $0x9d4] sm:$0xf0] }
 0x5ef   :  { %v18069_v52 = vld [vmem:[%s27361_s5 + $0xf8] sm:$0xff] }
 0x5f0   :  { %9673 = vmatpush.bf16.msrb.mxu1 %v18069_v52 }
 0x5f5   :  { %v8874_v4 = vpop.f32.mrf.mxu0 }
 0x5f6   :  { %v16451_v4 = vld [vmem:[%s27358_s3 + $0x980] sm:$0xf] }
 0x5f7   :  { %v16452_v25 = vor.u32 %v18120_v58, %v16451_v4  ;;  %v18057_v4 = vld [vmem:[%s27361_s5 + $0x98] sm:$0xff] }
 0x5f8   :  { %v18065_v58 = vld [vmem:[%s27361_s5 + $0xd8] sm:$0xff] }
 0x5fd   :  { %v8885_v54 = vpop.f32.mrf.mxu1  ;;  %v9229_v21 = vpop.f32.mrf.mxu0 }
 0x5fe   :  { %v9230_v53 = vadd.f32 %v9229_v21, %v9217_v6  ;;  %v8886_v59 = vadd.f32 %v8885_v54, %v8873_v16  ;;  %v26513_v6 = vpack.c.bf16 %v24873_v33, %v24873_v33  ;;  %v16364_v54 = vor.u32 %v18097_v61, %v16363_v3  ;;  %v16435_v21 = vld [vmem:[%s27358_s3 + $0x960] sm:$0xf]  ;;  %v16411_v61 = vld [vmem:[%s27358_s3 + $0x928] sm:$0xf] }
 0x600   :  { %v9272_v46 = vmax.f32 %v9230_v53, 0.0  ;;  %v8889_v20 = vmax.f32 %v8886_v59, 0.0  ;;  %v18116_v53 = vld [vmem:[%s27358_s3 + $0x96c] sm:$0xf0]  ;;  %v16387_v59 = vld [vmem:[%s27358_s3 + $0x900] sm:$0xf] }
 0x601   :  { %v16436_v33 = vor.u32 %v18116_v53, %v16435_v21  ;;  %v18064_v21 = vld [vmem:[%s27361_s5 + $0xd0] sm:$0xff] }
 0x602   :  { %v9274_v34 = vpack.c.bf16 %v9272_v46, %v9272_v46  ;;  %v26456_v57 = vpack.c.bf16 %v8889_v20, %v8889_v20  ;;  %v16348_v46 = vor.u32 %v18093_v9, %v16347_v5  ;;  %v16395_v5 = vld [vmem:[%s27358_s3 + $0x908] sm:$0xf]  ;;  %v18105_v9 = vld [vmem:[%s27358_s3 + $0x914] sm:$0xf0] }
 0x604   :  { %9483 = vmatmul.bf16.vlgmr.msra.gmra.mxu0 %v9274_v34  ;;  %9509 = vmatmul.bf16.vlgmr.msra.gmra.mxu2 %v9274_v34  ;;  %v18112_v34 = vld [vmem:[%s27358_s3 + $0x94c] sm:$0xf0] }
 0x605   :  { %10318 = vmatpush.bf16.msra.mxu2 %v16372_v38  ;;  %v8887_v37 = vpop.f32.mrf.mxu1  ;;  %v9231_v14 = vpop.f32.mrf.mxu0  ;;  %v16419_v38 = vld [vmem:[%s27358_s3 + $0x940] sm:$0xf] }
 0x606   :  { %v16420_v19 = vor.u32 %v18112_v34, %v16419_v38  ;;  %v16332_v37 = vor.u32 %v18089_v44, %v16331_v31  ;;  %v18108_v14 = vld [vmem:[%s27358_s3 + $0x92c] sm:$0xf0]  ;;  %v16251_v38 = vld [vmem:[%s27358_s3 + $0xae8] sm:$0xf]  ;;  %v18165_v34 = vld [vmem:[%s27358_s3 + $0xaf4] sm:$0xf0]  ;;  %v16396_v31 = vor.u32 %v18105_v9, %v16395_v5 }
 0x607   :  { %v18054_v44 = vld [vmem:[%s27361_s5 + $0x80] sm:$0xff] }
 0x609   :  { %10319 = vmatpush.bf16.msra.mxu2 %v16356_v43  ;;  %v16403_v43 = vld [vmem:[%s27358_s3 + $0x920] sm:$0xf] }
 0x60a   :  { %v16404_v16 = vor.u32 %v18108_v14, %v16403_v43  ;;  %v18161_v43 = vld [vmem:[%s27358_s3 + $0xad4] sm:$0xf0] }
 0x60d   :  { %10320 = vmatpush.bf16.msra.mxu2 %v16340_v29  ;;  %v9242_v47 = vpop.f32.mrf.mxu1  ;;  %v16316_v29 = vor.u32 %v18085_v42, %v16315_v23  ;;  %v18062_v23 = vld [vmem:[%s27361_s5 + $0xc0] sm:$0xff]  ;;  %v18163_v42 = vld [vmem:[%s27358_s3 + $0xaec] sm:$0xf] }
 0x60e   :  { %v9243_v62 = vadd.f32 %v9242_v47, %v8943_v15  ;;  %v18104_v15 = vld [vmem:[%s27358_s3 + $0x90c] sm:$0xf0]  ;;  %v16507_v47 = vld [vmem:[%s27358_s3 + $0x9e8] sm:$0xf] }
 0x60f   :  { %v16388_v20 = vor.u32 %v18104_v15, %v16387_v59  ;;  %v16219_v59 = vld [vmem:[%s27358_s3 + $0xaa8] sm:$0xf]  ;;  %v18157_v15 = vld [vmem:[%s27358_s3 + $0xab4] sm:$0xf0] }
 0x610   :  { %v9256_v63 = vadd.f32 %v26368_v32, %v9243_v62  ;;  %v18132_v32 = vld [vmem:[%s27358_s3 + $0x9ec] sm:$0xf0]  ;;  %v16300_v62 = vor.u32 %v18081_v51, %v16299_v12  ;;  %v16220_v12 = vor.u32 %v18157_v15, %v16219_v59  ;;  %v18159_v51 = vld [vmem:[%s27358_s3 + $0xacc] sm:$0xf]  ;;  %v16501_v59 = vld [vmem:[%s27358_s3 + $0x9f0] sm:$0xf0] }
 0x611   :  { %10321 = vmatpush.bf16.msra.mxu2 %v16324_v22  ;;  %v16500_v48 = vor.u32 %v18132_v32, %v16499_v27  ;;  %v18133_v22 = vld [vmem:[%s27358_s3 + $0x9f4] sm:$0xf0]  ;;  %v26591_v27 = vpack.c.bf16 %v24931_v36, %v24931_v36 }
 0x612   :  { %v9269_v13 = vadd.f32 %v26376_v2, %v9256_v63  ;;  %v16275_v2 = vld [vmem:[%s27358_s3 + $0x820] sm:$0xf]  ;;  %v16508_v39 = vor.u32 %v18133_v22, %v16507_v47  ;;  %v18077_v63 = vld [vmem:[%s27358_s3 + $0x834] sm:$0xf0]  ;;  %v16237_v47 = vld [vmem:[%s27358_s3 + $0xad8] sm:$0xf0] }
 0x613   :  { %v16276_v24 = vor.u32 %v18076_v1, %v16275_v2  ;;  %v16284_v32 = vor.u32 %v18077_v63, %v16283_v35  ;;  %v18125_v36 = vld [vmem:[%s27358_s3 + $0x9b4] sm:$0xf0]  ;;  %v18060_v2 = vld [vmem:[%s27361_s5 + $0xb0] sm:$0xff]  ;;  %v16240_v22 = vor.u32 %v18159_v51, %v16237_v47  ;;  %v16221_v63 = vld [vmem:[%s27358_s3 + $0xab8] sm:$0xf0] }
 0x614   :  { %v9273_v50 = vmax.f32 %v9269_v13, 0.0  ;;  %9954 = vmatmul.bf16.vlgmr.msrb.gmra.mxu2 %v26456_v57  ;;  %v18061_v13 = vld [vmem:[%s27361_s5 + $0xb8] sm:$0xff]  ;;  %v18090_v47 = vld [vmem:[%s27358_s3 + $0x8a4] sm:$0xf] }
 0x615   :  { %10322 = vmatpush.bf16.msra.mxu2 %v16308_v56  ;;  %v9244_v28 = vpop.f32.mrf.mxu1  ;;  %v16491_v56 = vld [vmem:[%s27358_s3 + $0x9c8] sm:$0xf]  ;;  %9660 = vmatpush.bf16.msrb.mxu0 %v18061_v13  ;;  %v18149_v13 = vld [vmem:[%s27358_s3 + $0xa74] sm:$0xf0] }
 0x616   :  { %v9275_v11 = vpack.c.bf16 %v9273_v50, %v9273_v50  ;;  %v16492_v50 = vor.u32 %v18129_v40, %v16491_v56  ;;  %v16267_v28 = vld [vmem:[%s27358_s3 + $0x808] sm:$0xf] }
 0x617   :  { %v16187_v40 = vld [vmem:[%s27358_s3 + $0xa68] sm:$0xf] }
 0x618   :  { %9496 = vmatmul.bf16.vlgmr.msra.gmra.mxu1 %v9275_v11  ;;  %9522 = vmatmul.bf16.vlgmr.msra.gmra.mxu3 %v9275_v11  ;;  %v18068_v11 = vld [vmem:[%s27361_s5 + $0xf0] sm:$0xff]  ;;  %v16188_v52 = vor.u32 %v18149_v13, %v16187_v40  ;;  %v18086_v40 = vld [vmem:[%s27358_s3 + $0x884] sm:$0xf] }
 0x619   :  { %10323 = vmatpush.bf16.msra.mxu2 %v16292_v55  ;;  %10331 = vmatpush.bf16.msra.mxu3 %v16500_v48  ;;  %v18073_v55 = vld [vmem:[%s27358_s3 + $0x814] sm:$0xf0]  ;;  %v16475_v48 = vld [vmem:[%s27358_s3 + $0x9a8] sm:$0xf]  ;;  %v16325_v13 = vld [vmem:[%s27358_s3 + $0x890] sm:$0xf0] }
 0x61a   :  { %v16268_v1 = vor.u32 %v18073_v55, %v16267_v28  ;;  %v16476_v60 = vor.u32 %v18125_v36, %v16475_v48  ;;  %9661 = vmatpush.bf16.msrb.mxu0 %v18060_v2  ;;  %9674 = vmatpush.bf16.msrb.mxu1 %v18068_v11  ;;  %v16171_v28 = vld [vmem:[%s27358_s3 + $0xa48] sm:$0xf]  ;;  %v18145_v48 = vld [vmem:[%s27358_s3 + $0xa54] sm:$0xf0]  ;;  %v18147_v2 = vld [vmem:[%s27358_s3 + $0xa6c] sm:$0xf] }
 0x61b   :  { %v16172_v36 = vor.u32 %v18145_v48, %v16171_v28  ;;  %v16189_v11 = vld [vmem:[%s27358_s3 + $0xa78] sm:$0xf0]  ;;  %v16469_v28 = vld [vmem:[%s27358_s3 + $0x9b0] sm:$0xf0]  ;;  %v18082_v48 = vld [vmem:[%s27358_s3 + $0x864] sm:$0xf] }
 0x61d   :  { %10324 = vmatpush.bf16.msra.mxu2 %v16276_v24  ;;  %10332 = vmatpush.bf16.msra.mxu3 %v16484_v41  ;;  %v18121_v24 = vld [vmem:[%s27358_s3 + $0x994] sm:$0xf0]  ;;  %v18059_v41 = vld [vmem:[%s27361_s5 + $0xa8] sm:$0xff] }
 0x61e   :  { %v16460_v18 = vor.u32 %v18121_v24, %v16459_v8  ;;  %9662 = vmatpush.bf16.msrb.mxu0 %v18059_v41  ;;  %9675 = vmatpush.bf16.msrb.mxu1 %v18067_v30  ;;  %v18141_v8 = vld [vmem:[%s27358_s3 + $0xa34] sm:$0xf0]  ;;  %v18143_v41 = vld [vmem:[%s27358_s3 + $0xa4c] sm:$0xf]  ;;  %v16173_v30 = vld [vmem:[%s27358_s3 + $0xa58] sm:$0xf0] }
 0x621   :  { %10325 = vmatpush.bf16.msra.mxu2 %v16260_v49  ;;  %10333 = vmatpush.bf16.msra.mxu3 %v16468_v0  ;;  %v16444_v49 = vor.u32 %v18117_v26, %v16443_v17  ;;  %v16427_v0 = vld [vmem:[%s27358_s3 + $0x948] sm:$0xf]  ;;  %v18137_v26 = vld [vmem:[%s27358_s3 + $0xa14] sm:$0xf0] }
 0x622   :  { %9663 = vmatpush.bf16.msrb.mxu0 %v18058_v10  ;;  %9676 = vmatpush.bf16.msrb.mxu1 %v18066_v45  ;;  %v16139_v17 = vld [vmem:[%s27358_s3 + $0xa08] sm:$0xf]  ;;  %v18139_v45 = vld [vmem:[%s27358_s3 + $0xa2c] sm:$0xf] }
 0x623   :  { %v16140_v10 = vor.u32 %v18137_v26, %v16139_v17  ;;  %v18114_v26 = vld [vmem:[%s27358_s3 + $0x964] sm:$0xf] }
 0x624   :  { %10326 = vmatmul.bf16.vlgmr.msra.gmra.mxu2 %v26513_v6 }
 0x625   :  { %10370 = vmatpush.bf16.msrb.mxu2 %v16380_v7  ;;  %10334 = vmatpush.bf16.msra.mxu3 %v16452_v25  ;;  %v18113_v7 = vld [vmem:[%s27358_s3 + $0x954] sm:$0xf0] }
 0x626   :  { %v16428_v3 = vor.u32 %v18113_v7, %v16427_v0  ;;  %v18109_v25 = vld [vmem:[%s27358_s3 + $0x934] sm:$0xf0]  ;;  %9664 = vmatpush.bf16.msrb.mxu0 %v18057_v4  ;;  %9677 = vmatpush.bf16.msrb.mxu1 %v18065_v58  ;;  %v18135_v7 = vld [vmem:[%s27358_s3 + $0xa0c] sm:$0xf]  ;;  %v16141_v4 = vld [vmem:[%s27358_s3 + $0xa18] sm:$0xf0] }
 0x627   :  { %v16412_v53 = vor.u32 %v18109_v25, %v16411_v61  ;;  %v16144_v58 = vor.u32 %v18135_v7, %v16141_v4 }
 0x628   :  { %9967 = vmatmul.bf16.vlgmr.msrb.gmra.mxu3 %v26456_v57 }
 0x629   :  { %10371 = vmatpush.bf16.msrb.mxu2 %v16364_v54  ;;  %10335 = vmatpush.bf16.msra.mxu3 %v16436_v33  ;;  %v18056_v54 = vld [vmem:[%s27361_s5 + $0x90] sm:$0xff]  ;;  %v18055_v33 = vld [vmem:[%s27361_s5 + $0x88] sm:$0xff] }
 0x62a   :  { %9665 = vmatpush.bf16.msrb.mxu0 %v18056_v54  ;;  %9678 = vmatpush.bf16.msrb.mxu1 %v18064_v21  ;;  %v15936_v54 = vld [vmem:[%s27357_s6 + $0x20] ss:$8 sm:$0x3] }
 0x62d   :  { %10372 = vmatpush.bf16.msrb.mxu2 %v16348_v46  ;;  %10336 = vmatpush.bf16.msra.mxu3 %v16420_v19  ;;  %v18063_v46 = vld [vmem:[%s27361_s5 + $0xc8] sm:$0xff]  ;;  %v16252_v19 = vor.u32 %v18165_v34, %v16251_v38  ;;  %v18098_v38 = vld [vmem:[%s27358_s3 + $0x8e4] sm:$0xf]  ;;  %v16373_v34 = vld [vmem:[%s27358_s3 + $0x8f0] sm:$0xf0] }
 0x62e   :  { %9666 = vmatpush.bf16.msrb.mxu0 %v18055_v33  ;;  %9679 = vmatpush.bf16.msrb.mxu1 %v18063_v46  ;;  %v9312_v33 = vperm.slane %v15936_v54, 1 }
 0x631   :  { %10373 = vmatpush.bf16.msrb.mxu2 %v16332_v37  ;;  %10337 = vmatpush.bf16.msra.mxu3 %v16404_v16  ;;  %v16235_v37 = vld [vmem:[%s27358_s3 + $0xac8] sm:$0xf]  ;;  %v16253_v16 = vld [vmem:[%s27358_s3 + $0xaf8] sm:$0xf0] }
 0x632   :  { %9667 = vmatpush.bf16.msrb.mxu0 %v18054_v44  ;;  %v16236_v14 = vor.u32 %v18161_v43, %v16235_v37  ;;  %9680 = vmatpush.bf16.msrb.mxu1 %v18062_v23  ;;  %v16357_v23 = vld [vmem:[%s27358_s3 + $0x8d0] sm:$0xf0] }
 0x635   :  { %10374 = vmatpush.bf16.msrb.mxu2 %v16316_v29  ;;  %10338 = vmatpush.bf16.msra.mxu3 %v16388_v20  ;;  %v16256_v29 = vor.u32 %v18163_v42, %v16253_v16  ;;  %v16203_v20 = vld [vmem:[%s27358_s3 + $0xa88] sm:$0xf] }
 0x636   :  { %9972 = vmatpush.bf16.msra.mxu0 %v16252_v19  ;;  %v16376_v19 = vor.u32 %v18098_v38, %v16373_v34 }
 0x637   :  { %9985 = vmatpush.bf16.msra.mxu1 %v16256_v29  ;;  %v18130_v29 = vld [vmem:[%s27358_s3 + $0x9e4] sm:$0xf] }
 0x638   :  { %10339 = vmatmul.bf16.vlgmr.msra.gmra.mxu3 %v26591_v27 }
 0x639   :  { %10375 = vmatpush.bf16.msrb.mxu2 %v16300_v62  ;;  %10383 = vmatpush.bf16.msrb.mxu3 %v16508_v39  ;;  %v18153_v62 = vld [vmem:[%s27358_s3 + $0xa94] sm:$0xf0]  ;;  %v18155_v39 = vld [vmem:[%s27358_s3 + $0xaac] sm:$0xf] }
 0x63a   :  { %9973 = vmatpush.bf16.msra.mxu0 %v16236_v14  ;;  %v16204_v35 = vor.u32 %v18153_v62, %v16203_v20  ;;  %v16224_v56 = vor.u32 %v18155_v39, %v16221_v63  ;;  %v18094_v14 = vld [vmem:[%s27358_s3 + $0x8c4] sm:$0xf]  ;;  %v16504_v62 = vor.u32 %v18130_v29, %v16501_v59  ;;  %v16485_v63 = vld [vmem:[%s27358_s3 + $0x9d0] sm:$0xf0]  ;;  %v18091_v29 = vld [vmem:[%s27358_s3 + $0x8ac] sm:$0xf] }
 0x63b   :  { %9986 = vmatpush.bf16.msra.mxu1 %v16240_v22  ;;  %v16341_v22 = vld [vmem:[%s27358_s3 + $0x8b0] sm:$0xf0]  ;;  %v16349_v59 = vld [vmem:[%s27358_s3 + $0x8b8] sm:$0xf0] }
 0x63d   :  { %10376 = vmatpush.bf16.msrb.mxu2 %v16284_v32  ;;  %10384 = vmatpush.bf16.msrb.mxu3 %v16492_v50  ;;  %v18151_v32 = vld [vmem:[%s27358_s3 + $0xa8c] sm:$0xf]  ;;  %v16205_v50 = vld [vmem:[%s27358_s3 + $0xa98] sm:$0xf0] }
 0x63e   :  { %9974 = vmatpush.bf16.msra.mxu0 %v16220_v12  ;;  %v16208_v55 = vor.u32 %v18151_v32, %v16205_v50  ;;  %v16360_v12 = vor.u32 %v18094_v14, %v16357_v23  ;;  %v18122_v50 = vld [vmem:[%s27358_s3 + $0x9a4] sm:$0xf]  ;;  %v16509_v14 = vld [vmem:[%s27358_s3 + $0x9f8] sm:$0xf0] }
 0x63f   :  { %9987 = vmatpush.bf16.msra.mxu1 %v16224_v56  ;;  %v16344_v56 = vor.u32 %v18090_v47, %v16341_v22  ;;  %v16493_v47 = vld [vmem:[%s27358_s3 + $0x9d8] sm:$0xf0]  ;;  %v16352_v22 = vor.u32 %v18091_v29, %v16349_v59  ;;  %v18071_v59 = vld [vmem:[%s27358_s3 + $0x80c] sm:$0xf] }
 0x641   :  { %10377 = vmatpush.bf16.msrb.mxu2 %v16268_v1  ;;  %10385 = vmatpush.bf16.msrb.mxu3 %v16476_v60  ;;  %v16192_v1 = vor.u32 %v18147_v2, %v16189_v11  ;;  %v16155_v60 = vld [vmem:[%s27358_s3 + $0xa28] sm:$0xf]  ;;  %v16472_v11 = vor.u32 %v18122_v50, %v16469_v28  ;;  %v18083_v28 = vld [vmem:[%s27358_s3 + $0x86c] sm:$0xf] }
 0x642   :  { %9975 = vmatpush.bf16.msra.mxu0 %v16204_v35  ;;  %v16156_v24 = vor.u32 %v18141_v8, %v16155_v60  ;;  %v18126_v35 = vld [vmem:[%s27358_s3 + $0x9c4] sm:$0xf]  ;;  %v16453_v8 = vld [vmem:[%s27358_s3 + $0x990] sm:$0xf0] }
 0x643   :  { %9988 = vmatpush.bf16.msra.mxu1 %v16208_v55  ;;  %v16488_v32 = vor.u32 %v18126_v35, %v16485_v63  ;;  %v16328_v55 = vor.u32 %v18086_v40, %v16325_v13  ;;  %v18118_v60 = vld [vmem:[%s27358_s3 + $0x984] sm:$0xf]  ;;  %v16627_v35 = vld [vmem:[%s27358_s3 + $0xbe0] sm:$0xf]  ;;  %v18196_v63 = vld [vmem:[%s27358_s3 + $0xbec] sm:$0xf0] }
 0x644   :  { %10378 = vmatmul.bf16.vlgmr.msrb.gmra.mxu2 %v26513_v6  ;;  %v16456_v17 = vor.u32 %v18118_v60, %v16453_v8  ;;  %v18123_v40 = vld [vmem:[%s27358_s3 + $0x9ac] sm:$0xf]  ;;  %v16477_v13 = vld [vmem:[%s27358_s3 + $0x9b8] sm:$0xf0]  ;;  %v16613_v60 = vld [vmem:[%s27358_s3 + $0xbd0] sm:$0xf0] }
 0x645   :  { %10386 = vmatpush.bf16.msrb.mxu3 %v16460_v18  ;;  %v16176_v18 = vor.u32 %v18143_v41, %v16173_v30  ;;  %v18078_v41 = vld [vmem:[%s27358_s3 + $0x844] sm:$0xf]  ;;  %v16293_v30 = vld [vmem:[%s27358_s3 + $0x850] sm:$0xf0] }
 0x646   :  { %9976 = vmatpush.bf16.msra.mxu0 %v16188_v52 }
 0x647   :  { %9989 = vmatpush.bf16.msra.mxu1 %v16192_v1 }
 0x649   :  { %10387 = vmatpush.bf16.msrb.mxu3 %v16444_v49  ;;  %v16157_v49 = vld [vmem:[%s27358_s3 + $0xa38] sm:$0xf0] }
 0x64a   :  { %9977 = vmatpush.bf16.msra.mxu0 %v16172_v36  ;;  %v16160_v0 = vor.u32 %v18139_v45, %v16157_v49  ;;  %v16309_v36 = vld [vmem:[%s27358_s3 + $0x870] sm:$0xf0]  ;;  %v16296_v45 = vor.u32 %v18078_v41, %v16293_v30  ;;  %v18074_v49 = vld [vmem:[%s27358_s3 + $0x824] sm:$0xf]  ;;  %v18119_v41 = vld [vmem:[%s27358_s3 + $0x98c] sm:$0xf] }
 0x64b   :  { %9990 = vmatpush.bf16.msra.mxu1 %v16176_v18 }
 0x64d   :  { %10388 = vmatpush.bf16.msrb.mxu3 %v16428_v3 }
 0x64e   :  { %9978 = vmatpush.bf16.msra.mxu0 %v16156_v24  ;;  %v16312_v24 = vor.u32 %v18082_v48, %v16309_v36  ;;  %v16611_v36 = vld [vmem:[%s27358_s3 + $0xbc0] sm:$0xf] }
 0x64f   :  { %9991 = vmatpush.bf16.msra.mxu1 %v16160_v0  ;;  %v16277_v0 = vld [vmem:[%s27358_s3 + $0x830] sm:$0xf0] }
 0x651   :  { %10389 = vmatpush.bf16.msrb.mxu3 %v16412_v53  ;;  %v9311_v53 = vperm.slane %v15936_v54, 0  ;;  %v16261_v54 = vld [vmem:[%s27358_s3 + $0x810] sm:$0xf0] }
 0x652   :  { %9979 = vmatpush.bf16.msra.mxu0 %v16140_v10  ;;  %v16437_v10 = vld [vmem:[%s27358_s3 + $0x970] sm:$0xf0] }
 0x653   :  { %9992 = vmatpush.bf16.msra.mxu1 %v16144_v58  ;;  %v16440_v4 = vor.u32 %v18114_v26, %v16437_v10  ;;  %v18110_v58 = vld [vmem:[%s27358_s3 + $0x944] sm:$0xf]  ;;  %v16461_v26 = vld [vmem:[%s27358_s3 + $0x998] sm:$0xf0]  ;;  %v16595_v10 = vld [vmem:[%s27358_s3 + $0xba0] sm:$0xf] }
 0x655   :  { %10390 = vmatpush.bf16.msrb.mxu3 %v16396_v31 }
 0x658   :  { %10391 = vmatmul.bf16.vlgmr.msrb.gmra.mxu3 %v26591_v27 }
 0x681   :  { %v9484_v3 = vpop.f32.mrf.mxu0 }
 0x682   :  { %v9485_v5 = vadd.f32 %v9484_v3, %v9311_v53  ;;  %v16421_v3 = vld [vmem:[%s27358_s3 + $0x950] sm:$0xf0] }
 0x683   :  { %v16424_v53 = vor.u32 %v18110_v58, %v16421_v3  ;;  %v16301_v58 = vld [vmem:[%s27358_s3 + $0x858] sm:$0xf0] }
 0x687   :  { %v9510_v61 = vpop.f32.mrf.mxu2 }
 0x688   :  { %v9511_v37 = vadd.f32 %v9510_v61, %v9312_v33  ;;  %v16280_v61 = vor.u32 %v18074_v49, %v16277_v0  ;;  %v16405_v33 = vld [vmem:[%s27358_s3 + $0x930] sm:$0xf0]  ;;  %v18186_v0 = vld [vmem:[%s27358_s3 + $0xba4] sm:$0xf] }
 0x689   :  { %v9486_v25 = vpop.f32.mrf.mxu0 }
 0x68a   :  { %v18070_v25 = vld [vmem:[%s27358_s3 + $0x804] sm:$0xf] }
 0x68f   :  { %v9512_v21 = vpop.f32.mrf.mxu2 }
 0x695   :  { %v9497_v9 = vpop.f32.mrf.mxu1 }
 0x696   :  { %v9498_v46 = vadd.f32 %v9497_v9, %v9485_v5  ;;  %v18099_v5 = vld [vmem:[%s27358_s3 + $0x8ec] sm:$0xf]  ;;  %v16381_v9 = vld [vmem:[%s27358_s3 + $0x8f8] sm:$0xf0] }
 0x697   :  { %v9955_v31 = vpop.f32.mrf.mxu2  ;;  %v16384_v38 = vor.u32 %v18099_v5, %v16381_v9  ;;  %v16445_v5 = vld [vmem:[%s27358_s3 + $0x978] sm:$0xf0]  ;;  %v18182_v9 = vld [vmem:[%s27358_s3 + $0xb84] sm:$0xf] }
 0x698   :  { %v9527_v44 = vmax.f32 %v9498_v46, 0.0  ;;  %v16264_v46 = vor.u32 %v18070_v25, %v16261_v54  ;;  %v18115_v25 = vld [vmem:[%s27358_s3 + $0x96c] sm:$0xf] }
 0x69a   :  { %v9529_v43 = vpack.c.bf16 %v9527_v44, %v9527_v44  ;;  %v16365_v44 = vld [vmem:[%s27358_s3 + $0x8d8] sm:$0xf0] }
 0x69b   :  { %v9523_v42 = vpop.f32.mrf.mxu3 }
 0x69c   :  { %v9524_v16 = vadd.f32 %v9523_v42, %v9511_v37  ;;  %9668 = vmatmul.bf16.vlgmr.msrb.gmra.mxu0 %v9529_v43  ;;  %v16389_v37 = vld [vmem:[%s27358_s3 + $0x910] sm:$0xf0]  ;;  %v18131_v43 = vld [vmem:[%s27358_s3 + $0x9ec] sm:$0xf] }
 0x69d   :  { %10344 = vmatpush.bf16.msrb.mxu0 %v16376_v19  ;;  %v9499_v15 = vpop.f32.mrf.mxu1  ;;  %v18102_v19 = vld [vmem:[%s27358_s3 + $0x904] sm:$0xf] }
 0x69e   :  { %v9528_v51 = vmax.f32 %v9524_v16, 0.0  ;;  %v16392_v16 = vor.u32 %v18102_v19, %v16389_v37  ;;  %v18111_v19 = vld [vmem:[%s27358_s3 + $0x94c] sm:$0xf] }
 0x69f   :  { %v9957_v20 = vpop.f32.mrf.mxu2 }
 0x6a0   :  { %v9530_v39 = vpack.c.bf16 %v9528_v51, %v9528_v51  ;;  %v18127_v51 = vld [vmem:[%s27358_s3 + $0x9cc] sm:$0xf] }
 0x6a1   :  { %10345 = vmatpush.bf16.msrb.mxu0 %v16360_v12  ;;  %v16512_v12 = vor.u32 %v18131_v43, %v16509_v14  ;;  %v18087_v20 = vld [vmem:[%s27358_s3 + $0x88c] sm:$0xf]  ;;  %v16563_v43 = vld [vmem:[%s27358_s3 + $0xb60] sm:$0xf]  ;;  %v18180_v14 = vld [vmem:[%s27358_s3 + $0xb6c] sm:$0xf0] }
 0x6a2   :  { %9681 = vmatmul.bf16.vlgmr.msrb.gmra.mxu1 %v9530_v39  ;;  %v16496_v39 = vor.u32 %v18127_v51, %v16493_v47  ;;  %v16564_v51 = vor.u32 %v18180_v14, %v16563_v43  ;;  %v16531_v14 = vld [vmem:[%s27358_s3 + $0xb20] sm:$0xf] }
 0x6a3   :  { %10357 = vmatpush.bf16.msrb.mxu1 %v16504_v62  ;;  %v9525_v52 = vpop.f32.mrf.mxu3  ;;  %v16333_v62 = vld [vmem:[%s27358_s3 + $0x898] sm:$0xf0] }
 0x6a4   :  { %v16628_v52 = vor.u32 %v18196_v63, %v16627_v35  ;;  %v16336_v50 = vor.u32 %v18087_v20, %v16333_v62  ;;  %v18197_v20 = vld [vmem:[%s27358_s3 + $0xbf4] sm:$0xf0]  ;;  %v16413_v35 = vld [vmem:[%s27358_s3 + $0x938] sm:$0xf0] }
 0x6a5   :  { %10346 = vmatpush.bf16.msrb.mxu0 %v16344_v56  ;;  %v18194_v56 = vld [vmem:[%s27358_s3 + $0xbe4] sm:$0xf] }
 0x6a6   :  { %10615 = vmatpush.bf16.msra.mxu2 %v16628_v52  ;;  %v18193_v52 = vld [vmem:[%s27358_s3 + $0xbd4] sm:$0xf0] }
 0x6a7   :  { %10358 = vmatpush.bf16.msrb.mxu1 %v16488_v32  ;;  %v10327_v2 = vpop.f32.mrf.mxu2  ;;  %v16629_v32 = vld [vmem:[%s27358_s3 + $0xbf0] sm:$0xf0] }
 0x6a8   :  { %v10328_v1 = vadd.f32 %v10327_v2, %v9955_v31  ;;  %v18095_v31 = vld [vmem:[%s27358_s3 + $0x8cc] sm:$0xf]  ;;  %v16632_v48 = vor.u32 %v18194_v56, %v16629_v32 }
 0x6a9   :  { %10347 = vmatpush.bf16.msrb.mxu0 %v16328_v55  ;;  %v16368_v23 = vor.u32 %v18095_v31, %v16365_v44  ;;  %v16317_v55 = vld [vmem:[%s27358_s3 + $0x878] sm:$0xf0]  ;;  %v16448_v44 = vor.u32 %v18115_v25, %v16445_v5  ;;  %v18103_v32 = vld [vmem:[%s27358_s3 + $0x90c] sm:$0xf]  ;;  %v16547_v5 = vld [vmem:[%s27358_s3 + $0xb40] sm:$0xf] }
 0x6aa   :  { %10628 = vmatpush.bf16.msra.mxu3 %v16632_v48  ;;  %v16320_v49 = vor.u32 %v18083_v28, %v16317_v55  ;;  %v18195_v28 = vld [vmem:[%s27358_s3 + $0xbec] sm:$0xf]  ;;  %v16637_v55 = vld [vmem:[%s27358_s3 + $0xbf8] sm:$0xf0] }
 0x6ab   :  { %10359 = vmatpush.bf16.msrb.mxu1 %v16472_v11  ;;  %v26839_v18 = vpop.f32.mrf.mxu3  ;;  %v18192_v11 = vld [vmem:[%s27358_s3 + $0xbcc] sm:$0xf0] }
 0x6ac   :  { %9980 = vmatmul.bf16.vlgmr.msra.gmra.mxu0 %v26456_v57  ;;  %v16612_v30 = vor.u32 %v18192_v11, %v16611_v36  ;;  %v16603_v11 = vld [vmem:[%s27358_s3 + $0xba8] sm:$0xf] }
 0x6ad   :  { %10348 = vmatpush.bf16.msrb.mxu0 %v16312_v24  ;;  %v16480_v24 = vor.u32 %v18123_v40, %v16477_v13  ;;  %v16619_v13 = vld [vmem:[%s27358_s3 + $0xbc8] sm:$0xf] }
 0x6ae   :  { %10616 = vmatpush.bf16.msra.mxu2 %v16612_v30  ;;  %v16620_v48 = vor.u32 %v18193_v52, %v16619_v13  ;;  %v16523_v13 = vld [vmem:[%s27358_s3 + $0xb08] sm:$0xf]  ;;  %v18169_v52 = vld [vmem:[%s27358_s3 + $0xb14] sm:$0xf0] }
 0x6af   :  { %10360 = vmatpush.bf16.msrb.mxu1 %v16456_v17  ;;  %v10329_v7 = vpop.f32.mrf.mxu2 }
 0x6b0   :  { %v16597_v7 = vld [vmem:[%s27358_s3 + $0xbb0] sm:$0xf0] }
 0x6b1   :  { %10349 = vmatpush.bf16.msrb.mxu0 %v16296_v45  ;;  %v18188_v45 = vld [vmem:[%s27358_s3 + $0xbac] sm:$0xf0]  ;;  %v16600_v54 = vor.u32 %v18186_v0, %v16597_v7  ;;  %v16571_v7 = vld [vmem:[%s27358_s3 + $0xb68] sm:$0xf] }
 0x6b2   :  { %9993 = vmatmul.bf16.vlgmr.msra.gmra.mxu1 %v26456_v57  ;;  %v18106_v57 = vld [vmem:[%s27358_s3 + $0x924] sm:$0xf]  ;;  %v16596_v3 = vor.u32 %v18188_v45, %v16595_v10  ;;  %v18187_v10 = vld [vmem:[%s27358_s3 + $0xbac] sm:$0xf]  ;;  %v16605_v45 = vld [vmem:[%s27358_s3 + $0xbb8] sm:$0xf0] }
 0x6b3   :  { %10361 = vmatpush.bf16.msrb.mxu1 %v16440_v4  ;;  %v9970_v21 = vpop.f32.mrf.mxu3  ;;  %v16408_v34 = vor.u32 %v18106_v57, %v16405_v33  ;;  %v18079_v4 = vld [vmem:[%s27358_s3 + $0x84c] sm:$0xf]  ;;  %v16581_v57 = vld [vmem:[%s27358_s3 + $0xb90] sm:$0xf0] }
 0x6b4   :  { %v16579_v21 = vld [vmem:[%s27358_s3 + $0xb80] sm:$0xf]  ;;  %v16304_v33 = vor.u32 %v18079_v4, %v16301_v58  ;;  %10617 = vmatpush.bf16.msra.mxu2 %v16596_v3  ;;  %v16584_v37 = vor.u32 %v18182_v9, %v16581_v57  ;;  %v18181_v4 = vld [vmem:[%s27358_s3 + $0xb74] sm:$0xf0]  ;;  %v16608_v58 = vor.u32 %v18187_v10, %v16605_v45  ;;  %v18183_v3 = vld [vmem:[%s27358_s3 + $0xb8c] sm:$0xf] }
 0x6b5   :  { %10350 = vmatpush.bf16.msrb.mxu0 %v16280_v61  ;;  %v16464_v61 = vor.u32 %v18119_v41, %v16461_v26  ;;  %v16621_v41 = vld [vmem:[%s27358_s3 + $0xbd8] sm:$0xf0]  ;;  %v18176_v9 = vld [vmem:[%s27358_s3 + $0xb4c] sm:$0xf0]  ;;  %v18174_v57 = vld [vmem:[%s27358_s3 + $0xb44] sm:$0xf] }
 0x6b7   :  { %10362 = vmatpush.bf16.msrb.mxu1 %v16424_v53  ;;  %v18184_v53 = vld [vmem:[%s27358_s3 + $0xb8c] sm:$0xf0] }
 0x6b9   :  { %10351 = vmatpush.bf16.msrb.mxu0 %v16264_v46  ;;  %v18075_v46 = vld [vmem:[%s27358_s3 + $0x82c] sm:$0xf] }
 0x6bb   :  { %10363 = vmatpush.bf16.msrb.mxu1 %v16408_v34  ;;  %v10340_v42 = vpop.f32.mrf.mxu3  ;;  %v16580_v34 = vor.u32 %v18184_v53, %v16579_v21  ;;  %v16573_v21 = vld [vmem:[%s27358_s3 + $0xb78] sm:$0xf0] }
 0x6bc   :  { %v26903_v15 = vadd.f32 %v10340_v42, %v10328_v1  ;;  %10352 = vmatmul.bf16.vlgmr.msrb.gmra.mxu0 %v26513_v6  ;;  %v18190_v1 = vld [vmem:[%s27358_s3 + $0xbc4] sm:$0xf] }
 0x6bd   :  { %10396 = vmatpush.bf16.msra.mxu0 %v16384_v38  ;;  %v16616_v17 = vor.u32 %v18190_v1, %v16613_v60  ;;  %v16285_v38 = vld [vmem:[%s27358_s3 + $0x838] sm:$0xf0]  ;;  %v18178_v42 = vld [vmem:[%s27358_s3 + $0xb64] sm:$0xf]  ;;  %10618 = vmatpush.bf16.msra.mxu2 %v16580_v34  ;;  %v18189_v1 = vld [vmem:[%s27358_s3 + $0xbb4] sm:$0xf0]  ;;  %v16640_v60 = vor.u32 %v18195_v28, %v16637_v55 }
 0x6be   :  { %v16288_v29 = vor.u32 %v18075_v46, %v16285_v38  ;;  %v16604_v30 = vor.u32 %v18189_v1, %v16603_v11  ;;  %v16549_v46 = vld [vmem:[%s27358_s3 + $0xb50] sm:$0xf0]  ;;  %v16555_v38 = vld [vmem:[%s27358_s3 + $0xb48] sm:$0xf]  ;;  %v18177_v34 = vld [vmem:[%s27358_s3 + $0xb54] sm:$0xf0] }
 0x6bf   :  { %10364 = vmatpush.bf16.msrb.mxu1 %v16392_v16  ;;  %10629 = vmatpush.bf16.msra.mxu3 %v16616_v17  ;;  %v16565_v16 = vld [vmem:[%s27358_s3 + $0xb70] sm:$0xf0]  ;;  %v16587_v17 = vld [vmem:[%s27358_s3 + $0xb88] sm:$0xf]  ;;  %v18167_v28 = vld [vmem:[%s27358_s3 + $0xb0c] sm:$0xf] }
 0x6c0   :  { %v16568_v62 = vor.u32 %v18178_v42, %v16565_v16  ;;  %v18170_v42 = vld [vmem:[%s27358_s3 + $0xb24] sm:$0xf]  ;;  %v16525_v55 = vld [vmem:[%s27358_s3 + $0xb18] sm:$0xf0]  ;;  %v9563_v11 = vld [vmem:[%s27357_s6 + $0x21] ss:$0 sm:$0xff] }
 0x6c1   :  { %10397 = vmatpush.bf16.msra.mxu0 %v16368_v23  ;;  %v16429_v23 = vld [vmem:[%s27358_s3 + $0x958] sm:$0xf0]  ;;  %10619 = vmatpush.bf16.msra.mxu2 %v16564_v51 }
 0x6c2   :  { %10365 = vmatmul.bf16.vlgmr.msrb.gmra.mxu1 %v26591_v27  ;;  %v16432_v47 = vor.u32 %v18111_v19, %v16429_v23  ;;  %v18175_v19 = vld [vmem:[%s27358_s3 + $0xb4c] sm:$0xf]  ;;  %v18172_v23 = vld [vmem:[%s27358_s3 + $0xb2c] sm:$0xf0] }
 0x6c3   :  { %10409 = vmatpush.bf16.msra.mxu1 %v16512_v12  ;;  %v10342_v2 = vpop.f32.mrf.mxu3  ;;  %10630 = vmatpush.bf16.msra.mxu3 %v16600_v54  ;;  %v16269_v12 = vld [vmem:[%s27358_s3 + $0x818] sm:$0xf0]  ;;  %v18179_v54 = vld [vmem:[%s27358_s3 + $0xb6c] sm:$0xf]  ;;  %v16532_v16 = vor.u32 %v18172_v23, %v16531_v14  ;;  %v18216_v23 = vld [vmem:[%s27361_s5 + $0x190] sm:$0xff] }
 0x6c4   :  { %v16272_v63 = vor.u32 %v18071_v59, %v16269_v12  ;;  %v16576_v53 = vor.u32 %v18179_v54, %v16573_v21  ;;  %v16539_v59 = vld [vmem:[%s27358_s3 + $0xb28] sm:$0xf]  ;;  %v18173_v12 = vld [vmem:[%s27358_s3 + $0xb34] sm:$0xf0]  ;;  %v18220_v54 = vld [vmem:[%s27361_s5 + $0x1b0] sm:$0xff] }
 0x6c5   :  { %10398 = vmatpush.bf16.msra.mxu0 %v16352_v22  ;;  %v16635_v22 = vld [vmem:[%s27358_s3 + $0xbe8] sm:$0xf]  ;;  %v18228_v21 = vld [vmem:[%s27361_s5 + $0x1f0] sm:$0xff] }
 0x6c6   :  { %v16636_v56 = vor.u32 %v18197_v20, %v16635_v22  ;;  %v18171_v22 = vld [vmem:[%s27358_s3 + $0xb2c] sm:$0xf]  ;;  %v16541_v20 = vld [vmem:[%s27358_s3 + $0xb38] sm:$0xf0] }
 0x6c7   :  { %v26955_v8 = vpop.f32.mrf.mxu2  ;;  %10410 = vmatpush.bf16.msra.mxu1 %v16496_v39  ;;  %10631 = vmatpush.bf16.msra.mxu3 %v16584_v37  ;;  %v18107_v39 = vld [vmem:[%s27358_s3 + $0x92c] sm:$0xf]  ;;  %v16557_v37 = vld [vmem:[%s27358_s3 + $0xb58] sm:$0xf0] }
 0x6c8   :  { %v16416_v40 = vor.u32 %v18107_v39, %v16413_v35  ;;  %v16560_v43 = vor.u32 %v18175_v19, %v16557_v37  ;;  %v16515_v39 = vld [vmem:[%s27358_s3 + $0xb00] sm:$0xf]  ;;  %v18168_v35 = vld [vmem:[%s27358_s3 + $0xb0c] sm:$0xf0]  ;;  %v18217_v37 = vld [vmem:[%s27361_s5 + $0x198] sm:$0xff] }
 0x6c9   :  { %10399 = vmatpush.bf16.msra.mxu0 %v16336_v50  ;;  %v16397_v50 = vld [vmem:[%s27358_s3 + $0x918] sm:$0xf0]  ;;  %v18210_v19 = vld [vmem:[%s27361_s5 + $0x160] sm:$0xff] }
 0x6ca   :  { %v16400_v2 = vor.u32 %v18103_v32, %v16397_v50  ;;  %v16524_v50 = vor.u32 %v18169_v52, %v16523_v13  ;;  %v18207_v13 = vld [vmem:[%s27361_s5 + $0x148] sm:$0xff]  ;;  %v18198_v52 = vld [vmem:[%s27361_s5 + $0x100] sm:$0xff] }
 0x6cb   :  { %10411 = vmatpush.bf16.msra.mxu1 %v16480_v24  ;;  %10632 = vmatpush.bf16.msra.mxu3 %v16568_v62  ;;  %v18191_v24 = vld [vmem:[%s27358_s3 + $0xbcc] sm:$0xf]  ;;  %v16544_v62 = vor.u32 %v18171_v22, %v16541_v20  ;;  %v18209_v22 = vld [vmem:[%s27361_s5 + $0x158] sm:$0xff] }
 0x6cc   :  { %v16624_v26 = vor.u32 %v18191_v24, %v16621_v41  ;;  %v18215_v20 = vld [vmem:[%s27361_s5 + $0x188] sm:$0xff] }
 0x6cd   :  { %10400 = vmatpush.bf16.msra.mxu0 %v16320_v49 }
 0x6cf   :  { %v10381_v31 = vpop.f32.mrf.mxu2  ;;  %10412 = vmatpush.bf16.msra.mxu1 %v16464_v61  ;;  %v16572_v61 = vor.u32 %v18181_v4, %v16571_v7 }
 0x6d0   :  { %v16552_v31 = vor.u32 %v18174_v57, %v16549_v46  ;;  %v18219_v57 = vld [vmem:[%s27361_s5 + $0x1a8] sm:$0xff] }
 0x6d1   :  { %10401 = vmatpush.bf16.msra.mxu0 %v16304_v33  ;;  %v16548_v33 = vor.u32 %v18176_v9, %v16547_v5  ;;  %v18204_v5 = vld [vmem:[%s27361_s5 + $0x130] sm:$0xff]  ;;  %v18203_v46 = vld [vmem:[%s27361_s5 + $0x128] sm:$0xff] }
 0x6d2   :  { %10633 = vmatpush.bf16.msra.mxu3 %v16552_v31  ;;  %v18212_v9 = vld [vmem:[%s27361_s5 + $0x170] sm:$0xff]  ;;  %v18226_v31 = vld [vmem:[%s27361_s5 + $0x1e0] sm:$0xff] }
 0x6d3   :  { %10413 = vmatpush.bf16.msra.mxu1 %v16448_v44  ;;  %v16556_v44 = vor.u32 %v18177_v34, %v16555_v38  ;;  %10620 = vmatpush.bf16.msra.mxu2 %v16548_v33  ;;  %v18227_v33 = vld [vmem:[%s27361_s5 + $0x1e8] sm:$0xff]  ;;  %v18218_v34 = vld [vmem:[%s27361_s5 + $0x1a0] sm:$0xff] }
 0x6d4   :  { %v18211_v38 = vld [vmem:[%s27361_s5 + $0x168] sm:$0xff] }
 0x6d5   :  { %10402 = vmatpush.bf16.msra.mxu0 %v16288_v29  ;;  %v16533_v29 = vld [vmem:[%s27358_s3 + $0xb30] sm:$0xf0] }
 0x6d6   :  { %v16536_v51 = vor.u32 %v18170_v42, %v16533_v29  ;;  %v18224_v42 = vld [vmem:[%s27361_s5 + $0x1d0] sm:$0xff] }
 0x6d7   :  { %10414 = vmatpush.bf16.msra.mxu1 %v16432_v47  ;;  %v16540_v47 = vor.u32 %v18173_v12, %v16539_v59  ;;  %10621 = vmatpush.bf16.msra.mxu2 %v16532_v16 }
 0x6d8   :  { %10634 = vmatpush.bf16.msra.mxu3 %v16536_v51 }
 0x6d9   :  { %10403 = vmatpush.bf16.msra.mxu0 %v16272_v63  ;;  %v18166_v63 = vld [vmem:[%s27358_s3 + $0xb04] sm:$0xf] }
 0x6db   :  { %v27059_v36 = vpop.f32.mrf.mxu3  ;;  %10415 = vmatpush.bf16.msra.mxu1 %v16416_v40  ;;  %v16517_v40 = vld [vmem:[%s27358_s3 + $0xb10] sm:$0xf0] }
 0x6dc   :  { %10404 = vmatmul.bf16.vlgmr.msra.gmra.mxu0 %v26513_v6  ;;  %v18185_v6 = vld [vmem:[%s27358_s3 + $0xb94] sm:$0xf0]  ;;  %v16520_v32 = vor.u32 %v18166_v63, %v16517_v40  ;;  %v18214_v63 = vld [vmem:[%s27361_s5 + $0x180] sm:$0xff]  ;;  %v18199_v40 = vld [vmem:[%s27361_s5 + $0x108] sm:$0xff] }
 0x6dd   :  { %10641 = vmatpush.bf16.msrb.mxu0 %v16636_v56  ;;  %v16588_v49 = vor.u32 %v18185_v6, %v16587_v17  ;;  %v16516_v56 = vor.u32 %v18168_v35, %v16515_v39  ;;  %v18200_v39 = vld [vmem:[%s27361_s5 + $0x110] sm:$0xff] }
 0x6de   :  { %10635 = vmatpush.bf16.msra.mxu3 %v16520_v32  ;;  %v18208_v35 = vld [vmem:[%s27361_s5 + $0x150] sm:$0xff]  ;;  %v18206_v32 = vld [vmem:[%s27361_s5 + $0x140] sm:$0xff] }
 0x6df   :  { %10416 = vmatpush.bf16.msra.mxu1 %v16400_v2  ;;  %10622 = vmatpush.bf16.msra.mxu2 %v16516_v56  ;;  %v18222_v56 = vld [vmem:[%s27361_s5 + $0x1c0] sm:$0xff] }
 0x6e1   :  { %10642 = vmatpush.bf16.msrb.mxu0 %v16620_v48  ;;  %v16528_v48 = vor.u32 %v18167_v28, %v16525_v55  ;;  %v18236_v28 = vld [vmem:[%s27361_s5 + $0x230] sm:$0xff] }
 0x6e2   :  { %10417 = vmatmul.bf16.vlgmr.msra.gmra.mxu1 %v26591_v27  ;;  %v16589_v27 = vld [vmem:[%s27358_s3 + $0xb98] sm:$0xf0] }
 0x6e3   :  { %10654 = vmatpush.bf16.msrb.mxu1 %v16640_v60  ;;  %v10394_v0 = vpop.f32.mrf.mxu3  ;;  %v16592_v25 = vor.u32 %v18183_v3, %v16589_v27  ;;  %v18221_v27 = vld [vmem:[%s27361_s5 + $0x1b8] sm:$0xff] }
 0x6e5   :  { %10643 = vmatpush.bf16.msrb.mxu0 %v16604_v30 }
 0x6e7   :  { %10655 = vmatpush.bf16.msrb.mxu1 %v16624_v26 }
 0x6e9   :  { %10644 = vmatpush.bf16.msrb.mxu0 %v16588_v49 }
 0x6eb   :  { %10656 = vmatpush.bf16.msrb.mxu1 %v16608_v58 }
 0x6ed   :  { %10645 = vmatpush.bf16.msrb.mxu0 %v16572_v61  ;;  %v18229_v61 = vld [vmem:[%s27361_s5 + $0x1f8] sm:$0xff] }
 0x6ef   :  { %10657 = vmatpush.bf16.msrb.mxu1 %v16592_v25  ;;  %v18205_v25 = vld [vmem:[%s27361_s5 + $0x138] sm:$0xff] }
 0x6f0   :  { %10951 = vmatpush.bf16.msrb.mxu2 %v18205_v25 }
 0x6f1   :  { %10646 = vmatpush.bf16.msrb.mxu0 %v16556_v44  ;;  %v18202_v44 = vld [vmem:[%s27361_s5 + $0x120] sm:$0xff] }
 0x6f3   :  { %10658 = vmatpush.bf16.msrb.mxu1 %v16576_v53 }
 0x6f4   :  { %10952 = vmatpush.bf16.msrb.mxu2 %v18204_v5 }
 0x6f5   :  { %10647 = vmatpush.bf16.msrb.mxu0 %v16540_v47  ;;  %v18201_v47 = vld [vmem:[%s27361_s5 + $0x118] sm:$0xff] }
 0x6f7   :  { %10659 = vmatpush.bf16.msrb.mxu1 %v16560_v43  ;;  %v18225_v43 = vld [vmem:[%s27361_s5 + $0x1d8] sm:$0xff] }
 0x6f8   :  { %10953 = vmatpush.bf16.msrb.mxu2 %v18203_v46  ;;  %v18232_v46 = vld [vmem:[%s27361_s5 + $0x210] sm:$0xff] }
 0x6f9   :  { %10648 = vmatpush.bf16.msrb.mxu0 %v16524_v50  ;;  %v18237_v50 = vld [vmem:[%s27361_s5 + $0x238] sm:$0xff] }
 0x6fb   :  { %10660 = vmatpush.bf16.msrb.mxu1 %v16544_v62  ;;  %v18223_v62 = vld [vmem:[%s27361_s5 + $0x1c8] sm:$0xff] }
 0x6fc   :  { %10954 = vmatpush.bf16.msrb.mxu2 %v18202_v44  ;;  %v18244_v44 = vld [vmem:[%s27361_s5 + $0x270] sm:$0xff] }
 0x6fd   :  { %10977 = vmatpush.bf16.msra.mxu0 %v18221_v27 }
 0x6ff   :  { %10661 = vmatpush.bf16.msrb.mxu1 %v16528_v48  ;;  %v16641_v48 = vld [vmem:[%s27357_s6 + $0x22] ss:$8 sm:$0xf] }
 0x700   :  { %10955 = vmatpush.bf16.msrb.mxu2 %v18201_v47 }
 0x701   :  { %10978 = vmatpush.bf16.msra.mxu0 %v18220_v54 }
 0x703   :  { %10990 = vmatpush.bf16.msra.mxu1 %v18229_v61 }
 0x704   :  { %10956 = vmatpush.bf16.msrb.mxu2 %v18200_v39 }
 0x705   :  { %10979 = vmatpush.bf16.msra.mxu0 %v18219_v57 }
 0x707   :  { %10991 = vmatpush.bf16.msra.mxu1 %v18228_v21 }
 0x708   :  { %10957 = vmatpush.bf16.msrb.mxu2 %v18199_v40  ;;  %v18239_v40 = vld [vmem:[%s27361_s5 + $0x248] sm:$0xff] }
 0x709   :  { %10980 = vmatpush.bf16.msra.mxu0 %v18218_v34  ;;  %v18230_v34 = vld [vmem:[%s27361_s5 + $0x200] sm:$0xff] }
 0x70b   :  { %10992 = vmatpush.bf16.msra.mxu1 %v18227_v33  ;;  %v18233_v33 = vld [vmem:[%s27361_s5 + $0x218] sm:$0xff] }
 0x70c   :  { %10958 = vmatpush.bf16.msrb.mxu2 %v18198_v52  ;;  %v11021_v52 = vld [vmem:[%s27357_s6 + $0x24] ss:$0 sm:$0xff] }
 0x70d   :  { %10981 = vmatpush.bf16.msra.mxu0 %v18217_v37 }
 0x70f   :  { %10993 = vmatpush.bf16.msra.mxu1 %v18226_v31  ;;  %v18245_v31 = vld [vmem:[%s27361_s5 + $0x278] sm:$0xff] }
 0x711   :  { %10982 = vmatpush.bf16.msra.mxu0 %v18216_v23  ;;  %v18241_v23 = vld [vmem:[%s27361_s5 + $0x258] sm:$0xff] }
 0x713   :  { %10994 = vmatpush.bf16.msra.mxu1 %v18225_v43 }
 0x715   :  { %10983 = vmatpush.bf16.msra.mxu0 %v18215_v20 }
 0x717   :  { %10995 = vmatpush.bf16.msra.mxu1 %v18224_v42 }
 0x719   :  { %v9669_v2 = vpop.f32.mrf.mxu0  ;;  %10984 = vmatpush.bf16.msra.mxu0 %v18214_v63 }
 0x71a   :  { %v9670_v1 = vadd.f32 %v9669_v2, %v9563_v11  ;;  %v10676_v11 = vperm.slane %v16641_v48, 2 }
 0x71b   :  { %10996 = vmatpush.bf16.msra.mxu1 %v18223_v62 }
 0x71f   :  { %v9682_v60 = vpop.f32.mrf.mxu1  ;;  %10997 = vmatpush.bf16.msra.mxu1 %v18222_v56 }
 0x720   :  { %v9683_v24 = vadd.f32 %v9682_v60, %v9670_v1  ;;  %v10677_v1 = vperm.slane %v16641_v48, 3 }
 0x721   :  { %v9671_v41 = vpop.f32.mrf.mxu0 }
 0x722   :  { %v9686_v30 = vmax.f32 %v9683_v24, 0.0 }
 0x724   :  { %v10422_v17 = vpack.c.bf16 %v9686_v30, %v9686_v30 }
 0x726   :  { %10623 = vmatmul.bf16.vlgmr.msra.gmra.mxu2 %v10422_v17  ;;  %10636 = vmatmul.bf16.vlgmr.msra.gmra.mxu3 %v10422_v17 }
 0x727   :  { %10649 = vmatmul.bf16.vlgmr.msrb.gmra.mxu0 %v10422_v17  ;;  %10662 = vmatmul.bf16.vlgmr.msrb.gmra.mxu1 %v10422_v17  ;;  %v9684_v6 = vpop.f32.mrf.mxu1 }
 0x728   :  { %11070 = vmatpush.bf16.msra.mxu2 %v18237_v50 }
 0x729   :  { %v27180_v26 = vpop.f32.mrf.mxu0 }
 0x72a   :  { %v10380_v55 = vadd.f32 %v26955_v8, %v27180_v26 }
 0x72c   :  { %11071 = vmatpush.bf16.msra.mxu2 %v18236_v28  ;;  %v10393_v2 = vadd.f32 %v27059_v36, %v10380_v55 }
 0x72f   :  { %v9994_v10 = vpop.f32.mrf.mxu1 }
 0x731   :  { %v9983_v45 = vpop.f32.mrf.mxu0 }
 0x732   :  { %v10675_v45 = vperm.slane %v16641_v48, 1 }
 0x737   :  { %v9996_v49 = vpop.f32.mrf.mxu1 }
 0x739   :  { %v10353_v0 = vpop.f32.mrf.mxu0 }
 0x73a   :  { %v10354_v7 = vadd.f32 %v10353_v0, %v26839_v18  ;;  %v18213_v18 = vld [vmem:[%s27361_s5 + $0x178] sm:$0xff] }
 0x73b   :  { %10964 = vmatpush.bf16.msrb.mxu3 %v18213_v18 }
 0x73f   :  { %v10366_v4 = vpop.f32.mrf.mxu1  ;;  %10965 = vmatpush.bf16.msrb.mxu3 %v18212_v9 }
 0x740   :  { %v27183_v58 = vadd.f32 %v10366_v4, %v10354_v7 }
 0x741   :  { %v10355_v3 = vpop.f32.mrf.mxu0 }
 0x743   :  { %10966 = vmatpush.bf16.msrb.mxu3 %v18211_v38  ;;  %v18231_v38 = vld [vmem:[%s27361_s5 + $0x208] sm:$0xff] }
 0x747   :  { %v10368_v53 = vpop.f32.mrf.mxu1  ;;  %10967 = vmatpush.bf16.msrb.mxu3 %v18210_v19  ;;  %v18243_v19 = vld [vmem:[%s27361_s5 + $0x268] sm:$0xff] }
 0x74b   :  { %10968 = vmatpush.bf16.msrb.mxu3 %v18209_v22 }
 0x74f   :  { %10969 = vmatpush.bf16.msrb.mxu3 %v18208_v35 }
 0x753   :  { %10970 = vmatpush.bf16.msrb.mxu3 %v18207_v13  ;;  %v18238_v13 = vld [vmem:[%s27361_s5 + $0x240] sm:$0xff] }
 0x757   :  { %10971 = vmatpush.bf16.msrb.mxu3 %v18206_v32 }
 0x759   :  { %v10405_v14 = vpop.f32.mrf.mxu0 }
 0x75a   :  { %v10406_v16 = vadd.f32 %v10405_v14, %v9994_v10  ;;  %v10674_v10 = vperm.slane %v16641_v48, 0  ;;  %v18242_v14 = vld [vmem:[%s27361_s5 + $0x260] sm:$0xff] }
 0x75b   :  { %11150 = vmatpush.bf16.msra.mxu3 %v18245_v31 }
 0x75f   :  { %v10418_v29 = vpop.f32.mrf.mxu1  ;;  %11151 = vmatpush.bf16.msra.mxu3 %v18244_v44 }
 0x760   :  { %v10419_v59 = vadd.f32 %v10418_v29, %v10406_v16  ;;  %v10758_v29 = vld [vmem:[%s27357_s6 + $0x23] ss:$0 sm:$0xff] }
 0x761   :  { %v10407_v12 = vpop.f32.mrf.mxu0 }
 0x763   :  { %11152 = vmatpush.bf16.msra.mxu3 %v18243_v19 }
 0x767   :  { %v10420_v51 = vpop.f32.mrf.mxu1  ;;  %11153 = vmatpush.bf16.msra.mxu3 %v18242_v14 }
 0x76b   :  { %11154 = vmatpush.bf16.msra.mxu3 %v18241_v23 }
 0x7a4   :  { %v10650_v60 = vpop.f32.mrf.mxu0  ;;  %v10663_v24 = vpop.f32.mrf.mxu1 }
 0x7a5   :  { %v10669_v41 = vadd.f32 %v10650_v60, %v10393_v2  ;;  %v10670_v30 = vadd.f32 %v10663_v24, %v10419_v59  ;;  %v18240_v59 = vld [vmem:[%s27361_s5 + $0x250] sm:$0xff]  ;;  %v11101_v2 = vld [vmem:[%s27357_s6 + $0x25] ss:$0 sm:$0xff]  ;;  %v11164_v60 = vld [vmem:[%s27357_s6 + $0x26] ss:$0 sm:$0xff] }
 0x7a6   :  { %11155 = vmatpush.bf16.msra.mxu3 %v18240_v59 }
 0x7a7   :  { %v10684_v17 = vadd.f32 %v10676_v11, %v10669_v41  ;;  %v10685_v6 = vadd.f32 %v10677_v1, %v10670_v30 }
 0x7a9   :  { %v10688_v49 = vmax.f32 %v10684_v17, 0.0  ;;  %v10689_v0 = vmax.f32 %v10685_v6, 0.0  ;;  %v10624_v7 = vpop.f32.mrf.mxu2  ;;  %v10637_v8 = vpop.f32.mrf.mxu3  ;;  %v11170_v6 = vld [vmem:[%s27357_s6 + $0x27] ss:$0 sm:$0xff] }
 0x7aa   :  { %v10667_v26 = vadd.f32 %v10624_v7, %v26903_v15  ;;  %v10668_v4 = vadd.f32 %v10637_v8, %v27183_v58  ;;  %v18235_v15 = vld [vmem:[%s27361_s5 + $0x228] sm:$0xff]  ;;  %v18234_v58 = vld [vmem:[%s27361_s5 + $0x220] sm:$0xff]  ;;  %11156 = vmatpush.bf16.msra.mxu3 %v18239_v40 }
 0x7ab   :  { %v10692_v3 = vpack.c.bf16 %v10688_v49, %v10688_v49  ;;  %v10693_v36 = vpack.c.bf16 %v10689_v0, %v10689_v0  ;;  %11072 = vmatpush.bf16.msra.mxu2 %v18235_v15 }
 0x7ac   :  { %v10682_v27 = vadd.f32 %v10674_v10, %v10667_v26  ;;  %v10683_v61 = vadd.f32 %v10675_v45, %v10668_v4  ;;  %v10652_v25 = vpop.f32.mrf.mxu0  ;;  %v10665_v18 = vpop.f32.mrf.mxu1 }
 0x7ad   :  { %10985 = vmatmul.bf16.vlgmr.msra.gmra.mxu0 %v10692_v3  ;;  %10998 = vmatmul.bf16.vlgmr.msra.gmra.mxu1 %v10693_v36 }
 0x7ae   :  { %v10686_v54 = vmax.f32 %v10682_v27, 0.0  ;;  %v10687_v21 = vmax.f32 %v10683_v61, 0.0  ;;  %11157 = vmatpush.bf16.msra.mxu3 %v18238_v13 }
 0x7af   :  { %11073 = vmatpush.bf16.msra.mxu2 %v18234_v58 }
 0x7b0   :  { %v10690_v53 = vpack.c.bf16 %v10686_v54, %v10686_v54  ;;  %v10691_v5 = vpack.c.bf16 %v10687_v21, %v10687_v21 }
 0x7b1   :  { %v10626_v9 = vpop.f32.mrf.mxu2  ;;  %v10639_v57 = vpop.f32.mrf.mxu3 }
 0x7b2   :  { %10959 = vmatmul.bf16.vlgmr.msrb.gmra.mxu2 %v10690_v53  ;;  %10972 = vmatmul.bf16.vlgmr.msrb.gmra.mxu3 %v10691_v5 }
 0x7b3   :  { %11074 = vmatpush.bf16.msra.mxu2 %v18233_v33 }
 0x7b7   :  { %11075 = vmatpush.bf16.msra.mxu2 %v18232_v46 }
 0x7bb   :  { %11076 = vmatpush.bf16.msra.mxu2 %v18231_v38 }
 0x7bf   :  { %11077 = vmatpush.bf16.msra.mxu2 %v18230_v34 }
 0x82a   :  { %v10986_v37 = vpop.f32.mrf.mxu0  ;;  %v10999_v43 = vpop.f32.mrf.mxu1 }
 0x832   :  { %v10988_v42 = vpop.f32.mrf.mxu0  ;;  %v11001_v16 = vpop.f32.mrf.mxu1 }
 0x835   :  { %v10960_v12 = vpop.f32.mrf.mxu2  ;;  %v10973_v51 = vpop.f32.mrf.mxu3 }
 0x836   :  { %v10961_v47 = vadd.f32 %v10960_v12, %v10758_v29 }
 0x838   :  { %v10974_v22 = vadd.f32 %v10973_v51, %v10961_v47 }
 0x83a   :  { %v10987_v20 = vadd.f32 %v10986_v37, %v10974_v22 }
 0x83c   :  { %v11000_v62 = vadd.f32 %v10999_v43, %v10987_v20 }
 0x83d   :  { %v10962_v39 = vpop.f32.mrf.mxu2  ;;  %v10975_v35 = vpop.f32.mrf.mxu3 }
 0x83e   :  { %v11003_v63 = vmax.f32 %v11000_v62, 0.0 }
 0x840   :  { %v11004_v56 = vpack.c.bf16 %v11003_v63, %v11003_v63 }
 0x842   :  { %11078 = vmatmul.bf16.vlgmr.msra.gmra.mxu2 %v11004_v56 }
 0x8c5   :  { %v11079_v32 = vpop.f32.mrf.mxu2 }
 0x8c6   :  { %v11080_v50 = vadd.f32 %v11079_v32, %v11021_v52 }
 0x8c8   :  { %v11083_v28 = vmax.f32 %v11080_v50, 0.0 }
 0x8ca   :  { %v11084_v55 = vpack.c.bf16 %v11083_v28, %v11083_v28 }
 0x8cc   :  { %11158 = vmatmul.bf16.vlgmr.msra.gmra.mxu3 %v11084_v55 }
 0x8cd   :  { %v11081_v48 = vpop.f32.mrf.mxu2 }
 0x94f   :  { %v11159_v11 = vpop.f32.mrf.mxu3 }
 0x950   :  { %v11160_v1 = vadd.f32 %v11159_v11, %v11101_v2 }
 0x952   :  { %v11163_v24 = vmax.f32 %v11160_v1, 0.0 }
 0x954   :  { %v11165_v41 = vmul.f32 %v11164_v60, %v11163_v24 }
 0x956   :  { %v11167_v30 = vsel %vm11166_vm0, %v11165_v41, 0.0 }
 0x957   :  { %v11161_v17 = vpop.f32.mrf.mxu3  ;;  %11168 = vadd.xlane.f32.xlu0 %v11167_v30 }
 0x9ca   :  { %v11169_v10 = vpop.xlane.xlu0 %11168 }
 0x9cb   :  { %v11171_v45 = vadd.f32 %v11170_v6, %v11169_v10 }
 0x9cd   :  { %11173 = vst.msk [vmem:[%s27362_s7] sm:$0x3] %vm11172_vm1, %v11171_v45 }

</bundles_post_ra>
